<compile_context>
chip_gen: v7x
topology: tpu7x:2x2x1
jax: 0.10.0
libtpu: 0.0.40
codegen_flags: <defaults>
</compile_context>

<pallas_src>
import functools

import jax
import jax.numpy as jnp
from jax.experimental import pallas as pl
from jax.experimental.pallas import tpu as pltpu


_WEIGHT_ORDER = ("w1", "b1", "w2", "b2", "w3", "b3",
                 "fw1", "fb1", "fw2", "fb2", "fw3", "fb3")


# ---------------------------------------------------------------------------
# Fused kernel: [transform-fold] + conv stack + chunked max-pool + FC head
# ---------------------------------------------------------------------------
def _pointnet_block_kernel(use_transform, apply_logsoftmax, c3_chunk, *refs):
    if use_transform:
        x_ref, t_ref = refs[0], refs[1]
        refs = refs[2:]
    else:
        x_ref, t_ref = refs[0], None
        refs = refs[1:]
    (w1_ref, b1_ref, w2_ref, b2_ref, w3_ref, b3_ref,
     fw1_ref, fb1_ref, fw2_ref, fb2_ref, fw3_ref, fb3_ref, o_ref) = refs

    Bt, N, Cin = x_ref.shape
    C1 = w1_ref.shape[1]
    x = x_ref[...]                                          # (Bt, N, Cin) f32
    w1 = w1_ref[...]                                        # (Cin, C1)

    if use_transform:
        # Fold the per-cloud transform into conv1: (x @ t) @ w1 == x @ (t @ w1).
        # t @ w1 is O(1) in N -> removes a K=3 MXU pass over all points.
        t = t_ref[...]                                      # (Bt, Cin, Cin)
        w1_eff = jnp.dot(t.reshape(Bt * Cin, Cin), w1,
                         preferred_element_type=jnp.float32
                         ).reshape(Bt, Cin, C1)             # (Bt, Cin, C1)
        h1 = jnp.einsum('bnj,bjk->bnk', x, w1_eff,
                        preferred_element_type=jnp.float32)  # (Bt, N, C1)
        h1 = jnp.maximum(h1.reshape(Bt * N, C1) + b1_ref[...], 0.0)
    else:
        h1 = jnp.maximum(
            jnp.dot(x.reshape(Bt * N, Cin), w1,
                    preferred_element_type=jnp.float32) + b1_ref[...], 0.0)

    # conv2: (Bt*N, C2)  -- rows from all Bt clouds flattened to feed the MXU.
    h2 = jnp.maximum(
        jnp.dot(h1, w2_ref[...], preferred_element_type=jnp.float32)
        + b2_ref[...], 0.0)

    # conv3 tiled over Cout chunks with the max-over-points fused per chunk:
    # the full (Bt*N, 1024) f32 activation is never materialized.
    C3 = w3_ref.shape[1]
    h2c = h2.astype(w3_ref.dtype)                           # bf16 for the MXU
    pooled = []
    for c in range(0, C3, c3_chunk):
        w3c = w3_ref[:, c:c + c3_chunk]                     # (C2, chunk)
        b3c = b3_ref[:, c:c + c3_chunk]                     # (1, chunk)
        h3c = jnp.maximum(
            jnp.dot(h2c, w3c, preferred_element_type=jnp.float32) + b3c, 0.0)
        # max over the N points of each cloud (no N padding -> no masking).
        pooled.append(jnp.max(h3c.reshape(Bt, N, c3_chunk), axis=1))
    feat = jnp.concatenate(pooled, axis=-1)                 # (Bt, C3)

    # Fused FC head: fc1 -> ReLU -> fc2 -> ReLU -> fc3 (+ optional log_softmax)
    g1 = jnp.maximum(
        jnp.dot(feat.astype(fw1_ref.dtype), fw1_ref[...],
                preferred_element_type=jnp.float32) + fb1_ref[...], 0.0)
    g2 = jnp.maximum(
        jnp.dot(g1.astype(fw2_ref.dtype), fw2_ref[...],
                preferred_element_type=jnp.float32) + fb2_ref[...], 0.0)
    logits = (jnp.dot(g2, fw3_ref[...], preferred_element_type=jnp.float32)
              + fb3_ref[...])                               # (Bt, K)

    if apply_logsoftmax:
        m = jnp.max(logits, axis=-1, keepdims=True)
        z = logits - m
        logits = z - jnp.log(jnp.sum(jnp.exp(z), axis=-1, keepdims=True))

    o_ref[...] = logits.reshape(Bt, 1, logits.shape[-1])


def pointnet_block(x_pts, trans, p, apply_logsoftmax,
                   batch_tile=4, c3_chunk=256):
    """Run one full PointNet branch (conv trunk + max-pool + FC head).

    x_pts: (B, N, Cin) f32 point clouds (points on sublanes, channels on lanes)
    trans: (B, Cin, Cin) per-cloud transform, or None (identity, skipped)
    p:     dict with w1,b1,w2,b2,w3,b3,fw1,fb1,fw2,fb2,fw3,fb3
    returns (B, K) f32 outputs (log-probs if apply_logsoftmax).
    """
    B, N, Cin = x_pts.shape
    K = p["fw3"].shape[1]
    C3 = p["w3"].shape[1]
    c3_chunk = min(c3_chunk, C3)
    assert C3 % c3_chunk == 0

    Bt = max(1, min(batch_tile, B))
    Bpad = ((B + Bt - 1) // Bt) * Bt
    if Bpad != B:
        # Padded clouds compute garbage rows that are sliced off below; each
        # cloud's max-pool / FC rows are independent, so real rows are safe.
        x_pts = jnp.pad(x_pts, ((0, Bpad - B), (0, 0), (0, 0)))
        if trans is not None:
            trans = jnp.pad(trans, ((0, Bpad - B), (0, 0), (0, 0)))

    use_transform = trans is not None
    kern = functools.partial(_pointnet_block_kernel, use_transform,
                             apply_logsoftmax, c3_chunk)

    args = [x_pts]
    in_specs = [pl.BlockSpec((Bt, N, Cin), lambda b: (b, 0, 0))]
    if use_transform:
        args.append(trans)
        in_specs.append(pl.BlockSpec((Bt, Cin, Cin), lambda b: (b, 0, 0)))
    for name in _WEIGHT_ORDER:
        w = p[name]
        args.append(w)
        in_specs.append(pl.BlockSpec(w.shape, lambda b: (0, 0)))

    out = pl.pallas_call(
        kern,
        out_shape=jax.ShapeDtypeStruct((Bpad, 1, K), jnp.float32),
        grid=(Bpad // Bt,),
        in_specs=in_specs,
        out_specs=pl.BlockSpec((Bt, 1, K), lambda b: (b, 0, 0)),
        compiler_params=pltpu.CompilerParams(
            dimension_semantics=("parallel",)),
    )(*args)
    return out.reshape(Bpad, K)[:B]


# ---------------------------------------------------------------------------
# Parameters (deterministic synthetic init, PyTorch-style uniform(-1/sqrt(fan)))
# Large weights stored in bf16 (halves DMA bytes; MXU-native on v6e/v7x);
# accumulation stays f32 inside the kernel via preferred_element_type.
# ---------------------------------------------------------------------------
def _dense(key, fan_in, fan_out, dtype=jnp.float32):
    k1, k2 = jax.random.split(key)
    bound = 1.0 / jnp.sqrt(jnp.float32(fan_in))
    w = jax.random.uniform(k1, (fan_in, fan_out), jnp.float32, -bound, bound)
    b = jax.random.uniform(k2, (1, fan_out), jnp.float32, -bound, bound)
    return w.astype(dtype), b    # bias stays f32


def _init_branch(key, cin, k_out):
    ks = jax.random.split(key, 6)
    p = {}
    p["w1"], p["b1"] = _dense(ks[0], cin, 64)
    p["w2"], p["b2"] = _dense(ks[1], 64, 128)
    p["w3"], p["b3"] = _dense(ks[2], 128, 1024, dtype=jnp.bfloat16)
    p["fw1"], p["fb1"] = _dense(ks[3], 1024, 512, dtype=jnp.bfloat16)
    p["fw2"], p["fb2"] = _dense(ks[4], 512, 256, dtype=jnp.bfloat16)
    p["fw3"], p["fb3"] = _dense(ks[5], 256, k_out)
    return p


def init_params(key, num_classes=10):
    k_t, k_m = jax.random.split(key)
    return {"tnet": _init_branch(k_t, 3, 9),           # TNet(k=3): fc3 -> 3*3
            "main": _init_branch(k_m, 3, num_classes)}  # classifier head


# ---------------------------------------------------------------------------
# Full PointNet forward (2 pallas_calls total)
# ---------------------------------------------------------------------------
def pointnet_forward(params, x, batch_tile=4):
    """x: (B, 3, N) float32 (PyTorch NCW) -> (B, num_classes) log-probs."""
    B = x.shape[0]
    x_pts = jnp.transpose(x, (0, 2, 1))                 # (B, N, 3) layout glue

    # TNet branch (identity input transform): trunk + regression head fused.
    t9 = pointnet_block(x_pts, None, params["tnet"],
                        apply_logsoftmax=False, batch_tile=batch_tile)  # (B, 9)
    trans = (t9 + jnp.eye(3, dtype=jnp.float32).reshape(1, 9)).reshape(B, 3, 3)

    # Main branch: learned 3x3 transform folded into conv1, classifier fused.
    logp = pointnet_block(x_pts, trans, params["main"],
                          apply_logsoftmax=True, batch_tile=batch_tile)
    return logp


if __name__ == "__main__":
    B, N, NUM_CLASSES = 2, 64, 10
    key = jax.random.PRNGKey(0)
    kx, kp = jax.random.split(key)
    x = jax.random.normal(kx, (B, 3, N), dtype=jnp.float32)   # PyTorch NCW input
    params = init_params(kp, num_classes=NUM_CLASSES)

    fwd = jax.jit(pointnet_forward)
    out = fwd(params, x)
    jax.block_until_ready(out)

    assert out.shape == (B, NUM_CLASSES)
    assert bool(jnp.all(jnp.isfinite(out)))
    # log-probs should (approximately) normalize
    assert bool(jnp.all(jnp.abs(jnp.sum(jnp.exp(out), axis=-1) - 1.0) < 1e-3))
    print("KERNEL_OK")
</pallas_src>

<mosaic_0001>
module attributes {stable_mosaic.version = 11 : i64} {
  func.func @_pointnet_block_kernel(%arg0: i32, %arg1: memref<2x64x3xf32, #tpu.memory_space<vmem>>, %arg2: memref<3x64xf32, #tpu.memory_space<vmem>>, %arg3: memref<1x64xf32, #tpu.memory_space<vmem>>, %arg4: memref<64x128xf32, #tpu.memory_space<vmem>>, %arg5: memref<1x128xf32, #tpu.memory_space<vmem>>, %arg6: memref<128x1024xbf16, #tpu.memory_space<vmem>>, %arg7: memref<1x1024xf32, #tpu.memory_space<vmem>>, %arg8: memref<1024x512xbf16, #tpu.memory_space<vmem>>, %arg9: memref<1x512xf32, #tpu.memory_space<vmem>>, %arg10: memref<512x256xbf16, #tpu.memory_space<vmem>>, %arg11: memref<1x256xf32, #tpu.memory_space<vmem>>, %arg12: memref<256x9xf32, #tpu.memory_space<vmem>>, %arg13: memref<1x9xf32, #tpu.memory_space<vmem>>, %arg14: memref<2x1x9xf32, #tpu.memory_space<vmem>>) attributes {dimension_semantics = [#tpu.dimension_semantics<parallel>], iteration_bounds = array<i64: 1>, scalar_prefetch = 0 : i64, scratch_operands = 0 : i64, tpu.core_type = #tpu.core_type<tc>, window_params = [{transform_indices = @transform_0, window_bounds = array<i64: 2, 64, 3>}, {pipeline_mode = #tpu.pipeline_mode<synchronous>, transform_indices = @transform_1, window_bounds = array<i64: 3, 64>}, {pipeline_mode = #tpu.pipeline_mode<synchronous>, transform_indices = @transform_2, window_bounds = array<i64: 1, 64>}, {pipeline_mode = #tpu.pipeline_mode<synchronous>, transform_indices = @transform_3, window_bounds = array<i64: 64, 128>}, {pipeline_mode = #tpu.pipeline_mode<synchronous>, transform_indices = @transform_4, window_bounds = array<i64: 1, 128>}, {pipeline_mode = #tpu.pipeline_mode<synchronous>, transform_indices = @transform_5, window_bounds = array<i64: 128, 1024>}, {pipeline_mode = #tpu.pipeline_mode<synchronous>, transform_indices = @transform_6, window_bounds = array<i64: 1, 1024>}, {pipeline_mode = #tpu.pipeline_mode<synchronous>, transform_indices = @transform_7, window_bounds = array<i64: 1024, 512>}, {pipeline_mode = #tpu.pipeline_mode<synchronous>, transform_indices = @transform_8, window_bounds = array<i64: 1, 512>}, {pipeline_mode = #tpu.pipeline_mode<synchronous>, transform_indices = @transform_9, window_bounds = array<i64: 512, 256>}, {pipeline_mode = #tpu.pipeline_mode<synchronous>, transform_indices = @transform_10, window_bounds = array<i64: 1, 256>}, {pipeline_mode = #tpu.pipeline_mode<synchronous>, transform_indices = @transform_11, window_bounds = array<i64: 256, 9>}, {pipeline_mode = #tpu.pipeline_mode<synchronous>, transform_indices = @transform_12, window_bounds = array<i64: 1, 9>}, {transform_indices = @transform_13, window_bounds = array<i64: 2, 1, 9>}]} {
    %c0 = arith.constant 0 : index
    %c0_0 = arith.constant 0 : index
    %c0_1 = arith.constant 0 : index
    %0 = vector.load %arg1[%c0, %c0_0, %c0_1] : memref<2x64x3xf32, #tpu.memory_space<vmem>>, vector<2x64x3xf32>
    %c0_2 = arith.constant 0 : index
    %c0_3 = arith.constant 0 : index
    %1 = vector.load %arg2[%c0_2, %c0_3] : memref<3x64xf32, #tpu.memory_space<vmem>>, vector<3x64xf32>
    %2 = vector.shape_cast %0 : vector<2x64x3xf32> to vector<128x3xf32>
    %cst = arith.constant dense<0.000000e+00> : vector<128x64xf32>
    %3 = tpu.matmul %2, %1, %cst {dimension_numbers = #tpu.dot_dimension_numbers<[1], [0], [0], [1], [0, 0, 1, 1], [], []>} : vector<128x3xf32>, vector<3x64xf32>, vector<128x64xf32> -> vector<128x64xf32>
    %c0_4 = arith.constant 0 : index
    %c0_5 = arith.constant 0 : index
    %4 = vector.load %arg3[%c0_4, %c0_5] : memref<1x64xf32, #tpu.memory_space<vmem>>, vector<1x64xf32>
    %5 = vector.broadcast %4 : vector<1x64xf32> to vector<128x64xf32>
    %6 = arith.addf %3, %5 : vector<128x64xf32>
    %cst_6 = arith.constant 0.000000e+00 : f32
    %7 = vector.broadcast %cst_6 : f32 to vector<128x64xf32>
    %8 = arith.maximumf %6, %7 : vector<128x64xf32>
    %c0_7 = arith.constant 0 : index
    %c0_8 = arith.constant 0 : index
    %9 = vector.load %arg4[%c0_7, %c0_8] : memref<64x128xf32, #tpu.memory_space<vmem>>, vector<64x128xf32>
    %cst_9 = arith.constant dense<0.000000e+00> : vector<128x128xf32>
    %10 = tpu.matmul %8, %9, %cst_9 {dimension_numbers = #tpu.dot_dimension_numbers<[1], [0], [0], [1], [0, 0, 1, 1], [], []>} : vector<128x64xf32>, vector<64x128xf32>, vector<128x128xf32> -> vector<128x128xf32>
    %c0_10 = arith.constant 0 : index
    %c0_11 = arith.constant 0 : index
    %11 = vector.load %arg5[%c0_10, %c0_11] : memref<1x128xf32, #tpu.memory_space<vmem>>, vector<1x128xf32>
    %12 = vector.broadcast %11 : vector<1x128xf32> to vector<128x128xf32>
    %13 = arith.addf %10, %12 : vector<128x128xf32>
    %cst_12 = arith.constant 0.000000e+00 : f32
    %14 = vector.broadcast %cst_12 : f32 to vector<128x128xf32>
    %15 = arith.maximumf %13, %14 : vector<128x128xf32>
    %16 = arith.truncf %15 : vector<128x128xf32> to vector<128x128xbf16>
    %c0_13 = arith.constant 0 : index
    %c0_14 = arith.constant 0 : index
    %17 = vector.load %arg6[%c0_13, %c0_14] : memref<128x1024xbf16, #tpu.memory_space<vmem>>, vector<128x256xbf16>
    %c0_15 = arith.constant 0 : index
    %c0_16 = arith.constant 0 : index
    %18 = vector.load %arg7[%c0_15, %c0_16] : memref<1x1024xf32, #tpu.memory_space<vmem>>, vector<1x256xf32>
    %cst_17 = arith.constant dense<0.000000e+00> : vector<128x256xf32>
    %19 = tpu.matmul %16, %17, %cst_17 {dimension_numbers = #tpu.dot_dimension_numbers<[1], [0], [0], [1], [0, 0, 1, 1], [], []>} : vector<128x128xbf16>, vector<128x256xbf16>, vector<128x256xf32> -> vector<128x256xf32>
    %20 = vector.broadcast %18 : vector<1x256xf32> to vector<128x256xf32>
    %21 = arith.addf %19, %20 : vector<128x256xf32>
    %cst_18 = arith.constant 0.000000e+00 : f32
    %22 = vector.broadcast %cst_18 : f32 to vector<128x256xf32>
    %23 = arith.maximumf %21, %22 : vector<128x256xf32>
    %24 = vector.shape_cast %23 : vector<128x256xf32> to vector<2x64x256xf32>
    %cst_19 = arith.constant dense<0xFF800000> : vector<2x256xf32>
    %25 = vector.multi_reduction <maximumf>, %24, %cst_19 [1] : vector<2x64x256xf32> to vector<2x256xf32>
    %c0_20 = arith.constant 0 : index
    %c256 = arith.constant 256 : index
    %26 = vector.load %arg6[%c0_20, %c256] : memref<128x1024xbf16, #tpu.memory_space<vmem>>, vector<128x256xbf16>
    %c0_21 = arith.constant 0 : index
    %c256_22 = arith.constant 256 : index
    %27 = vector.load %arg7[%c0_21, %c256_22] : memref<1x1024xf32, #tpu.memory_space<vmem>>, vector<1x256xf32>
    %cst_23 = arith.constant dense<0.000000e+00> : vector<128x256xf32>
    %28 = tpu.matmul %16, %26, %cst_23 {dimension_numbers = #tpu.dot_dimension_numbers<[1], [0], [0], [1], [0, 0, 1, 1], [], []>} : vector<128x128xbf16>, vector<128x256xbf16>, vector<128x256xf32> -> vector<128x256xf32>
    %29 = vector.broadcast %27 : vector<1x256xf32> to vector<128x256xf32>
    %30 = arith.addf %28, %29 : vector<128x256xf32>
    %cst_24 = arith.constant 0.000000e+00 : f32
    %31 = vector.broadcast %cst_24 : f32 to vector<128x256xf32>
    %32 = arith.maximumf %30, %31 : vector<128x256xf32>
    %33 = vector.shape_cast %32 : vector<128x256xf32> to vector<2x64x256xf32>
    %cst_25 = arith.constant dense<0xFF800000> : vector<2x256xf32>
    %34 = vector.multi_reduction <maximumf>, %33, %cst_25 [1] : vector<2x64x256xf32> to vector<2x256xf32>
    %c0_26 = arith.constant 0 : index
    %c512 = arith.constant 512 : index
    %35 = vector.load %arg6[%c0_26, %c512] : memref<128x1024xbf16, #tpu.memory_space<vmem>>, vector<128x256xbf16>
    %c0_27 = arith.constant 0 : index
    %c512_28 = arith.constant 512 : index
    %36 = vector.load %arg7[%c0_27, %c512_28] : memref<1x1024xf32, #tpu.memory_space<vmem>>, vector<1x256xf32>
    %cst_29 = arith.constant dense<0.000000e+00> : vector<128x256xf32>
    %37 = tpu.matmul %16, %35, %cst_29 {dimension_numbers = #tpu.dot_dimension_numbers<[1], [0], [0], [1], [0, 0, 1, 1], [], []>} : vector<128x128xbf16>, vector<128x256xbf16>, vector<128x256xf32> -> vector<128x256xf32>
    %38 = vector.broadcast %36 : vector<1x256xf32> to vector<128x256xf32>
    %39 = arith.addf %37, %38 : vector<128x256xf32>
    %cst_30 = arith.constant 0.000000e+00 : f32
    %40 = vector.broadcast %cst_30 : f32 to vector<128x256xf32>
    %41 = arith.maximumf %39, %40 : vector<128x256xf32>
    %42 = vector.shape_cast %41 : vector<128x256xf32> to vector<2x64x256xf32>
    %cst_31 = arith.constant dense<0xFF800000> : vector<2x256xf32>
    %43 = vector.multi_reduction <maximumf>, %42, %cst_31 [1] : vector<2x64x256xf32> to vector<2x256xf32>
    %c0_32 = arith.constant 0 : index
    %c768 = arith.constant 768 : index
    %44 = vector.load %arg6[%c0_32, %c768] : memref<128x1024xbf16, #tpu.memory_space<vmem>>, vector<128x256xbf16>
    %c0_33 = arith.constant 0 : index
    %c768_34 = arith.constant 768 : index
    %45 = vector.load %arg7[%c0_33, %c768_34] : memref<1x1024xf32, #tpu.memory_space<vmem>>, vector<1x256xf32>
    %cst_35 = arith.constant dense<0.000000e+00> : vector<128x256xf32>
    %46 = tpu.matmul %16, %44, %cst_35 {dimension_numbers = #tpu.dot_dimension_numbers<[1], [0], [0], [1], [0, 0, 1, 1], [], []>} : vector<128x128xbf16>, vector<128x256xbf16>, vector<128x256xf32> -> vector<128x256xf32>
    %47 = vector.broadcast %45 : vector<1x256xf32> to vector<128x256xf32>
    %48 = arith.addf %46, %47 : vector<128x256xf32>
    %cst_36 = arith.constant 0.000000e+00 : f32
    %49 = vector.broadcast %cst_36 : f32 to vector<128x256xf32>
    %50 = arith.maximumf %48, %49 : vector<128x256xf32>
    %51 = vector.shape_cast %50 : vector<128x256xf32> to vector<2x64x256xf32>
    %cst_37 = arith.constant dense<0xFF800000> : vector<2x256xf32>
    %52 = vector.multi_reduction <maximumf>, %51, %cst_37 [1] : vector<2x64x256xf32> to vector<2x256xf32>
    %53 = tpu.concatenate %25, %34, %43, %52 in 1 : vector<2x256xf32>, vector<2x256xf32>, vector<2x256xf32>, vector<2x256xf32> -> vector<2x1024xf32>
    %54 = arith.truncf %53 : vector<2x1024xf32> to vector<2x1024xbf16>
    %c0_38 = arith.constant 0 : index
    %c0_39 = arith.constant 0 : index
    %55 = vector.load %arg8[%c0_38, %c0_39] : memref<1024x512xbf16, #tpu.memory_space<vmem>>, vector<1024x512xbf16>
    %cst_40 = arith.constant dense<0.000000e+00> : vector<2x512xf32>
    %56 = tpu.matmul %54, %55, %cst_40 {dimension_numbers = #tpu.dot_dimension_numbers<[1], [0], [0], [1], [0, 0, 1, 1], [], []>} : vector<2x1024xbf16>, vector<1024x512xbf16>, vector<2x512xf32> -> vector<2x512xf32>
    %c0_41 = arith.constant 0 : index
    %c0_42 = arith.constant 0 : index
    %57 = vector.load %arg9[%c0_41, %c0_42] : memref<1x512xf32, #tpu.memory_space<vmem>>, vector<1x512xf32>
    %58 = vector.broadcast %57 : vector<1x512xf32> to vector<2x512xf32>
    %59 = arith.addf %56, %58 : vector<2x512xf32>
    %cst_43 = arith.constant 0.000000e+00 : f32
    %60 = vector.broadcast %cst_43 : f32 to vector<2x512xf32>
    %61 = arith.maximumf %59, %60 : vector<2x512xf32>
    %62 = arith.truncf %61 : vector<2x512xf32> to vector<2x512xbf16>
    %c0_44 = arith.constant 0 : index
    %c0_45 = arith.constant 0 : index
    %63 = vector.load %arg10[%c0_44, %c0_45] : memref<512x256xbf16, #tpu.memory_space<vmem>>, vector<512x256xbf16>
    %cst_46 = arith.constant dense<0.000000e+00> : vector<2x256xf32>
    %64 = tpu.matmul %62, %63, %cst_46 {dimension_numbers = #tpu.dot_dimension_numbers<[1], [0], [0], [1], [0, 0, 1, 1], [], []>} : vector<2x512xbf16>, vector<512x256xbf16>, vector<2x256xf32> -> vector<2x256xf32>
    %c0_47 = arith.constant 0 : index
    %c0_48 = arith.constant 0 : index
    %65 = vector.load %arg11[%c0_47, %c0_48] : memref<1x256xf32, #tpu.memory_space<vmem>>, vector<1x256xf32>
    %66 = vector.broadcast %65 : vector<1x256xf32> to vector<2x256xf32>
    %67 = arith.addf %64, %66 : vector<2x256xf32>
    %cst_49 = arith.constant 0.000000e+00 : f32
    %68 = vector.broadcast %cst_49 : f32 to vector<2x256xf32>
    %69 = arith.maximumf %67, %68 : vector<2x256xf32>
    %c0_50 = arith.constant 0 : index
    %c0_51 = arith.constant 0 : index
    %70 = vector.load %arg12[%c0_50, %c0_51] : memref<256x9xf32, #tpu.memory_space<vmem>>, vector<256x9xf32>
    %cst_52 = arith.constant dense<0.000000e+00> : vector<2x9xf32>
    %71 = tpu.matmul %69, %70, %cst_52 {dimension_numbers = #tpu.dot_dimension_numbers<[1], [0], [0], [1], [0, 0, 1, 1], [], []>} : vector<2x256xf32>, vector<256x9xf32>, vector<2x9xf32> -> vector<2x9xf32>
    %c0_53 = arith.constant 0 : index
    %c0_54 = arith.constant 0 : index
    %72 = vector.load %arg13[%c0_53, %c0_54] : memref<1x9xf32, #tpu.memory_space<vmem>>, vector<1x9xf32>
    %73 = vector.broadcast %72 : vector<1x9xf32> to vector<2x9xf32>
    %74 = arith.addf %71, %73 : vector<2x9xf32>
    %75 = vector.shape_cast %74 : vector<2x9xf32> to vector<2x1x9xf32>
    %c0_55 = arith.constant 0 : index
    %c0_56 = arith.constant 0 : index
    %c0_57 = arith.constant 0 : index
    %76 = vector.load %arg14[%c0_55, %c0_56, %c0_57] : memref<2x1x9xf32, #tpu.memory_space<vmem>>, vector<2x1x9xf32>
    tpu.vector_store %arg14[%c0_55, %c0_56, %c0_57], %75 {strides = array<i32>} : memref<2x1x9xf32, #tpu.memory_space<vmem>>, vector<2x1x9xf32>,
    return
  }
  func.func @transform_0(%arg0: i32) -> (i32, i32, i32) {
    %c0_i32 = arith.constant 0 : i32
    %c0_i32_0 = arith.constant 0 : i32
    %c0_i32_1 = arith.constant 0 : i32
    return %arg0, %c0_i32, %c0_i32_0 : i32, i32, i32
  }
  func.func @transform_1(%arg0: i32) -> (i32, i32) {
    %c0_i32 = arith.constant 0 : i32
    %c0_i32_0 = arith.constant 0 : i32
    %c0_i32_1 = arith.constant 0 : i32
    return %c0_i32, %c0_i32_0 : i32, i32
  }
  func.func @transform_2(%arg0: i32) -> (i32, i32) {
    %c0_i32 = arith.constant 0 : i32
    %c0_i32_0 = arith.constant 0 : i32
    %c0_i32_1 = arith.constant 0 : i32
    return %c0_i32, %c0_i32_0 : i32, i32
  }
  func.func @transform_3(%arg0: i32) -> (i32, i32) {
    %c0_i32 = arith.constant 0 : i32
    %c0_i32_0 = arith.constant 0 : i32
    %c0_i32_1 = arith.constant 0 : i32
    return %c0_i32, %c0_i32_0 : i32, i32
  }
  func.func @transform_4(%arg0: i32) -> (i32, i32) {
    %c0_i32 = arith.constant 0 : i32
    %c0_i32_0 = arith.constant 0 : i32
    %c0_i32_1 = arith.constant 0 : i32
    return %c0_i32, %c0_i32_0 : i32, i32
  }
  func.func @transform_5(%arg0: i32) -> (i32, i32) {
    %c0_i32 = arith.constant 0 : i32
    %c0_i32_0 = arith.constant 0 : i32
    %c0_i32_1 = arith.constant 0 : i32
    return %c0_i32, %c0_i32_0 : i32, i32
  }
  func.func @transform_6(%arg0: i32) -> (i32, i32) {
    %c0_i32 = arith.constant 0 : i32
    %c0_i32_0 = arith.constant 0 : i32
    %c0_i32_1 = arith.constant 0 : i32
    return %c0_i32, %c0_i32_0 : i32, i32
  }
  func.func @transform_7(%arg0: i32) -> (i32, i32) {
    %c0_i32 = arith.constant 0 : i32
    %c0_i32_0 = arith.constant 0 : i32
    %c0_i32_1 = arith.constant 0 : i32
    return %c0_i32, %c0_i32_0 : i32, i32
  }
  func.func @transform_8(%arg0: i32) -> (i32, i32) {
    %c0_i32 = arith.constant 0 : i32
    %c0_i32_0 = arith.constant 0 : i32
    %c0_i32_1 = arith.constant 0 : i32
    return %c0_i32, %c0_i32_0 : i32, i32
  }
  func.func @transform_9(%arg0: i32) -> (i32, i32) {
    %c0_i32 = arith.constant 0 : i32
    %c0_i32_0 = arith.constant 0 : i32
    %c0_i32_1 = arith.constant 0 : i32
    return %c0_i32, %c0_i32_0 : i32, i32
  }
  func.func @transform_10(%arg0: i32) -> (i32, i32) {
    %c0_i32 = arith.constant 0 : i32
    %c0_i32_0 = arith.constant 0 : i32
    %c0_i32_1 = arith.constant 0 : i32
    return %c0_i32, %c0_i32_0 : i32, i32
  }
  func.func @transform_11(%arg0: i32) -> (i32, i32) {
    %c0_i32 = arith.constant 0 : i32
    %c0_i32_0 = arith.constant 0 : i32
    %c0_i32_1 = arith.constant 0 : i32
    return %c0_i32, %c0_i32_0 : i32, i32
  }
  func.func @transform_12(%arg0: i32) -> (i32, i32) {
    %c0_i32 = arith.constant 0 : i32
    %c0_i32_0 = arith.constant 0 : i32
    %c0_i32_1 = arith.constant 0 : i32
    return %c0_i32, %c0_i32_0 : i32, i32
  }
  func.func @transform_13(%arg0: i32) -> (i32, i32, i32) {
    %c0_i32 = arith.constant 0 : i32
    %c0_i32_0 = arith.constant 0 : i32
    %c0_i32_1 = arith.constant 0 : i32
    return %arg0, %c0_i32, %c0_i32_0 : i32, i32, i32
  }
}

module attributes {stable_mosaic.version = 11 : i64} {
  func.func @_pointnet_block_kernel(%arg0: i32, %arg1: memref<2x64x3xf32, #tpu.memory_space<vmem>>, %arg2: memref<2x3x3xf32, #tpu.memory_space<vmem>>, %arg3: memref<3x64xf32, #tpu.memory_space<vmem>>, %arg4: memref<1x64xf32, #tpu.memory_space<vmem>>, %arg5: memref<64x128xf32, #tpu.memory_space<vmem>>, %arg6: memref<1x128xf32, #tpu.memory_space<vmem>>, %arg7: memref<128x1024xbf16, #tpu.memory_space<vmem>>, %arg8: memref<1x1024xf32, #tpu.memory_space<vmem>>, %arg9: memref<1024x512xbf16, #tpu.memory_space<vmem>>, %arg10: memref<1x512xf32, #tpu.memory_space<vmem>>, %arg11: memref<512x256xbf16, #tpu.memory_space<vmem>>, %arg12: memref<1x256xf32, #tpu.memory_space<vmem>>, %arg13: memref<256x10xf32, #tpu.memory_space<vmem>>, %arg14: memref<1x10xf32, #tpu.memory_space<vmem>>, %arg15: memref<2x1x10xf32, #tpu.memory_space<vmem>>) attributes {dimension_semantics = [#tpu.dimension_semantics<parallel>], iteration_bounds = array<i64: 1>, scalar_prefetch = 0 : i64, scratch_operands = 0 : i64, tpu.core_type = #tpu.core_type<tc>, window_params = [{transform_indices = @transform_0, window_bounds = array<i64: 2, 64, 3>}, {transform_indices = @transform_1, window_bounds = array<i64: 2, 3, 3>}, {pipeline_mode = #tpu.pipeline_mode<synchronous>, transform_indices = @transform_2, window_bounds = array<i64: 3, 64>}, {pipeline_mode = #tpu.pipeline_mode<synchronous>, transform_indices = @transform_3, window_bounds = array<i64: 1, 64>}, {pipeline_mode = #tpu.pipeline_mode<synchronous>, transform_indices = @transform_4, window_bounds = array<i64: 64, 128>}, {pipeline_mode = #tpu.pipeline_mode<synchronous>, transform_indices = @transform_5, window_bounds = array<i64: 1, 128>}, {pipeline_mode = #tpu.pipeline_mode<synchronous>, transform_indices = @transform_6, window_bounds = array<i64: 128, 1024>}, {pipeline_mode = #tpu.pipeline_mode<synchronous>, transform_indices = @transform_7, window_bounds = array<i64: 1, 1024>}, {pipeline_mode = #tpu.pipeline_mode<synchronous>, transform_indices = @transform_8, window_bounds = array<i64: 1024, 512>}, {pipeline_mode = #tpu.pipeline_mode<synchronous>, transform_indices = @transform_9, window_bounds = array<i64: 1, 512>}, {pipeline_mode = #tpu.pipeline_mode<synchronous>, transform_indices = @transform_10, window_bounds = array<i64: 512, 256>}, {pipeline_mode = #tpu.pipeline_mode<synchronous>, transform_indices = @transform_11, window_bounds = array<i64: 1, 256>}, {pipeline_mode = #tpu.pipeline_mode<synchronous>, transform_indices = @transform_12, window_bounds = array<i64: 256, 10>}, {pipeline_mode = #tpu.pipeline_mode<synchronous>, transform_indices = @transform_13, window_bounds = array<i64: 1, 10>}, {transform_indices = @transform_14, window_bounds = array<i64: 2, 1, 10>}]} {
    %c0 = arith.constant 0 : index
    %c0_0 = arith.constant 0 : index
    %c0_1 = arith.constant 0 : index
    %0 = vector.load %arg1[%c0, %c0_0, %c0_1] : memref<2x64x3xf32, #tpu.memory_space<vmem>>, vector<2x64x3xf32>
    %c0_2 = arith.constant 0 : index
    %c0_3 = arith.constant 0 : index
    %1 = vector.load %arg3[%c0_2, %c0_3] : memref<3x64xf32, #tpu.memory_space<vmem>>, vector<3x64xf32>
    %c0_4 = arith.constant 0 : index
    %c0_5 = arith.constant 0 : index
    %c0_6 = arith.constant 0 : index
    %2 = vector.load %arg2[%c0_4, %c0_5, %c0_6] : memref<2x3x3xf32, #tpu.memory_space<vmem>>, vector<2x3x3xf32>
    %3 = vector.shape_cast %2 : vector<2x3x3xf32> to vector<6x3xf32>
    %cst = arith.constant dense<0.000000e+00> : vector<6x64xf32>
    %4 = tpu.matmul %3, %1, %cst {dimension_numbers = #tpu.dot_dimension_numbers<[1], [0], [0], [1], [0, 0, 1, 1], [], []>} : vector<6x3xf32>, vector<3x64xf32>, vector<6x64xf32> -> vector<6x64xf32>
    %5 = vector.shape_cast %4 : vector<6x64xf32> to vector<2x3x64xf32>
    "tpu.trace_start"() <{level = 10 : i32, message = "bnj,bjk->bnk"}> : () -> ()
    %cst_7 = arith.constant dense<0.000000e+00> : vector<2x64x64xf32>
    %6 = tpu.matmul %0, %5, %cst_7 {dimension_numbers = #tpu.dot_dimension_numbers<[2], [1], [1], [2], [0, 0, 0, 1, 1, 2], [0], [0]>} : vector<2x64x3xf32>, vector<2x3x64xf32>, vector<2x64x64xf32> -> vector<2x64x64xf32>
    "tpu.trace_stop"() : () -> ()
    %7 = vector.shape_cast %6 : vector<2x64x64xf32> to vector<128x64xf32>
    %c0_8 = arith.constant 0 : index
    %c0_9 = arith.constant 0 : index
    %8 = vector.load %arg4[%c0_8, %c0_9] : memref<1x64xf32, #tpu.memory_space<vmem>>, vector<1x64xf32>
    %9 = vector.broadcast %8 : vector<1x64xf32> to vector<128x64xf32>
    %10 = arith.addf %7, %9 : vector<128x64xf32>
    %cst_10 = arith.constant 0.000000e+00 : f32
    %11 = vector.broadcast %cst_10 : f32 to vector<128x64xf32>
    %12 = arith.maximumf %10, %11 : vector<128x64xf32>
    %c0_11 = arith.constant 0 : index
    %c0_12 = arith.constant 0 : index
    %13 = vector.load %arg5[%c0_11, %c0_12] : memref<64x128xf32, #tpu.memory_space<vmem>>, vector<64x128xf32>
    %cst_13 = arith.constant dense<0.000000e+00> : vector<128x128xf32>
    %14 = tpu.matmul %12, %13, %cst_13 {dimension_numbers = #tpu.dot_dimension_numbers<[1], [0], [0], [1], [0, 0, 1, 1], [], []>} : vector<128x64xf32>, vector<64x128xf32>, vector<128x128xf32> -> vector<128x128xf32>
    %c0_14 = arith.constant 0 : index
    %c0_15 = arith.constant 0 : index
    %15 = vector.load %arg6[%c0_14, %c0_15] : memref<1x128xf32, #tpu.memory_space<vmem>>, vector<1x128xf32>
    %16 = vector.broadcast %15 : vector<1x128xf32> to vector<128x128xf32>
    %17 = arith.addf %14, %16 : vector<128x128xf32>
    %cst_16 = arith.constant 0.000000e+00 : f32
    %18 = vector.broadcast %cst_16 : f32 to vector<128x128xf32>
    %19 = arith.maximumf %17, %18 : vector<128x128xf32>
    %20 = arith.truncf %19 : vector<128x128xf32> to vector<128x128xbf16>
    %c0_17 = arith.constant 0 : index
    %c0_18 = arith.constant 0 : index
    %21 = vector.load %arg7[%c0_17, %c0_18] : memref<128x1024xbf16, #tpu.memory_space<vmem>>, vector<128x256xbf16>
    %c0_19 = arith.constant 0 : index
    %c0_20 = arith.constant 0 : index
    %22 = vector.load %arg8[%c0_19, %c0_20] : memref<1x1024xf32, #tpu.memory_space<vmem>>, vector<1x256xf32>
    %cst_21 = arith.constant dense<0.000000e+00> : vector<128x256xf32>
    %23 = tpu.matmul %20, %21, %cst_21 {dimension_numbers = #tpu.dot_dimension_numbers<[1], [0], [0], [1], [0, 0, 1, 1], [], []>} : vector<128x128xbf16>, vector<128x256xbf16>, vector<128x256xf32> -> vector<128x256xf32>
    %24 = vector.broadcast %22 : vector<1x256xf32> to vector<128x256xf32>
    %25 = arith.addf %23, %24 : vector<128x256xf32>
    %cst_22 = arith.constant 0.000000e+00 : f32
    %26 = vector.broadcast %cst_22 : f32 to vector<128x256xf32>
    %27 = arith.maximumf %25, %26 : vector<128x256xf32>
    %28 = vector.shape_cast %27 : vector<128x256xf32> to vector<2x64x256xf32>
    %cst_23 = arith.constant dense<0xFF800000> : vector<2x256xf32>
    %29 = vector.multi_reduction <maximumf>, %28, %cst_23 [1] : vector<2x64x256xf32> to vector<2x256xf32>
    %c0_24 = arith.constant 0 : index
    %c256 = arith.constant 256 : index
    %30 = vector.load %arg7[%c0_24, %c256] : memref<128x1024xbf16, #tpu.memory_space<vmem>>, vector<128x256xbf16>
    %c0_25 = arith.constant 0 : index
    %c256_26 = arith.constant 256 : index
    %31 = vector.load %arg8[%c0_25, %c256_26] : memref<1x1024xf32, #tpu.memory_space<vmem>>, vector<1x256xf32>
    %cst_27 = arith.constant dense<0.000000e+00> : vector<128x256xf32>
    %32 = tpu.matmul %20, %30, %cst_27 {dimension_numbers = #tpu.dot_dimension_numbers<[1], [0], [0], [1], [0, 0, 1, 1], [], []>} : vector<128x128xbf16>, vector<128x256xbf16>, vector<128x256xf32> -> vector<128x256xf32>
    %33 = vector.broadcast %31 : vector<1x256xf32> to vector<128x256xf32>
    %34 = arith.addf %32, %33 : vector<128x256xf32>
    %cst_28 = arith.constant 0.000000e+00 : f32
    %35 = vector.broadcast %cst_28 : f32 to vector<128x256xf32>
    %36 = arith.maximumf %34, %35 : vector<128x256xf32>
    %37 = vector.shape_cast %36 : vector<128x256xf32> to vector<2x64x256xf32>
    %cst_29 = arith.constant dense<0xFF800000> : vector<2x256xf32>
    %38 = vector.multi_reduction <maximumf>, %37, %cst_29 [1] : vector<2x64x256xf32> to vector<2x256xf32>
    %c0_30 = arith.constant 0 : index
    %c512 = arith.constant 512 : index
    %39 = vector.load %arg7[%c0_30, %c512] : memref<128x1024xbf16, #tpu.memory_space<vmem>>, vector<128x256xbf16>
    %c0_31 = arith.constant 0 : index
    %c512_32 = arith.constant 512 : index
    %40 = vector.load %arg8[%c0_31, %c512_32] : memref<1x1024xf32, #tpu.memory_space<vmem>>, vector<1x256xf32>
    %cst_33 = arith.constant dense<0.000000e+00> : vector<128x256xf32>
    %41 = tpu.matmul %20, %39, %cst_33 {dimension_numbers = #tpu.dot_dimension_numbers<[1], [0], [0], [1], [0, 0, 1, 1], [], []>} : vector<128x128xbf16>, vector<128x256xbf16>, vector<128x256xf32> -> vector<128x256xf32>
    %42 = vector.broadcast %40 : vector<1x256xf32> to vector<128x256xf32>
    %43 = arith.addf %41, %42 : vector<128x256xf32>
    %cst_34 = arith.constant 0.000000e+00 : f32
    %44 = vector.broadcast %cst_34 : f32 to vector<128x256xf32>
    %45 = arith.maximumf %43, %44 : vector<128x256xf32>
    %46 = vector.shape_cast %45 : vector<128x256xf32> to vector<2x64x256xf32>
    %cst_35 = arith.constant dense<0xFF800000> : vector<2x256xf32>
    %47 = vector.multi_reduction <maximumf>, %46, %cst_35 [1] : vector<2x64x256xf32> to vector<2x256xf32>
    %c0_36 = arith.constant 0 : index
    %c768 = arith.constant 768 : index
    %48 = vector.load %arg7[%c0_36, %c768] : memref<128x1024xbf16, #tpu.memory_space<vmem>>, vector<128x256xbf16>
    %c0_37 = arith.constant 0 : index
    %c768_38 = arith.constant 768 : index
    %49 = vector.load %arg8[%c0_37, %c768_38] : memref<1x1024xf32, #tpu.memory_space<vmem>>, vector<1x256xf32>
    %cst_39 = arith.constant dense<0.000000e+00> : vector<128x256xf32>
    %50 = tpu.matmul %20, %48, %cst_39 {dimension_numbers = #tpu.dot_dimension_numbers<[1], [0], [0], [1], [0, 0, 1, 1], [], []>} : vector<128x128xbf16>, vector<128x256xbf16>, vector<128x256xf32> -> vector<128x256xf32>
    %51 = vector.broadcast %49 : vector<1x256xf32> to vector<128x256xf32>
    %52 = arith.addf %50, %51 : vector<128x256xf32>
    %cst_40 = arith.constant 0.000000e+00 : f32
    %53 = vector.broadcast %cst_40 : f32 to vector<128x256xf32>
    %54 = arith.maximumf %52, %53 : vector<128x256xf32>
    %55 = vector.shape_cast %54 : vector<128x256xf32> to vector<2x64x256xf32>
    %cst_41 = arith.constant dense<0xFF800000> : vector<2x256xf32>
    %56 = vector.multi_reduction <maximumf>, %55, %cst_41 [1] : vector<2x64x256xf32> to vector<2x256xf32>
    %57 = tpu.concatenate %29, %38, %47, %56 in 1 : vector<2x256xf32>, vector<2x256xf32>, vector<2x256xf32>, vector<2x256xf32> -> vector<2x1024xf32>
    %58 = arith.truncf %57 : vector<2x1024xf32> to vector<2x1024xbf16>
    %c0_42 = arith.constant 0 : index
    %c0_43 = arith.constant 0 : index
    %59 = vector.load %arg9[%c0_42, %c0_43] : memref<1024x512xbf16, #tpu.memory_space<vmem>>, vector<1024x512xbf16>
    %cst_44 = arith.constant dense<0.000000e+00> : vector<2x512xf32>
    %60 = tpu.matmul %58, %59, %cst_44 {dimension_numbers = #tpu.dot_dimension_numbers<[1], [0], [0], [1], [0, 0, 1, 1], [], []>} : vector<2x1024xbf16>, vector<1024x512xbf16>, vector<2x512xf32> -> vector<2x512xf32>
    %c0_45 = arith.constant 0 : index
    %c0_46 = arith.constant 0 : index
    %61 = vector.load %arg10[%c0_45, %c0_46] : memref<1x512xf32, #tpu.memory_space<vmem>>, vector<1x512xf32>
    %62 = vector.broadcast %61 : vector<1x512xf32> to vector<2x512xf32>
    %63 = arith.addf %60, %62 : vector<2x512xf32>
    %cst_47 = arith.constant 0.000000e+00 : f32
    %64 = vector.broadcast %cst_47 : f32 to vector<2x512xf32>
    %65 = arith.maximumf %63, %64 : vector<2x512xf32>
    %66 = arith.truncf %65 : vector<2x512xf32> to vector<2x512xbf16>
    %c0_48 = arith.constant 0 : index
    %c0_49 = arith.constant 0 : index
    %67 = vector.load %arg11[%c0_48, %c0_49] : memref<512x256xbf16, #tpu.memory_space<vmem>>, vector<512x256xbf16>
    %cst_50 = arith.constant dense<0.000000e+00> : vector<2x256xf32>
    %68 = tpu.matmul %66, %67, %cst_50 {dimension_numbers = #tpu.dot_dimension_numbers<[1], [0], [0], [1], [0, 0, 1, 1], [], []>} : vector<2x512xbf16>, vector<512x256xbf16>, vector<2x256xf32> -> vector<2x256xf32>
    %c0_51 = arith.constant 0 : index
    %c0_52 = arith.constant 0 : index
    %69 = vector.load %arg12[%c0_51, %c0_52] : memref<1x256xf32, #tpu.memory_space<vmem>>, vector<1x256xf32>
    %70 = vector.broadcast %69 : vector<1x256xf32> to vector<2x256xf32>
    %71 = arith.addf %68, %70 : vector<2x256xf32>
    %cst_53 = arith.constant 0.000000e+00 : f32
    %72 = vector.broadcast %cst_53 : f32 to vector<2x256xf32>
    %73 = arith.maximumf %71, %72 : vector<2x256xf32>
    %c0_54 = arith.constant 0 : index
    %c0_55 = arith.constant 0 : index
    %74 = vector.load %arg13[%c0_54, %c0_55] : memref<256x10xf32, #tpu.memory_space<vmem>>, vector<256x10xf32>
    %cst_56 = arith.constant dense<0.000000e+00> : vector<2x10xf32>
    %75 = tpu.matmul %73, %74, %cst_56 {dimension_numbers = #tpu.dot_dimension_numbers<[1], [0], [0], [1], [0, 0, 1, 1], [], []>} : vector<2x256xf32>, vector<256x10xf32>, vector<2x10xf32> -> vector<2x10xf32>
    %c0_57 = arith.constant 0 : index
    %c0_58 = arith.constant 0 : index
    %76 = vector.load %arg14[%c0_57, %c0_58] : memref<1x10xf32, #tpu.memory_space<vmem>>, vector<1x10xf32>
    %77 = vector.broadcast %76 : vector<1x10xf32> to vector<2x10xf32>
    %78 = arith.addf %75, %77 : vector<2x10xf32>
    %cst_59 = arith.constant dense<0xFF800000> : vector<2xf32>
    %79 = vector.multi_reduction <maximumf>, %78, %cst_59 [1] : vector<2x10xf32> to vector<2xf32>
    %80 = vector.shape_cast %79 : vector<2xf32> to vector<2x1xf32>
    %81 = vector.broadcast %80 : vector<2x1xf32> to vector<2x10xf32>
    %82 = arith.subf %78, %81 : vector<2x10xf32>
    %83 = math.exp %82 : vector<2x10xf32>
    %cst_60 = arith.constant dense<0.000000e+00> : vector<2xf32>
    %84 = vector.multi_reduction <add>, %83, %cst_60 [1] : vector<2x10xf32> to vector<2xf32>
    %85 = vector.shape_cast %84 : vector<2xf32> to vector<2x1xf32>
    %86 = math.log %85 : vector<2x1xf32>
    %87 = vector.broadcast %86 : vector<2x1xf32> to vector<2x10xf32>
    %88 = arith.subf %82, %87 : vector<2x10xf32>
    %89 = vector.shape_cast %88 : vector<2x10xf32> to vector<2x1x10xf32>
    %c0_61 = arith.constant 0 : index
    %c0_62 = arith.constant 0 : index
    %c0_63 = arith.constant 0 : index
    %90 = vector.load %arg15[%c0_61, %c0_62, %c0_63] : memref<2x1x10xf32, #tpu.memory_space<vmem>>, vector<2x1x10xf32>
    tpu.vector_store %arg15[%c0_61, %c0_62, %c0_63], %89 {strides = array<i32>} : memref<2x1x10xf32, #tpu.memory_space<vmem>>, vector<2x1x10xf32>,
    return
  }
  func.func @transform_0(%arg0: i32) -> (i32, i32, i32) {
    %c0_i32 = arith.constant 0 : i32
    %c0_i32_0 = arith.constant 0 : i32
    %c0_i32_1 = arith.constant 0 : i32
    return %arg0, %c0_i32, %c0_i32_0 : i32, i32, i32
  }
  func.func @transform_1(%arg0: i32) -> (i32, i32, i32) {
    %c0_i32 = arith.constant 0 : i32
    %c0_i32_0 = arith.constant 0 : i32
    %c0_i32_1 = arith.constant 0 : i32
    return %arg0, %c0_i32, %c0_i32_0 : i32, i32, i32
  }
  func.func @transform_2(%arg0: i32) -> (i32, i32) {
    %c0_i32 = arith.constant 0 : i32
    %c0_i32_0 = arith.constant 0 : i32
    %c0_i32_1 = arith.constant 0 : i32
    return %c0_i32, %c0_i32_0 : i32, i32
  }
  func.func @transform_3(%arg0: i32) -> (i32, i32) {
    %c0_i32 = arith.constant 0 : i32
    %c0_i32_0 = arith.constant 0 : i32
    %c0_i32_1 = arith.constant 0 : i32
    return %c0_i32, %c0_i32_0 : i32, i32
  }
  func.func @transform_4(%arg0: i32) -> (i32, i32) {
    %c0_i32 = arith.constant 0 : i32
    %c0_i32_0 = arith.constant 0 : i32
    %c0_i32_1 = arith.constant 0 : i32
    return %c0_i32, %c0_i32_0 : i32, i32
  }
  func.func @transform_5(%arg0: i32) -> (i32, i32) {
    %c0_i32 = arith.constant 0 : i32
    %c0_i32_0 = arith.constant 0 : i32
    %c0_i32_1 = arith.constant 0 : i32
    return %c0_i32, %c0_i32_0 : i32, i32
  }
  func.func @transform_6(%arg0: i32) -> (i32, i32) {
    %c0_i32 = arith.constant 0 : i32
    %c0_i32_0 = arith.constant 0 : i32
    %c0_i32_1 = arith.constant 0 : i32
    return %c0_i32, %c0_i32_0 : i32, i32
  }
  func.func @transform_7(%arg0: i32) -> (i32, i32) {
    %c0_i32 = arith.constant 0 : i32
    %c0_i32_0 = arith.constant 0 : i32
    %c0_i32_1 = arith.constant 0 : i32
    return %c0_i32, %c0_i32_0 : i32, i32
  }
  func.func @transform_8(%arg0: i32) -> (i32, i32) {
    %c0_i32 = arith.constant 0 : i32
    %c0_i32_0 = arith.constant 0 : i32
    %c0_i32_1 = arith.constant 0 : i32
    return %c0_i32, %c0_i32_0 : i32, i32
  }
  func.func @transform_9(%arg0: i32) -> (i32, i32) {
    %c0_i32 = arith.constant 0 : i32
    %c0_i32_0 = arith.constant 0 : i32
    %c0_i32_1 = arith.constant 0 : i32
    return %c0_i32, %c0_i32_0 : i32, i32
  }
  func.func @transform_10(%arg0: i32) -> (i32, i32) {
    %c0_i32 = arith.constant 0 : i32
    %c0_i32_0 = arith.constant 0 : i32
    %c0_i32_1 = arith.constant 0 : i32
    return %c0_i32, %c0_i32_0 : i32, i32
  }
  func.func @transform_11(%arg0: i32) -> (i32, i32) {
    %c0_i32 = arith.constant 0 : i32
    %c0_i32_0 = arith.constant 0 : i32
    %c0_i32_1 = arith.constant 0 : i32
    return %c0_i32, %c0_i32_0 : i32, i32
  }
  func.func @transform_12(%arg0: i32) -> (i32, i32) {
    %c0_i32 = arith.constant 0 : i32
    %c0_i32_0 = arith.constant 0 : i32
    %c0_i32_1 = arith.constant 0 : i32
    return %c0_i32, %c0_i32_0 : i32, i32
  }
  func.func @transform_13(%arg0: i32) -> (i32, i32) {
    %c0_i32 = arith.constant 0 : i32
    %c0_i32_0 = arith.constant 0 : i32
    %c0_i32_1 = arith.constant 0 : i32
    return %c0_i32, %c0_i32_0 : i32, i32
  }
  func.func @transform_14(%arg0: i32) -> (i32, i32, i32) {
    %c0_i32 = arith.constant 0 : i32
    %c0_i32_0 = arith.constant 0 : i32
    %c0_i32_1 = arith.constant 0 : i32
    return %arg0, %c0_i32, %c0_i32_0 : i32, i32, i32
  }
}

</mosaic_0001>

<bundles_post_ra>
// kernel: pointnet_forward.2
= control target key start
LH: loop header
LB: loop body
LE: loop exit
PB: predicated region body
PF: predicated region fallthrough
CT: control target
= control target key end

     0   :  { %18 = vsyncpa [#allocation3], 0  ;;  %s6279_s0 = inlined_call_operand.vmem [shape: f32[2,64,3], index: 0, kind: input, shape index: {}]   ;;  %s6280_s1 = inlined_call_operand.vmem [shape: f32[3,64], index: 1, kind: input, shape index: {}]   ;;  %s6281_s2 = inlined_call_operand.vmem [shape: f32[1,64], index: 2, kind: input, shape index: {}]   ;;  %s6282_s3 = inlined_call_operand.vmem [shape: f32[64,128], index: 3, kind: input, shape index: {}]   ;;  %s6283_s4 = inlined_call_operand.vmem [shape: f32[1,128], index: 4, kind: input, shape index: {}]   ;;  %s6284_s5 = inlined_call_operand.hbm [shape: bf16[128,1024], index: 5, kind: input, shape index: {}]   ;;  %s6285_s6 = inlined_call_operand.vmem [shape: f32[1,1024], index: 6, kind: input, shape index: {}]   ;;  %s6286_s7 = inlined_call_operand.hbm [shape: bf16[1024,512], index: 7, kind: input, shape index: {}]   ;;  %s6287_s8 = inlined_call_operand.vmem [shape: f32[1,512], index: 8, kind: input, shape index: {}]   ;;  %s6288_s9 = inlined_call_operand.hbm [shape: bf16[512,256], index: 9, kind: input, shape index: {}]   ;;  %s6289_s10 = inlined_call_operand.vmem [shape: f32[1,256], index: 10, kind: input, shape index: {}]   ;;  %s6290_s11 = inlined_call_operand.vmem [shape: f32[256,9], index: 11, kind: input, shape index: {}]   ;;  %s6291_s12 = inlined_call_operand.vmem [shape: f32[1,9], index: 12, kind: input, shape index: {}]   ;;  %s6292_s13 = inlined_call_operand.vmem [shape: f32[2,1,9], index: 13, kind: output, shape index: {}]  }
   0x1   :  { %19 = vsyncpa [#allocation5], 0  ;;  %s5556_s25 = smov [#allocation4]   ;;  %s5486_s29 = scalar_lea.hbm %s6286_s7, 32768 }
   0x2   :  { %s49_s26 = sshll.u32 %s5556_s25, 4  ;;  %p5487_p0 = scmp.ne.s32.totalorder %s6286_s7, %s5486_s29  ;;  %s50_s26 = int_to_ptr.vmem [resolvable:$true] %s49_s26 }
   0x3   :  { %p5490_p1 = scmp.lt.u32.totalorder %s5486_s29, %s6286_s7 }
   0x5   :  { %p5492_p2 = pnand %p5490_p1, %p5487_p0 }
   0x7   :  { %5495 = shalt.err (!%p5492_p2)
}
   0x8   :  { %s5496_s17 = scalar_lea.vmem %s50_s26, 32768  ;;  %p5501_p4 = scmp.lt.s32.totalorder %s50_s26, %s50_s26 }
   0x9   :  { %p5497_p3 = scmp.ne.s32.totalorder %s50_s26, %s5496_s17  ;;  %p5502_p5 = scmp.lt.s32.totalorder %s5496_s17, %s5496_s17 }
   0xb   :  { %p5503_p6 = por %p5502_p5, %p5501_p4 }
   0xd   :  { %p5504_p7 = pnand %p5503_p6, %p5497_p3 }
   0xf   :  { %5507 = shalt.err (!%p5504_p7)
}
  0x10   :  { %s5557_s18 = smov 256   ;;  %s5558_s19 = smov 16  }
  0x11   :  { %55 = dma.hbm_to_vmem [thread:$0]  %s6286_s7, 32768, %s50_s26, [#allocation5], %s5557_s18, %s5557_s18, %s5558_s19  }
  0x12   :  { %s5559_s22 = smov [#allocation2]   ;;  %s5508_s27 = scalar_lea.hbm %s6284_s5, 8192 }
  0x13   :  { %s35_s23 = sshll.u32 %s5559_s22, 4  ;;  %p5509_p8 = scmp.ne.s32.totalorder %s6284_s5, %s5508_s27  ;;  %s36_s23 = int_to_ptr.vmem [resolvable:$true] %s35_s23 }
  0x14   :  { %p5512_p9 = scmp.lt.u32.totalorder %s5508_s27, %s6284_s5 }
  0x16   :  { %p5514_p10 = pnand %p5512_p9, %p5509_p8 }
  0x18   :  { %5517 = shalt.err (!%p5514_p10)
}
  0x19   :  { %s5518_s15 = scalar_lea.vmem %s36_s23, 8192  ;;  %p5523_p12 = scmp.lt.s32.totalorder %s36_s23, %s36_s23 }
  0x1a   :  { %p5519_p11 = scmp.ne.s32.totalorder %s36_s23, %s5518_s15  ;;  %p5524_p13 = scmp.lt.s32.totalorder %s5518_s15, %s5518_s15 }
  0x1c   :  { %p5525_p0 = por %p5524_p13, %p5523_p12 }
  0x1e   :  { %p5526_p1 = pnand %p5525_p0, %p5519_p11 }
  0x20   :  { %5529 = shalt.err (!%p5526_p1)
}
  0x21   :  { %s5560_s7 = smov 512   ;;  %s5561_s26 = smov 32  }
  0x22   :  { %41 = dma.hbm_to_vmem [thread:$0]  %s6284_s5, 8192, %s36_s23, [#allocation3], %s5560_s7, %s5560_s7, %s5561_s26  }
  0x23   :  { %s5562_s18 = smov [#allocation6]   ;;  %s5530_s22 = scalar_lea.hbm %s6288_s9, 8192 }
  0x24   :  { %s63_s19 = sshll.u32 %s5562_s18, 4  ;;  %p5531_p2 = scmp.ne.s32.totalorder %s6288_s9, %s5530_s22  ;;  %s64_s19 = int_to_ptr.vmem [resolvable:$true] %s63_s19 }
  0x25   :  { %p5534_p3 = scmp.lt.u32.totalorder %s5530_s22, %s6288_s9 }
  0x27   :  { %p5536_p4 = pnand %p5534_p3, %p5531_p2 }
  0x29   :  { %5539 = shalt.err (!%p5536_p4)
}
  0x2a   :  { %s5540_s29 = scalar_lea.vmem %s64_s19, 8192  ;;  %p5545_p6 = scmp.lt.s32.totalorder %s64_s19, %s64_s19 }
  0x2b   :  { %p5541_p5 = scmp.ne.s32.totalorder %s64_s19, %s5540_s29  ;;  %p5546_p7 = scmp.lt.s32.totalorder %s5540_s29, %s5540_s29 }
  0x2d   :  { %p5547_p8 = por %p5546_p7, %p5545_p6 }
  0x2f   :  { %p5548_p9 = pnand %p5547_p8, %p5541_p5 }
  0x31   :  { %5551 = shalt.err (!%p5548_p9)
}
  0x32   :  { %s5563_s5 = smov 128   ;;  %s5564_s23 = smov 8  }
  0x33   :  { %69 = dma.hbm_to_vmem [thread:$0]  %s6288_s9, 8192, %s64_s19, [#allocation5], %s5563_s5, %s5563_s5, %s5564_s23  }
  0x34   :  { %5552 = dma.done.wait [#allocation3], 8192  }
  0x35   :  { %5553 = vsyncadd [#allocation3], 4294959104 }
  0x36   :  { %5554 = dma.done.wait [#allocation5], 40960  }
  0x37   :  { %5555 = vsyncadd [#allocation5], 4294926336  ;;  %vm159_vm0 = vcmask 1042432   ;;  %vm110_vm1 = vcmask 23552   ;;  %v102_v0 = vld [vmem:[%s6280_s1] sm:$0x7] }
  0x38   :  { %v86_v1 = vld [vmem:[%s6279_s0] sm:$0xff]  ;;  %v87_v2 = vld [vmem:[%s6279_s0 + $0x8] sm:$0xff]  ;;  %4831 = vmatprep.subr.msk.mxu1 %vm159_vm0, %v102_v0  ;;  %v88_v3 = vld [vmem:[%s6279_s0 + $0x10] sm:$0xff]  ;;  %vm339_vm2 = vcmask 523264   ;;  %vm1781_vm3 = vcmask 1041409   ;;  %vm4326_vm4 = vcmask 65536  }
  0x39   :  { %4833 = vmatprep.mubr.msk.f32.mxu1 %vm110_vm1, %v86_v1  ;;  %4832 = vmatpush3.msk.msra.mxu1 %vm159_vm0, %v102_v0  ;;  %v89_v4 = vld [vmem:[%s6279_s0 + $0x18] sm:$0xff]  ;;  %v90_v5 = vld [vmem:[%s6279_s0 + $0x20] sm:$0xff]  ;;  %v325_v7 = vld [vmem:[%s6282_s3 + $0x8] sm:$0xff] }
  0x3a   :  { %4834 = vmatmul.mubr.msk.f32.vlgmr.msra.gmra.mrb[0].mxu1 %vm110_vm1, %v87_v2  ;;  %v324_v6 = vld [vmem:[%s6282_s3] sm:$0xff]  ;;  %v326_v8 = vld [vmem:[%s6282_s3 + $0x10] sm:$0xff]  ;;  %v327_v9 = vld [vmem:[%s6282_s3 + $0x18] sm:$0xff] }
  0x3b   :  { %4836 = vmatprep.mubr.msk.f32.mxu1 %vm110_vm1, %v88_v3  ;;  %v91_v10 = vld [vmem:[%s6279_s0 + $0x28] sm:$0xff]  ;;  %v92_v11 = vld [vmem:[%s6279_s0 + $0x30] sm:$0xff]  ;;  %v4897_v12 = vpack.c.bf16 %v325_v7, %v324_v6  ;;  %v4901_v13 = vpack.c.bf16 %v327_v9, %v326_v8  ;;  %v328_v14 = vld [vmem:[%s6282_s3 + $0x20] sm:$0xff] }
  0x3c   :  { %v329_v15 = vld [vmem:[%s6282_s3 + $0x28] sm:$0xff]  ;;  %v93_v16 = vld [vmem:[%s6279_s0 + $0x38] sm:$0xff]  ;;  %v330_v17 = vld [vmem:[%s6282_s3 + $0x30] sm:$0xff] }
  0x3d   :  { %4898 = vmatprep.subr.bf16.mxu1 %v4897_v12  ;;  %v331_v18 = vld [vmem:[%s6282_s3 + $0x38] sm:$0xff]  ;;  %v94_v19 = vld [vmem:[%s6279_s0 + $0x40] sm:$0xff]  ;;  %v4905_v20 = vpack.c.bf16 %v329_v15, %v328_v14  ;;  %v95_v21 = vld [vmem:[%s6279_s0 + $0x48] sm:$0xff] }
  0x3e   :  { %4837 = vmatmul.mubr.msk.f32.gmra.mrb[2].mxu1 %vm110_vm1, %v89_v4  ;;  %v96_v22 = vld [vmem:[%s6279_s0 + $0x50] sm:$0xff]  ;;  %v4909_v23 = vpack.c.bf16 %v331_v18, %v330_v17  ;;  %v97_v24 = vld [vmem:[%s6279_s0 + $0x58] sm:$0xff]  ;;  %v98_v25 = vld [vmem:[%s6279_s0 + $0x60] sm:$0xff] }
  0x3f   :  { %4839 = vmatprep.mubr.msk.f32.mxu1 %vm110_vm1, %v90_v5  ;;  %4900 = vmatpush3.bf16.msra.mxu1 %v4897_v12  ;;  %v99_v26 = vld [vmem:[%s6279_s0 + $0x68] sm:$0xff]  ;;  %v100_v27 = vld [vmem:[%s6279_s0 + $0x70] sm:$0xff]  ;;  %v101_v28 = vld [vmem:[%s6279_s0 + $0x78] sm:$0xff] }
  0x40   :  { %4902 = vmatprep.subr.bf16.mxu1 %v4901_v13  ;;  %v557_v29 = vld [vmem:[#allocation2] sm:$0xff] }
  0x41   :  { %v558_v30 = vld [vmem:[#allocation2 + $0x20] sm:$0xff] }
  0x42   :  { %4840 = vmatmul.mubr.msk.f32.gmra.mrb[4].mxu1 %vm110_vm1, %v91_v10  ;;  %v559_v31 = vld [vmem:[#allocation2 + $0x40] sm:$0xff]  ;;  %v4371_v32 = vcombine.high %v557_v29, %v558_v30  ;;  %v4370_v33 = vcombine.low %v557_v29, %v558_v30 }
  0x43   :  { %4842 = vmatprep.mubr.msk.f32.mxu1 %vm110_vm1, %v92_v11  ;;  %4904 = vmatpush3.bf16.msra.mxu1 %v4901_v13  ;;  %v560_v34 = vld [vmem:[#allocation2 + $0x60] sm:$0xff] }
  0x44   :  { %4906 = vmatprep.subr.bf16.mxu1 %v4905_v20  ;;  %v4373_v35 = vcombine.high %v559_v31, %v560_v34  ;;  %v561_v36 = vld [vmem:[#allocation2 + $0x80] sm:$0xff]  ;;  %665 = vmatprep.subr.bf16.mxu0 %v4371_v32  ;;  %v4372_v38 = vcombine.low %v559_v31, %v560_v34 }
  0x45   :  { %v562_v37 = vld [vmem:[#allocation2 + $0xa0] sm:$0xff]  ;;  %666 = vmatpush1.bf16.msra.mxu0 %v4370_v33 }
  0x46   :  { %4843 = vmatmul.mubr.msk.f32.gmra.mrb[6].mxu1 %vm110_vm1, %v93_v16  ;;  %667 = vmatprep.subr.bf16.mxu0 %v4373_v35  ;;  %v4375_v39 = vcombine.high %v561_v36, %v562_v37  ;;  %v563_v40 = vld [vmem:[#allocation2 + $0xc0] sm:$0xff]  ;;  %v4374_v42 = vcombine.low %v561_v36, %v562_v37 }
  0x47   :  { %4845 = vmatprep.mubr.msk.f32.mxu1 %vm110_vm1, %v94_v19  ;;  %4908 = vmatpush3.bf16.msra.mxu1 %v4905_v20  ;;  %v564_v41 = vld [vmem:[#allocation2 + $0xe0] sm:$0xff] }
  0x48   :  { %4910 = vmatprep.subr.bf16.mxu1 %v4909_v23  ;;  %v4377_v43 = vcombine.high %v563_v40, %v564_v41  ;;  %v565_v44 = vld [vmem:[#allocation2 + $0x100] sm:$0xff]  ;;  %v4376_v46 = vcombine.low %v563_v40, %v564_v41 }
  0x49   :  { %668 = vmatpush1.bf16.msra.mxu0 %v4372_v38  ;;  %v566_v45 = vld [vmem:[#allocation2 + $0x120] sm:$0xff] }
  0x4a   :  { %4846 = vmatmul.mubr.msk.f32.gmra.mrb[8].mxu1 %vm110_vm1, %v95_v21  ;;  %669 = vmatprep.subr.bf16.mxu0 %v4375_v39  ;;  %v4379_v47 = vcombine.high %v565_v44, %v566_v45  ;;  %v567_v48 = vld [vmem:[#allocation2 + $0x140] sm:$0xff]  ;;  %v5764_v50 = vcombine.low %v565_v44, %v566_v45 }
  0x4b   :  { %4848 = vmatprep.mubr.msk.f32.mxu1 %vm110_vm1, %v96_v22  ;;  %4912 = vmatpush3.bf16.msra.mxu1 %v4909_v23  ;;  %v568_v49 = vld [vmem:[#allocation2 + $0x160] sm:$0xff] }
  0x4c   :  { %4945 = vmatprep.subr.bf16.mxu1 %v4371_v32  ;;  %v5766_v51 = vcombine.high %v567_v48, %v568_v49  ;;  %v5769_v52 = vcombine.low %v567_v48, %v568_v49  ;;  %v5776_v53 = vld [vmem:[%s6281_s2] ss:$0 sm:$0xff]  ;;  %v5565_v49 = vmov 0  }
  0x4d   :  { %670 = vmatpush1.bf16.msra.mxu0 %v4374_v42  ;;  %697 = vmatprep.mubr.bf16.mxu0 %v5565_v49 }
  0x4e   :  { %4849 = vmatmul.mubr.msk.f32.gmra.mrb[10].mxu1 %vm110_vm1, %v97_v24  ;;  %671 = vmatprep.subr.bf16.mxu0 %v4377_v43 }
  0x4f   :  { %4851 = vmatprep.mubr.msk.f32.mxu1 %vm110_vm1, %v98_v25 }
  0x51   :  { %672 = vmatpush1.bf16.msra.mxu0 %v4376_v46 }
  0x52   :  { %4852 = vmatmul.mubr.msk.f32.gmra.mrb[12].mxu1 %vm110_vm1, %v99_v26  ;;  %673 = vmatprep.subr.bf16.mxu0 %v4379_v47 }
  0x53   :  { %4854 = vmatprep.mubr.msk.f32.mxu1 %vm110_vm1, %v100_v27 }
  0x55   :  { %674 = vmatpush1.bf16.msra.mxu0 %v5764_v50 }
  0x56   :  { %4855 = vmatmul.mubr.msk.f32.gmra.mrb[14].mxu1 %vm110_vm1, %v101_v28  ;;  %675 = vmatprep.subr.bf16.mxu0 %v5766_v51 }
  0x59   :  { %676 = vmatpush1.bf16.msra.mxu0 %v5769_v52 }
 0x10d   :  { %v4835_v54 = vpop.f32.mrb[0].mxu1 }
 0x10e   :  { %v235_v55 = vadd.f32 %v4835_v54, %v5776_v53  ;;  %v229_v56 = vpop.f32.mrb[1].mxu1 }
 0x10f   :  { %v230_v57 = vadd.f32 %v5776_v53, %v229_v56 }
 0x110   :  { %v309_v60 = vmax.f32 %v235_v55, 0.0  ;;  %v5826_v55 = vld [vmem:[%s6283_s4] ss:$0 sm:$0xff] }
 0x111   :  { %v308_v58 = vmax.f32 %v230_v57, 0.0  ;;  %v4838_v59 = vpop.f32.mrb[2].mxu1 }
 0x112   :  { %v245_v61 = vadd.f32 %v4838_v59, %v5776_v53  ;;  %v239_v62 = vpop.f32.mrb[3].mxu1 }
 0x113   :  { %v240_v63 = vadd.f32 %v5776_v53, %v239_v62  ;;  %4873 = vmatprep.mubr.msk.f32.mxu1 %vm339_vm2, %v308_v58  ;;  %v1170_v62 = vld [vmem:[#allocation2 + $0x70] sm:$0xff] }
 0x114   :  { %4874 = vmatmul.mubr.msk.f32.vlgmr.msra.gmra.mrb[16].mxu1 %vm339_vm2, %v309_v60  ;;  %v311_v2 = vmax.f32 %v245_v61, 0.0  ;;  %v1169_v61 = vld [vmem:[#allocation2 + $0x50] sm:$0xff] }
 0x115   :  { %v310_v0 = vmax.f32 %v240_v63, 0.0  ;;  %v4841_v1 = vpop.f32.mrb[4].mxu1  ;;  %4953 = vmatpush1.bf16.msra.mxu1 %v4370_v33 }
 0x116   :  { %v255_v3 = vadd.f32 %v4841_v1, %v5776_v53  ;;  %v249_v4 = vpop.f32.mrb[5].mxu1  ;;  %4946 = vmatprep.subr.bf16.mxu1 %v4373_v35 }
 0x117   :  { %v250_v5 = vadd.f32 %v5776_v53, %v249_v4  ;;  %4876 = vmatprep.mubr.msk.f32.mxu1 %vm339_vm2, %v310_v0 }
 0x118   :  { %4877 = vmatmul.mubr.msk.f32.gmra.mrb[18].mxu1 %vm339_vm2, %v311_v2  ;;  %v313_v8 = vmax.f32 %v255_v3, 0.0 }
 0x119   :  { %v312_v6 = vmax.f32 %v250_v5, 0.0  ;;  %v4844_v7 = vpop.f32.mrb[6].mxu1  ;;  %4954 = vmatpush1.bf16.msra.mxu1 %v4372_v38  ;;  %v569_v38 = vld [vmem:[#allocation2 + $0x180] sm:$0xff]  ;;  %v4405_v5 = vcombine.high %v1169_v61, %v1170_v62 }
 0x11a   :  { %v265_v9 = vadd.f32 %v4844_v7, %v5776_v53  ;;  %v259_v10 = vpop.f32.mrb[7].mxu1  ;;  %4947 = vmatprep.subr.bf16.mxu1 %v4375_v39  ;;  %v570_v39 = vld [vmem:[#allocation2 + $0x1a0] sm:$0xff]  ;;  %v1171_v7 = vld [vmem:[#allocation2 + $0x90] sm:$0xff] }
 0x11b   :  { %v260_v11 = vadd.f32 %v5776_v53, %v259_v10  ;;  %4879 = vmatprep.mubr.msk.f32.mxu1 %vm339_vm2, %v312_v6  ;;  %v4383_v40 = vcombine.high %v569_v38, %v570_v39  ;;  %v4382_v41 = vcombine.low %v569_v38, %v570_v39  ;;  %v864_v39 = vld [vmem:[#allocation2 + $0x48] sm:$0xff] }
 0x11c   :  { %4880 = vmatmul.mubr.msk.f32.gmra.mrb[20].mxu1 %vm339_vm2, %v313_v8  ;;  %v315_v14 = vmax.f32 %v265_v9, 0.0  ;;  %v1172_v8 = vld [vmem:[#allocation2 + $0xb0] sm:$0xff] }
 0x11d   :  { %v314_v12 = vmax.f32 %v260_v11, 0.0  ;;  %v4847_v13 = vpop.f32.mrb[8].mxu1  ;;  %4955 = vmatpush1.bf16.msra.mxu1 %v4374_v42  ;;  %677 = vmatprep.subr.bf16.mxu0 %v4383_v40  ;;  %v571_v42 = vld [vmem:[#allocation2 + $0x1c0] sm:$0xff] }
 0x11e   :  { %v275_v15 = vadd.f32 %v4847_v13, %v5776_v53  ;;  %v269_v16 = vpop.f32.mrb[9].mxu1  ;;  %4948 = vmatprep.subr.bf16.mxu1 %v4377_v43  ;;  %678 = vmatpush1.bf16.msra.mxu0 %v4382_v41  ;;  %v572_v43 = vld [vmem:[#allocation2 + $0x1e0] sm:$0xff]  ;;  %v4404_v13 = vcombine.low %v1169_v61, %v1170_v62  ;;  %v1179_v61 = vld [vmem:[#allocation2 + $0x190] sm:$0xff] }
 0x11f   :  { %v270_v17 = vadd.f32 %v5776_v53, %v269_v16  ;;  %4882 = vmatprep.mubr.msk.f32.mxu1 %vm339_vm2, %v314_v12  ;;  %v4385_v44 = vcombine.high %v571_v42, %v572_v43  ;;  %v4384_v45 = vcombine.low %v571_v42, %v572_v43  ;;  %v4407_v16 = vcombine.high %v1171_v7, %v1172_v8  ;;  %v1177_v42 = vld [vmem:[#allocation2 + $0x150] sm:$0xff] }
 0x120   :  { %4883 = vmatmul.mubr.msk.f32.gmra.mrb[22].mxu1 %vm339_vm2, %v315_v14  ;;  %v317_v20 = vmax.f32 %v275_v15, 0.0  ;;  %v1178_v43 = vld [vmem:[#allocation2 + $0x170] sm:$0xff] }
 0x121   :  { %v316_v18 = vmax.f32 %v270_v17, 0.0  ;;  %v4850_v19 = vpop.f32.mrb[10].mxu1  ;;  %4956 = vmatpush1.bf16.msra.mxu1 %v4376_v46  ;;  %679 = vmatprep.subr.bf16.mxu0 %v4385_v44  ;;  %v1167_v46 = vld [vmem:[#allocation2 + $0x10] sm:$0xff] }
 0x122   :  { %v285_v21 = vadd.f32 %v4850_v19, %v5776_v53  ;;  %v279_v22 = vpop.f32.mrb[11].mxu1  ;;  %4949 = vmatprep.subr.bf16.mxu1 %v4379_v47  ;;  %680 = vmatpush1.bf16.msra.mxu0 %v4384_v45  ;;  %v1168_v47 = vld [vmem:[#allocation2 + $0x30] sm:$0xff] }
 0x123   :  { %v280_v23 = vadd.f32 %v5776_v53, %v279_v22  ;;  %4885 = vmatprep.mubr.msk.f32.mxu1 %vm339_vm2, %v316_v18  ;;  %v4403_v48 = vcombine.high %v1167_v46, %v1168_v47  ;;  %v1173_v18 = vld [vmem:[#allocation2 + $0xd0] sm:$0xff] }
 0x124   :  { %v319_v24 = vmax.f32 %v285_v21, 0.0  ;;  %4886 = vmatmul.mubr.msk.f32.gmra.mrb[24].mxu1 %vm339_vm2, %v317_v20  ;;  %v1174_v19 = vld [vmem:[#allocation2 + $0xf0] sm:$0xff] }
 0x125   :  { %v318_v25 = vmax.f32 %v280_v23, 0.0  ;;  %v4853_v26 = vpop.f32.mrb[12].mxu1  ;;  %4957 = vmatpush1.bf16.msra.mxu1 %v5764_v50  ;;  %v4402_v50 = vcombine.low %v1167_v46, %v1168_v47  ;;  %1275 = vmatprep.subr.bf16.mxu0 %v4403_v48  ;;  %v1180_v62 = vld [vmem:[#allocation2 + $0x1b0] sm:$0xff] }
 0x126   :  { %v295_v27 = vadd.f32 %v4853_v26, %v5776_v53  ;;  %v289_v28 = vpop.f32.mrb[13].mxu1  ;;  %4950 = vmatprep.subr.bf16.mxu1 %v5766_v51  ;;  %v5815_v51 = vld [vmem:[#allocation2 + $0x8] sm:$0xff] }
 0x127   :  { %4888 = vmatprep.mubr.msk.f32.mxu1 %vm339_vm2, %v318_v25  ;;  %v290_v29 = vadd.f32 %v5776_v53, %v289_v28 }
 0x128   :  { %4889 = vmatmul.mubr.msk.f32.gmra.mrb[26].mxu1 %vm339_vm2, %v319_v24  ;;  %v321_v30 = vmax.f32 %v295_v27, 0.0  ;;  %v4406_v24 = vcombine.low %v1171_v7, %v1172_v8  ;;  %v4409_v27 = vcombine.high %v1173_v18, %v1174_v19 }
 0x129   :  { %v320_v31 = vmax.f32 %v290_v29, 0.0  ;;  %v4856_v32 = vpop.f32.mrb[14].mxu1  ;;  %4958 = vmatpush1.bf16.msra.mxu1 %v5769_v52  ;;  %v5817_v52 = vld [vmem:[#allocation2 + $0x28] sm:$0xff]  ;;  %v1175_v29 = vld [vmem:[#allocation2 + $0x110] sm:$0xff] }
 0x12a   :  { %v305_v33 = vadd.f32 %v4856_v32, %v5776_v53  ;;  %v299_v34 = vpop.f32.mrb[15].mxu1  ;;  %4951 = vmatprep.subr.bf16.mxu1 %v4383_v40  ;;  %v4386_v54 = vcombine.low %v5815_v51, %v5817_v52 }
 0x12b   :  { %4891 = vmatprep.mubr.msk.f32.mxu1 %vm339_vm2, %v320_v31  ;;  %v300_v35 = vadd.f32 %v5776_v53, %v299_v34  ;;  %v4387_v53 = vcombine.high %v5815_v51, %v5817_v52  ;;  %v1181_v51 = vld [vmem:[#allocation2 + $0x1d0] sm:$0xff] }
 0x12c   :  { %4892 = vmatmul.mubr.msk.f32.gmra.mrb[28].mxu1 %vm339_vm2, %v321_v30  ;;  %v323_v36 = vmax.f32 %v305_v33, 0.0  ;;  %v1176_v30 = vld [vmem:[#allocation2 + $0x130] sm:$0xff] }
 0x12d   :  { %v322_v37 = vmax.f32 %v300_v35, 0.0  ;;  %4959 = vmatpush1.bf16.msra.mxu1 %v4382_v41  ;;  %v4408_v35 = vcombine.low %v1173_v18, %v1174_v19  ;;  %v4411_v38 = vcombine.high %v1175_v29, %v1176_v30  ;;  %v865_v41 = vld [vmem:[#allocation2 + $0x68] sm:$0xff]  ;;  %v4410_v48 = vcombine.low %v1175_v29, %v1176_v30  ;;  %v1182_v52 = vld [vmem:[#allocation2 + $0x1f0] sm:$0xff] }
 0x12e   :  { %4952 = vmatprep.subr.bf16.mxu1 %v4385_v44  ;;  %v4416_v29 = vcombine.low %v1181_v51, %v1182_v52 }
 0x12f   :  { %4894 = vmatprep.mubr.msk.f32.mxu1 %vm339_vm2, %v322_v37 }
 0x130   :  { %4895 = vmatmul.mubr.msk.f32.gmra.mrb[30].mxu1 %vm339_vm2, %v323_v36 }
 0x131   :  { %4960 = vmatpush1.bf16.msra.mxu1 %v4384_v45  ;;  %737 = vmatprep.mubr.bf16.mxu1 %v5565_v49 }
 0x132   :  { %970 = vmatprep.subr.bf16.mxu1 %v4387_v53 }
 0x1e7   :  { %v4875_v56 = vpop.f32.mrb[16].mxu1 }
 0x1e8   :  { %v460_v57 = vadd.f32 %v4875_v56, %v5826_v55  ;;  %v454_v58 = vpop.f32.mrb[17].mxu1  ;;  %v4389_v56 = vcombine.high %v864_v39, %v865_v41 }
 0x1e9   :  { %v455_v59 = vadd.f32 %v5826_v55, %v454_v58  ;;  %v866_v58 = vld [vmem:[#allocation2 + $0x88] sm:$0xff] }
 0x1ea   :  { %v534_v60 = vmax.f32 %v460_v57, 0.0  ;;  %v4413_v57 = vcombine.high %v1177_v42, %v1178_v43 }
 0x1eb   :  { %v533_v63 = vmax.f32 %v455_v59, 0.0  ;;  %v4878_v0 = vpop.f32.mrb[18].mxu1  ;;  %v867_v59 = vld [vmem:[#allocation2 + $0xa8] sm:$0xff] }
 0x1ec   :  { %v470_v1 = vadd.f32 %v4878_v0, %v5826_v55  ;;  %v464_v2 = vpop.f32.mrb[19].mxu1  ;;  %v4388_v0 = vcombine.low %v864_v39, %v865_v41  ;;  %v877_v41 = vld [vmem:[#allocation2 + $0x1e8] sm:$0xff] }
 0x1ed   :  { %v5831_v3 = vpack.c.bf16 %v534_v60, %v533_v63  ;;  %v465_v4 = vadd.f32 %v5826_v55, %v464_v2  ;;  %v4412_v2 = vcombine.low %v1177_v42, %v1178_v43 }
 0x1ee   :  { %v536_v6 = vmax.f32 %v470_v1, 0.0 }
 0x1ef   :  { %v535_v9 = vmax.f32 %v465_v4, 0.0  ;;  %v4881_v10 = vpop.f32.mrb[20].mxu1  ;;  %698 = vmatmul.mubr.bf16.vlgmr.msra.gmra.mrb[0].mxu0 %v5831_v3 }
 0x1f0   :  { %v480_v11 = vadd.f32 %v4881_v10, %v5826_v55  ;;  %v474_v12 = vpop.f32.mrb[21].mxu1  ;;  %1276 = vmatpush1.bf16.msra.mxu0 %v4402_v50  ;;  %707 = vmatprep.mubr.bf16.mxu0 %v5565_v49  ;;  %v868_v10 = vld [vmem:[#allocation2 + $0xc8] sm:$0xff] }
 0x1f1   :  { %v5837_v14 = vpack.c.bf16 %v536_v6, %v535_v9  ;;  %v475_v15 = vadd.f32 %v5826_v55, %v474_v12  ;;  %1277 = vmatprep.subr.bf16.mxu0 %v4405_v5  ;;  %v4391_v6 = vcombine.high %v866_v58, %v867_v59  ;;  %v4415_v9 = vcombine.high %v1179_v61, %v1180_v62 }
 0x1f2   :  { %v538_v17 = vmax.f32 %v480_v11, 0.0  ;;  %v869_v11 = vld [vmem:[#allocation2 + $0xe8] sm:$0xff] }
 0x1f3   :  { %v537_v20 = vmax.f32 %v475_v15, 0.0  ;;  %v4884_v21 = vpop.f32.mrb[22].mxu1 }
 0x1f4   :  { %v490_v22 = vadd.f32 %v4884_v21, %v5826_v55  ;;  %v484_v23 = vpop.f32.mrb[23].mxu1  ;;  %1278 = vmatpush1.bf16.msra.mxu0 %v4404_v13  ;;  %v4390_v13 = vcombine.low %v866_v58, %v867_v59  ;;  %v4417_v21 = vcombine.high %v1181_v51, %v1182_v52  ;;  %v1476_v58 = vld [vmem:[#allocation2 + $0x98] sm:$0xff] }
 0x1f5   :  { %v5841_v25 = vpack.c.bf16 %v538_v17, %v537_v20  ;;  %v485_v26 = vadd.f32 %v5826_v55, %v484_v23  ;;  %1279 = vmatprep.subr.bf16.mxu0 %v4407_v16  ;;  %v4414_v16 = vcombine.low %v1179_v61, %v1180_v62  ;;  %v4393_v17 = vcombine.high %v868_v10, %v869_v11  ;;  %v1477_v59 = vld [vmem:[#allocation2 + $0xb8] sm:$0xff] }
 0x1f6   :  { %v540_v28 = vmax.f32 %v490_v22, 0.0  ;;  %v4423_v61 = vcombine.high %v1476_v58, %v1477_v59  ;;  %v1478_v62 = vld [vmem:[#allocation2 + $0xd8] sm:$0xff] }
 0x1f7   :  { %v539_v31 = vmax.f32 %v485_v26, 0.0  ;;  %v4887_v32 = vpop.f32.mrb[24].mxu1  ;;  %708 = vmatmul.mubr.bf16.gmra.mrb[4].mxu0 %v5837_v14  ;;  %v871_v26 = vld [vmem:[#allocation2 + $0x128] sm:$0xff]  ;;  %v1485_v51 = vld [vmem:[#allocation2 + $0x1b8] sm:$0xff] }
 0x1f8   :  { %v500_v33 = vadd.f32 %v4887_v32, %v5826_v55  ;;  %v494_v34 = vpop.f32.mrb[25].mxu1  ;;  %1280 = vmatpush1.bf16.msra.mxu0 %v4406_v24  ;;  %717 = vmatprep.mubr.bf16.mxu0 %v5565_v49  ;;  %v870_v24 = vld [vmem:[#allocation2 + $0x108] sm:$0xff] }
 0x1f9   :  { %v5847_v36 = vpack.c.bf16 %v540_v28, %v539_v31  ;;  %v495_v37 = vadd.f32 %v5826_v55, %v494_v34  ;;  %1281 = vmatprep.subr.bf16.mxu0 %v4409_v27  ;;  %v4392_v28 = vcombine.low %v868_v10, %v869_v11  ;;  %v4395_v31 = vcombine.high %v870_v24, %v871_v26  ;;  %v873_v32 = vld [vmem:[#allocation2 + $0x168] sm:$0xff] }
 0x1fa   :  { %v542_v40 = vmax.f32 %v500_v33, 0.0  ;;  %v4394_v33 = vcombine.low %v870_v24, %v871_v26  ;;  %v5012_v24 = vld [vmem:[#allocation4 + $0x20] ss:$16 sps:$4 sm:$0xff]   ;;  %v5020_v26 = vld [vmem:[#allocation4 + $0x44] ss:$16 sps:$4 sm:$0xff]  }
 0x1fb   :  { %v541_v44 = vmax.f32 %v495_v37, 0.0  ;;  %v4890_v45 = vpop.f32.mrb[26].mxu1  ;;  %v875_v37 = vld [vmem:[#allocation2 + $0x1a8] sm:$0xff] }
 0x1fc   :  { %v510_v46 = vadd.f32 %v4890_v45, %v5826_v55  ;;  %1282 = vmatpush1.bf16.msra.mxu0 %v4408_v35  ;;  %v504_v47 = vpop.f32.mrb[27].mxu1  ;;  %v874_v35 = vld [vmem:[#allocation2 + $0x188] sm:$0xff]  ;;  %v1473_v45 = vld [vmem:[#allocation2 + $0x38] sm:$0xff] }
 0x1fd   :  { %v5851_v50 = vpack.c.bf16 %v542_v40, %v541_v44  ;;  %v505_v53 = vadd.f32 %v5826_v55, %v504_v47  ;;  %1283 = vmatprep.subr.bf16.mxu0 %v4411_v38  ;;  %v4399_v39 = vcombine.high %v874_v35, %v875_v37  ;;  %v876_v40 = vld [vmem:[#allocation2 + $0x1c8] sm:$0xff]  ;;  %v4398_v42 = vcombine.low %v874_v35, %v875_v37  ;;  %v1472_v44 = vld [vmem:[#allocation2 + $0x18] sm:$0xff]  ;;  %v5042_v35 = vld [vmem:[#allocation4 + $0xc0] ss:$16 sps:$4 sm:$0xff]  }
 0x1fe   :  { %v544_v60 = vmax.f32 %v510_v46, 0.0  ;;  %v4401_v43 = vcombine.high %v876_v40, %v877_v41  ;;  %v4400_v46 = vcombine.low %v876_v40, %v877_v41  ;;  %v4419_v47 = vcombine.high %v1472_v44, %v1473_v45  ;;  %v5009_v37 = vld [vmem:[#allocation4 + $0x8] ss:$16 sps:$4 sm:$0xff]   ;;  %v5048_v40 = vld [vmem:[#allocation4 + $0xe0] ss:$16 sps:$4 sm:$0xff]  }
 0x1ff   :  { %v543_v63 = vmax.f32 %v505_v53, 0.0  ;;  %718 = vmatmul.mubr.bf16.gmra.mrb[8].mxu0 %v5841_v25  ;;  %738 = vmatmul.mubr.bf16.vlgmr.msra.gmra.mrb[32].mxu1 %v5851_v50  ;;  %v4893_v1 = vpop.f32.mrb[28].mxu1  ;;  %v1475_v53 = vld [vmem:[#allocation2 + $0x78] sm:$0xff] }
 0x200   :  { %971 = vmatpush1.bf16.msra.mxu1 %v4386_v54  ;;  %1284 = vmatpush1.bf16.msra.mxu0 %v4410_v48  ;;  %v520_v4 = vadd.f32 %v4893_v1, %v5826_v55  ;;  %v514_v5 = vpop.f32.mrb[29].mxu1  ;;  %v1474_v48 = vld [vmem:[#allocation2 + $0x58] sm:$0xff] }
 0x201   :  { %v5860_v7 = vpack.c.bf16 %v544_v60, %v543_v63  ;;  %972 = vmatprep.subr.bf16.mxu1 %v4389_v56  ;;  %1285 = vmatprep.subr.bf16.mxu0 %v4413_v57  ;;  %v515_v8 = vadd.f32 %v5826_v55, %v514_v5  ;;  %v4418_v56 = vcombine.low %v1472_v44, %v1473_v45  ;;  %v1479_v63 = vld [vmem:[#allocation2 + $0xf8] sm:$0xff]  ;;  %v5054_v44 = vld [vmem:[#allocation4 + $0x100] ss:$16 sps:$4 sm:$0xff]  }
 0x202   :  { %v546_v12 = vmax.f32 %v520_v4, 0.0  ;;  %727 = vmatprep.mubr.bf16.mxu0 %v5565_v49  ;;  %747 = vmatprep.mubr.bf16.mxu1 %v5565_v49  ;;  %v4421_v57 = vcombine.high %v1474_v48, %v1475_v53  ;;  %v4420_v60 = vcombine.low %v1474_v48, %v1475_v53  ;;  %v4425_v1 = vcombine.high %v1478_v62, %v1479_v63  ;;  %v1481_v4 = vld [vmem:[#allocation2 + $0x138] sm:$0xff]  ;;  %v5060_v48 = vld [vmem:[#allocation4 + $0x120] ss:$16 sps:$4 sm:$0xff]  }
 0x203   :  { %v545_v54 = vmax.f32 %v515_v8, 0.0  ;;  %v4896_v15 = vpop.f32.mrb[30].mxu1  ;;  %v4424_v5 = vcombine.low %v1478_v62, %v1479_v63  ;;  %v1482_v8 = vld [vmem:[#allocation2 + $0x158] sm:$0xff]  ;;  %v5080_v63 = vld [vmem:[#allocation4 + $0x184] ss:$16 sps:$4 sm:$0xff]  }
 0x204   :  { %973 = vmatpush1.bf16.msra.mxu1 %v4388_v0  ;;  %1286 = vmatpush1.bf16.msra.mxu0 %v4412_v2  ;;  %v530_v18 = vadd.f32 %v4896_v15, %v5826_v55  ;;  %v524_v19 = vpop.f32.mrb[31].mxu1  ;;  %v4422_v0 = vcombine.low %v1476_v58, %v1477_v59  ;;  %v1480_v2 = vld [vmem:[#allocation2 + $0x118] sm:$0xff]  ;;  %v5066_v58 = vld [vmem:[#allocation4 + $0x140] ss:$16 sps:$4 sm:$0xff]  }
 0x205   :  { %v5866_v20 = vpack.c.bf16 %v546_v12, %v545_v54  ;;  %974 = vmatprep.subr.bf16.mxu1 %v4391_v6  ;;  %1287 = vmatprep.subr.bf16.mxu0 %v4415_v9  ;;  %v525_v22 = vadd.f32 %v5826_v55, %v524_v19  ;;  %v872_v55 = vld [vmem:[#allocation2 + $0x148] sm:$0xff]  ;;  %v4427_v6 = vcombine.high %v1480_v2, %v1481_v4  ;;  %v1483_v9 = vld [vmem:[#allocation2 + $0x178] sm:$0xff]  ;;  %v5008_v19 = vld [vmem:[#allocation4 + $0x4] ss:$16 sps:$4 sm:$0xff]  }
 0x206   :  { %v548_v23 = vmax.f32 %v530_v18, 0.0  ;;  %v4397_v34 = vcombine.high %v872_v55, %v873_v32  ;;  %v4396_v38 = vcombine.low %v872_v55, %v873_v32  ;;  %v4426_v10 = vcombine.low %v1480_v2, %v1481_v4  ;;  %v1484_v12 = vld [vmem:[#allocation2 + $0x198] sm:$0xff]  ;;  %v5030_v55 = vld [vmem:[#allocation4 + $0x80] ss:$16 sps:$4 sm:$0xff]   ;;  %v5038_v32 = vld [vmem:[#allocation4 + $0xa4] ss:$16 sps:$4 sm:$0xff]  }
 0x207   :  { %728 = vmatmul.mubr.bf16.gmra.mrb[12].mxu0 %v5847_v36  ;;  %748 = vmatmul.mubr.bf16.gmra.mrb[36].mxu1 %v5860_v7  ;;  %v547_v27 = vmax.f32 %v525_v22, 0.0  ;;  %v4429_v11 = vcombine.high %v1482_v8, %v1483_v9  ;;  %v4428_v52 = vcombine.low %v1482_v8, %v1483_v9  ;;  %v4431_v54 = vcombine.high %v1484_v12, %v1485_v51  ;;  %v1487_v15 = vld [vmem:[#allocation2 + $0x1f8] sm:$0xff]  ;;  %v5006_v22 = vld [vmem:[#allocation4] ss:$16 sps:$4 sm:$0xff]   ;;  %v5092_v8 = vld [vmem:[#allocation4 + $0x1c4] ss:$16 sps:$4 sm:$0xff]  }
 0x208   :  { %975 = vmatpush1.bf16.msra.mxu1 %v4390_v13  ;;  %1288 = vmatpush1.bf16.msra.mxu0 %v4414_v16  ;;  %v1486_v13 = vld [vmem:[#allocation2 + $0x1d8] sm:$0xff]  ;;  %v4430_v16 = vcombine.low %v1484_v12, %v1485_v51  ;;  %v5096_v51 = vld [vmem:[#allocation4 + $0x1e0] ss:$16 sps:$4 sm:$0xff]  }
 0x209   :  { %976 = vmatprep.subr.bf16.mxu1 %v4393_v17  ;;  %1289 = vmatprep.subr.bf16.mxu0 %v4417_v21  ;;  %v5871_v30 = vpack.c.bf16 %v548_v23, %v547_v27  ;;  %v4433_v17 = vcombine.high %v1486_v13, %v1487_v15  ;;  %v4432_v18 = vcombine.low %v1486_v13, %v1487_v15  ;;  %v5011_v21 = vld [vmem:[#allocation4 + $0xc] ss:$16 sps:$4 sm:$0xff]   ;;  %v5014_v23 = vld [vmem:[#allocation4 + $0x24] ss:$16 sps:$4 sm:$0xff]   ;;  %v5018_v27 = vld [vmem:[#allocation4 + $0x40] ss:$16 sps:$4 sm:$0xff]  }
 0x20a   :  { %757 = vmatprep.mubr.bf16.mxu1 %v5565_v49  ;;  %1307 = vmatprep.mubr.bf16.mxu0 %v5565_v49  ;;  %v5015_v41 = vld [vmem:[#allocation4 + $0x28] ss:$16 sps:$4 sm:$0xff]   ;;  %v5035_v53 = vld [vmem:[#allocation4 + $0x8c] ss:$16 sps:$4 sm:$0xff]   ;;  %v5104_v13 = vld [vmem:[#allocation4 + $0x204] ss:$16 sps:$4 sm:$0xff]  }
 0x20b   :  { %v5021_v45 = vld [vmem:[#allocation4 + $0x48] ss:$16 sps:$4 sm:$0xff]   ;;  %v5041_v59 = vld [vmem:[#allocation4 + $0xac] ss:$16 sps:$4 sm:$0xff]  }
 0x20c   :  { %977 = vmatpush1.bf16.msra.mxu1 %v4392_v28  ;;  %1290 = vmatpush1.bf16.msra.mxu0 %v4416_v29  ;;  %v5026_v28 = vld [vmem:[#allocation4 + $0x64] ss:$16 sps:$4 sm:$0xff]   ;;  %v5024_v29 = vld [vmem:[#allocation4 + $0x60] ss:$16 sps:$4 sm:$0xff]   ;;  %v5047_v62 = vld [vmem:[#allocation4 + $0xcc] ss:$16 sps:$4 sm:$0xff]  }
 0x20d   :  { %978 = vmatprep.subr.bf16.mxu1 %v4395_v31  ;;  %3376 = vmatprep.subr.bf16.mxu0 %v5008_v19  ;;  %v5032_v31 = vld [vmem:[#allocation4 + $0x84] ss:$16 sps:$4 sm:$0xff]   ;;  %v5053_v2 = vld [vmem:[#allocation4 + $0xec] ss:$16 sps:$4 sm:$0xff]   ;;  %v5051_v4 = vld [vmem:[#allocation4 + $0xe8] ss:$16 sps:$4 sm:$0xff]  }
 0x20e   :  { %v5057_v9 = vld [vmem:[#allocation4 + $0x108] ss:$16 sps:$4 sm:$0xff]   ;;  %v5077_v15 = vld [vmem:[#allocation4 + $0x16c] ss:$16 sps:$4 sm:$0xff]  }
 0x20f   :  { %758 = vmatmul.mubr.bf16.gmra.mrb[40].mxu1 %v5866_v20  ;;  %1308 = vmatmul.mubr.bf16.vlgmr.msra.gmra.mrb[16].mxu0 %v5831_v3  ;;  %v5063_v12 = vld [vmem:[#allocation4 + $0x128] ss:$16 sps:$4 sm:$0xff]  }
 0x210   :  { %979 = vmatpush1.bf16.msra.mxu1 %v4394_v33  ;;  %767 = vmatprep.mubr.bf16.mxu1 %v5565_v49  ;;  %v5036_v33 = vld [vmem:[#allocation4 + $0xa0] ss:$16 sps:$4 sm:$0xff]   ;;  %v5087_v19 = vld [vmem:[#allocation4 + $0x1a8] ss:$16 sps:$4 sm:$0xff]  }
 0x211   :  { %980 = vmatprep.subr.bf16.mxu1 %v4397_v34  ;;  %1317 = vmatprep.mubr.bf16.mxu0 %v5565_v49  ;;  %v5044_v34 = vld [vmem:[#allocation4 + $0xc4] ss:$16 sps:$4 sm:$0xff]  }
 0x212   :  { %3377 = vmatpush1.bf16.msra.mxu0 %v5006_v22  ;;  %v5101_v22 = vld [vmem:[#allocation4 + $0x1ec] ss:$16 sps:$4 sm:$0xff]  }
 0x213   :  { %3378 = vmatprep.subr.bf16.mxu0 %v5014_v23  ;;  %v5099_v23 = vld [vmem:[#allocation4 + $0x1e8] ss:$16 sps:$4 sm:$0xff]  }
 0x214   :  { %981 = vmatpush1.bf16.msra.mxu1 %v4396_v38  ;;  %v5017_v38 = vld [vmem:[#allocation4 + $0x2c] ss:$16 sps:$4 sm:$0xff]  }
 0x215   :  { %982 = vmatprep.subr.bf16.mxu1 %v4399_v39  ;;  %v5050_v39 = vld [vmem:[#allocation4 + $0xe4] ss:$16 sps:$4 sm:$0xff]  }
 0x216   :  { %3379 = vmatpush1.bf16.msra.mxu0 %v5012_v24  ;;  %v5107_v24 = vld [vmem:[#allocation4 + $0x20c] ss:$16 sps:$4 sm:$0xff]  }
 0x217   :  { %768 = vmatmul.mubr.bf16.gmra.mrb[44].mxu1 %v5871_v30  ;;  %1318 = vmatmul.mubr.bf16.gmra.mrb[20].mxu0 %v5837_v14 }
 0x218   :  { %983 = vmatpush1.bf16.msra.mxu1 %v4398_v42  ;;  %1002 = vmatprep.mubr.bf16.mxu1 %v5565_v49  ;;  %v5023_v42 = vld [vmem:[#allocation4 + $0x4c] ss:$16 sps:$4 sm:$0xff]  }
 0x219   :  { %984 = vmatprep.subr.bf16.mxu1 %v4401_v43  ;;  %1327 = vmatprep.mubr.bf16.mxu0 %v5565_v49  ;;  %v5056_v43 = vld [vmem:[#allocation4 + $0x104] ss:$16 sps:$4 sm:$0xff]  }
 0x21a   :  { %3380 = vmatprep.subr.bf16.mxu0 %v5020_v26  ;;  %v575_v26 = vlaneseq }
 0x21b   :  { %3381 = vmatpush1.bf16.msra.mxu0 %v5018_v27  ;;  %v573_v27 = vld [vmem:[%s6285_s6] sm:$0x3] }
 0x21c   :  { %985 = vmatpush1.bf16.msra.mxu1 %v4400_v46  ;;  %3382 = vmatprep.subr.bf16.mxu0 %v5026_v28  ;;  %v5029_v46 = vld [vmem:[#allocation4 + $0x6c] ss:$16 sps:$4 sm:$0xff]  }
 0x21d   :  { %1580 = vmatprep.subr.bf16.mxu1 %v4419_v47  ;;  %v5062_v47 = vld [vmem:[#allocation4 + $0x124] ss:$16 sps:$4 sm:$0xff]  }
 0x21f   :  { %1003 = vmatmul.mubr.bf16.vlgmr.msra.gmra.mrb[48].mxu1 %v5831_v3  ;;  %1328 = vmatmul.mubr.bf16.gmra.mrb[24].mxu0 %v5841_v25 }
 0x220   :  { %1012 = vmatprep.mubr.bf16.mxu1 %v5565_v49  ;;  %1337 = vmatprep.mubr.bf16.mxu0 %v5565_v49 }
 0x221   :  { %1581 = vmatpush1.bf16.msra.mxu1 %v4418_v56  ;;  %3383 = vmatpush1.bf16.msra.mxu0 %v5024_v29  ;;  %v5068_v56 = vld [vmem:[#allocation4 + $0x144] ss:$16 sps:$4 sm:$0xff]  }
 0x222   :  { %1582 = vmatprep.subr.bf16.mxu1 %v4421_v57  ;;  %3384 = vmatprep.subr.bf16.mxu0 %v5032_v31  ;;  %v5033_v57 = vld [vmem:[#allocation4 + $0x88] ss:$16 sps:$4 sm:$0xff]  }
 0x225   :  { %1583 = vmatpush1.bf16.msra.mxu1 %v4420_v60  ;;  %3385 = vmatpush1.bf16.msra.mxu0 %v5030_v55  ;;  %v5039_v60 = vld [vmem:[#allocation4 + $0xa8] ss:$16 sps:$4 sm:$0xff]  }
 0x226   :  { %1584 = vmatprep.subr.bf16.mxu1 %v4423_v61  ;;  %3386 = vmatprep.subr.bf16.mxu0 %v5038_v32  ;;  %v5072_v61 = vld [vmem:[#allocation4 + $0x160] ss:$16 sps:$4 sm:$0xff]  }
 0x227   :  { %1013 = vmatmul.mubr.bf16.gmra.mrb[52].mxu1 %v5837_v14  ;;  %1338 = vmatmul.mubr.bf16.gmra.mrb[28].mxu0 %v5847_v36 }
 0x228   :  { %1022 = vmatprep.mubr.bf16.mxu1 %v5565_v49  ;;  %1347 = vmatprep.mubr.bf16.mxu0 %v5565_v49 }
 0x229   :  { %1585 = vmatpush1.bf16.msra.mxu1 %v4422_v0  ;;  %3387 = vmatpush1.bf16.msra.mxu0 %v5036_v33  ;;  %v5045_v0 = vld [vmem:[#allocation4 + $0xc8] ss:$16 sps:$4 sm:$0xff]  }
 0x22a   :  { %1586 = vmatprep.subr.bf16.mxu1 %v4425_v1  ;;  %3388 = vmatprep.subr.bf16.mxu0 %v5044_v34  ;;  %v5078_v1 = vld [vmem:[#allocation4 + $0x180] ss:$16 sps:$4 sm:$0xff]  }
 0x22d   :  { %1587 = vmatpush1.bf16.msra.mxu1 %v4424_v5  ;;  %3389 = vmatpush1.bf16.msra.mxu0 %v5042_v35  ;;  %v5084_v5 = vld [vmem:[#allocation4 + $0x1a0] ss:$16 sps:$4 sm:$0xff]  }
 0x22e   :  { %1588 = vmatprep.subr.bf16.mxu1 %v4427_v6  ;;  %3390 = vmatprep.subr.bf16.mxu0 %v5050_v39  ;;  %v5059_v6 = vld [vmem:[#allocation4 + $0x10c] ss:$16 sps:$4 sm:$0xff]  }
 0x22f   :  { %1023 = vmatmul.mubr.bf16.gmra.mrb[56].mxu1 %v5841_v25  ;;  %1348 = vmatmul.mubr.bf16.gmra.mrb[32].mxu0 %v5851_v50 }
 0x230   :  { %1032 = vmatprep.mubr.bf16.mxu1 %v5565_v49  ;;  %1357 = vmatprep.mubr.bf16.mxu0 %v5565_v49 }
 0x231   :  { %1589 = vmatpush1.bf16.msra.mxu1 %v4426_v10  ;;  %3391 = vmatpush1.bf16.msra.mxu0 %v5048_v40  ;;  %v5090_v10 = vld [vmem:[#allocation4 + $0x1c0] ss:$16 sps:$4 sm:$0xff]  }
 0x232   :  { %1590 = vmatprep.subr.bf16.mxu1 %v4429_v11  ;;  %3392 = vmatprep.subr.bf16.mxu0 %v5056_v43  ;;  %v5065_v11 = vld [vmem:[#allocation4 + $0x12c] ss:$16 sps:$4 sm:$0xff]  }
 0x235   :  { %1591 = vmatpush1.bf16.msra.mxu1 %v4428_v52  ;;  %3393 = vmatpush1.bf16.msra.mxu0 %v5054_v44  ;;  %v5071_v52 = vld [vmem:[#allocation4 + $0x14c] ss:$16 sps:$4 sm:$0xff]  }
 0x236   :  { %1592 = vmatprep.subr.bf16.mxu1 %v4431_v54  ;;  %3394 = vmatprep.subr.bf16.mxu0 %v5062_v47  ;;  %v5069_v54 = vld [vmem:[#allocation4 + $0x148] ss:$16 sps:$4 sm:$0xff]  }
 0x237   :  { %1033 = vmatmul.mubr.bf16.gmra.mrb[60].mxu1 %v5847_v36  ;;  %1358 = vmatmul.mubr.bf16.gmra.mrb[36].mxu0 %v5860_v7 }
 0x238   :  { %1042 = vmatprep.mubr.bf16.mxu1 %v5565_v49  ;;  %1367 = vmatprep.mubr.bf16.mxu0 %v5565_v49 }
 0x239   :  { %1593 = vmatpush1.bf16.msra.mxu1 %v4430_v16  ;;  %3395 = vmatpush1.bf16.msra.mxu0 %v5060_v48  ;;  %v5083_v16 = vld [vmem:[#allocation4 + $0x18c] ss:$16 sps:$4 sm:$0xff]  }
 0x23a   :  { %1594 = vmatprep.subr.bf16.mxu1 %v4433_v17  ;;  %3396 = vmatprep.subr.bf16.mxu0 %v5068_v56  ;;  %v5081_v17 = vld [vmem:[#allocation4 + $0x188] ss:$16 sps:$4 sm:$0xff]  }
 0x23d   :  { %1595 = vmatpush1.bf16.msra.mxu1 %v4432_v18  ;;  %3397 = vmatpush1.bf16.msra.mxu0 %v5066_v58  ;;  %v5089_v18 = vld [vmem:[#allocation4 + $0x1ac] ss:$16 sps:$4 sm:$0xff]  }
 0x23e   :  { %3540 = vmatprep.subr.bf16.mxu1 %v5011_v21  ;;  %v5095_v21 = vld [vmem:[#allocation4 + $0x1cc] ss:$16 sps:$4 sm:$0xff]  }
 0x23f   :  { %1043 = vmatmul.mubr.bf16.gmra.mrb[64].mxu1 %v5851_v50  ;;  %1368 = vmatmul.mubr.bf16.gmra.mrb[40].mxu0 %v5866_v20 }
 0x240   :  { %1052 = vmatprep.mubr.bf16.mxu1 %v5565_v49  ;;  %1377 = vmatprep.mubr.bf16.mxu0 %v5565_v49 }
 0x247   :  { %1053 = vmatmul.mubr.bf16.gmra.mrb[68].mxu1 %v5860_v7  ;;  %1378 = vmatmul.mubr.bf16.gmra.mrb[44].mxu0 %v5871_v30 }
 0x248   :  { %1062 = vmatprep.mubr.bf16.mxu1 %v5565_v49 }
 0x24f   :  { %1063 = vmatmul.mubr.bf16.gmra.mrb[72].mxu1 %v5866_v20 }
 0x250   :  { %1072 = vmatprep.mubr.bf16.mxu1 %v5565_v49 }
 0x257   :  { %1073 = vmatmul.mubr.bf16.gmra.mrb[76].mxu1 %v5871_v30 }
 0x258   :  { %1612 = vmatprep.mubr.bf16.mxu1 %v5565_v49 }
 0x25f   :  { %1613 = vmatmul.mubr.bf16.vlgmr.msra.gmra.mrb[80].mxu1 %v5831_v3  ;;  %v5027_v3 = vld [vmem:[#allocation4 + $0x68] ss:$16 sps:$4 sm:$0xff]  }
 0x260   :  { %1622 = vmatprep.mubr.bf16.mxu1 %v5565_v49  ;;  %3541 = vmatpush1.bf16.msra.mxu1 %v5009_v37 }
 0x261   :  { %3542 = vmatprep.subr.bf16.mxu1 %v5017_v38 }
 0x264   :  { %3543 = vmatpush1.bf16.msra.mxu1 %v5015_v41 }
 0x265   :  { %3544 = vmatprep.subr.bf16.mxu1 %v5023_v42 }
 0x267   :  { %1623 = vmatmul.mubr.bf16.gmra.mrb[84].mxu1 %v5837_v14  ;;  %v5074_v14 = vld [vmem:[#allocation4 + $0x164] ss:$16 sps:$4 sm:$0xff]  }
 0x268   :  { %1632 = vmatprep.mubr.bf16.mxu1 %v5565_v49  ;;  %3545 = vmatpush1.bf16.msra.mxu1 %v5021_v45 }
 0x269   :  { %3546 = vmatprep.subr.bf16.mxu1 %v5029_v46  ;;  %3398 = vmatprep.subr.bf16.mxu0 %v5074_v14 }
 0x26a   :  { %3399 = vmatpush1.bf16.msra.mxu0 %v5072_v61 }
 0x26b   :  { %3400 = vmatprep.subr.bf16.mxu0 %v5080_v63 }
 0x26c   :  { %3547 = vmatpush1.bf16.msra.mxu1 %v5027_v3 }
 0x26d   :  { %3548 = vmatprep.subr.bf16.mxu1 %v5035_v53 }
 0x26e   :  { %3401 = vmatpush1.bf16.msra.mxu0 %v5078_v1 }
 0x26f   :  { %1633 = vmatmul.mubr.bf16.gmra.mrb[88].mxu1 %v5841_v25  ;;  %v5086_v25 = vld [vmem:[#allocation4 + $0x1a4] ss:$16 sps:$4 sm:$0xff]  }
 0x270   :  { %1642 = vmatprep.mubr.bf16.mxu1 %v5565_v49  ;;  %3549 = vmatpush1.bf16.msra.mxu1 %v5033_v57 }
 0x271   :  { %3550 = vmatprep.subr.bf16.mxu1 %v5041_v59  ;;  %3402 = vmatprep.subr.bf16.mxu0 %v5086_v25 }
 0x272   :  { %3403 = vmatpush1.bf16.msra.mxu0 %v5084_v5 }
 0x273   :  { %3404 = vmatprep.subr.bf16.mxu0 %v5092_v8 }
 0x274   :  { %3551 = vmatpush1.bf16.msra.mxu1 %v5039_v60 }
 0x275   :  { %3552 = vmatprep.subr.bf16.mxu1 %v5047_v62 }
 0x276   :  { %3405 = vmatpush1.bf16.msra.mxu0 %v5090_v10 }
 0x277   :  { %1643 = vmatmul.mubr.bf16.gmra.mrb[92].mxu1 %v5847_v36  ;;  %v5098_v36 = vld [vmem:[#allocation4 + $0x1e4] ss:$16 sps:$4 sm:$0xff]  }
 0x278   :  { %1652 = vmatprep.mubr.bf16.mxu1 %v5565_v49  ;;  %3553 = vmatpush1.bf16.msra.mxu1 %v5045_v0 }
 0x279   :  { %3554 = vmatprep.subr.bf16.mxu1 %v5053_v2  ;;  %3406 = vmatprep.subr.bf16.mxu0 %v5098_v36 }
 0x27a   :  { %3407 = vmatpush1.bf16.msra.mxu0 %v5096_v51 }
 0x27b   :  { %3417 = vmatprep.subr.bf16.mxu0 %v5104_v13 }
 0x27c   :  { %3555 = vmatpush1.bf16.msra.mxu1 %v5051_v4 }
 0x27d   :  { %3556 = vmatprep.subr.bf16.mxu1 %v5059_v6 }
 0x27f   :  { %1653 = vmatmul.mubr.bf16.gmra.mrb[96].mxu1 %v5851_v50  ;;  %v5075_v50 = vld [vmem:[#allocation4 + $0x168] ss:$16 sps:$4 sm:$0xff]  }
 0x280   :  { %1662 = vmatprep.mubr.bf16.mxu1 %v5565_v49  ;;  %3557 = vmatpush1.bf16.msra.mxu1 %v5057_v9 }
 0x281   :  { %3558 = vmatprep.subr.bf16.mxu1 %v5065_v11 }
 0x284   :  { %3559 = vmatpush1.bf16.msra.mxu1 %v5063_v12 }
 0x285   :  { %3560 = vmatprep.subr.bf16.mxu1 %v5071_v52 }
 0x287   :  { %1663 = vmatmul.mubr.bf16.gmra.mrb[100].mxu1 %v5860_v7  ;;  %v5093_v7 = vld [vmem:[#allocation4 + $0x1c8] ss:$16 sps:$4 sm:$0xff]  }
 0x288   :  { %1672 = vmatprep.mubr.bf16.mxu1 %v5565_v49  ;;  %3561 = vmatpush1.bf16.msra.mxu1 %v5069_v54 }
 0x289   :  { %3562 = vmatprep.subr.bf16.mxu1 %v5077_v15 }
 0x28c   :  { %3563 = vmatpush1.bf16.msra.mxu1 %v5075_v50 }
 0x28d   :  { %3564 = vmatprep.subr.bf16.mxu1 %v5083_v16 }
 0x28f   :  { %1673 = vmatmul.mubr.bf16.gmra.mrb[104].mxu1 %v5866_v20  ;;  %v5925_v20 = vshrl.u32 %v575_v26, 7 }
 0x290   :  { %1682 = vmatprep.mubr.bf16.mxu1 %v5565_v49  ;;  %3565 = vmatpush1.bf16.msra.mxu1 %v5081_v17 }
 0x291   :  { %3566 = vmatprep.subr.bf16.mxu1 %v5089_v18  ;;  %v5928_v49 = vsub.s32 0, %v5925_v20  ;;  %v5934_v28 = vsub.s32 1, %v5925_v20 }
 0x293   :  { %v5940_v29 = vrot.slane %v573_v27, %v5934_v28 }
 0x294   :  { %3567 = vmatpush1.bf16.msra.mxu1 %v5087_v19 }
 0x295   :  { %3568 = vmatprep.subr.bf16.mxu1 %v5095_v21 }
 0x297   :  { %1683 = vmatmul.mubr.bf16.gmra.mrb[108].mxu1 %v5871_v30  ;;  %v5937_v30 = vrot.slane %v573_v27, %v5928_v49  ;;  %v1183_v27 = vld [vmem:[%s6285_s6 + $0x4] sm:$0x3] }
 0x298   :  { %3569 = vmatpush1.bf16.msra.mxu1 %v5093_v7 }
 0x299   :  { %3570 = vmatprep.subr.bf16.mxu1 %v5101_v22 }
 0x29c   :  { %3571 = vmatpush1.bf16.msra.mxu1 %v5099_v23 }
 0x29d   :  { %3581 = vmatprep.subr.bf16.mxu1 %v5107_v24 }
 0x2c2   :  { %v699_v31 = vpop.f32.mrb[0].mxu0 }
 0x2c3   :  { %v700_v55 = vadd.f32 %v699_v31, %v5937_v30  ;;  %v701_v32 = vpop.f32.mrb[1].mxu0 }
 0x2c4   :  { %v702_v33 = vadd.f32 %v701_v32, %v5940_v29  ;;  %v703_v34 = vpop.f32.mrb[2].mxu0 }
 0x2c5   :  { %v704_v35 = vadd.f32 %v703_v34, %v5937_v30  ;;  %v705_v37 = vpop.f32.mrb[3].mxu0  ;;  %v778_v39 = vmax.f32 %v700_v55, 0.0 }
 0x2c6   :  { %v706_v38 = vadd.f32 %v705_v37, %v5940_v29  ;;  %v779_v41 = vmax.f32 %v702_v33, 0.0 }
 0x2c7   :  { %v780_v40 = vmax.f32 %v704_v35, 0.0 }
 0x2c8   :  { %v781_v42 = vmax.f32 %v706_v38, 0.0 }
 0x2c9   :  { %v810_v43 = vmax.f32 %v778_v39, %v780_v40 }
 0x2ca   :  { %v823_v44 = vmax.f32 %v779_v41, %v781_v42  ;;  %v709_v45 = vpop.f32.mrb[4].mxu0 }
 0x2cb   :  { %v710_v46 = vadd.f32 %v709_v45, %v5937_v30  ;;  %v711_v47 = vpop.f32.mrb[5].mxu0 }
 0x2cc   :  { %v712_v3 = vadd.f32 %v711_v47, %v5940_v29  ;;  %v713_v48 = vpop.f32.mrb[6].mxu0 }
 0x2cd   :  { %v782_v53 = vmax.f32 %v710_v46, 0.0  ;;  %v714_v56 = vadd.f32 %v713_v48, %v5937_v30  ;;  %v715_v57 = vpop.f32.mrb[7].mxu0 }
 0x2ce   :  { %v783_v58 = vmax.f32 %v712_v3, 0.0  ;;  %v716_v59 = vadd.f32 %v715_v57, %v5940_v29 }
 0x2cf   :  { %v811_v14 = vmax.f32 %v810_v43, %v782_v53  ;;  %v784_v60 = vmax.f32 %v714_v56, 0.0  ;;  %v5966_v43 = vrot.slane %v1183_v27, %v5928_v49 }
 0x2d0   :  { %v824_v61 = vmax.f32 %v823_v44, %v783_v58  ;;  %v785_v62 = vmax.f32 %v716_v59, 0.0 }
 0x2d1   :  { %v812_v63 = vmax.f32 %v811_v14, %v784_v60 }
 0x2d2   :  { %v825_v0 = vmax.f32 %v824_v61, %v785_v62  ;;  %v719_v1 = vpop.f32.mrb[8].mxu0  ;;  %v739_v2 = vpop.f32.mrb[32].mxu1 }
 0x2d3   :  { %v720_v25 = vadd.f32 %v719_v1, %v5937_v30  ;;  %v740_v4 = vadd.f32 %v739_v2, %v5937_v30  ;;  %v721_v5 = vpop.f32.mrb[9].mxu0  ;;  %v741_v6 = vpop.f32.mrb[33].mxu1 }
 0x2d4   :  { %v722_v8 = vadd.f32 %v721_v5, %v5940_v29  ;;  %v742_v9 = vadd.f32 %v741_v6, %v5940_v29  ;;  %v723_v10 = vpop.f32.mrb[10].mxu0  ;;  %v743_v11 = vpop.f32.mrb[34].mxu1 }
 0x2d5   :  { %v786_v36 = vmax.f32 %v720_v25, 0.0  ;;  %v724_v12 = vadd.f32 %v723_v10, %v5937_v30  ;;  %v744_v51 = vadd.f32 %v743_v11, %v5937_v30  ;;  %v725_v52 = vpop.f32.mrb[11].mxu0  ;;  %v745_v54 = vpop.f32.mrb[35].mxu1  ;;  %v794_v17 = vmax.f32 %v740_v4, 0.0 }
 0x2d6   :  { %v787_v13 = vmax.f32 %v722_v8, 0.0  ;;  %v726_v15 = vadd.f32 %v725_v52, %v5940_v29  ;;  %v746_v50 = vadd.f32 %v745_v54, %v5940_v29  ;;  %v795_v7 = vmax.f32 %v742_v9, 0.0 }
 0x2d7   :  { %v813_v16 = vmax.f32 %v812_v63, %v786_v36  ;;  %v788_v18 = vmax.f32 %v724_v12, 0.0  ;;  %v796_v19 = vmax.f32 %v744_v51, 0.0  ;;  %v5973_v4 = vrot.slane %v1183_v27, %v5934_v28 }
 0x2d8   :  { %v826_v21 = vmax.f32 %v825_v0, %v787_v13  ;;  %v789_v22 = vmax.f32 %v726_v15, 0.0  ;;  %v797_v23 = vmax.f32 %v746_v50, 0.0 }
 0x2d9   :  { %v814_v24 = vmax.f32 %v813_v16, %v788_v18  ;;  %v836_v26 = vmax.f32 %v794_v17, %v796_v19 }
 0x2da   :  { %v827_v31 = vmax.f32 %v826_v21, %v789_v22  ;;  %v849_v55 = vmax.f32 %v795_v7, %v797_v23  ;;  %v729_v32 = vpop.f32.mrb[12].mxu0  ;;  %v749_v33 = vpop.f32.mrb[36].mxu1 }
 0x2db   :  { %v730_v34 = vadd.f32 %v729_v32, %v5937_v30  ;;  %v750_v35 = vadd.f32 %v749_v33, %v5937_v30  ;;  %v731_v37 = vpop.f32.mrb[13].mxu0  ;;  %v751_v38 = vpop.f32.mrb[37].mxu1 }
 0x2dc   :  { %v732_v39 = vadd.f32 %v731_v37, %v5940_v29  ;;  %v752_v40 = vadd.f32 %v751_v38, %v5940_v29  ;;  %v733_v41 = vpop.f32.mrb[14].mxu0  ;;  %v753_v42 = vpop.f32.mrb[38].mxu1  ;;  %v878_v37 = vld [vmem:[%s6285_s6 + $0x2] sm:$0x3] }
 0x2dd   :  { %v790_v44 = vmax.f32 %v730_v34, 0.0  ;;  %v798_v45 = vmax.f32 %v750_v35, 0.0  ;;  %v734_v46 = vadd.f32 %v733_v41, %v5937_v30  ;;  %v754_v47 = vadd.f32 %v753_v42, %v5937_v30  ;;  %v735_v3 = vpop.f32.mrb[15].mxu0  ;;  %v755_v48 = vpop.f32.mrb[39].mxu1 }
 0x2de   :  { %v791_v53 = vmax.f32 %v732_v39, 0.0  ;;  %v799_v56 = vmax.f32 %v752_v40, 0.0  ;;  %v736_v57 = vadd.f32 %v735_v3, %v5940_v29  ;;  %v756_v58 = vadd.f32 %v755_v48, %v5940_v29 }
 0x2df   :  { %v815_v59 = vmax.f32 %v814_v24, %v790_v44  ;;  %v837_v14 = vmax.f32 %v836_v26, %v798_v45  ;;  %v792_v60 = vmax.f32 %v734_v46, 0.0  ;;  %v800_v61 = vmax.f32 %v754_v47, 0.0 }
 0x2e0   :  { %v828_v62 = vmax.f32 %v827_v31, %v791_v53  ;;  %v850_v63 = vmax.f32 %v849_v55, %v799_v56  ;;  %v793_v0 = vmax.f32 %v736_v57, 0.0  ;;  %v801_v1 = vmax.f32 %v756_v58, 0.0 }
 0x2e1   :  { %v816_v2 = vmax.f32 %v815_v59, %v792_v60  ;;  %v838_v25 = vmax.f32 %v837_v14, %v800_v61  ;;  %v5989_v57 = vrot.slane %v878_v37, %v5928_v49 }
 0x2e2   :  { %v829_v5 = vmax.f32 %v828_v62, %v793_v0  ;;  %v851_v6 = vmax.f32 %v850_v63, %v801_v1  ;;  %v759_v8 = vpop.f32.mrb[40].mxu1  ;;  %v1309_v9 = vpop.f32.mrb[16].mxu0 }
 0x2e3   :  { %v817_v10 = vrot.slane %v816_v2, 4  ;;  %v760_v11 = vadd.f32 %v759_v8, %v5937_v30  ;;  %v1310_v36 = vadd.f32 %v1309_v9, %v5966_v43  ;;  %v761_v12 = vpop.f32.mrb[41].mxu1  ;;  %v1311_v51 = vpop.f32.mrb[17].mxu0 }
 0x2e4   :  { %v830_v52 = vrot.slane %v829_v5, 4  ;;  %v762_v54 = vadd.f32 %v761_v12, %v5940_v29  ;;  %v763_v13 = vpop.f32.mrb[42].mxu1  ;;  %v1313_v15 = vpop.f32.mrb[18].mxu0  ;;  %v1312_v17 = vadd.f32 %v1311_v51, %v5973_v4 }
 0x2e5   :  { %v818_v50 = vmax.f32 %v816_v2, %v817_v10  ;;  %v802_v16 = vmax.f32 %v760_v11, 0.0  ;;  %v764_v18 = vadd.f32 %v763_v13, %v5937_v30  ;;  %v765_v19 = vpop.f32.mrb[43].mxu1  ;;  %v1315_v21 = vpop.f32.mrb[19].mxu0  ;;  %v1388_v22 = vmax.f32 %v1310_v36, 0.0 }
 0x2e6   :  { %v831_v7 = vmax.f32 %v829_v5, %v830_v52  ;;  %v803_v23 = vmax.f32 %v762_v54, 0.0  ;;  %v1314_v24 = vadd.f32 %v1313_v15, %v5966_v43  ;;  %v766_v55 = vadd.f32 %v765_v19, %v5940_v29 }
 0x2e7   :  { %v819_v26 = vrot.slane %v818_v50, 2  ;;  %v839_v27 = vmax.f32 %v838_v25, %v802_v16  ;;  %v804_v31 = vmax.f32 %v764_v18, 0.0  ;;  %v1316_v35 = vadd.f32 %v1315_v21, %v5973_v4 }
 0x2e8   :  { %v832_v32 = vrot.slane %v831_v7, 2  ;;  %v852_v33 = vmax.f32 %v851_v6, %v803_v23  ;;  %v1390_v34 = vmax.f32 %v1314_v24, 0.0  ;;  %v805_v40 = vmax.f32 %v766_v55, 0.0 }
 0x2e9   :  { %v820_v38 = vmax.f32 %v818_v50, %v819_v26  ;;  %v840_v39 = vmax.f32 %v839_v27, %v804_v31  ;;  %v1389_v41 = vmax.f32 %v1312_v17, 0.0  ;;  %v1391_v44 = vmax.f32 %v1316_v35, 0.0 }
 0x2ea   :  { %v1420_v42 = vmax.f32 %v1388_v22, %v1390_v34  ;;  %v769_v45 = vpop.f32.mrb[44].mxu1  ;;  %v1319_v46 = vpop.f32.mrb[20].mxu0  ;;  %v853_v47 = vmax.f32 %v852_v33, %v805_v40  ;;  %v5991_v58 = vmax.f32 %v831_v7, %v832_v32 }
 0x2eb   :  { %v770_v3 = vadd.f32 %v769_v45, %v5937_v30  ;;  %v1320_v48 = vadd.f32 %v1319_v46, %v5966_v43  ;;  %v771_v53 = vpop.f32.mrb[45].mxu1  ;;  %v1321_v56 = vpop.f32.mrb[21].mxu0  ;;  %v1433_v59 = vmax.f32 %v1389_v41, %v1391_v44  ;;  %v821_v63 = vrot.slane %v820_v38, 1 }
 0x2ec   :  { %v772_v14 = vadd.f32 %v771_v53, %v5940_v29  ;;  %v1322_v60 = vadd.f32 %v1321_v56, %v5973_v4  ;;  %v773_v61 = vpop.f32.mrb[46].mxu1  ;;  %v1323_v62 = vpop.f32.mrb[22].mxu0  ;;  %v834_v31 = vrot.slane %v5991_v58, 1 }
 0x2ed   :  { %v806_v0 = vmax.f32 %v770_v3, 0.0  ;;  %v1392_v1 = vmax.f32 %v1320_v48, 0.0  ;;  %v774_v2 = vadd.f32 %v773_v61, %v5937_v30  ;;  %v775_v25 = vpop.f32.mrb[47].mxu1  ;;  %v1325_v5 = vpop.f32.mrb[23].mxu0  ;;  %v1324_v9 = vadd.f32 %v1323_v62, %v5966_v43 }
 0x2ee   :  { %v807_v6 = vmax.f32 %v772_v14, 0.0  ;;  %v1393_v8 = vmax.f32 %v1322_v60, 0.0  ;;  %v776_v10 = vadd.f32 %v775_v25, %v5940_v29  ;;  %v1326_v51 = vadd.f32 %v1325_v5, %v5973_v4 }
 0x2ef   :  { %v841_v11 = vmax.f32 %v840_v39, %v806_v0  ;;  %v1421_v36 = vmax.f32 %v1420_v42, %v1392_v1  ;;  %v808_v12 = vmax.f32 %v774_v2, 0.0  ;;  %v1394_v13 = vmax.f32 %v1324_v9, 0.0 }
 0x2f0   :  { %v854_v52 = vmax.f32 %v853_v47, %v807_v6  ;;  %v1434_v54 = vmax.f32 %v1433_v59, %v1393_v8  ;;  %v809_v15 = vmax.f32 %v776_v10, 0.0  ;;  %v1395_v16 = vmax.f32 %v1326_v51, 0.0 }
 0x2f1   :  { %v842_v50 = vmax.f32 %v841_v11, %v808_v12  ;;  %v6000_v30 = vrot.slane %v878_v37, %v5934_v28  ;;  %v1422_v17 = vmax.f32 %v1421_v36, %v1394_v13  ;;  %v6004_v27 = vmax.f32 %v820_v38, %v821_v63 }
 0x2f2   :  { %v855_v18 = vmax.f32 %v854_v52, %v809_v15  ;;  %v1004_v19 = vpop.f32.mrb[48].mxu1  ;;  %v1329_v21 = vpop.f32.mrb[24].mxu0  ;;  %v1435_v29 = vmax.f32 %v1434_v54, %v1395_v16  ;;  %v835_v8 = vmax.f32 %v5991_v58, %v834_v31 }
 0x2f3   :  { %v843_v7 = vrot.slane %v842_v50, 4  ;;  %v1005_v22 = vadd.f32 %v1004_v19, %v5989_v57  ;;  %v1330_v23 = vadd.f32 %v1329_v21, %v5966_v43  ;;  %v1006_v24 = vpop.f32.mrb[49].mxu1  ;;  %v1331_v26 = vpop.f32.mrb[25].mxu0 }
 0x2f4   :  { %v856_v55 = vrot.slane %v855_v18, 4  ;;  %v1332_v32 = vadd.f32 %v1331_v26, %v5973_v4  ;;  %v1008_v33 = vpop.f32.mrb[50].mxu1  ;;  %v1333_v34 = vpop.f32.mrb[26].mxu0  ;;  %v1007_v39 = vadd.f32 %v1006_v24, %v6000_v30 }
 0x2f5   :  { %v844_v35 = vmax.f32 %v842_v50, %v843_v7  ;;  %v1396_v37 = vmax.f32 %v1330_v23, 0.0  ;;  %v1009_v40 = vadd.f32 %v1008_v33, %v5989_v57  ;;  %v1010_v41 = vpop.f32.mrb[51].mxu1  ;;  %v1335_v42 = vpop.f32.mrb[27].mxu0  ;;  %v1083_v45 = vmax.f32 %v1005_v22, 0.0 }
 0x2f6   :  { %v857_v44 = vmax.f32 %v855_v18, %v856_v55  ;;  %v1397_v46 = vmax.f32 %v1332_v32, 0.0  ;;  %v1334_v38 = vadd.f32 %v1333_v34, %v5966_v43  ;;  %v1011_v53 = vadd.f32 %v1010_v41, %v6000_v30 }
 0x2f7   :  { %v845_v47 = vrot.slane %v844_v35, 2  ;;  %v1423_v3 = vmax.f32 %v1422_v17, %v1396_v37  ;;  %v1085_v48 = vmax.f32 %v1009_v40, 0.0  ;;  %v1336_v60 = vadd.f32 %v1335_v42, %v5973_v4 }
 0x2f8   :  { %v858_v56 = vrot.slane %v857_v44, 2  ;;  %v1436_v59 = vmax.f32 %v1435_v29, %v1397_v46  ;;  %v1398_v14 = vmax.f32 %v1334_v38, 0.0  ;;  %v1084_v62 = vmax.f32 %v1007_v39, 0.0 }
 0x2f9   :  { %v846_v61 = vmax.f32 %v844_v35, %v845_v47  ;;  %v1115_v63 = vmax.f32 %v1083_v45, %v1085_v48  ;;  %v1086_v0 = vmax.f32 %v1011_v53, 0.0  ;;  %v1399_v25 = vmax.f32 %v1336_v60, 0.0 }
 0x2fa   :  { %v859_v1 = vmax.f32 %v857_v44, %v858_v56  ;;  %v1424_v2 = vmax.f32 %v1423_v3, %v1398_v14  ;;  %v1014_v5 = vpop.f32.mrb[52].mxu1  ;;  %v1339_v6 = vpop.f32.mrb[28].mxu0 }
 0x2fb   :  { %v847_v9 = vrot.slane %v846_v61, 1  ;;  %v1128_v10 = vmax.f32 %v1084_v62, %v1086_v0  ;;  %v1015_v11 = vadd.f32 %v1014_v5, %v5989_v57  ;;  %v1340_v36 = vadd.f32 %v1339_v6, %v5966_v43  ;;  %v1016_v12 = vpop.f32.mrb[53].mxu1  ;;  %v1341_v51 = vpop.f32.mrb[29].mxu0  ;;  %v5110_v0 = vld [vmem:[#allocation4 + $0x224] ss:$16 sps:$4 sm:$0xff]  }
 0x2fc   :  { %v860_v52 = vrot.slane %v859_v1, 1  ;;  %v1437_v54 = vmax.f32 %v1436_v59, %v1399_v25  ;;  %v1017_v13 = vadd.f32 %v1016_v12, %v6000_v30  ;;  %v1342_v15 = vadd.f32 %v1341_v51, %v5973_v4  ;;  %v1018_v50 = vpop.f32.mrb[54].mxu1  ;;  %v1343_v16 = vpop.f32.mrb[30].mxu0  ;;  %v5102_v59 = vld [vmem:[#allocation4 + $0x200] ss:$16 sps:$4 sm:$0xff]  }
 0x2fd   :  { %v848_v17 = vmax.f32 %v846_v61, %v847_v9  ;;  %v1087_v18 = vmax.f32 %v1015_v11, 0.0  ;;  %v1400_v19 = vmax.f32 %v1340_v36, 0.0  ;;  %v1019_v58 = vadd.f32 %v1018_v50, %v5989_v57  ;;  %v1020_v21 = vpop.f32.mrb[55].mxu1  ;;  %v1345_v7 = vpop.f32.mrb[31].mxu0  ;;  %v5113_v9 = vld [vmem:[#allocation4 + $0x22c] ss:$16 sps:$4 sm:$0xff]  }
 0x2fe   :  { %v1088_v29 = vmax.f32 %v1017_v13, 0.0  ;;  %v1401_v22 = vmax.f32 %v1342_v15, 0.0  ;;  %v1344_v23 = vadd.f32 %v1343_v16, %v5966_v43  ;;  %v1021_v24 = vadd.f32 %v1020_v21, %v6000_v30  ;;  %v5108_v50 = vld [vmem:[#allocation4 + $0x220] ss:$16 sps:$4 sm:$0xff]   ;;  %v5111_v16 = vld [vmem:[#allocation4 + $0x228] ss:$16 sps:$4 sm:$0xff]  }
 0x2ff   :  { %v1116_v26 = vmax.f32 %v1115_v63, %v1087_v18  ;;  %v1425_v31 = vmax.f32 %v1424_v2, %v1400_v19  ;;  %v1089_v55 = vmax.f32 %v1019_v58, 0.0  ;;  %v1346_v32 = vadd.f32 %v1345_v7, %v5973_v4  ;;  %v5116_v19 = vld [vmem:[#allocation4 + $0x244] ss:$16 sps:$4 sm:$0xff]   ;;  %v5119_v58 = vld [vmem:[#allocation4 + $0x24c] ss:$16 sps:$4 sm:$0xff]  }
 0x300   :  { %v1129_v33 = vmax.f32 %v1128_v10, %v1088_v29  ;;  %v1438_v34 = vmax.f32 %v1437_v54, %v1401_v22  ;;  %v1402_v35 = vmax.f32 %v1344_v23, 0.0  ;;  %v1090_v37 = vmax.f32 %v1021_v24, 0.0 }
 0x301   :  { %v1117_v39 = vmax.f32 %v1116_v26, %v1089_v55  ;;  %v1403_v40 = vmax.f32 %v1346_v32, 0.0  ;;  %v861_v41 = vmax.f32 %v859_v1, %v860_v52  ;;  %v1782_v42 = vsel %vm1781_vm3, %v848_v17, %v6004_v27  ;;  %v5105_v27 = vld [vmem:[#allocation4 + $0x208] ss:$16 sps:$4 sm:$0xff]  }
 0x302   :  { %v6024_v44 = vmax.f32 %v1425_v31, %v1402_v35  ;;  %v1130_v45 = vmax.f32 %v1129_v33, %v1090_v37  ;;  %v1024_v46 = vpop.f32.mrb[56].mxu1  ;;  %v1349_v38 = vpop.f32.mrb[32].mxu0  ;;  %v1810_v25 = vpack.c.bf16 %v1782_v42, %v1782_v42  ;;  %v5114_v33 = vld [vmem:[#allocation4 + $0x240] ss:$16 sps:$4 sm:$0xff]   ;;  %v5122_v42 = vld [vmem:[#allocation4 + $0x264] ss:$16 sps:$4 sm:$0xff]  }
 0x303   :  { %v6026_v47 = vmax.f32 %v1438_v34, %v1403_v40  ;;  %v1025_v3 = vadd.f32 %v1024_v46, %v5989_v57  ;;  %v1026_v48 = vpop.f32.mrb[57].mxu1  ;;  %v1351_v53 = vpop.f32.mrb[33].mxu0  ;;  %v1783_v56 = vsel %vm1781_vm3, %v861_v41, %v835_v8  ;;  %v1350_v14 = vadd.f32 %v1349_v38, %v5966_v43 }
 0x304   :  { %v1027_v60 = vadd.f32 %v1026_v48, %v6000_v30  ;;  %v1811_v61 = vpack.c.bf16 %v1783_v56, %v1783_v56  ;;  %v1028_v62 = vpop.f32.mrb[58].mxu1  ;;  %v1353_v63 = vpop.f32.mrb[34].mxu0  ;;  %v1352_v8 = vadd.f32 %v1351_v53, %v5973_v4  ;;  %v5125_v53 = vld [vmem:[#allocation4 + $0x26c] ss:$16 sps:$4 sm:$0xff]  }
 0x305   :  { %v1091_v1 = vmax.f32 %v1025_v3, 0.0  ;;  %v1029_v2 = vadd.f32 %v1028_v62, %v5989_v57  ;;  %v1030_v5 = vpop.f32.mrb[59].mxu1  ;;  %v1355_v6 = vpop.f32.mrb[35].mxu0  ;;  %v1354_v11 = vadd.f32 %v1353_v63, %v5966_v43  ;;  %v1404_v52 = vmax.f32 %v1350_v14, 0.0 }
 0x306   :  { %v1092_v10 = vmax.f32 %v1027_v60, 0.0  ;;  %3408 = vmatprep.mubr.bf16.mxu0 %v1811_v61  ;;  %3572 = vmatprep.mubr.bf16.mxu1 %v1811_v61  ;;  %v1031_v51 = vadd.f32 %v1030_v5, %v6000_v30  ;;  %v1356_v15 = vadd.f32 %v1355_v6, %v5973_v4  ;;  %v1405_v21 = vmax.f32 %v1352_v8, 0.0  ;;  %v5123_v5 = vld [vmem:[#allocation4 + $0x268] ss:$16 sps:$4 sm:$0xff]   ;;  %v5131_v8 = vld [vmem:[#allocation4 + $0x28c] ss:$16 sps:$4 sm:$0xff]  }
 0x307   :  { %v1118_v36 = vmax.f32 %v1117_v39, %v1091_v1  ;;  %v1093_v12 = vmax.f32 %v1029_v2, 0.0  ;;  %3409 = vmatmul.mubr.bf16.vlgmr.msra.gmra.mrb[48].mxu0 %v1810_v25  ;;  %3573 = vmatmul.mubr.bf16.vlgmr.msra.gmra.mrb[112].mxu1 %v1810_v25  ;;  %v1406_v13 = vmax.f32 %v1354_v11, 0.0  ;;  %v5117_v39 = vld [vmem:[#allocation4 + $0x248] ss:$16 sps:$4 sm:$0xff]   ;;  %v5120_v25 = vld [vmem:[#allocation4 + $0x260] ss:$16 sps:$4 sm:$0xff]  }
 0x308   :  { %v1131_v54 = vmax.f32 %v1130_v45, %v1092_v10  ;;  %3418 = vmatpush1.bf16.msra.mxu0 %v5102_v59  ;;  %3582 = vmatpush1.bf16.msra.mxu1 %v5105_v27  ;;  %v1094_v18 = vmax.f32 %v1031_v51, 0.0  ;;  %v1407_v29 = vmax.f32 %v1356_v15, 0.0  ;;  %v5128_v10 = vld [vmem:[#allocation4 + $0x284] ss:$16 sps:$4 sm:$0xff]  }
 0x309   :  { %v1119_v17 = vmax.f32 %v1118_v36, %v1093_v12  ;;  %3419 = vmatprep.subr.bf16.mxu0 %v5110_v0  ;;  %3583 = vmatprep.subr.bf16.mxu1 %v5113_v9  ;;  %v1446_v7 = vmax.f32 %v1404_v52, %v1406_v13 }
 0x30a   :  { %v1034_v22 = vpop.f32.mrb[60].mxu1  ;;  %v1359_v23 = vpop.f32.mrb[36].mxu0  ;;  %v1132_v24 = vmax.f32 %v1131_v54, %v1094_v18  ;;  %v1459_v34 = vmax.f32 %v1405_v21, %v1407_v29  ;;  %v1427_v29 = vrot.slane %v6024_v44, 4 }
 0x30b   :  { %v1035_v26 = vadd.f32 %v1034_v22, %v5989_v57  ;;  %v1360_v31 = vadd.f32 %v1359_v23, %v5966_v43  ;;  %v1036_v55 = vpop.f32.mrb[61].mxu1  ;;  %v1361_v32 = vpop.f32.mrb[37].mxu0 }
 0x30c   :  { %3420 = vmatpush1.bf16.msra.mxu0 %v5108_v50  ;;  %3584 = vmatpush1.bf16.msra.mxu1 %v5111_v16  ;;  %v1037_v35 = vadd.f32 %v1036_v55, %v6000_v30  ;;  %v1362_v37 = vadd.f32 %v1361_v32, %v5973_v4  ;;  %v1038_v40 = vpop.f32.mrb[62].mxu1  ;;  %v1363_v41 = vpop.f32.mrb[38].mxu0  ;;  %v5126_v16 = vld [vmem:[#allocation4 + $0x280] ss:$16 sps:$4 sm:$0xff]  }
 0x30d   :  { %v1095_v45 = vmax.f32 %v1035_v26, 0.0  ;;  %v1408_v46 = vmax.f32 %v1360_v31, 0.0  ;;  %3421 = vmatprep.subr.bf16.mxu0 %v5116_v19  ;;  %3585 = vmatprep.subr.bf16.mxu1 %v5119_v58  ;;  %v1039_v38 = vadd.f32 %v1038_v40, %v5989_v57  ;;  %v1040_v3 = vpop.f32.mrb[63].mxu1  ;;  %v1365_v48 = vpop.f32.mrb[39].mxu0  ;;  %v1364_v14 = vadd.f32 %v1363_v41, %v5966_v43  ;;  %v5129_v19 = vld [vmem:[#allocation4 + $0x288] ss:$16 sps:$4 sm:$0xff]  }
 0x30e   :  { %v1096_v56 = vmax.f32 %v1037_v35, 0.0  ;;  %v1409_v59 = vmax.f32 %v1362_v37, 0.0  ;;  %v1041_v62 = vadd.f32 %v1040_v3, %v6000_v30  ;;  %v1366_v2 = vadd.f32 %v1365_v48, %v5973_v4  ;;  %v5137_v31 = vld [vmem:[#allocation4 + $0x2ac] ss:$16 sps:$4 sm:$0xff]  }
 0x30f   :  { %v1120_v60 = vmax.f32 %v1119_v17, %v1095_v45  ;;  %v1447_v61 = vmax.f32 %v1446_v7, %v1408_v46  ;;  %v1097_v27 = vmax.f32 %v1039_v38, 0.0  ;;  %v1410_v1 = vmax.f32 %v1364_v14, 0.0  ;;  %v5134_v7 = vld [vmem:[#allocation4 + $0x2a4] ss:$16 sps:$4 sm:$0xff]   ;;  %v5135_v46 = vld [vmem:[#allocation4 + $0x2a8] ss:$16 sps:$4 sm:$0xff]  }
 0x310   :  { %v1133_v63 = vmax.f32 %v1132_v24, %v1096_v56  ;;  %v1460_v0 = vmax.f32 %v1459_v34, %v1409_v59  ;;  %3422 = vmatpush1.bf16.msra.mxu0 %v5114_v33  ;;  %3586 = vmatpush1.bf16.msra.mxu1 %v5117_v39  ;;  %v1098_v9 = vmax.f32 %v1041_v62, 0.0  ;;  %v1411_v36 = vmax.f32 %v1366_v2, 0.0  ;;  %v5132_v39 = vld [vmem:[#allocation4 + $0x2a0] ss:$16 sps:$4 sm:$0xff]   ;;  %v5140_v38 = vld [vmem:[#allocation4 + $0x2c4] ss:$16 sps:$4 sm:$0xff]  }
 0x311   :  { %v6045_v6 = vmax.f32 %v1120_v60, %v1097_v27  ;;  %3423 = vmatprep.subr.bf16.mxu0 %v5122_v42  ;;  %3587 = vmatprep.subr.bf16.mxu1 %v5125_v53  ;;  %v1448_v11 = vmax.f32 %v1447_v61, %v1410_v1  ;;  %v6059_v3 = vmax.f32 %v6024_v44, %v1427_v29  ;;  %v1440_v48 = vrot.slane %v6026_v47, 4  ;;  %v5143_v59 = vld [vmem:[#allocation4 + $0x2cc] ss:$16 sps:$4 sm:$0xff]  }
 0x312   :  { %v1044_v12 = vpop.f32.mrb[64].mxu1  ;;  %v1369_v51 = vpop.f32.mrb[40].mxu0  ;;  %v6047_v52 = vmax.f32 %v1133_v63, %v1098_v9  ;;  %v1461_v17 = vmax.f32 %v1460_v0, %v1411_v36  ;;  %v5146_v36 = vld [vmem:[#allocation4 + $0x2e4] ss:$16 sps:$4 sm:$0xff]  }
 0x313   :  { %v1045_v54 = vadd.f32 %v1044_v12, %v5989_v57  ;;  %v1370_v13 = vadd.f32 %v1369_v51, %v5966_v43  ;;  %v1046_v15 = vpop.f32.mrb[65].mxu1  ;;  %v1371_v50 = vpop.f32.mrb[41].mxu0  ;;  %v1429_v12 = vrot.slane %v6059_v3, 2  ;;  %v1441_v51 = vmax.f32 %v6026_v47, %v1440_v48 }
 0x314   :  { %3424 = vmatpush1.bf16.msra.mxu0 %v5120_v25  ;;  %3588 = vmatpush1.bf16.msra.mxu1 %v5123_v5  ;;  %v1372_v18 = vadd.f32 %v1371_v50, %v5973_v4  ;;  %v1048_v58 = vpop.f32.mrb[66].mxu1  ;;  %v1373_v21 = vpop.f32.mrb[42].mxu0  ;;  %v1047_v23 = vadd.f32 %v1046_v15, %v6000_v30  ;;  %v5138_v25 = vld [vmem:[#allocation4 + $0x2c0] ss:$16 sps:$4 sm:$0xff]  }
 0x315   :  { %v1412_v22 = vmax.f32 %v1370_v13, 0.0  ;;  %3425 = vmatprep.subr.bf16.mxu0 %v5128_v10  ;;  %3589 = vmatprep.subr.bf16.mxu1 %v5131_v8  ;;  %v1050_v24 = vpop.f32.mrb[67].mxu1  ;;  %v1375_v26 = vpop.f32.mrb[43].mxu0  ;;  %v1049_v32 = vadd.f32 %v1048_v58, %v5989_v57  ;;  %v1374_v33 = vadd.f32 %v1373_v21, %v5966_v43  ;;  %v1099_v34 = vmax.f32 %v1045_v54, 0.0  ;;  %v5141_v10 = vld [vmem:[#allocation4 + $0x2c8] ss:$16 sps:$4 sm:$0xff]  }
 0x316   :  { %v1413_v55 = vmax.f32 %v1372_v18, 0.0  ;;  %v1051_v37 = vadd.f32 %v1050_v24, %v6000_v30  ;;  %v1376_v45 = vadd.f32 %v1375_v26, %v5973_v4  ;;  %v1100_v53 = vmax.f32 %v1047_v23, 0.0 }
 0x317   :  { %v1449_v35 = vmax.f32 %v1448_v11, %v1412_v22  ;;  %v1101_v41 = vmax.f32 %v1049_v32, 0.0  ;;  %v1414_v42 = vmax.f32 %v1374_v33, 0.0  ;;  %v1430_v48 = vmax.f32 %v6059_v3, %v1429_v12 }
 0x318   :  { %v1462_v40 = vmax.f32 %v1461_v17, %v1413_v55  ;;  %3426 = vmatpush1.bf16.msra.mxu0 %v5126_v16  ;;  %3590 = vmatpush1.bf16.msra.mxu1 %v5129_v19  ;;  %v1102_v56 = vmax.f32 %v1051_v37, 0.0  ;;  %v1415_v61 = vmax.f32 %v1376_v45, 0.0  ;;  %v5149_v16 = vld [vmem:[#allocation4 + $0x2ec] ss:$16 sps:$4 sm:$0xff]   ;;  %v5147_v55 = vld [vmem:[#allocation4 + $0x2e8] ss:$16 sps:$4 sm:$0xff]  }
 0x319   :  { %3427 = vmatprep.subr.bf16.mxu0 %v5134_v7  ;;  %3591 = vmatprep.subr.bf16.mxu1 %v5137_v31  ;;  %v1141_v14 = vmax.f32 %v1099_v34, %v1101_v41  ;;  %v1450_v60 = vmax.f32 %v1449_v35, %v1414_v42  ;;  %v5144_v31 = vld [vmem:[#allocation4 + $0x2e0] ss:$16 sps:$4 sm:$0xff]   ;;  %v5155_v35 = vld [vmem:[#allocation4 + $0x30c] ss:$16 sps:$4 sm:$0xff]   ;;  %v1442_v41 = vrot.slane %v1441_v51, 2 }
 0x31a   :  { %v1054_v27 = vpop.f32.mrb[68].mxu1  ;;  %v1379_v62 = vpop.f32.mrb[44].mxu0  ;;  %v1154_v63 = vmax.f32 %v1100_v53, %v1102_v56  ;;  %v1463_v44 = vmax.f32 %v1462_v40, %v1415_v61 }
 0x31b   :  { %v1055_v0 = vadd.f32 %v1054_v27, %v5989_v57  ;;  %v1056_v1 = vpop.f32.mrb[69].mxu1  ;;  %v1381_v2 = vpop.f32.mrb[45].mxu0  ;;  %v1380_v5 = vadd.f32 %v1379_v62, %v5966_v43 }
 0x31c   :  { %3428 = vmatpush1.bf16.msra.mxu0 %v5132_v39  ;;  %3592 = vmatpush1.bf16.msra.mxu1 %v5135_v46  ;;  %v1057_v9 = vadd.f32 %v1056_v1, %v6000_v30  ;;  %v1058_v8 = vpop.f32.mrb[70].mxu1  ;;  %v1383_v11 = vpop.f32.mrb[46].mxu0  ;;  %v1382_v13 = vadd.f32 %v1381_v2, %v5973_v4 }
 0x31d   :  { %v1103_v54 = vmax.f32 %v1055_v0, 0.0  ;;  %3429 = vmatprep.subr.bf16.mxu0 %v5140_v38  ;;  %3593 = vmatprep.subr.bf16.mxu1 %v5143_v59  ;;  %v1060_v15 = vpop.f32.mrb[71].mxu1  ;;  %v1385_v50 = vpop.f32.mrb[47].mxu0  ;;  %v1416_v17 = vmax.f32 %v1380_v5, 0.0  ;;  %v1059_v19 = vadd.f32 %v1058_v8, %v5989_v57  ;;  %v1384_v58 = vadd.f32 %v1383_v11, %v5966_v43  ;;  %v5152_v43 = vld [vmem:[#allocation4 + $0x304] ss:$16 sps:$4 sm:$0xff]  }
 0x31e   :  { %v1104_v18 = vmax.f32 %v1057_v9, 0.0  ;;  %v1417_v7 = vmax.f32 %v1382_v13, 0.0  ;;  %v1061_v29 = vadd.f32 %v1060_v15, %v6000_v30  ;;  %v1386_v47 = vadd.f32 %v1385_v50, %v5973_v4  ;;  %v5150_v38 = vld [vmem:[#allocation4 + $0x300] ss:$16 sps:$4 sm:$0xff]   ;;  %v5153_v59 = vld [vmem:[#allocation4 + $0x308] ss:$16 sps:$4 sm:$0xff]  }
 0x31f   :  { %v1142_v21 = vmax.f32 %v1141_v14, %v1103_v54  ;;  %v1451_v22 = vmax.f32 %v1450_v60, %v1416_v17  ;;  %v1105_v24 = vmax.f32 %v1059_v19, 0.0  ;;  %v1418_v26 = vmax.f32 %v1384_v58, 0.0  ;;  %v5158_v60 = vld [vmem:[#allocation4 + $0x324] ss:$16 sps:$4 sm:$0xff]   ;;  %v5161_v0 = vld [vmem:[#allocation4 + $0x32c] ss:$16 sps:$4 sm:$0xff]  }
 0x320   :  { %v1155_v23 = vmax.f32 %v1154_v63, %v1104_v18  ;;  %3430 = vmatpush1.bf16.msra.mxu0 %v5138_v25  ;;  %3594 = vmatpush1.bf16.msra.mxu1 %v5141_v10  ;;  %v1464_v32 = vmax.f32 %v1463_v44, %v1417_v7  ;;  %v1106_v33 = vmax.f32 %v1061_v29, 0.0  ;;  %v1419_v34 = vmax.f32 %v1386_v47, 0.0  ;;  %v5156_v10 = vld [vmem:[#allocation4 + $0x320] ss:$16 sps:$4 sm:$0xff]   ;;  %v5159_v8 = vld [vmem:[#allocation4 + $0x328] ss:$16 sps:$4 sm:$0xff]  }
 0x321   :  { %3431 = vmatprep.subr.bf16.mxu0 %v5146_v36  ;;  %3595 = vmatprep.subr.bf16.mxu1 %v5149_v16  ;;  %v1143_v37 = vmax.f32 %v1142_v21, %v1105_v24  ;;  %v1452_v39 = vmax.f32 %v1451_v22, %v1418_v26  ;;  %v1443_v25 = vmax.f32 %v1441_v51, %v1442_v41  ;;  %v1431_v11 = vrot.slane %v1430_v48, 1  ;;  %v5164_v13 = vld [vmem:[#allocation4 + $0x344] ss:$16 sps:$4 sm:$0xff]   ;;  %v5167_v17 = vld [vmem:[#allocation4 + $0x34c] ss:$16 sps:$4 sm:$0xff]  }
 0x322   :  { %v1064_v40 = vpop.f32.mrb[72].mxu1  ;;  %v1156_v4 = vmax.f32 %v1155_v23, %v1106_v33  ;;  %v1465_v42 = vmax.f32 %v1464_v32, %v1419_v34  ;;  %v1122_v15 = vrot.slane %v6045_v6, 4  ;;  %v1488_v51 = vld [vmem:[%s6285_s6 + $0x6] sm:$0x3]  ;;  %v1135_v18 = vrot.slane %v6047_v52, 4 }
 0x323   :  { %v1065_v45 = vadd.f32 %v1064_v40, %v5989_v57  ;;  %v1066_v46 = vpop.f32.mrb[73].mxu1  ;;  %v1453_v53 = vrot.slane %v1452_v39, 4  ;;  %v1444_v7 = vrot.slane %v1443_v25, 1  ;;  %v5162_v23 = vld [vmem:[#allocation4 + $0x340] ss:$16 sps:$4 sm:$0xff]   ;;  %v1432_v24 = vmax.f32 %v1430_v48, %v1431_v11 }
 0x324   :  { %3432 = vmatpush1.bf16.msra.mxu0 %v5144_v31  ;;  %3596 = vmatpush1.bf16.msra.mxu1 %v5147_v55  ;;  %v1067_v56 = vadd.f32 %v1066_v46, %v6000_v30  ;;  %v1068_v14 = vpop.f32.mrb[74].mxu1  ;;  %v1466_v61 = vrot.slane %v1465_v42, 4  ;;  %v5165_v55 = vld [vmem:[#allocation4 + $0x348] ss:$16 sps:$4 sm:$0xff]   ;;  %v5170_v33 = vld [vmem:[#allocation4 + $0x364] ss:$16 sps:$4 sm:$0xff]   ;;  %v6085_v34 = vrot.slane %v1488_v51, %v5928_v49 }
 0x325   :  { %v1107_v27 = vmax.f32 %v1065_v45, 0.0  ;;  %3433 = vmatprep.subr.bf16.mxu0 %v5152_v43  ;;  %3597 = vmatprep.subr.bf16.mxu1 %v5155_v35  ;;  %v1069_v62 = vadd.f32 %v1068_v14, %v5989_v57  ;;  %v1070_v63 = vpop.f32.mrb[75].mxu1  ;;  %v1454_v1 = vmax.f32 %v1452_v39, %v1453_v53  ;;  %v1123_v43 = vmax.f32 %v6045_v6, %v1122_v15  ;;  %v5173_v41 = vld [vmem:[#allocation4 + $0x36c] ss:$16 sps:$4 sm:$0xff]   ;;  %v5168_v14 = vld [vmem:[#allocation4 + $0x360] ss:$16 sps:$4 sm:$0xff]  }
 0x326   :  { %v1108_v2 = vmax.f32 %v1067_v56, 0.0  ;;  %v1071_v3 = vadd.f32 %v1070_v63, %v6000_v30  ;;  %v1467_v44 = vmax.f32 %v1465_v42, %v1466_v61  ;;  %v1445_v53 = vmax.f32 %v1443_v25, %v1444_v7  ;;  %v5182_v15 = vld [vmem:[#allocation4 + $0x3a4] ss:$16 sps:$4 sm:$0xff]  }
 0x327   :  { %v1144_v5 = vmax.f32 %v1143_v37, %v1107_v27  ;;  %v1109_v9 = vmax.f32 %v1069_v62, 0.0  ;;  %v1455_v36 = vrot.slane %v1454_v1, 2  ;;  %v5179_v62 = vld [vmem:[#allocation4 + $0x38c] ss:$16 sps:$4 sm:$0xff]  }
 0x328   :  { %v1157_v12 = vmax.f32 %v1156_v4, %v1108_v2  ;;  %3434 = vmatpush1.bf16.msra.mxu0 %v5150_v38  ;;  %3598 = vmatpush1.bf16.msra.mxu1 %v5153_v59  ;;  %v1110_v54 = vmax.f32 %v1071_v3, 0.0  ;;  %v1468_v50 = vrot.slane %v1467_v44, 2  ;;  %v1136_v4 = vmax.f32 %v6047_v52, %v1135_v18 }
 0x329   :  { %v1145_v16 = vmax.f32 %v1144_v5, %v1109_v9  ;;  %3435 = vmatprep.subr.bf16.mxu0 %v5158_v60  ;;  %3599 = vmatprep.subr.bf16.mxu1 %v5161_v0  ;;  %v1456_v19 = vmax.f32 %v1454_v1, %v1455_v36  ;;  %v5171_v60 = vld [vmem:[#allocation4 + $0x368] ss:$16 sps:$4 sm:$0xff]   ;;  %v1124_v52 = vrot.slane %v1123_v43, 2 }
 0x32a   :  { %v1158_v58 = vmax.f32 %v1157_v12, %v1110_v54  ;;  %v1074_v21 = vpop.f32.mrb[76].mxu1  ;;  %v1469_v29 = vmax.f32 %v1467_v44, %v1468_v50  ;;  %v1137_v0 = vrot.slane %v1136_v4, 2  ;;  %v5185_v50 = vld [vmem:[#allocation4 + $0x3ac] ss:$16 sps:$4 sm:$0xff]  }
 0x32b   :  { %v1075_v47 = vadd.f32 %v1074_v21, %v5989_v57  ;;  %v1076_v22 = vpop.f32.mrb[77].mxu1  ;;  %v1457_v26 = vrot.slane %v1456_v19, 1  ;;  %v1125_v36 = vmax.f32 %v1123_v43, %v1124_v52  ;;  %v5180_v21 = vld [vmem:[#allocation4 + $0x3a0] ss:$16 sps:$4 sm:$0xff]  }
 0x32c   :  { %3436 = vmatpush1.bf16.msra.mxu0 %v5156_v10  ;;  %3600 = vmatpush1.bf16.msra.mxu1 %v5159_v8  ;;  %v1077_v31 = vadd.f32 %v1076_v22, %v6000_v30  ;;  %v1078_v32 = vpop.f32.mrb[78].mxu1  ;;  %v1470_v35 = vrot.slane %v1469_v29, 1  ;;  %v5174_v10 = vld [vmem:[#allocation4 + $0x380] ss:$16 sps:$4 sm:$0xff]   ;;  %v5177_v8 = vld [vmem:[#allocation4 + $0x388] ss:$16 sps:$4 sm:$0xff]  }
 0x32d   :  { %v1111_v37 = vmax.f32 %v1075_v47, 0.0  ;;  %3437 = vmatprep.subr.bf16.mxu0 %v5164_v13  ;;  %3601 = vmatprep.subr.bf16.mxu1 %v5167_v17  ;;  %v1079_v39 = vadd.f32 %v1078_v32, %v5989_v57  ;;  %v1080_v40 = vpop.f32.mrb[79].mxu1  ;;  %v1458_v42 = vmax.f32 %v1456_v19, %v1457_v26  ;;  %v6092_v57 = vrot.slane %v1488_v51, %v5934_v28  ;;  %v5183_v22 = vld [vmem:[#allocation4 + $0x3a8] ss:$16 sps:$4 sm:$0xff]  }
 0x32e   :  { %v1112_v45 = vmax.f32 %v1077_v31, 0.0  ;;  %v1081_v46 = vadd.f32 %v1080_v40, %v6000_v30  ;;  %v1471_v56 = vmax.f32 %v1469_v29, %v1470_v35  ;;  %v5176_v30 = vld [vmem:[#allocation4 + $0x384] ss:$16 sps:$4 sm:$0xff]  }
 0x32f   :  { %v1146_v38 = vmax.f32 %v1145_v16, %v1111_v37  ;;  %v1113_v48 = vmax.f32 %v1079_v39, 0.0  ;;  %v6095_v61 = vsel %vm1781_vm3, %v1458_v42, %v1432_v24  ;;  %v1138_v16 = vmax.f32 %v1136_v4, %v1137_v0  ;;  %v5188_v31 = vld [vmem:[#allocation4 + $0x3c4] ss:$16 sps:$4 sm:$0xff]   ;;  %v5186_v42 = vld [vmem:[#allocation4 + $0x3c0] ss:$16 sps:$4 sm:$0xff]  }
 0x330   :  { %v1159_v59 = vmax.f32 %v1158_v58, %v1112_v45  ;;  %3438 = vmatpush1.bf16.msra.mxu0 %v5162_v23  ;;  %3602 = vmatpush1.bf16.msra.mxu1 %v5165_v55  ;;  %v1114_v6 = vmax.f32 %v1081_v46, 0.0  ;;  %v6098_v63 = vsel %vm1781_vm3, %v1471_v56, %v1445_v53  ;;  %v1126_v23 = vrot.slane %v1125_v36, 1  ;;  %v5191_v55 = vld [vmem:[#allocation4 + $0x3cc] ss:$16 sps:$4 sm:$0xff]   ;;  %v5189_v45 = vld [vmem:[#allocation4 + $0x3c8] ss:$16 sps:$4 sm:$0xff]  }
 0x331   :  { %v1147_v27 = vmax.f32 %v1146_v38, %v1113_v48  ;;  %3439 = vmatprep.subr.bf16.mxu0 %v5170_v33  ;;  %3603 = vmatprep.subr.bf16.mxu1 %v5173_v41  ;;  %v1139_v32 = vrot.slane %v1138_v16, 1 }
 0x332   :  { %v1160_v1 = vmax.f32 %v1159_v59, %v1114_v6  ;;  %v1614_v2 = vpop.f32.mrb[80].mxu1  ;;  %v1127_v38 = vmax.f32 %v1125_v36, %v1126_v23  ;;  %v5194_v6 = vld [vmem:[#allocation4 + $0x3e4] ss:$16 sps:$4 sm:$0xff]  }
 0x333   :  { %v1148_v3 = vrot.slane %v1147_v27, 4  ;;  %v1615_v25 = vadd.f32 %v1614_v2, %v6085_v34  ;;  %v1616_v44 = vpop.f32.mrb[81].mxu1 }
 0x334   :  { %v1161_v5 = vrot.slane %v1160_v1, 4  ;;  %3440 = vmatpush1.bf16.msra.mxu0 %v5168_v14  ;;  %3604 = vmatpush1.bf16.msra.mxu1 %v5171_v60  ;;  %v1617_v9 = vadd.f32 %v1616_v44, %v6092_v57  ;;  %v1618_v11 = vpop.f32.mrb[82].mxu1  ;;  %v5197_v14 = vld [vmem:[#allocation4 + $0x3ec] ss:$16 sps:$4 sm:$0xff]   ;;  %v5195_v44 = vld [vmem:[#allocation4 + $0x3e8] ss:$16 sps:$4 sm:$0xff]  }
 0x335   :  { %v1149_v12 = vmax.f32 %v1147_v27, %v1148_v3  ;;  %3441 = vmatprep.subr.bf16.mxu0 %v5176_v30  ;;  %3605 = vmatprep.subr.bf16.mxu1 %v5179_v62  ;;  %v1619_v54 = vadd.f32 %v1618_v11, %v6085_v34  ;;  %v1620_v13 = vpop.f32.mrb[83].mxu1  ;;  %v1693_v19 = vmax.f32 %v1615_v25, 0.0  ;;  %v1140_v27 = vmax.f32 %v1138_v16, %v1139_v32  ;;  %v5192_v25 = vld [vmem:[#allocation4 + $0x3e0] ss:$16 sps:$4 sm:$0xff]   ;;  %v5203_v11 = vld [vmem:[#allocation4 + $0x40c] ss:$16 sps:$4 sm:$0xff]  }
 0x336   :  { %v1162_v17 = vmax.f32 %v1160_v1, %v1161_v5  ;;  %v1621_v51 = vadd.f32 %v1620_v13, %v6092_v57  ;;  %v1694_v29 = vmax.f32 %v1617_v9, 0.0  ;;  %v5201_v16 = vld [vmem:[#allocation4 + $0x408] ss:$16 sps:$4 sm:$0xff]  }
 0x337   :  { %v1150_v18 = vrot.slane %v1149_v12, 2  ;;  %v1695_v58 = vmax.f32 %v1619_v54, 0.0  ;;  %v5207_v32 = vld [vmem:[#allocation4 + $0x428] ss:$16 sps:$4 sm:$0xff]  }
 0x338   :  { %v1163_v7 = vrot.slane %v1162_v17, 2  ;;  %3442 = vmatpush1.bf16.msra.mxu0 %v5174_v10  ;;  %3606 = vmatpush1.bf16.msra.mxu1 %v5177_v8  ;;  %v1696_v47 = vmax.f32 %v1621_v51, 0.0  ;;  %v5200_v8 = vld [vmem:[#allocation4 + $0x404] ss:$16 sps:$4 sm:$0xff]  }
 0x339   :  { %v1151_v24 = vmax.f32 %v1149_v12, %v1150_v18  ;;  %v1725_v26 = vmax.f32 %v1693_v19, %v1695_v58  ;;  %3443 = vmatprep.subr.bf16.mxu0 %v5182_v15  ;;  %3607 = vmatprep.subr.bf16.mxu1 %v5185_v50  ;;  %v5198_v50 = vld [vmem:[#allocation4 + $0x400] ss:$16 sps:$4 sm:$0xff]  }
 0x33a   :  { %v1164_v33 = vmax.f32 %v1162_v17, %v1163_v7  ;;  %v1738_v43 = vmax.f32 %v1694_v29, %v1696_v47  ;;  %v1624_v35 = vpop.f32.mrb[84].mxu1  ;;  %v5206_v29 = vld [vmem:[#allocation4 + $0x424] ss:$16 sps:$4 sm:$0xff]   ;;  %v5209_v47 = vld [vmem:[#allocation4 + $0x42c] ss:$16 sps:$4 sm:$0xff]  }
 0x33b   :  { %v1152_v37 = vrot.slane %v1151_v24, 1  ;;  %v1625_v39 = vadd.f32 %v1624_v35, %v6085_v34  ;;  %v1626_v40 = vpop.f32.mrb[85].mxu1  ;;  %v5215_v35 = vld [vmem:[#allocation4 + $0x44c] ss:$16 sps:$4 sm:$0xff]  }
 0x33c   :  { %v1165_v41 = vrot.slane %v1164_v33, 1  ;;  %3444 = vmatpush1.bf16.msra.mxu0 %v5180_v21  ;;  %3608 = vmatpush1.bf16.msra.mxu1 %v5183_v22  ;;  %v1627_v4 = vadd.f32 %v1626_v40, %v6092_v57  ;;  %v1628_v46 = vpop.f32.mrb[86].mxu1 }
 0x33d   :  { %v1153_v48 = vmax.f32 %v1151_v24, %v1152_v37  ;;  %v1697_v53 = vmax.f32 %v1625_v39, 0.0  ;;  %3445 = vmatprep.subr.bf16.mxu0 %v5188_v31  ;;  %3609 = vmatprep.subr.bf16.mxu1 %v5191_v55  ;;  %v1629_v56 = vadd.f32 %v1628_v46, %v6085_v34  ;;  %v1630_v59 = vpop.f32.mrb[87].mxu1  ;;  %v1815_v24 = vpack.c.bf16 %v6098_v63, %v6098_v63  ;;  %v5204_v55 = vld [vmem:[#allocation4 + $0x420] ss:$16 sps:$4 sm:$0xff]  }
 0x33e   :  { %v1698_v60 = vmax.f32 %v1627_v4, 0.0  ;;  %v1631_v52 = vadd.f32 %v1630_v59, %v6092_v57  ;;  %v1166_v30 = vmax.f32 %v1164_v33, %v1165_v41  ;;  %v5210_v4 = vld [vmem:[#allocation4 + $0x440] ss:$16 sps:$4 sm:$0xff]  }
 0x33f   :  { %v1726_v62 = vmax.f32 %v1725_v26, %v1697_v53  ;;  %v1699_v0 = vmax.f32 %v1629_v56, 0.0  ;;  %v1790_v1 = vsel %vm1781_vm3, %v1153_v48, %v1127_v38  ;;  %v5218_v53 = vld [vmem:[#allocation4 + $0x464] ss:$16 sps:$4 sm:$0xff]   ;;  %v5221_v56 = vld [vmem:[#allocation4 + $0x46c] ss:$16 sps:$4 sm:$0xff]  }
 0x340   :  { %v1739_v2 = vmax.f32 %v1738_v43, %v1698_v60  ;;  %3446 = vmatpush1.bf16.msra.mxu0 %v5186_v42  ;;  %3610 = vmatpush1.bf16.msra.mxu1 %v5189_v45  ;;  %v1700_v3 = vmax.f32 %v1631_v52, 0.0  ;;  %v1791_v5 = vsel %vm1781_vm3, %v1166_v30, %v1140_v27  ;;  %v1812_v19 = vpack.c.bf16 %v1790_v1, %v1790_v1  ;;  %v5212_v43 = vld [vmem:[#allocation4 + $0x444] ss:$16 sps:$4 sm:$0xff]   ;;  %v5213_v42 = vld [vmem:[#allocation4 + $0x448] ss:$16 sps:$4 sm:$0xff]  }
 0x341   :  { %v1727_v9 = vmax.f32 %v1726_v62, %v1699_v0  ;;  %3447 = vmatprep.subr.bf16.mxu0 %v5194_v6  ;;  %3611 = vmatprep.subr.bf16.mxu1 %v5197_v14  ;;  %v1813_v10 = vpack.c.bf16 %v1791_v5, %v1791_v5  ;;  %v5216_v30 = vld [vmem:[#allocation4 + $0x460] ss:$16 sps:$4 sm:$0xff]   ;;  %v5219_v62 = vld [vmem:[#allocation4 + $0x468] ss:$16 sps:$4 sm:$0xff]   ;;  %v5224_v1 = vld [vmem:[#allocation4 + $0x484] ss:$16 sps:$4 sm:$0xff]  }
 0x342   :  { %v1740_v36 = vmax.f32 %v1739_v2, %v1700_v3  ;;  %v1634_v12 = vpop.f32.mrb[88].mxu1  ;;  %v5227_v2 = vld [vmem:[#allocation4 + $0x48c] ss:$16 sps:$4 sm:$0xff]  }
 0x343   :  { %v1635_v54 = vadd.f32 %v1634_v12, %v6085_v34  ;;  %v1636_v13 = vpop.f32.mrb[89].mxu1  ;;  %3449 = vmatprep.mubr.bf16.mxu0 %v1813_v10  ;;  %3613 = vmatprep.mubr.bf16.mxu1 %v1813_v10  ;;  %v5222_v10 = vld [vmem:[#allocation4 + $0x480] ss:$16 sps:$4 sm:$0xff]  }
 0x344   :  { %3448 = vmatpush1.bf16.msra.mxu0 %v5192_v25  ;;  %3612 = vmatpush1.bf16.msra.mxu1 %v5195_v44  ;;  %v1637_v15 = vadd.f32 %v1636_v13, %v6092_v57  ;;  %v1638_v17 = vpop.f32.mrb[90].mxu1  ;;  %v5233_v13 = vld [vmem:[#allocation4 + $0x4ac] ss:$16 sps:$4 sm:$0xff]  }
 0x345   :  { %v1701_v51 = vmax.f32 %v1635_v54, 0.0  ;;  %3458 = vmatprep.subr.bf16.mxu0 %v5200_v8  ;;  %3622 = vmatprep.subr.bf16.mxu1 %v5203_v11  ;;  %v1639_v18 = vadd.f32 %v1638_v17, %v6085_v34  ;;  %v1640_v58 = vpop.f32.mrb[91].mxu1  ;;  %v5225_v8 = vld [vmem:[#allocation4 + $0x488] ss:$16 sps:$4 sm:$0xff]   ;;  %v5230_v54 = vld [vmem:[#allocation4 + $0x4a4] ss:$16 sps:$4 sm:$0xff]  }
 0x346   :  { %v1702_v21 = vmax.f32 %v1637_v15, 0.0  ;;  %v1641_v7 = vadd.f32 %v1640_v58, %v6092_v57 }
 0x347   :  { %v1728_v22 = vmax.f32 %v1727_v9, %v1701_v51  ;;  %v1703_v23 = vmax.f32 %v1639_v18, 0.0  ;;  %3450 = vmatmul.mubr.bf16.vlgmr.msra.gmra.mrb[48].mxu0 %v1812_v19  ;;  %3614 = vmatmul.mubr.bf16.vlgmr.msra.gmra.mrb[112].mxu1 %v1812_v19  ;;  %v5228_v18 = vld [vmem:[#allocation4 + $0x4a0] ss:$16 sps:$4 sm:$0xff]   ;;  %v5231_v19 = vld [vmem:[#allocation4 + $0x4a8] ss:$16 sps:$4 sm:$0xff]  }
 0x348   :  { %v1741_v26 = vmax.f32 %v1740_v36, %v1702_v21  ;;  %3459 = vmatpush1.bf16.msra.mxu0 %v5198_v50  ;;  %3623 = vmatpush1.bf16.msra.mxu1 %v5201_v16  ;;  %v1704_v31 = vmax.f32 %v1641_v7, 0.0  ;;  %v5236_v21 = vld [vmem:[#allocation4 + $0x4c4] ss:$16 sps:$4 sm:$0xff]   ;;  %v5239_v7 = vld [vmem:[#allocation4 + $0x4cc] ss:$16 sps:$4 sm:$0xff]  }
 0x349   :  { %v1729_v33 = vmax.f32 %v1728_v22, %v1703_v23  ;;  %3490 = vmatprep.mubr.bf16.mxu0 %v1815_v24  ;;  %3654 = vmatprep.mubr.bf16.mxu1 %v1815_v24 }
 0x34a   :  { %v1742_v37 = vmax.f32 %v1741_v26, %v1704_v31  ;;  %3460 = vmatprep.subr.bf16.mxu0 %v5206_v29  ;;  %3624 = vmatprep.subr.bf16.mxu1 %v5209_v47  ;;  %v1644_v39 = vpop.f32.mrb[92].mxu1  ;;  %v5234_v26 = vld [vmem:[#allocation4 + $0x4c0] ss:$16 sps:$4 sm:$0xff]   ;;  %v5237_v31 = vld [vmem:[#allocation4 + $0x4c8] ss:$16 sps:$4 sm:$0xff]  }
 0x34b   :  { %v1645_v40 = vadd.f32 %v1644_v39, %v6085_v34  ;;  %v1646_v41 = vpop.f32.mrb[93].mxu1 }
 0x34c   :  { %3461 = vmatpush1.bf16.msra.mxu0 %v5204_v55  ;;  %3625 = vmatpush1.bf16.msra.mxu1 %v5207_v32  ;;  %v1647_v63 = vadd.f32 %v1646_v41, %v6092_v57  ;;  %v1648_v45 = vpop.f32.mrb[94].mxu1 }
 0x34d   :  { %v1705_v46 = vmax.f32 %v1645_v40, 0.0  ;;  %3462 = vmatprep.subr.bf16.mxu0 %v5212_v43  ;;  %3626 = vmatprep.subr.bf16.mxu1 %v5215_v35  ;;  %v1649_v38 = vadd.f32 %v1648_v45, %v6085_v34  ;;  %v1650_v48 = vpop.f32.mrb[95].mxu1  ;;  %v5242_v35 = vld [vmem:[#allocation4 + $0x4e4] ss:$16 sps:$4 sm:$0xff]   ;;  %v5240_v45 = vld [vmem:[#allocation4 + $0x4e0] ss:$16 sps:$4 sm:$0xff]  }
 0x34e   :  { %v1706_v59 = vmax.f32 %v1647_v63, 0.0  ;;  %v1651_v6 = vadd.f32 %v1650_v48, %v6092_v57  ;;  %v5248_v48 = vld [vmem:[#allocation4 + $0x504] ss:$16 sps:$4 sm:$0xff]  }
 0x34f   :  { %v1730_v14 = vmax.f32 %v1729_v33, %v1705_v46  ;;  %v1707_v60 = vmax.f32 %v1649_v38, 0.0  ;;  %v5243_v46 = vld [vmem:[#allocation4 + $0x4e8] ss:$16 sps:$4 sm:$0xff]  }
 0x350   :  { %v1743_v52 = vmax.f32 %v1742_v37, %v1706_v59  ;;  %3463 = vmatpush1.bf16.msra.mxu0 %v5210_v4  ;;  %3627 = vmatpush1.bf16.msra.mxu1 %v5213_v42  ;;  %v1708_v27 = vmax.f32 %v1651_v6, 0.0  ;;  %v5245_v37 = vld [vmem:[#allocation4 + $0x4ec] ss:$16 sps:$4 sm:$0xff]  }
 0x351   :  { %v6120_v0 = vmax.f32 %v1730_v14, %v1707_v60  ;;  %3464 = vmatprep.subr.bf16.mxu0 %v5218_v53  ;;  %3628 = vmatprep.subr.bf16.mxu1 %v5221_v56  ;;  %v5251_v53 = vld [vmem:[#allocation4 + $0x50c] ss:$16 sps:$4 sm:$0xff]  }
 0x352   :  { %v6122_v3 = vmax.f32 %v1743_v52, %v1708_v27  ;;  %v1654_v25 = vpop.f32.mrb[96].mxu1  ;;  %v5246_v52 = vld [vmem:[#allocation4 + $0x500] ss:$16 sps:$4 sm:$0xff]   ;;  %v5249_v27 = vld [vmem:[#allocation4 + $0x508] ss:$16 sps:$4 sm:$0xff]  }
 0x353   :  { %v1655_v44 = vadd.f32 %v1654_v25, %v6085_v34  ;;  %v1656_v5 = vpop.f32.mrb[97].mxu1  ;;  %v5254_v25 = vld [vmem:[#allocation4 + $0x524] ss:$16 sps:$4 sm:$0xff]  }
 0x354   :  { %3465 = vmatpush1.bf16.msra.mxu0 %v5216_v30  ;;  %3629 = vmatpush1.bf16.msra.mxu1 %v5219_v62  ;;  %v1657_v9 = vadd.f32 %v1656_v5, %v6092_v57  ;;  %v1658_v11 = vpop.f32.mrb[98].mxu1 }
 0x355   :  { %3466 = vmatprep.subr.bf16.mxu0 %v5224_v1  ;;  %3630 = vmatprep.subr.bf16.mxu1 %v5227_v2  ;;  %v1659_v36 = vadd.f32 %v1658_v11, %v6085_v34  ;;  %v1660_v12 = vpop.f32.mrb[99].mxu1  ;;  %v1709_v50 = vmax.f32 %v1655_v44, 0.0  ;;  %v5257_v44 = vld [vmem:[#allocation4 + $0x52c] ss:$16 sps:$4 sm:$0xff]  }
 0x356   :  { %v1661_v15 = vadd.f32 %v1660_v12, %v6092_v57  ;;  %v1710_v17 = vmax.f32 %v1657_v9, 0.0  ;;  %v5252_v12 = vld [vmem:[#allocation4 + $0x520] ss:$16 sps:$4 sm:$0xff]  }
 0x357   :  { %v1711_v16 = vmax.f32 %v1659_v36, 0.0 }
 0x358   :  { %3467 = vmatpush1.bf16.msra.mxu0 %v5222_v10  ;;  %3631 = vmatpush1.bf16.msra.mxu1 %v5225_v8  ;;  %v1712_v51 = vmax.f32 %v1661_v15, 0.0 }
 0x359   :  { %v1751_v58 = vmax.f32 %v1709_v50, %v1711_v16  ;;  %3468 = vmatprep.subr.bf16.mxu0 %v5230_v54  ;;  %3632 = vmatprep.subr.bf16.mxu1 %v5233_v13  ;;  %v5255_v54 = vld [vmem:[#allocation4 + $0x528] ss:$16 sps:$4 sm:$0xff]   ;;  %v1732_v13 = vrot.slane %v6120_v0, 4  ;;  %v5260_v50 = vld [vmem:[#allocation4 + $0x544] ss:$16 sps:$4 sm:$0xff]  }
 0x35a   :  { %v1764_v29 = vmax.f32 %v1710_v17, %v1712_v51  ;;  %v1664_v47 = vpop.f32.mrb[100].mxu1  ;;  %v5263_v16 = vld [vmem:[#allocation4 + $0x54c] ss:$16 sps:$4 sm:$0xff]   ;;  %v1745_v17 = vrot.slane %v6122_v3, 4 }
 0x35b   :  { %v1665_v22 = vadd.f32 %v1664_v47, %v6085_v34  ;;  %v1666_v23 = vpop.f32.mrb[101].mxu1 }
 0x35c   :  { %3469 = vmatpush1.bf16.msra.mxu0 %v5228_v18  ;;  %3633 = vmatpush1.bf16.msra.mxu1 %v5231_v19  ;;  %v1667_v24 = vadd.f32 %v1666_v23, %v6092_v57  ;;  %v1668_v55 = vpop.f32.mrb[102].mxu1 }
 0x35d   :  { %v1713_v32 = vmax.f32 %v1665_v22, 0.0  ;;  %3470 = vmatprep.subr.bf16.mxu0 %v5236_v21  ;;  %3634 = vmatprep.subr.bf16.mxu1 %v5239_v7  ;;  %v1669_v33 = vadd.f32 %v1668_v55, %v6085_v34  ;;  %v1670_v43 = vpop.f32.mrb[103].mxu1  ;;  %v5258_v7 = vld [vmem:[#allocation4 + $0x540] ss:$16 sps:$4 sm:$0xff]   ;;  %v1733_v22 = vmax.f32 %v6120_v0, %v1732_v13  ;;  %v5269_v55 = vld [vmem:[#allocation4 + $0x56c] ss:$16 sps:$4 sm:$0xff]  }
 0x35e   :  { %v1714_v39 = vmax.f32 %v1667_v24, 0.0  ;;  %v1671_v40 = vadd.f32 %v1670_v43, %v6092_v57  ;;  %v5264_v0 = vld [vmem:[#allocation4 + $0x560] ss:$16 sps:$4 sm:$0xff]   ;;  %v5290_v13 = vld [vmem:[#allocation4 + $0x5e4] ss:$16 sps:$4 sm:$0xff]  }
 0x35f   :  { %v1752_v41 = vmax.f32 %v1751_v58, %v1713_v32  ;;  %v1715_v63 = vmax.f32 %v1669_v33, 0.0  ;;  %v1746_v32 = vmax.f32 %v6122_v3, %v1745_v17 }
 0x360   :  { %v1765_v4 = vmax.f32 %v1764_v29, %v1714_v39  ;;  %3471 = vmatpush1.bf16.msra.mxu0 %v5234_v26  ;;  %3635 = vmatpush1.bf16.msra.mxu1 %v5237_v31  ;;  %v1716_v42 = vmax.f32 %v1671_v40, 0.0  ;;  %v5261_v29 = vld [vmem:[#allocation4 + $0x548] ss:$16 sps:$4 sm:$0xff]   ;;  %v5266_v31 = vld [vmem:[#allocation4 + $0x564] ss:$16 sps:$4 sm:$0xff]  }
 0x361   :  { %v1753_v38 = vmax.f32 %v1752_v41, %v1715_v63  ;;  %3472 = vmatprep.subr.bf16.mxu0 %v5242_v35  ;;  %3636 = vmatprep.subr.bf16.mxu1 %v5245_v37  ;;  %v5267_v41 = vld [vmem:[#allocation4 + $0x568] ss:$16 sps:$4 sm:$0xff]   ;;  %v1734_v63 = vrot.slane %v1733_v22, 2 }
 0x362   :  { %v1766_v56 = vmax.f32 %v1765_v4, %v1716_v42  ;;  %v1674_v59 = vpop.f32.mrb[104].mxu1  ;;  %v5275_v42 = vld [vmem:[#allocation4 + $0x58c] ss:$16 sps:$4 sm:$0xff]  }
 0x363   :  { %v1675_v6 = vadd.f32 %v1674_v59, %v6085_v34  ;;  %v1676_v14 = vpop.f32.mrb[105].mxu1  ;;  %v5278_v59 = vld [vmem:[#allocation4 + $0x5a4] ss:$16 sps:$4 sm:$0xff]  }
 0x364   :  { %3473 = vmatpush1.bf16.msra.mxu0 %v5240_v45  ;;  %3637 = vmatpush1.bf16.msra.mxu1 %v5243_v46  ;;  %v1677_v60 = vadd.f32 %v1676_v14, %v6092_v57  ;;  %v1678_v30 = vpop.f32.mrb[106].mxu1  ;;  %v1747_v45 = vrot.slane %v1746_v32, 2 }
 0x365   :  { %v1717_v62 = vmax.f32 %v1675_v6, 0.0  ;;  %3474 = vmatprep.subr.bf16.mxu0 %v5248_v48  ;;  %3638 = vmatprep.subr.bf16.mxu1 %v5251_v53  ;;  %v1679_v1 = vadd.f32 %v1678_v30, %v6085_v34  ;;  %v1680_v2 = vpop.f32.mrb[107].mxu1  ;;  %v5273_v48 = vld [vmem:[#allocation4 + $0x588] ss:$16 sps:$4 sm:$0xff]   ;;  %v1735_v53 = vmax.f32 %v1733_v22, %v1734_v63  ;;  %v5281_v6 = vld [vmem:[#allocation4 + $0x5ac] ss:$16 sps:$4 sm:$0xff]  }
 0x366   :  { %v1718_v5 = vmax.f32 %v1677_v60, 0.0  ;;  %v1681_v9 = vadd.f32 %v1680_v2, %v6092_v57  ;;  %v1748_v14 = vmax.f32 %v1746_v32, %v1747_v45  ;;  %v5276_v30 = vld [vmem:[#allocation4 + $0x5a0] ss:$16 sps:$4 sm:$0xff]   ;;  %v5297_v22 = vld [vmem:[#allocation4 + $0x608] ss:$16 sps:$4 sm:$0xff]  }
 0x367   :  { %v1754_v10 = vmax.f32 %v1753_v38, %v1717_v62  ;;  %v1719_v8 = vmax.f32 %v1679_v1, 0.0  ;;  %v5279_v62 = vld [vmem:[#allocation4 + $0x5a8] ss:$16 sps:$4 sm:$0xff]   ;;  %v1736_v1 = vrot.slane %v1735_v53, 1  ;;  %v5311_v32 = vld [vmem:[#allocation4 + $0x64c] ss:$16 sps:$4 sm:$0xff]  }
 0x368   :  { %v1767_v11 = vmax.f32 %v1766_v56, %v1718_v5  ;;  %3475 = vmatpush1.bf16.msra.mxu0 %v5246_v52  ;;  %3639 = vmatpush1.bf16.msra.mxu1 %v5249_v27  ;;  %v1720_v36 = vmax.f32 %v1681_v9, 0.0  ;;  %v1749_v5 = vrot.slane %v1748_v14, 1  ;;  %v5321_v63 = vld [vmem:[#allocation4 + $0x688] ss:$16 sps:$4 sm:$0xff]  }
 0x369   :  { %v1755_v15 = vmax.f32 %v1754_v10, %v1719_v8  ;;  %3476 = vmatprep.subr.bf16.mxu0 %v5254_v25  ;;  %3640 = vmatprep.subr.bf16.mxu1 %v5257_v44  ;;  %v5284_v25 = vld [vmem:[#allocation4 + $0x5c4] ss:$16 sps:$4 sm:$0xff]   ;;  %v5287_v44 = vld [vmem:[#allocation4 + $0x5cc] ss:$16 sps:$4 sm:$0xff]   ;;  %v5327_v45 = vld [vmem:[#allocation4 + $0x6a8] ss:$16 sps:$4 sm:$0xff]  }
 0x36a   :  { %v1768_v51 = vmax.f32 %v1767_v11, %v1720_v36  ;;  %v1684_v18 = vpop.f32.mrb[108].mxu1  ;;  %v5282_v11 = vld [vmem:[#allocation4 + $0x5c0] ss:$16 sps:$4 sm:$0xff]   ;;  %v5285_v36 = vld [vmem:[#allocation4 + $0x5c8] ss:$16 sps:$4 sm:$0xff]  }
 0x36b   :  { %v1685_v19 = vadd.f32 %v1684_v18, %v6085_v34  ;;  %v1686_v58 = vpop.f32.mrb[109].mxu1  ;;  %v5291_v18 = vld [vmem:[#allocation4 + $0x5e8] ss:$16 sps:$4 sm:$0xff]  }
 0x36c   :  { %3477 = vmatpush1.bf16.msra.mxu0 %v5252_v12  ;;  %3641 = vmatpush1.bf16.msra.mxu1 %v5255_v54  ;;  %v1687_v21 = vadd.f32 %v1686_v58, %v6092_v57  ;;  %v1688_v47 = vpop.f32.mrb[110].mxu1  ;;  %v1737_v12 = vmax.f32 %v1735_v53, %v1736_v1  ;;  %v5296_v58 = vld [vmem:[#allocation4 + $0x604] ss:$16 sps:$4 sm:$0xff]   ;;  %v5341_v53 = vld [vmem:[#allocation4 + $0x6ec] ss:$16 sps:$4 sm:$0xff]  }
 0x36d   :  { %v1721_v23 = vmax.f32 %v1685_v19, 0.0  ;;  %3478 = vmatprep.subr.bf16.mxu0 %v5260_v50  ;;  %3642 = vmatprep.subr.bf16.mxu1 %v5263_v16  ;;  %v1689_v24 = vadd.f32 %v1688_v47, %v6085_v34  ;;  %v1690_v26 = vpop.f32.mrb[111].mxu1  ;;  %v5272_v34 = vld [vmem:[#allocation4 + $0x584] ss:$16 sps:$4 sm:$0xff]   ;;  %v1750_v50 = vmax.f32 %v1748_v14, %v1749_v5  ;;  %v1814_v47 = vpack.c.bf16 %v6095_v61, %v6095_v61  ;;  %v5309_v61 = vld [vmem:[#allocation4 + $0x648] ss:$16 sps:$4 sm:$0xff]  }
 0x36e   :  { %v1722_v33 = vmax.f32 %v1687_v21, 0.0  ;;  %v1691_v43 = vadd.f32 %v1690_v26, %v6092_v57  ;;  %v5270_v57 = vld [vmem:[#allocation4 + $0x580] ss:$16 sps:$4 sm:$0xff]   ;;  %v5299_v21 = vld [vmem:[#allocation4 + $0x60c] ss:$16 sps:$4 sm:$0xff]  }
 0x36f   :  { %v1756_v35 = vmax.f32 %v1755_v15, %v1721_v23  ;;  %v1723_v37 = vmax.f32 %v1689_v24, 0.0  ;;  %v5293_v15 = vld [vmem:[#allocation4 + $0x5ec] ss:$16 sps:$4 sm:$0xff]   ;;  %v5302_v23 = vld [vmem:[#allocation4 + $0x624] ss:$16 sps:$4 sm:$0xff]  }
 0x370   :  { %v1769_v39 = vmax.f32 %v1768_v51, %v1722_v33  ;;  %3479 = vmatpush1.bf16.msra.mxu0 %v5258_v7  ;;  %3643 = vmatpush1.bf16.msra.mxu1 %v5261_v29  ;;  %v1724_v40 = vmax.f32 %v1691_v43, 0.0  ;;  %v5288_v51 = vld [vmem:[#allocation4 + $0x5e0] ss:$16 sps:$4 sm:$0xff]   ;;  %v5305_v24 = vld [vmem:[#allocation4 + $0x62c] ss:$16 sps:$4 sm:$0xff]  }
 0x371   :  { %v1757_v4 = vmax.f32 %v1756_v35, %v1723_v37  ;;  %3480 = vmatprep.subr.bf16.mxu0 %v5266_v31  ;;  %3644 = vmatprep.subr.bf16.mxu1 %v5269_v55  ;;  %v5294_v7 = vld [vmem:[#allocation4 + $0x600] ss:$16 sps:$4 sm:$0xff]   ;;  %v5303_v31 = vld [vmem:[#allocation4 + $0x628] ss:$16 sps:$4 sm:$0xff]   ;;  %v5308_v55 = vld [vmem:[#allocation4 + $0x644] ss:$16 sps:$4 sm:$0xff]  }
 0x372   :  { %v1770_v46 = vmax.f32 %v1769_v39, %v1724_v40  ;;  %v5300_v26 = vld [vmem:[#allocation4 + $0x620] ss:$16 sps:$4 sm:$0xff]   ;;  %v5314_v43 = vld [vmem:[#allocation4 + $0x664] ss:$16 sps:$4 sm:$0xff]   ;;  %v5317_v35 = vld [vmem:[#allocation4 + $0x66c] ss:$16 sps:$4 sm:$0xff]  }
 0x373   :  { %v1758_v3 = vrot.slane %v1757_v4, 4  ;;  %v5306_v33 = vld [vmem:[#allocation4 + $0x640] ss:$16 sps:$4 sm:$0xff]   ;;  %v5315_v39 = vld [vmem:[#allocation4 + $0x668] ss:$16 sps:$4 sm:$0xff]  }
 0x374   :  { %v1771_v38 = vrot.slane %v1770_v46, 4  ;;  %3481 = vmatpush1.bf16.msra.mxu0 %v5264_v0  ;;  %3645 = vmatpush1.bf16.msra.mxu1 %v5267_v41  ;;  %v5312_v37 = vld [vmem:[#allocation4 + $0x660] ss:$16 sps:$4 sm:$0xff]   ;;  %v5320_v40 = vld [vmem:[#allocation4 + $0x684] ss:$16 sps:$4 sm:$0xff]  }
 0x375   :  { %v1759_v56 = vmax.f32 %v1757_v4, %v1758_v3  ;;  %3482 = vmatprep.subr.bf16.mxu0 %v5272_v34  ;;  %3646 = vmatprep.subr.bf16.mxu1 %v5275_v42  ;;  %v5323_v0 = vld [vmem:[#allocation4 + $0x68c] ss:$16 sps:$4 sm:$0xff]   ;;  %v5318_v41 = vld [vmem:[#allocation4 + $0x680] ss:$16 sps:$4 sm:$0xff]   ;;  %v5326_v4 = vld [vmem:[#allocation4 + $0x6a4] ss:$16 sps:$4 sm:$0xff]  }
 0x376   :  { %v1772_v60 = vmax.f32 %v1770_v46, %v1771_v38  ;;  %v5329_v34 = vld [vmem:[#allocation4 + $0x6ac] ss:$16 sps:$4 sm:$0xff]   ;;  %v5324_v42 = vld [vmem:[#allocation4 + $0x6a0] ss:$16 sps:$4 sm:$0xff]   ;;  %v5332_v46 = vld [vmem:[#allocation4 + $0x6c4] ss:$16 sps:$4 sm:$0xff]  }
 0x377   :  { %v1760_v52 = vrot.slane %v1759_v56, 2  ;;  %v5335_v3 = vld [vmem:[#allocation4 + $0x6cc] ss:$16 sps:$4 sm:$0xff]   ;;  %v5330_v38 = vld [vmem:[#allocation4 + $0x6c0] ss:$16 sps:$4 sm:$0xff]  }
 0x378   :  { %v1773_v27 = vrot.slane %v1772_v60, 2  ;;  %3483 = vmatpush1.bf16.msra.mxu0 %v5270_v57  ;;  %3647 = vmatpush1.bf16.msra.mxu1 %v5273_v48  ;;  %v5333_v57 = vld [vmem:[#allocation4 + $0x6c8] ss:$16 sps:$4 sm:$0xff]   ;;  %v5338_v48 = vld [vmem:[#allocation4 + $0x6e4] ss:$16 sps:$4 sm:$0xff]  }
 0x379   :  { %v1761_v2 = vmax.f32 %v1759_v56, %v1760_v52  ;;  %3484 = vmatprep.subr.bf16.mxu0 %v5278_v59  ;;  %3648 = vmatprep.subr.bf16.mxu1 %v5281_v6  ;;  %v5336_v56 = vld [vmem:[#allocation4 + $0x6e0] ss:$16 sps:$4 sm:$0xff]   ;;  %v5339_v59 = vld [vmem:[#allocation4 + $0x6e8] ss:$16 sps:$4 sm:$0xff]   ;;  %v5344_v6 = vld [vmem:[#allocation4 + $0x704] ss:$16 sps:$4 sm:$0xff]  }
 0x37a   :  { %v1774_v9 = vmax.f32 %v1772_v60, %v1773_v27  ;;  %v5347_v14 = vld [vmem:[#allocation4 + $0x70c] ss:$16 sps:$4 sm:$0xff]   ;;  %v5342_v60 = vld [vmem:[#allocation4 + $0x700] ss:$16 sps:$4 sm:$0xff]   ;;  %v5345_v52 = vld [vmem:[#allocation4 + $0x708] ss:$16 sps:$4 sm:$0xff]  }
 0x37b   :  { %v1762_v10 = vrot.slane %v1761_v2, 1  ;;  %v5350_v27 = vld [vmem:[#allocation4 + $0x724] ss:$16 sps:$4 sm:$0xff]   ;;  %v5351_v1 = vld [vmem:[#allocation4 + $0x728] ss:$16 sps:$4 sm:$0xff]  }
 0x37c   :  { %v1775_v8 = vrot.slane %v1774_v9, 1  ;;  %3485 = vmatpush1.bf16.msra.mxu0 %v5276_v30  ;;  %3649 = vmatpush1.bf16.msra.mxu1 %v5279_v62  ;;  %v5353_v30 = vld [vmem:[#allocation4 + $0x72c] ss:$16 sps:$4 sm:$0xff]   ;;  %v5348_v62 = vld [vmem:[#allocation4 + $0x720] ss:$16 sps:$4 sm:$0xff]  }
 0x37d   :  { %v1763_v54 = vmax.f32 %v1761_v2, %v1762_v10  ;;  %3486 = vmatprep.subr.bf16.mxu0 %v5284_v25  ;;  %3650 = vmatprep.subr.bf16.mxu1 %v5287_v44  ;;  %v5356_v2 = vld [vmem:[#allocation4 + $0x744] ss:$16 sps:$4 sm:$0xff]   ;;  %v5359_v25 = vld [vmem:[#allocation4 + $0x74c] ss:$16 sps:$4 sm:$0xff]   ;;  %v5354_v44 = vld [vmem:[#allocation4 + $0x740] ss:$16 sps:$4 sm:$0xff]  }
 0x37e   :  { %v1776_v16 = vmax.f32 %v1774_v9, %v1775_v8  ;;  %v5357_v5 = vld [vmem:[#allocation4 + $0x748] ss:$16 sps:$4 sm:$0xff]   ;;  %v5362_v9 = vld [vmem:[#allocation4 + $0x764] ss:$16 sps:$4 sm:$0xff]   ;;  %v5365_v10 = vld [vmem:[#allocation4 + $0x76c] ss:$16 sps:$4 sm:$0xff]  }
 0x37f   :  { %v6145_v17 = vsel %vm1781_vm3, %v1763_v54, %v1737_v12  ;;  %v5360_v8 = vld [vmem:[#allocation4 + $0x760] ss:$16 sps:$4 sm:$0xff]   ;;  %v5371_v12 = vld [vmem:[#allocation4 + $0x78c] ss:$16 sps:$4 sm:$0xff]  }
 0x380   :  { %3487 = vmatpush1.bf16.msra.mxu0 %v5282_v11  ;;  %3651 = vmatpush1.bf16.msra.mxu1 %v5285_v36  ;;  %v1807_v19 = vsel %vm1781_vm3, %v1776_v16, %v1750_v50  ;;  %v5363_v11 = vld [vmem:[#allocation4 + $0x768] ss:$16 sps:$4 sm:$0xff]   ;;  %v5368_v36 = vld [vmem:[#allocation4 + $0x784] ss:$16 sps:$4 sm:$0xff]   ;;  %v5366_v54 = vld [vmem:[#allocation4 + $0x780] ss:$16 sps:$4 sm:$0xff]  }
 0x381   :  { %3488 = vmatprep.subr.bf16.mxu0 %v5290_v13  ;;  %3652 = vmatprep.subr.bf16.mxu1 %v5293_v15  ;;  %v1817_v29 = vpack.c.bf16 %v1807_v19, %v1807_v19  ;;  %v5369_v13 = vld [vmem:[#allocation4 + $0x788] ss:$16 sps:$4 sm:$0xff]   ;;  %v5374_v15 = vld [vmem:[#allocation4 + $0x7a4] ss:$16 sps:$4 sm:$0xff]   ;;  %v5377_v50 = vld [vmem:[#allocation4 + $0x7ac] ss:$16 sps:$4 sm:$0xff]  }
 0x382   :  { %v5372_v16 = vld [vmem:[#allocation4 + $0x7a0] ss:$16 sps:$4 sm:$0xff]   ;;  %v5383_v19 = vld [vmem:[#allocation4 + $0x7cc] ss:$16 sps:$4 sm:$0xff]  }
 0x384   :  { %3489 = vmatpush1.bf16.msra.mxu0 %v5288_v51  ;;  %3653 = vmatpush1.bf16.msra.mxu1 %v5291_v18  ;;  %v5375_v51 = vld [vmem:[#allocation4 + $0x7a8] ss:$16 sps:$4 sm:$0xff]   ;;  %v5380_v18 = vld [vmem:[#allocation4 + $0x7c4] ss:$16 sps:$4 sm:$0xff]  }
 0x385   :  { %3499 = vmatprep.subr.bf16.mxu0 %v5296_v58  ;;  %3663 = vmatprep.subr.bf16.mxu1 %v5299_v21  ;;  %v5378_v58 = vld [vmem:[#allocation4 + $0x7c0] ss:$16 sps:$4 sm:$0xff]   ;;  %v5381_v21 = vld [vmem:[#allocation4 + $0x7c8] ss:$16 sps:$4 sm:$0xff]  }
 0x387   :  { %3491 = vmatmul.mubr.bf16.vlgmr.msra.gmra.mrb[48].mxu0 %v1814_v47  ;;  %3655 = vmatmul.mubr.bf16.vlgmr.msra.gmra.mrb[112].mxu1 %v1814_v47  ;;  %v5384_v47 = vld [vmem:[#allocation4 + $0x7e0] ss:$16 sps:$4 sm:$0xff]  }
 0x388   :  { %3500 = vmatpush1.bf16.msra.mxu0 %v5294_v7  ;;  %3531 = vmatprep.mubr.bf16.mxu0 %v1817_v29  ;;  %v5386_v7 = vld [vmem:[#allocation4 + $0x7e4] ss:$16 sps:$4 sm:$0xff]  }
 0x389   :  { %3664 = vmatpush1.bf16.msra.mxu1 %v5297_v22  ;;  %3695 = vmatprep.mubr.bf16.mxu1 %v1817_v29  ;;  %v5389_v29 = vld [vmem:[#allocation4 + $0x7ec] ss:$16 sps:$4 sm:$0xff]   ;;  %v5387_v22 = vld [vmem:[#allocation4 + $0x7e8] ss:$16 sps:$4 sm:$0xff]  }
 0x38a   :  { %3501 = vmatprep.subr.bf16.mxu0 %v5302_v23  ;;  %3665 = vmatprep.subr.bf16.mxu1 %v5305_v24  ;;  %v5392_v23 = vld [vmem:[#allocation6 + $0x4] ss:$8 sps:$4 sm:$0xff]   ;;  %v5390_v24 = vld [vmem:[#allocation6] ss:$8 sps:$4 sm:$0xff]  }
 0x38c   :  { %3502 = vmatpush1.bf16.msra.mxu0 %v5300_v26  ;;  %v1816_v26 = vpack.c.bf16 %v6145_v17, %v6145_v17  ;;  %v5407_v17 = vld [vmem:[#allocation6 + $0x54] ss:$8 sps:$4 sm:$0xff]  }
 0x38d   :  { %3666 = vmatpush1.bf16.msra.mxu1 %v5303_v31  ;;  %3503 = vmatprep.subr.bf16.mxu0 %v5308_v55  ;;  %v5395_v31 = vld [vmem:[#allocation6 + $0x14] ss:$8 sps:$4 sm:$0xff]   ;;  %v5393_v55 = vld [vmem:[#allocation6 + $0x10] ss:$8 sps:$4 sm:$0xff]  }
 0x38e   :  { %3667 = vmatprep.subr.bf16.mxu1 %v5311_v32  ;;  %v5398_v32 = vld [vmem:[#allocation6 + $0x24] ss:$8 sps:$4 sm:$0xff]  }
 0x390   :  { %3504 = vmatpush1.bf16.msra.mxu0 %v5306_v33  ;;  %v5396_v33 = vld [vmem:[#allocation6 + $0x20] ss:$8 sps:$4 sm:$0xff]  }
 0x391   :  { %3668 = vmatpush1.bf16.msra.mxu1 %v5309_v61  ;;  %3505 = vmatprep.subr.bf16.mxu0 %v5314_v43  ;;  %v5401_v61 = vld [vmem:[#allocation6 + $0x34] ss:$8 sps:$4 sm:$0xff]   ;;  %v5399_v43 = vld [vmem:[#allocation6 + $0x30] ss:$8 sps:$4 sm:$0xff]  }
 0x392   :  { %3669 = vmatprep.subr.bf16.mxu1 %v5317_v35  ;;  %v5404_v35 = vld [vmem:[#allocation6 + $0x44] ss:$8 sps:$4 sm:$0xff]  }
 0x394   :  { %3506 = vmatpush1.bf16.msra.mxu0 %v5312_v37  ;;  %v5402_v37 = vld [vmem:[#allocation6 + $0x40] ss:$8 sps:$4 sm:$0xff]  }
 0x395   :  { %3670 = vmatpush1.bf16.msra.mxu1 %v5315_v39  ;;  %3507 = vmatprep.subr.bf16.mxu0 %v5320_v40  ;;  %v5405_v39 = vld [vmem:[#allocation6 + $0x50] ss:$8 sps:$4 sm:$0xff]   ;;  %v5410_v40 = vld [vmem:[#allocation6 + $0x64] ss:$8 sps:$4 sm:$0xff]  }
 0x396   :  { %3671 = vmatprep.subr.bf16.mxu1 %v5323_v0  ;;  %v5408_v0 = vld [vmem:[#allocation6 + $0x60] ss:$8 sps:$4 sm:$0xff]  }
 0x398   :  { %3508 = vmatpush1.bf16.msra.mxu0 %v5318_v41  ;;  %v5413_v41 = vld [vmem:[#allocation6 + $0x74] ss:$8 sps:$4 sm:$0xff]  }
 0x399   :  { %3672 = vmatpush1.bf16.msra.mxu1 %v5321_v63  ;;  %3509 = vmatprep.subr.bf16.mxu0 %v5326_v4  ;;  %v5411_v63 = vld [vmem:[#allocation6 + $0x70] ss:$8 sps:$4 sm:$0xff]   ;;  %v5416_v4 = vld [vmem:[#allocation6 + $0x84] ss:$8 sps:$4 sm:$0xff]  }
 0x39a   :  { %3673 = vmatprep.subr.bf16.mxu1 %v5329_v34  ;;  %v5414_v34 = vld [vmem:[#allocation6 + $0x80] ss:$8 sps:$4 sm:$0xff]  }
 0x39c   :  { %3510 = vmatpush1.bf16.msra.mxu0 %v5324_v42  ;;  %v5419_v42 = vld [vmem:[#allocation6 + $0x94] ss:$8 sps:$4 sm:$0xff]  }
 0x39d   :  { %3674 = vmatpush1.bf16.msra.mxu1 %v5327_v45  ;;  %3511 = vmatprep.subr.bf16.mxu0 %v5332_v46  ;;  %v5417_v45 = vld [vmem:[#allocation6 + $0x90] ss:$8 sps:$4 sm:$0xff]   ;;  %v5422_v46 = vld [vmem:[#allocation6 + $0xa4] ss:$8 sps:$4 sm:$0xff]  }
 0x39e   :  { %3675 = vmatprep.subr.bf16.mxu1 %v5335_v3  ;;  %v5420_v3 = vld [vmem:[#allocation6 + $0xa0] ss:$8 sps:$4 sm:$0xff]  }
 0x3a0   :  { %3512 = vmatpush1.bf16.msra.mxu0 %v5330_v38  ;;  %v5425_v38 = vld [vmem:[#allocation6 + $0xb4] ss:$8 sps:$4 sm:$0xff]  }
 0x3a1   :  { %3676 = vmatpush1.bf16.msra.mxu1 %v5333_v57  ;;  %3513 = vmatprep.subr.bf16.mxu0 %v5338_v48  ;;  %v5423_v57 = vld [vmem:[#allocation6 + $0xb0] ss:$8 sps:$4 sm:$0xff]   ;;  %v5428_v48 = vld [vmem:[#allocation6 + $0xc4] ss:$8 sps:$4 sm:$0xff]  }
 0x3a2   :  { %3677 = vmatprep.subr.bf16.mxu1 %v5341_v53  ;;  %v5426_v53 = vld [vmem:[#allocation6 + $0xc0] ss:$8 sps:$4 sm:$0xff]  }
 0x3a4   :  { %3514 = vmatpush1.bf16.msra.mxu0 %v5336_v56  ;;  %v5431_v56 = vld [vmem:[#allocation6 + $0xd4] ss:$8 sps:$4 sm:$0xff]  }
 0x3a5   :  { %3678 = vmatpush1.bf16.msra.mxu1 %v5339_v59  ;;  %3515 = vmatprep.subr.bf16.mxu0 %v5344_v6  ;;  %v5429_v59 = vld [vmem:[#allocation6 + $0xd0] ss:$8 sps:$4 sm:$0xff]   ;;  %v5434_v6 = vld [vmem:[#allocation6 + $0xe4] ss:$8 sps:$4 sm:$0xff]  }
 0x3a6   :  { %3679 = vmatprep.subr.bf16.mxu1 %v5347_v14  ;;  %v5432_v14 = vld [vmem:[#allocation6 + $0xe0] ss:$8 sps:$4 sm:$0xff]  }
 0x3a8   :  { %3516 = vmatpush1.bf16.msra.mxu0 %v5342_v60  ;;  %v5437_v60 = vld [vmem:[#allocation6 + $0xf4] ss:$8 sps:$4 sm:$0xff]  }
 0x3a9   :  { %3680 = vmatpush1.bf16.msra.mxu1 %v5345_v52  ;;  %3517 = vmatprep.subr.bf16.mxu0 %v5350_v27  ;;  %v5435_v52 = vld [vmem:[#allocation6 + $0xf0] ss:$8 sps:$4 sm:$0xff]   ;;  %v5440_v27 = vld [vmem:[#allocation6 + $0x104] ss:$8 sps:$4 sm:$0xff]  }
 0x3aa   :  { %3681 = vmatprep.subr.bf16.mxu1 %v5353_v30  ;;  %v4208_v30 = vld [vmem:[%s6290_s11 + $0x80] sm:$0xff] }
 0x3ac   :  { %3518 = vmatpush1.bf16.msra.mxu0 %v5348_v62  ;;  %v4209_v62 = vld [vmem:[%s6290_s11 + $0x88] sm:$0xff] }
 0x3ad   :  { %3682 = vmatpush1.bf16.msra.mxu1 %v5351_v1  ;;  %3519 = vmatprep.subr.bf16.mxu0 %v5356_v2  ;;  %v4192_v1 = vld [vmem:[%s6290_s11] sm:$0xff]  ;;  %v4913_v2 = vpack.c.bf16 %v4209_v62, %v4208_v30  ;;  %v5443_v30 = vld [vmem:[#allocation6 + $0x114] ss:$8 sps:$4 sm:$0xff]  }
 0x3ae   :  { %3683 = vmatprep.subr.bf16.mxu1 %v5359_v25  ;;  %v4193_v25 = vld [vmem:[%s6290_s11 + $0x8] sm:$0xff] }
 0x3b0   :  { %3520 = vmatpush1.bf16.msra.mxu0 %v5354_v44  ;;  %v4210_v44 = vld [vmem:[%s6290_s11 + $0x90] sm:$0xff] }
 0x3b1   :  { %3684 = vmatpush1.bf16.msra.mxu1 %v5357_v5  ;;  %3521 = vmatprep.subr.bf16.mxu0 %v5362_v9  ;;  %v4211_v5 = vld [vmem:[%s6290_s11 + $0x98] sm:$0xff]  ;;  %v4915_v9 = vpack.c.bf16 %v4193_v25, %v4192_v1  ;;  %v5444_v25 = vld [vmem:[#allocation6 + $0x120] ss:$8 sps:$4 sm:$0xff]  }
 0x3b2   :  { %3685 = vmatprep.subr.bf16.mxu1 %v5365_v10  ;;  %v4917_v10 = vpack.c.bf16 %v4211_v5, %v4210_v44  ;;  %v5441_v1 = vld [vmem:[#allocation6 + $0x110] ss:$8 sps:$4 sm:$0xff]   ;;  %v5449_v44 = vld [vmem:[#allocation6 + $0x134] ss:$8 sps:$4 sm:$0xff]  }
 0x3b3   :  { %v5447_v5 = vld [vmem:[#allocation6 + $0x130] ss:$8 sps:$4 sm:$0xff]  }
 0x3b4   :  { %3522 = vmatpush1.bf16.msra.mxu0 %v5360_v8  ;;  %v4194_v8 = vld [vmem:[%s6290_s11 + $0x10] sm:$0xff] }
 0x3b5   :  { %3686 = vmatpush1.bf16.msra.mxu1 %v5363_v11  ;;  %3523 = vmatprep.subr.bf16.mxu0 %v5368_v36  ;;  %v4195_v11 = vld [vmem:[%s6290_s11 + $0x18] sm:$0xff]  ;;  %v4212_v36 = vld [vmem:[%s6290_s11 + $0xa0] sm:$0xff] }
 0x3b6   :  { %3687 = vmatprep.subr.bf16.mxu1 %v5371_v12  ;;  %v4213_v12 = vld [vmem:[%s6290_s11 + $0xa8] sm:$0xff] }
 0x3b8   :  { %3524 = vmatpush1.bf16.msra.mxu0 %v5366_v54  ;;  %v4919_v54 = vpack.c.bf16 %v4195_v11, %v4194_v8  ;;  %v5455_v8 = vld [vmem:[#allocation6 + $0x154] ss:$8 sps:$4 sm:$0xff]   ;;  %v5453_v11 = vld [vmem:[#allocation6 + $0x150] ss:$8 sps:$4 sm:$0xff]  }
 0x3b9   :  { %3688 = vmatpush1.bf16.msra.mxu1 %v5369_v13  ;;  %3525 = vmatprep.subr.bf16.mxu0 %v5374_v15  ;;  %v4921_v13 = vpack.c.bf16 %v4213_v12, %v4212_v36  ;;  %v4196_v15 = vld [vmem:[%s6290_s11 + $0x20] sm:$0xff] }
 0x3ba   :  { %3689 = vmatprep.subr.bf16.mxu1 %v5377_v50  ;;  %v4197_v50 = vld [vmem:[%s6290_s11 + $0x28] sm:$0xff] }
 0x3bb   :  { %v5458_v36 = vld [vmem:[#allocation6 + $0x164] ss:$8 sps:$4 sm:$0xff]   ;;  %v5456_v12 = vld [vmem:[#allocation6 + $0x160] ss:$8 sps:$4 sm:$0xff]  }
 0x3bc   :  { %3526 = vmatpush1.bf16.msra.mxu0 %v5372_v16  ;;  %v4214_v16 = vld [vmem:[%s6290_s11 + $0xb0] sm:$0xff] }
 0x3bd   :  { %3690 = vmatpush1.bf16.msra.mxu1 %v5375_v51  ;;  %3527 = vmatprep.subr.bf16.mxu0 %v5380_v18  ;;  %v4215_v51 = vld [vmem:[%s6290_s11 + $0xb8] sm:$0xff]  ;;  %v4923_v18 = vpack.c.bf16 %v4197_v50, %v4196_v15  ;;  %v5464_v15 = vld [vmem:[#allocation6 + $0x184] ss:$8 sps:$4 sm:$0xff]   ;;  %v5462_v50 = vld [vmem:[#allocation6 + $0x180] ss:$8 sps:$4 sm:$0xff]  }
 0x3be   :  { %3691 = vmatprep.subr.bf16.mxu1 %v5383_v19  ;;  %v4925_v19 = vpack.c.bf16 %v4215_v51, %v4214_v16  ;;  %v5467_v16 = vld [vmem:[#allocation6 + $0x194] ss:$8 sps:$4 sm:$0xff]   ;;  %v5465_v51 = vld [vmem:[#allocation6 + $0x190] ss:$8 sps:$4 sm:$0xff]  }
 0x3c0   :  { %3528 = vmatpush1.bf16.msra.mxu0 %v5378_v58  ;;  %v4198_v58 = vld [vmem:[%s6290_s11 + $0x30] sm:$0xff] }
 0x3c1   :  { %3692 = vmatpush1.bf16.msra.mxu1 %v5381_v21  ;;  %3529 = vmatprep.subr.bf16.mxu0 %v5386_v7  ;;  %v4199_v21 = vld [vmem:[%s6290_s11 + $0x38] sm:$0xff]  ;;  %v4216_v7 = vld [vmem:[%s6290_s11 + $0xc0] sm:$0xff] }
 0x3c2   :  { %3693 = vmatprep.subr.bf16.mxu1 %v5389_v29  ;;  %v4217_v29 = vld [vmem:[%s6290_s11 + $0xc8] sm:$0xff] }
 0x3c4   :  { %3530 = vmatpush1.bf16.msra.mxu0 %v5384_v47  ;;  %v4927_v47 = vpack.c.bf16 %v4199_v21, %v4198_v58  ;;  %v5473_v58 = vld [vmem:[#allocation6 + $0x1b4] ss:$8 sps:$4 sm:$0xff]   ;;  %v5471_v21 = vld [vmem:[#allocation6 + $0x1b0] ss:$8 sps:$4 sm:$0xff]  }
 0x3c5   :  { %3694 = vmatpush1.bf16.msra.mxu1 %v5387_v22  ;;  %4108 = vmatprep.subr.bf16.mxu0 %v5392_v23  ;;  %v4929_v22 = vpack.c.bf16 %v4217_v29, %v4216_v7  ;;  %v4200_v23 = vld [vmem:[%s6290_s11 + $0x40] sm:$0xff] }
 0x3c6   :  { %4914 = vmatprep.subr.bf16.mxu1 %v4913_v2  ;;  %v5446_v2 = vld [vmem:[#allocation6 + $0x124] ss:$8 sps:$4 sm:$0xff]   ;;  %v5474_v29 = vld [vmem:[#allocation6 + $0x1c0] ss:$8 sps:$4 sm:$0xff]  }
 0x3c7   :  { %3532 = vmatmul.mubr.bf16.vlgmr.msra.gmra.mrb[48].mxu0 %v1816_v26  ;;  %v5476_v7 = vld [vmem:[#allocation6 + $0x1c4] ss:$8 sps:$4 sm:$0xff]  }
 0x3c8   :  { %3696 = vmatmul.mubr.bf16.vlgmr.msra.gmra.mrb[112].mxu1 %v1816_v26  ;;  %4109 = vmatpush1.bf16.msra.mxu0 %v5390_v24  ;;  %v4201_v24 = vld [vmem:[%s6290_s11 + $0x48] sm:$0xff]  ;;  %v4218_v26 = vld [vmem:[%s6290_s11 + $0xd0] sm:$0xff] }
 0x3c9   :  { %4110 = vmatprep.subr.bf16.mxu0 %v5395_v31  ;;  %4916 = vmatpush3.bf16.msra.mxu1 %v4915_v9  ;;  %v4219_v31 = vld [vmem:[%s6290_s11 + $0xd8] sm:$0xff]  ;;  %v5452_v9 = vld [vmem:[#allocation6 + $0x144] ss:$8 sps:$4 sm:$0xff]  }
 0x3ca   :  { %4918 = vmatprep.subr.bf16.mxu1 %v4917_v10  ;;  %v5450_v10 = vld [vmem:[#allocation6 + $0x140] ss:$8 sps:$4 sm:$0xff]  }
 0x3cc   :  { %4111 = vmatpush1.bf16.msra.mxu0 %v5393_v55  ;;  %v4931_v55 = vpack.c.bf16 %v4201_v24, %v4200_v23  ;;  %v5477_v23 = vld [vmem:[#allocation6 + $0x1d0] ss:$8 sps:$4 sm:$0xff]  }
 0x3cd   :  { %4112 = vmatprep.subr.bf16.mxu0 %v5398_v32  ;;  %4920 = vmatpush3.bf16.msra.mxu1 %v4919_v54  ;;  %v4933_v32 = vpack.c.bf16 %v4219_v31, %v4218_v26  ;;  %v5461_v54 = vld [vmem:[#allocation6 + $0x174] ss:$8 sps:$4 sm:$0xff]   ;;  %v5482_v26 = vld [vmem:[#allocation6 + $0x1e4] ss:$8 sps:$4 sm:$0xff]   ;;  %v5480_v31 = vld [vmem:[#allocation6 + $0x1e0] ss:$8 sps:$4 sm:$0xff]  }
 0x3ce   :  { %4922 = vmatprep.subr.bf16.mxu1 %v4921_v13  ;;  %v5459_v13 = vld [vmem:[#allocation6 + $0x170] ss:$8 sps:$4 sm:$0xff]  }
 0x3d0   :  { %4113 = vmatpush1.bf16.msra.mxu0 %v5396_v33  ;;  %v4202_v33 = vld [vmem:[%s6290_s11 + $0x50] sm:$0xff] }
 0x3d1   :  { %4114 = vmatprep.subr.bf16.mxu0 %v5401_v61  ;;  %4924 = vmatpush3.bf16.msra.mxu1 %v4923_v18  ;;  %v4203_v61 = vld [vmem:[%s6290_s11 + $0x58] sm:$0xff]  ;;  %v5470_v18 = vld [vmem:[#allocation6 + $0x1a4] ss:$8 sps:$4 sm:$0xff]  }
 0x3d2   :  { %4926 = vmatprep.subr.bf16.mxu1 %v4925_v19  ;;  %v5468_v19 = vld [vmem:[#allocation6 + $0x1a0] ss:$8 sps:$4 sm:$0xff]  }
 0x3d4   :  { %4115 = vmatpush1.bf16.msra.mxu0 %v5399_v43  ;;  %v4220_v43 = vld [vmem:[%s6290_s11 + $0xe0] sm:$0xff] }
 0x3d5   :  { %4116 = vmatprep.subr.bf16.mxu0 %v5404_v35  ;;  %4928 = vmatpush3.bf16.msra.mxu1 %v4927_v47  ;;  %v4221_v35 = vld [vmem:[%s6290_s11 + $0xe8] sm:$0xff]  ;;  %v2086_v47 = vsub.s32 2, %v5925_v20 }
 0x3d6   :  { %4930 = vmatprep.subr.bf16.mxu1 %v4929_v22  ;;  %v5479_v22 = vld [vmem:[#allocation6 + $0x1d4] ss:$8 sps:$4 sm:$0xff]  }
 0x3d8   :  { %4117 = vmatpush1.bf16.msra.mxu0 %v5402_v37  ;;  %v4935_v37 = vpack.c.bf16 %v4203_v61, %v4202_v33  ;;  %v5483_v33 = vld [vmem:[#allocation6 + $0x1f0] ss:$8 sps:$4 sm:$0xff]  }
 0x3d9   :  { %4118 = vmatprep.subr.bf16.mxu0 %v5407_v17  ;;  %4932 = vmatpush3.bf16.msra.mxu1 %v4931_v55  ;;  %v4937_v17 = vpack.c.bf16 %v4221_v35, %v4220_v43  ;;  %v4204_v35 = vld [vmem:[%s6290_s11 + $0x60] sm:$0xff] }
 0x3da   :  { %4934 = vmatprep.subr.bf16.mxu1 %v4933_v32  ;;  %v5485_v32 = vld [vmem:[#allocation6 + $0x1f4] ss:$8 sps:$4 sm:$0xff]  }
 0x3dc   :  { %4119 = vmatpush1.bf16.msra.mxu0 %v5405_v39  ;;  %v6233_v39 = vld [vmem:[%s6287_s8] sm:$0xf] }
 0x3dd   :  { %4120 = vmatprep.subr.bf16.mxu0 %v5410_v40  ;;  %4936 = vmatpush3.bf16.msra.mxu1 %v4935_v37  ;;  %v2090_v40 = vsub.s32 3, %v5925_v20  ;;  %v2087_v24 = vrot.slane %v6233_v39, %v2086_v47  ;;  %v4205_v37 = vld [vmem:[%s6290_s11 + $0x68] sm:$0xff] }
 0x3de   :  { %4938 = vmatprep.subr.bf16.mxu1 %v4937_v17  ;;  %v4939_v17 = vpack.c.bf16 %v4205_v37, %v4204_v35 }
 0x3e0   :  { %4121 = vmatpush1.bf16.msra.mxu0 %v5408_v0  ;;  %v2079_v0 = vrot.slane %v6233_v39, %v5928_v49 }
 0x3e1   :  { %4122 = vmatprep.subr.bf16.mxu0 %v5413_v41  ;;  %v2083_v41 = vrot.slane %v6233_v39, %v5934_v28  ;;  %4940 = vmatpush3.bf16.msra.mxu1 %v4939_v17 }
 0x3e4   :  { %4123 = vmatpush1.bf16.msra.mxu0 %v5411_v63  ;;  %v2091_v63 = vrot.slane %v6233_v39, %v2090_v40  ;;  %v4222_v39 = vld [vmem:[%s6290_s11 + $0xf0] sm:$0xff]  ;;  %v4223_v40 = vld [vmem:[%s6290_s11 + $0xf8] sm:$0xff] }
 0x3e5   :  { %4124 = vmatprep.subr.bf16.mxu0 %v5416_v4 }
 0x3e8   :  { %4125 = vmatpush1.bf16.msra.mxu0 %v5414_v34 }
 0x3e9   :  { %4126 = vmatprep.subr.bf16.mxu0 %v5419_v42 }
 0x3ec   :  { %4127 = vmatpush1.bf16.msra.mxu0 %v5417_v45 }
 0x3ed   :  { %4128 = vmatprep.subr.bf16.mxu0 %v5422_v46 }
 0x3f0   :  { %4129 = vmatpush1.bf16.msra.mxu0 %v5420_v3 }
 0x3f1   :  { %4130 = vmatprep.subr.bf16.mxu0 %v5425_v38 }
 0x3f4   :  { %4131 = vmatpush1.bf16.msra.mxu0 %v5423_v57 }
 0x3f5   :  { %4132 = vmatprep.subr.bf16.mxu0 %v5428_v48 }
 0x3f8   :  { %4133 = vmatpush1.bf16.msra.mxu0 %v5426_v53 }
 0x3f9   :  { %4134 = vmatprep.subr.bf16.mxu0 %v5431_v56 }
 0x3fc   :  { %4135 = vmatpush1.bf16.msra.mxu0 %v5429_v59 }
 0x3fd   :  { %4136 = vmatprep.subr.bf16.mxu0 %v5434_v6 }
 0x400   :  { %4137 = vmatpush1.bf16.msra.mxu0 %v5432_v14 }
 0x401   :  { %4138 = vmatprep.subr.bf16.mxu0 %v5437_v60 }
 0x404   :  { %4139 = vmatpush1.bf16.msra.mxu0 %v5435_v52  ;;  %v5438_v52 = vld [vmem:[#allocation6 + $0x100] ss:$8 sps:$4 sm:$0xff]  }
 0x405   :  { %4149 = vmatprep.subr.bf16.mxu0 %v5440_v27 }
 0x49a   :  { %v3533_v4 = vpop.f32.mrb[48].mxu0 }
 0x49b   :  { %v4961_v34 = vadd.f32 %v3533_v4, %v2079_v0  ;;  %v6241_v42 = vpop.f32.mrb[112].mxu1  ;;  %v3535_v45 = vpop.f32.mrb[49].mxu0  ;;  %v4941_v0 = vpack.c.bf16 %v4223_v40, %v4222_v39 }
 0x49c   :  { %v4962_v46 = vadd.f32 %v3535_v45, %v2083_v41  ;;  %v3699_v3 = vpop.f32.mrb[113].mxu1  ;;  %v3537_v38 = vpop.f32.mrb[50].mxu0  ;;  %v4963_v55 = vadd.f32 %v6241_v42, %v2087_v24  ;;  %v4206_v41 = vld [vmem:[%s6290_s11 + $0x70] sm:$0xff] }
 0x49d   :  { %v3704_v57 = vmax.f32 %v4961_v34, 0.0  ;;  %v4964_v48 = vadd.f32 %v3699_v3, %v2091_v63  ;;  %v3701_v53 = vpop.f32.mrb[114].mxu1  ;;  %v3538_v56 = vpop.f32.mrb[51].mxu0  ;;  %v4207_v63 = vld [vmem:[%s6290_s11 + $0x78] sm:$0xff]  ;;  %4942 = vmatprep.subr.bf16.mxu1 %v4941_v0  ;;  %v3776_v34 = vld [vmem:[%s6289_s10] sm:$0x3] }
 0x49e   :  { %v3705_v59 = vmax.f32 %v4962_v46, 0.0  ;;  %v3702_v6 = vpop.f32.mrb[115].mxu1  ;;  %v3706_v61 = vmax.f32 %v4963_v55, 0.0  ;;  %v4943_v4 = vpack.c.bf16 %v4207_v63, %v4206_v41  ;;  %v3781_v42 = vrot.slane %v3776_v34, %v5928_v49  ;;  %v4754_v49 = vld [vmem:[%s6291_s12] ss:$0 sm:$0xff] }
 0x49f   :  { %v3707_v14 = vmax.f32 %v4964_v48, 0.0  ;;  %v3708_v27 = vpack.c.bf16 %v3704_v57, %v3704_v57  ;;  %v3785_v45 = vrot.slane %v3776_v34, %v5934_v28  ;;  %v5566_v6 = vmov 1966171168  }
 0x4a0   :  { %v3709_v60 = vpack.c.bf16 %v3705_v59, %v3705_v59  ;;  %v3710_v43 = vpack.c.bf16 %v3706_v61, %v3706_v61  ;;  %4944 = vmatpush3.bf16.msra.mxu1 %v4943_v4 }
 0x4a1   :  { %v3711_v62 = vpack.c.bf16 %v3707_v14, %v3707_v14  ;;  %v4303_v14 = vunpack.c.l.s4 %v5566_v6 }
 0x4a2   :  { %4140 = vmatprep.mubr.bf16.mxu0 %v3709_v60 }
 0x4a3   :  { %4141 = vmatmul.mubr.bf16.vlgmr.msra.gmra.mrb[52].mxu0 %v3708_v27  ;;  %v4304_v60 = vunpack.c.0.s8 %v4303_v14 }
 0x4a4   :  { %4150 = vmatpush1.bf16.msra.mxu0 %v5438_v52  ;;  %4181 = vmatprep.mubr.bf16.mxu0 %v3711_v62 }
 0x4a5   :  { %4151 = vmatprep.subr.bf16.mxu0 %v5443_v30  ;;  %v4307_v30 = vsub.s32 %v4304_v60, %v5925_v20 }
 0x4a8   :  { %4152 = vmatpush1.bf16.msra.mxu0 %v5441_v1 }
 0x4a9   :  { %4153 = vmatprep.subr.bf16.mxu0 %v5446_v2 }
 0x4ac   :  { %4154 = vmatpush1.bf16.msra.mxu0 %v5444_v25 }
 0x4ad   :  { %4155 = vmatprep.subr.bf16.mxu0 %v5449_v44 }
 0x4b0   :  { %4156 = vmatpush1.bf16.msra.mxu0 %v5447_v5 }
 0x4b1   :  { %4157 = vmatprep.subr.bf16.mxu0 %v5452_v9 }
 0x4b4   :  { %4158 = vmatpush1.bf16.msra.mxu0 %v5450_v10 }
 0x4b5   :  { %4159 = vmatprep.subr.bf16.mxu0 %v5455_v8 }
 0x4b8   :  { %4160 = vmatpush1.bf16.msra.mxu0 %v5453_v11 }
 0x4b9   :  { %4161 = vmatprep.subr.bf16.mxu0 %v5458_v36 }
 0x4bc   :  { %4162 = vmatpush1.bf16.msra.mxu0 %v5456_v12 }
 0x4bd   :  { %4163 = vmatprep.subr.bf16.mxu0 %v5461_v54 }
 0x4c0   :  { %4164 = vmatpush1.bf16.msra.mxu0 %v5459_v13 }
 0x4c1   :  { %4165 = vmatprep.subr.bf16.mxu0 %v5464_v15 }
 0x4c4   :  { %4166 = vmatpush1.bf16.msra.mxu0 %v5462_v50 }
 0x4c5   :  { %4167 = vmatprep.subr.bf16.mxu0 %v5467_v16 }
 0x4c8   :  { %4168 = vmatpush1.bf16.msra.mxu0 %v5465_v51 }
 0x4c9   :  { %4169 = vmatprep.subr.bf16.mxu0 %v5470_v18 }
 0x4cc   :  { %4170 = vmatpush1.bf16.msra.mxu0 %v5468_v19 }
 0x4cd   :  { %4171 = vmatprep.subr.bf16.mxu0 %v5473_v58 }
 0x4d0   :  { %4172 = vmatpush1.bf16.msra.mxu0 %v5471_v21 }
 0x4d1   :  { %4173 = vmatprep.subr.bf16.mxu0 %v5476_v7 }
 0x4d4   :  { %4174 = vmatpush1.bf16.msra.mxu0 %v5474_v29 }
 0x4d5   :  { %4175 = vmatprep.subr.bf16.mxu0 %v5479_v22 }
 0x4d8   :  { %4176 = vmatpush1.bf16.msra.mxu0 %v5477_v23 }
 0x4d9   :  { %4177 = vmatprep.subr.bf16.mxu0 %v5482_v26 }
 0x4dc   :  { %4178 = vmatpush1.bf16.msra.mxu0 %v5480_v31 }
 0x4dd   :  { %4179 = vmatprep.subr.bf16.mxu0 %v5485_v32 }
 0x4e0   :  { %4180 = vmatpush1.bf16.msra.mxu0 %v5483_v33 }
 0x4e3   :  { %4182 = vmatmul.mubr.bf16.vlgmr.msra.gmra.mrb[52].mxu0 %v3710_v43 }
 0x5b6   :  { %v4183_v46 = vpop.f32.mrb[52].mxu0 }
 0x5b7   :  { %v4965_v3 = vadd.f32 %v4183_v46, %v3781_v42  ;;  %v4185_v38 = vpop.f32.mrb[53].mxu0 }
 0x5b8   :  { %v4966_v57 = vadd.f32 %v4185_v38, %v3785_v45  ;;  %v4187_v48 = vpop.f32.mrb[54].mxu0 }
 0x5b9   :  { %v4188_v53 = vpop.f32.mrb[55].mxu0  ;;  %v4190_v59 = vmax.f32 %v4965_v3, 0.0 }
 0x5ba   :  { %v4191_v56 = vmax.f32 %v4966_v57, 0.0 }
 0x5bc   :  { %4295 = vmatprep.mubr.f32.mxu1 %v4191_v56 }
 0x5bd   :  { %4296 = vmatmul.mubr.f32.vlgmr.msra.gmra.mrb[116].mxu1 %v4190_v59 }
 0x690   :  { %v4828_v52 = vpop.f32.mrb[116].mxu1 }
 0x691   :  { %v4829_v27 = vpop.f32.mrb[117].mxu1 }
 0x692   :  { %v4830_v28 = vadd.f32 %v4829_v27, %v4828_v52 }
 0x694   :  { %v4298_v62 = vadd.f32 %v4830_v28, %v4754_v49 }
 0x696   :  { %v4308_v1 = vrot.slane %v4298_v62, %v4307_v30 }
 0x698   :  { %v4309_v2 = vcombine.high %v4308_v1, %v4308_v1  ;;  %v4316_v25 = vrot.slane %v4308_v1, %v4307_v30 }
 0x69a   :  { %v4323_v44 = vrot.slane %v4309_v2, %v4307_v30  ;;  %4327 = vst.msk [vmem:[%s6292_s13] sm:$0x1] %vm4326_vm4, %v4316_v25 }
 0x69c   :  { %4328 = vst.msk [vmem:[%s6292_s13 + $0x1] sm:$0x1] %vm4326_vm4, %v4323_v44 }
 0x69d   :  { %4333 = vsyncpa [#allocation3], 1 }
 0x69e   :  { %4334 = vsyncpa [#allocation5], 1 }

// kernel: pointnet_forward.3
= control target key start
LH: loop header
LB: loop body
LE: loop exit
PB: predicated region body
PF: predicated region fallthrough
CT: control target
= control target key end

     0   :  { %vm159_vm0 = vcmask 1042432   ;;  %v81_v1 = vlaneseq  ;;  %v5852_v2 = vmov 0.0   ;;  %vm5853_vm1 = vmmov 0   ;;  %s7752_s0 = inlined_call_operand.vmem [shape: f32[2,64,3], index: 0, kind: input, shape index: {}]   ;;  %s7753_s1 = inlined_call_operand.vmem [shape: f32[2,3,3], index: 1, kind: input, shape index: {}]   ;;  %s7754_s2 = inlined_call_operand.vmem [shape: f32[3,64], index: 2, kind: input, shape index: {}]   ;;  %s7755_s3 = inlined_call_operand.vmem [shape: f32[1,64], index: 3, kind: input, shape index: {}]   ;;  %s7756_s4 = inlined_call_operand.vmem [shape: f32[64,128], index: 4, kind: input, shape index: {}]   ;;  %s7757_s5 = inlined_call_operand.vmem [shape: f32[1,128], index: 5, kind: input, shape index: {}]   ;;  %s7758_s6 = inlined_call_operand.vmem [shape: bf16[128,1024], index: 6, kind: input, shape index: {}]   ;;  %s7759_s7 = inlined_call_operand.vmem [shape: f32[1,1024], index: 7, kind: input, shape index: {}]   ;;  %s7760_s8 = inlined_call_operand.vmem [shape: bf16[1024,512], index: 8, kind: input, shape index: {}]   ;;  %s7761_s9 = inlined_call_operand.vmem [shape: f32[1,512], index: 9, kind: input, shape index: {}]   ;;  %s7762_s10 = inlined_call_operand.vmem [shape: bf16[512,256], index: 10, kind: input, shape index: {}]   ;;  %s7763_s11 = inlined_call_operand.vmem [shape: f32[1,256], index: 11, kind: input, shape index: {}]   ;;  %s7764_s12 = inlined_call_operand.vmem [shape: f32[256,10], index: 12, kind: input, shape index: {}]   ;;  %s7765_s13 = inlined_call_operand.vmem [shape: f32[1,10], index: 13, kind: input, shape index: {}]   ;;  %s7766_s14 = inlined_call_operand.hbm [shape: f32[2,1,10], index: 14, kind: output, shape index: {}]  }
   0x1   :  { %v65_v0 = vld [vmem:[%s7754_s2] sm:$0x7]  ;;  %5166 = vmatprep.subr.mxu1 %v5852_v2  ;;  %5168 = vmatprep.mubr.msk.f32.mxu1 %vm5853_vm1, %v5852_v2  ;;  %v4663_v4 = vld.sshfl [vmem:[%s7753_s1 + $0x4] sm:$0x13 pattern:$0x75316420] }
   0x2   :  { %v4662_v3 = vld.sshfl [vmem:[%s7753_s1] sm:$0x13 pattern:$0x75316420]  ;;  %5167 = vmatpush3.msk.msra.mxu1 %vm159_vm0, %v65_v0  ;;  %v5854_v5 = vmov 1966171168   ;;  %v100_v10 = vcombine.high %v4663_v4, %v4663_v4 }
   0x3   :  { %v79_v6 = vunpack.c.l.s4 %v5854_v5  ;;  %v5944_v7 = vshrl.u32 %v81_v1, 7  ;;  %v77_v8 = vcombine.high %v4662_v3, %v4662_v3  ;;  %vm156_vm2 = vcmask 23552  }
   0x5   :  { %v80_v9 = vunpack.c.0.s8 %v79_v6 }
   0x7   :  { %v5947_v11 = vsub.s32 %v80_v9, %v5944_v7 }
   0x9   :  { %v84_v12 = vrot.slane %v4662_v3, %v5947_v11  ;;  %v91_v13 = vrot.slane %v77_v8, %v5947_v11  ;;  %v107_v14 = vrot.slane %v4663_v4, %v5947_v11  ;;  %v114_v15 = vrot.slane %v100_v10, %v5947_v11 }
   0xb   :  { %v92_v16 = vcombine.high %v84_v12, %v84_v12  ;;  %v115_v17 = vcombine.high %v107_v14, %v107_v14  ;;  %v116_v18 = vcombine.low %v84_v12, %v91_v13 }
   0xd   :  { %v117_v19 = vcombine.low %v92_v16, %v107_v14  ;;  %v118_v20 = vcombine.low %v114_v15, %v115_v17  ;;  %v125_v21 = vrot.slane %v116_v18, %v5947_v11 }
   0xf   :  { %v132_v22 = vrot.slane %v117_v19, %v5947_v11  ;;  %v139_v23 = vrot.slane %v118_v20, %v5947_v11 }
  0x11   :  { %v140_v24 = vcombine.low %v125_v21, %v132_v22  ;;  %v154_v25 = vrot.slane %v139_v23, %v5947_v11 }
  0x13   :  { %v147_v26 = vrot.slane %v140_v24, %v5947_v11 }
  0x15   :  { %v155_v27 = vcombine.low %v147_v26, %v154_v25 }
  0x17   :  { %5169 = vmatmul.mubr.msk.f32.vlgmr.msra.gmra.mrb[0].mxu1 %vm156_vm2, %v155_v27 }
  0x18   :  { %19 = vsyncpa [#allocation3], 0  ;;  %v49_v28 = vld [vmem:[%s7752_s0] sm:$0xff]  ;;  %v629_v51 = vld [vmem:[%s7756_s4 + $0x8] sm:$0xff]  ;;  %vm643_vm3 = vcmask 523264   ;;  %vm2085_vm4 = vcmask 1041409  }
  0x19   :  { %5173 = vmatprep.mubr.msk.f32.mxu1 %vm156_vm2, %v49_v28  ;;  %v57_v29 = vld [vmem:[%s7752_s0 + $0x40] sm:$0xff]  ;;  %v50_v54 = vld [vmem:[%s7752_s0 + $0x8] sm:$0xff]  ;;  %v630_v55 = vld [vmem:[%s7756_s4 + $0x10] sm:$0xff]  ;;  %vm4605_vm5 = vcmask 74752   ;;  %vm4643_vm6 = vcmask 73728  }
  0x1a   :  { %5187 = vmatprep.mubr.msk.f32.mxu0 %vm156_vm2, %v57_v29  ;;  %v628_v50 = vld [vmem:[%s7756_s4] sm:$0xff]  ;;  %v631_v56 = vld [vmem:[%s7756_s4 + $0x18] sm:$0xff]  ;;  %v51_v58 = vld [vmem:[%s7752_s0 + $0x10] sm:$0xff] }
  0x1b   :  { %v5239_v59 = vpack.c.bf16 %v629_v51, %v628_v50  ;;  %v58_v60 = vld [vmem:[%s7752_s0 + $0x48] sm:$0xff]  ;;  %v59_v61 = vld [vmem:[%s7752_s0 + $0x50] sm:$0xff]  ;;  %v5243_v62 = vpack.c.bf16 %v631_v56, %v630_v55  ;;  %v52_v63 = vld [vmem:[%s7752_s0 + $0x18] sm:$0xff] }
  0x1c   :  { %v632_v0 = vld [vmem:[%s7756_s4 + $0x20] sm:$0xff]  ;;  %v633_v1 = vld [vmem:[%s7756_s4 + $0x28] sm:$0xff]  ;;  %v60_v3 = vld [vmem:[%s7752_s0 + $0x58] sm:$0xff] }
  0x1d   :  { %v53_v2 = vld [vmem:[%s7752_s0 + $0x20] sm:$0xff]  ;;  %v5247_v5 = vpack.c.bf16 %v633_v1, %v632_v0  ;;  %v54_v6 = vld [vmem:[%s7752_s0 + $0x28] sm:$0xff]  ;;  %v55_v8 = vld [vmem:[%s7752_s0 + $0x30] sm:$0xff] }
  0x1e   :  { %v61_v4 = vld [vmem:[%s7752_s0 + $0x60] sm:$0xff]  ;;  %v62_v9 = vld [vmem:[%s7752_s0 + $0x68] sm:$0xff]  ;;  %v63_v10 = vld [vmem:[%s7752_s0 + $0x70] sm:$0xff] }
  0x1f   :  { %v56_v12 = vld [vmem:[%s7752_s0 + $0x38] sm:$0xff]  ;;  %v634_v14 = vld [vmem:[%s7756_s4 + $0x30] sm:$0xff]  ;;  %v861_v17 = vld [vmem:[%s7758_s6] sm:$0xff] }
  0x20   :  { %v64_v13 = vld [vmem:[%s7752_s0 + $0x78] sm:$0xff]  ;;  %v862_v18 = vld [vmem:[%s7758_s6 + $0x20] sm:$0xff] }
  0x21   :  { %v635_v15 = vld [vmem:[%s7756_s4 + $0x38] sm:$0xff]  ;;  %v863_v19 = vld [vmem:[%s7758_s6 + $0x40] sm:$0xff]  ;;  %v4702_v20 = vcombine.low %v861_v17, %v862_v18  ;;  %v4703_v21 = vcombine.high %v861_v17, %v862_v18 }
  0x22   :  { %v5251_v16 = vpack.c.bf16 %v635_v15, %v634_v14  ;;  %v864_v22 = vld [vmem:[%s7758_s6 + $0x60] sm:$0xff] }
  0x23   :  { %v4705_v23 = vcombine.high %v863_v19, %v864_v22  ;;  %v865_v24 = vld [vmem:[%s7758_s6 + $0x80] sm:$0xff]  ;;  %v4704_v26 = vcombine.low %v863_v19, %v864_v22 }
  0x24   :  { %v866_v25 = vld [vmem:[%s7758_s6 + $0xa0] sm:$0xff] }
  0x25   :  { %v4707_v27 = vcombine.high %v865_v24, %v866_v25  ;;  %v867_v28 = vld [vmem:[%s7758_s6 + $0xc0] sm:$0xff] }
  0x26   :  { %v868_v29 = vld [vmem:[%s7758_s6 + $0xe0] sm:$0xff] }
  0xea   :  { %v229_v30 = vpop.f32.mrb[0].mxu1 }
  0xeb   :  { %v234_v31 = vcombine.high %v229_v30, %v229_v30  ;;  %v241_v32 = vrot.slane %v229_v30, %v5947_v11  ;;  %v5170_v33 = vpop.f32.mrb[1].mxu1  ;;  %v6087_v30 = vcombine.low %v865_v24, %v866_v25 }
  0xec   :  { %v870_v33 = vld [vmem:[%s7758_s6 + $0x120] sm:$0xff] }
  0xed   :  { %v248_v34 = vrot.slane %v234_v31, %v5947_v11  ;;  %v249_v35 = vcombine.high %v241_v32, %v241_v32  ;;  %v257_v36 = vrot.slane %v241_v32, %v5947_v11  ;;  %v6089_v31 = vcombine.high %v867_v28, %v868_v29  ;;  %v869_v32 = vld [vmem:[%s7758_s6 + $0x100] sm:$0xff] }
  0xef   :  { %v250_v37 = vcombine.high %v248_v34, %v248_v34  ;;  %v271_v38 = vrot.slane %v249_v35, %v5947_v11  ;;  %v279_v39 = vcombine.high %v257_v36, %v257_v36  ;;  %v264_v40 = vrot.slane %v248_v34, %v5947_v11 }
  0xf0   :  { %v6098_v34 = vcombine.low %v867_v28, %v868_v29  ;;  %v6101_v35 = vcombine.high %v869_v32, %v870_v33  ;;  %v873_v28 = vld [vmem:[%s7758_s6 + $0x180] sm:$0xff] }
  0xf1   :  { %v280_v41 = vcombine.high %v271_v38, %v271_v38  ;;  %v281_v42 = vcombine.low %v257_v36, %v271_v38  ;;  %v278_v43 = vrot.slane %v250_v37, %v5947_v11  ;;  %v295_v45 = vrot.slane %v279_v39, %v5947_v11  ;;  %v871_v36 = vld [vmem:[%s7758_s6 + $0x140] sm:$0xff] }
  0xf2   :  { %v872_v37 = vld [vmem:[%s7758_s6 + $0x160] sm:$0xff]  ;;  %v6110_v38 = vcombine.low %v869_v32, %v870_v33 }
  0xf3   :  { %v288_v44 = vrot.slane %v281_v42, %v5947_v11  ;;  %v435_v46 = vcombine.low %v280_v41, %v264_v40  ;;  %v449_v49 = vrot.slane %v278_v43, %v5947_v11  ;;  %v6113_v39 = vcombine.high %v871_v36, %v872_v37  ;;  %v6123_v41 = vld [vmem:[%s7755_s3] ss:$0 sm:$0xff] }
  0xf4   :  { %v6116_v40 = vcombine.low %v871_v36, %v872_v37  ;;  %v874_v29 = vld [vmem:[%s7758_s6 + $0x1a0] sm:$0xff]  ;;  %v1471_v36 = vld [vmem:[%s7758_s6 + $0x10] sm:$0xff] }
  0xf5   :  { %v296_v47 = vcombine.low %v288_v44, %v295_v45  ;;  %v442_v48 = vrot.slane %v435_v46, %v5947_v11  ;;  %v875_v32 = vld [vmem:[%s7758_s6 + $0x1c0] sm:$0xff]  ;;  %v1472_v37 = vld [vmem:[%s7758_s6 + $0x30] sm:$0xff] }
  0xf6   :  { %v876_v33 = vld [vmem:[%s7758_s6 + $0x1e0] sm:$0xff] }
  0xf7   :  { %v303_v52 = vrot.slane %v296_v47, %v5947_v11  ;;  %v450_v53 = vcombine.low %v442_v48, %v449_v49 }
  0xf9   :  { %5171 = vmatprep.subr.msk.mxu1 %vm159_vm0, %v303_v52  ;;  %v457_v57 = vrot.slane %v450_v53, %v5947_v11 }
  0xfa   :  { %5172 = vmatpush3.msk.msra.mxu1 %vm159_vm0, %v303_v52 }
  0xfb   :  { %5174 = vmatmul.mubr.msk.f32.vlgmr.msra.gmra.mrb[2].mxu1 %vm156_vm2, %v50_v54  ;;  %5185 = vmatprep.subr.msk.mxu0 %vm159_vm0, %v457_v57 }
  0xfc   :  { %5186 = vmatpush3.msk.msra.mxu0 %vm159_vm0, %v457_v57  ;;  %5176 = vmatprep.mubr.msk.f32.mxu1 %vm156_vm2, %v51_v58 }
  0xfd   :  { %5188 = vmatmul.mubr.msk.f32.vlgmr.msra.gmra.mrb[0].mxu0 %vm156_vm2, %v58_v60  ;;  %5240 = vmatprep.subr.bf16.mxu1 %v5239_v59 }
  0xfe   :  { %5190 = vmatprep.mubr.msk.f32.mxu0 %vm156_vm2, %v59_v61  ;;  %5242 = vmatpush3.bf16.msra.mxu1 %v5239_v59 }
  0xff   :  { %5177 = vmatmul.mubr.msk.f32.gmra.mrb[4].mxu1 %vm156_vm2, %v52_v63  ;;  %5244 = vmatprep.subr.bf16.mxu1 %v5243_v62 }
 0x100   :  { %5179 = vmatprep.mubr.msk.f32.mxu1 %vm156_vm2, %v53_v2  ;;  %969 = vmatprep.subr.bf16.mxu0 %v4703_v21 }
 0x101   :  { %5191 = vmatmul.mubr.msk.f32.gmra.mrb[2].mxu0 %vm156_vm2, %v60_v3 }
 0x102   :  { %5193 = vmatprep.mubr.msk.f32.mxu0 %vm156_vm2, %v61_v4  ;;  %5246 = vmatpush3.bf16.msra.mxu1 %v5243_v62 }
 0x103   :  { %5180 = vmatmul.mubr.msk.f32.gmra.mrb[6].mxu1 %vm156_vm2, %v54_v6  ;;  %5248 = vmatprep.subr.bf16.mxu1 %v5247_v5 }
 0x104   :  { %5182 = vmatprep.mubr.msk.f32.mxu1 %vm156_vm2, %v55_v8  ;;  %970 = vmatpush1.bf16.msra.mxu0 %v4702_v20 }
 0x105   :  { %5194 = vmatmul.mubr.msk.f32.gmra.mrb[4].mxu0 %vm156_vm2, %v62_v9  ;;  %971 = vmatprep.subr.bf16.mxu0 %v4705_v23 }
 0x106   :  { %5196 = vmatprep.mubr.msk.f32.mxu0 %vm156_vm2, %v63_v10  ;;  %5250 = vmatpush3.bf16.msra.mxu1 %v5247_v5 }
 0x107   :  { %5183 = vmatmul.mubr.msk.f32.gmra.mrb[8].mxu1 %vm156_vm2, %v56_v12  ;;  %5252 = vmatprep.subr.bf16.mxu1 %v5251_v16 }
 0x108   :  { %972 = vmatpush1.bf16.msra.mxu0 %v4704_v26 }
 0x109   :  { %5197 = vmatmul.mubr.msk.f32.gmra.mrb[6].mxu0 %vm156_vm2, %v64_v13  ;;  %973 = vmatprep.subr.bf16.mxu0 %v4707_v27 }
 0x10a   :  { %5254 = vmatpush3.bf16.msra.mxu1 %v5251_v16 }
 0x10b   :  { %5287 = vmatprep.subr.bf16.mxu1 %v4703_v21 }
 0x10c   :  { %974 = vmatpush1.bf16.msra.mxu0 %v6087_v30 }
 0x10d   :  { %975 = vmatprep.subr.bf16.mxu0 %v6089_v31 }
 0x110   :  { %976 = vmatpush1.bf16.msra.mxu0 %v6098_v34 }
 0x111   :  { %977 = vmatprep.subr.bf16.mxu0 %v6101_v35 }
 0x114   :  { %978 = vmatpush1.bf16.msra.mxu0 %v6110_v38 }
 0x115   :  { %979 = vmatprep.subr.bf16.mxu0 %v6113_v39 }
 0x118   :  { %980 = vmatpush1.bf16.msra.mxu0 %v6116_v40 }
 0x1ce   :  { %v5175_v42 = vpop.f32.mrb[2].mxu1 }
 0x1cf   :  { %v597_v43 = vadd.f32 %v5175_v42, %v6123_v41  ;;  %v396_v44 = vpop.f32.mrb[3].mxu1  ;;  %v6192_v42 = vld [vmem:[%s7758_s6 + $0x28] sm:$0xff] }
 0x1d0   :  { %v596_v45 = vadd.f32 %v6123_v41, %v396_v44  ;;  %v5189_v46 = vpop.f32.mrb[0].mxu0 }
 0x1d1   :  { %v550_v47 = vpop.f32.mrb[1].mxu0  ;;  %v613_v50 = vmax.f32 %v597_v43, 0.0  ;;  %v605_v15 = vadd.f32 %v5189_v46, %v6123_v41 }
 0x1d2   :  { %v612_v48 = vmax.f32 %v596_v45, 0.0  ;;  %v5178_v49 = vpop.f32.mrb[4].mxu1  ;;  %v604_v2 = vadd.f32 %v6123_v41, %v550_v47  ;;  %v6201_v45 = vld [vmem:[%s7757_s5] ss:$0 sm:$0xff] }
 0x1d3   :  { %v599_v51 = vadd.f32 %v5178_v49, %v6123_v41  ;;  %v406_v52 = vpop.f32.mrb[5].mxu1  ;;  %v621_v19 = vmax.f32 %v605_v15, 0.0 }
 0x1d4   :  { %v598_v53 = vadd.f32 %v6123_v41, %v406_v52  ;;  %5215 = vmatprep.mubr.msk.f32.mxu1 %vm643_vm3, %v612_v48  ;;  %v5192_v54 = vpop.f32.mrb[2].mxu0  ;;  %v620_v12 = vmax.f32 %v604_v2, 0.0  ;;  %v1474_v52 = vld [vmem:[%s7758_s6 + $0x70] sm:$0xff] }
 0x1d5   :  { %5216 = vmatmul.mubr.msk.f32.vlgmr.msra.gmra.mrb[10].mxu1 %vm643_vm3, %v613_v50  ;;  %v560_v55 = vpop.f32.mrb[3].mxu0  ;;  %v615_v58 = vmax.f32 %v599_v51, 0.0  ;;  %v607_v16 = vadd.f32 %v5192_v54, %v6123_v41  ;;  %v1473_v51 = vld [vmem:[%s7758_s6 + $0x50] sm:$0xff] }
 0x1d6   :  { %v614_v56 = vmax.f32 %v598_v53, 0.0  ;;  %v5181_v57 = vpop.f32.mrb[6].mxu1  ;;  %5295 = vmatpush1.bf16.msra.mxu1 %v4702_v20  ;;  %v606_v13 = vadd.f32 %v6123_v41, %v560_v55 }
 0x1d7   :  { %v601_v59 = vadd.f32 %v5181_v57, %v6123_v41  ;;  %v416_v60 = vpop.f32.mrb[7].mxu1  ;;  %5288 = vmatprep.subr.bf16.mxu1 %v4705_v23  ;;  %v623_v20 = vmax.f32 %v607_v16, 0.0 }
 0x1d8   :  { %v600_v61 = vadd.f32 %v6123_v41, %v416_v60  ;;  %5218 = vmatprep.mubr.msk.f32.mxu1 %vm643_vm3, %v614_v56  ;;  %v5195_v62 = vpop.f32.mrb[4].mxu0  ;;  %v622_v17 = vmax.f32 %v606_v13, 0.0 }
 0x1d9   :  { %5219 = vmatmul.mubr.msk.f32.gmra.mrb[12].mxu1 %vm643_vm3, %v615_v58  ;;  %v570_v63 = vpop.f32.mrb[5].mxu0  ;;  %v617_v3 = vmax.f32 %v601_v59, 0.0  ;;  %v609_v21 = vadd.f32 %v5195_v62, %v6123_v41  ;;  %v4737_v59 = vcombine.high %v1473_v51, %v1474_v52  ;;  %v1476_v62 = vld [vmem:[%s7758_s6 + $0xb0] sm:$0xff] }
 0x1da   :  { %v616_v0 = vmax.f32 %v600_v61, 0.0  ;;  %v5184_v1 = vpop.f32.mrb[8].mxu1  ;;  %5296 = vmatpush1.bf16.msra.mxu1 %v4704_v26  ;;  %v608_v18 = vadd.f32 %v6123_v41, %v570_v63  ;;  %v1475_v61 = vld [vmem:[%s7758_s6 + $0x90] sm:$0xff] }
 0x1db   :  { %v603_v4 = vadd.f32 %v5184_v1, %v6123_v41  ;;  %v426_v5 = vpop.f32.mrb[9].mxu1  ;;  %5289 = vmatprep.subr.bf16.mxu1 %v4707_v27  ;;  %v625_v24 = vmax.f32 %v609_v21, 0.0  ;;  %v4738_v16 = vcombine.low %v1475_v61, %v1476_v62  ;;  %v1479_v21 = vld [vmem:[%s7758_s6 + $0x110] sm:$0xff] }
 0x1dc   :  { %v602_v6 = vadd.f32 %v6123_v41, %v426_v5  ;;  %5221 = vmatprep.mubr.msk.f32.mxu1 %vm643_vm3, %v616_v0  ;;  %v5198_v8 = vpop.f32.mrb[6].mxu0  ;;  %v624_v22 = vmax.f32 %v608_v18, 0.0 }
 0x1dd   :  { %5222 = vmatmul.mubr.msk.f32.gmra.mrb[14].mxu1 %vm643_vm3, %v617_v3  ;;  %v580_v9 = vpop.f32.mrb[7].mxu0  ;;  %v619_v14 = vmax.f32 %v603_v4, 0.0  ;;  %v611_v25 = vadd.f32 %v5198_v8, %v6123_v41  ;;  %v4736_v3 = vcombine.low %v1473_v51, %v1474_v52  ;;  %v1171_v51 = vld [vmem:[%s7758_s6 + $0xa8] sm:$0xff] }
 0x1de   :  { %v618_v10 = vmax.f32 %v602_v6, 0.0  ;;  %5297 = vmatpush1.bf16.msra.mxu1 %v6087_v30  ;;  %v610_v23 = vadd.f32 %v6123_v41, %v580_v9  ;;  %v4715_v30 = vcombine.high %v873_v28, %v874_v29  ;;  %v6187_v41 = vld [vmem:[%s7758_s6 + $0x8] sm:$0xff]  ;;  %v4739_v6 = vcombine.high %v1475_v61, %v1476_v62  ;;  %v1477_v9 = vld [vmem:[%s7758_s6 + $0xd0] sm:$0xff] }
 0x1df   :  { %5290 = vmatprep.subr.bf16.mxu1 %v6089_v31  ;;  %v627_v27 = vmax.f32 %v611_v25, 0.0  ;;  %v4714_v31 = vcombine.low %v873_v28, %v874_v29  ;;  %v4719_v43 = vcombine.high %v6187_v41, %v6192_v42  ;;  %v4718_v44 = vcombine.low %v6187_v41, %v6192_v42  ;;  %v1173_v41 = vld [vmem:[%s7758_s6 + $0xe8] sm:$0xff] }
 0x1e0   :  { %5224 = vmatprep.mubr.msk.f32.mxu1 %vm643_vm3, %v618_v10  ;;  %v626_v26 = vmax.f32 %v610_v23, 0.0  ;;  %981 = vmatprep.subr.bf16.mxu0 %v4715_v30  ;;  %v1478_v10 = vld [vmem:[%s7758_s6 + $0xf0] sm:$0xff] }
 0x1e1   :  { %5225 = vmatmul.mubr.msk.f32.gmra.mrb[16].mxu1 %vm643_vm3, %v619_v14  ;;  %982 = vmatpush1.bf16.msra.mxu0 %v4714_v31 }
 0x1e2   :  { %5227 = vmatprep.mubr.msk.f32.mxu1 %vm643_vm3, %v620_v12  ;;  %5298 = vmatpush1.bf16.msra.mxu1 %v6098_v34  ;;  %v4717_v34 = vcombine.high %v875_v32, %v876_v33 }
 0x1e3   :  { %5291 = vmatprep.subr.bf16.mxu1 %v6101_v35  ;;  %v4716_v35 = vcombine.low %v875_v32, %v876_v33  ;;  %v1169_v33 = vld [vmem:[%s7758_s6 + $0x68] sm:$0xff] }
 0x1e4   :  { %983 = vmatprep.subr.bf16.mxu0 %v4717_v34 }
 0x1e5   :  { %5228 = vmatmul.mubr.msk.f32.gmra.mrb[18].mxu1 %vm643_vm3, %v621_v19  ;;  %984 = vmatpush1.bf16.msra.mxu0 %v4716_v35  ;;  %v4741_v19 = vcombine.high %v1477_v9, %v1478_v10 }
 0x1e6   :  { %5230 = vmatprep.mubr.msk.f32.mxu1 %vm643_vm3, %v622_v17  ;;  %5299 = vmatpush1.bf16.msra.mxu1 %v6110_v38  ;;  %v4735_v38 = vcombine.high %v1471_v36, %v1472_v37 }
 0x1e7   :  { %5292 = vmatprep.subr.bf16.mxu1 %v6113_v39  ;;  %v5855_v39 = vmov 0  }
 0x1e8   :  { %1001 = vmatprep.mubr.bf16.mxu0 %v5855_v39  ;;  %1579 = vmatprep.subr.bf16.mxu0 %v4735_v38 }
 0x1e9   :  { %5231 = vmatmul.mubr.msk.f32.gmra.mrb[20].mxu1 %vm643_vm3, %v623_v20 }
 0x1ea   :  { %5233 = vmatprep.mubr.msk.f32.mxu1 %vm643_vm3, %v624_v22  ;;  %5300 = vmatpush1.bf16.msra.mxu1 %v6116_v40  ;;  %v4734_v40 = vcombine.low %v1471_v36, %v1472_v37  ;;  %v1480_v22 = vld [vmem:[%s7758_s6 + $0x130] sm:$0xff] }
 0x1eb   :  { %5293 = vmatprep.subr.bf16.mxu1 %v4715_v30  ;;  %v4743_v30 = vcombine.high %v1479_v21, %v1480_v22 }
 0x1ed   :  { %5234 = vmatmul.mubr.msk.f32.gmra.mrb[22].mxu1 %vm643_vm3, %v625_v24 }
 0x1ee   :  { %5236 = vmatprep.mubr.msk.f32.mxu1 %vm643_vm3, %v626_v26  ;;  %5301 = vmatpush1.bf16.msra.mxu1 %v4714_v31  ;;  %v1168_v31 = vld [vmem:[%s7758_s6 + $0x48] sm:$0xff] }
 0x1ef   :  { %5294 = vmatprep.subr.bf16.mxu1 %v4717_v34  ;;  %v1481_v34 = vld [vmem:[%s7758_s6 + $0x150] sm:$0xff] }
 0x1f1   :  { %5237 = vmatmul.mubr.msk.f32.gmra.mrb[24].mxu1 %vm643_vm3, %v627_v27  ;;  %v4740_v27 = vcombine.low %v1477_v9, %v1478_v10 }
 0x1f2   :  { %5302 = vmatpush1.bf16.msra.mxu1 %v4716_v35  ;;  %1041 = vmatprep.mubr.bf16.mxu1 %v5855_v39  ;;  %v1482_v35 = vld [vmem:[%s7758_s6 + $0x170] sm:$0xff] }
 0x1f3   :  { %1274 = vmatprep.subr.bf16.mxu1 %v4719_v43 }
 0x2a8   :  { %v5217_v46 = vpop.f32.mrb[10].mxu1 }
 0x2a9   :  { %v764_v47 = vadd.f32 %v5217_v46, %v6201_v45  ;;  %v758_v48 = vpop.f32.mrb[11].mxu1 }
 0x2aa   :  { %v759_v49 = vadd.f32 %v6201_v45, %v758_v48  ;;  %v4721_v48 = vcombine.high %v1168_v31, %v1169_v33 }
 0x2ab   :  { %v838_v50 = vmax.f32 %v764_v47, 0.0 }
 0x2ac   :  { %v837_v53 = vmax.f32 %v759_v49, 0.0  ;;  %v5220_v54 = vpop.f32.mrb[12].mxu1  ;;  %v4745_v49 = vcombine.high %v1481_v34, %v1482_v35 }
 0x2ad   :  { %v774_v55 = vadd.f32 %v5220_v54, %v6201_v45  ;;  %v768_v56 = vpop.f32.mrb[13].mxu1  ;;  %v1484_v54 = vld [vmem:[%s7758_s6 + $0x1b0] sm:$0xff] }
 0x2ae   :  { %v6212_v57 = vpack.c.bf16 %v838_v50, %v837_v53  ;;  %v769_v58 = vadd.f32 %v6201_v45, %v768_v56  ;;  %v1170_v50 = vld [vmem:[%s7758_s6 + $0x88] sm:$0xff]  ;;  %v1483_v53 = vld [vmem:[%s7758_s6 + $0x190] sm:$0xff]  ;;  %v4720_v56 = vcombine.low %v1168_v31, %v1169_v33 }
 0x2af   :  { %v840_v60 = vmax.f32 %v774_v55, 0.0  ;;  %v4723_v61 = vcombine.high %v1170_v50, %v1171_v51  ;;  %v4746_v9 = vcombine.low %v1483_v53, %v1484_v54  ;;  %v1179_v31 = vld [vmem:[%s7758_s6 + $0x1a8] sm:$0xff] }
 0x2b0   :  { %v839_v63 = vmax.f32 %v769_v58, 0.0  ;;  %v5223_v0 = vpop.f32.mrb[14].mxu1  ;;  %1002 = vmatmul.mubr.bf16.vlgmr.msra.gmra.mrb[8].mxu0 %v6212_v57 }
 0x2b1   :  { %v784_v1 = vadd.f32 %v5223_v0, %v6201_v45  ;;  %v778_v2 = vpop.f32.mrb[15].mxu1  ;;  %1580 = vmatpush1.bf16.msra.mxu0 %v4734_v40  ;;  %1011 = vmatprep.mubr.bf16.mxu0 %v5855_v39  ;;  %v4742_v40 = vcombine.low %v1479_v21, %v1480_v22  ;;  %v4747_v0 = vcombine.high %v1483_v53, %v1484_v54  ;;  %v1781_v53 = vld [vmem:[%s7758_s6 + $0xb8] sm:$0xff] }
 0x2b2   :  { %v6224_v4 = vpack.c.bf16 %v840_v60, %v839_v63  ;;  %v779_v5 = vadd.f32 %v6201_v45, %v778_v2  ;;  %1581 = vmatprep.subr.bf16.mxu0 %v4737_v59  ;;  %v4744_v59 = vcombine.low %v1481_v34, %v1482_v35  ;;  %v1172_v2 = vld [vmem:[%s7758_s6 + $0xc8] sm:$0xff] }
 0x2b3   :  { %v842_v8 = vmax.f32 %v784_v1, 0.0  ;;  %v4725_v10 = vcombine.high %v1172_v2, %v1173_v41  ;;  %v4724_v22 = vcombine.low %v1172_v2, %v1173_v41  ;;  %v1180_v34 = vld [vmem:[%s7758_s6 + $0x1c8] sm:$0xff]  ;;  %v1786_v2 = vld [vmem:[%s7758_s6 + $0x158] sm:$0xff] }
 0x2b4   :  { %v841_v12 = vmax.f32 %v779_v5, 0.0  ;;  %v5226_v13 = vpop.f32.mrb[16].mxu1  ;;  %v4722_v5 = vcombine.low %v1170_v50, %v1171_v51  ;;  %v1181_v35 = vld [vmem:[%s7758_s6 + $0x1e8] sm:$0xff]  ;;  %v1787_v41 = vld [vmem:[%s7758_s6 + $0x178] sm:$0xff] }
 0x2b5   :  { %v794_v14 = vadd.f32 %v5226_v13, %v6201_v45  ;;  %v788_v15 = vpop.f32.mrb[17].mxu1  ;;  %1582 = vmatpush1.bf16.msra.mxu0 %v4736_v3  ;;  %v1486_v3 = vld [vmem:[%s7758_s6 + $0x1f0] sm:$0xff] }
 0x2b6   :  { %v6234_v17 = vpack.c.bf16 %v842_v8, %v841_v12  ;;  %v789_v18 = vadd.f32 %v6201_v45, %v788_v15  ;;  %1583 = vmatprep.subr.bf16.mxu0 %v4739_v6 }
 0x2b7   :  { %v844_v20 = vmax.f32 %v794_v14, 0.0 }
 0x2b8   :  { %v843_v23 = vmax.f32 %v789_v18, 0.0  ;;  %v5229_v24 = vpop.f32.mrb[18].mxu1  ;;  %1012 = vmatmul.mubr.bf16.gmra.mrb[12].mxu0 %v6224_v4 }
 0x2b9   :  { %v804_v25 = vadd.f32 %v5229_v24, %v6201_v45  ;;  %v798_v26 = vpop.f32.mrb[19].mxu1  ;;  %1584 = vmatpush1.bf16.msra.mxu0 %v4738_v16  ;;  %1021 = vmatprep.mubr.bf16.mxu0 %v5855_v39 }
 0x2ba   :  { %v6246_v28 = vpack.c.bf16 %v844_v20, %v843_v23  ;;  %v799_v29 = vadd.f32 %v6201_v45, %v798_v26  ;;  %1585 = vmatprep.subr.bf16.mxu0 %v4741_v19  ;;  %v1174_v19 = vld [vmem:[%s7758_s6 + $0x108] sm:$0xff] }
 0x2bb   :  { %v846_v32 = vmax.f32 %v804_v25, 0.0  ;;  %v1175_v20 = vld [vmem:[%s7758_s6 + $0x128] sm:$0xff] }
 0x2bc   :  { %v845_v36 = vmax.f32 %v799_v29, 0.0  ;;  %v5232_v37 = vpop.f32.mrb[20].mxu1  ;;  %v1176_v25 = vld [vmem:[%s7758_s6 + $0x148] sm:$0xff] }
 0x2bd   :  { %1586 = vmatpush1.bf16.msra.mxu0 %v4740_v27  ;;  %v814_v38 = vadd.f32 %v5232_v37, %v6201_v45  ;;  %v808_v43 = vpop.f32.mrb[21].mxu1  ;;  %v1177_v26 = vld [vmem:[%s7758_s6 + $0x168] sm:$0xff]  ;;  %v4726_v27 = vcombine.low %v1174_v19, %v1175_v20  ;;  %v4733_v37 = vcombine.high %v1180_v34, %v1181_v35 }
 0x2be   :  { %v6262_v46 = vpack.c.bf16 %v846_v32, %v845_v36  ;;  %1587 = vmatprep.subr.bf16.mxu0 %v4743_v30  ;;  %v809_v47 = vadd.f32 %v6201_v45, %v808_v43  ;;  %v4729_v29 = vcombine.high %v1176_v25, %v1177_v26  ;;  %v1178_v30 = vld [vmem:[%s7758_s6 + $0x188] sm:$0xff]  ;;  %v4728_v32 = vcombine.low %v1176_v25, %v1177_v26  ;;  %v5362_v25 = vld [vmem:[%s7760_s8 + $0x60] ss:$16 sps:$4 sm:$0xff]   ;;  %v5370_v26 = vld [vmem:[%s7760_s8 + $0x84] ss:$16 sps:$4 sm:$0xff]  }
 0x2bf   :  { %v848_v52 = vmax.f32 %v814_v38, 0.0  ;;  %v4731_v33 = vcombine.high %v1178_v30, %v1179_v31  ;;  %v4730_v36 = vcombine.low %v1178_v30, %v1179_v31  ;;  %v1776_v38 = vld [vmem:[%s7758_s6 + $0x18] sm:$0xff]  ;;  %v4732_v43 = vcombine.low %v1180_v34, %v1181_v35  ;;  %v5374_v30 = vld [vmem:[%s7760_s8 + $0xa0] ss:$16 sps:$4 sm:$0xff]   ;;  %v5382_v31 = vld [vmem:[%s7760_s8 + $0xc4] ss:$16 sps:$4 sm:$0xff]  }
 0x2c0   :  { %1022 = vmatmul.mubr.bf16.gmra.mrb[16].mxu0 %v6234_v17  ;;  %1042 = vmatmul.mubr.bf16.vlgmr.msra.gmra.mrb[28].mxu1 %v6262_v46  ;;  %v847_v55 = vmax.f32 %v809_v47, 0.0  ;;  %v5235_v58 = vpop.f32.mrb[22].mxu1  ;;  %v5355_v34 = vld [vmem:[%s7760_s8 + $0x2c] ss:$16 sps:$4 sm:$0xff]   ;;  %v5388_v35 = vld [vmem:[%s7760_s8 + $0xe4] ss:$16 sps:$4 sm:$0xff]  }
 0x2c1   :  { %1275 = vmatpush1.bf16.msra.mxu1 %v4718_v44  ;;  %1588 = vmatpush1.bf16.msra.mxu0 %v4742_v40  ;;  %v824_v60 = vadd.f32 %v5235_v58, %v6201_v45  ;;  %v818_v62 = vpop.f32.mrb[23].mxu1  ;;  %v1485_v44 = vld [vmem:[%s7758_s6 + $0x1d0] sm:$0xff]  ;;  %v1777_v40 = vld [vmem:[%s7758_s6 + $0x38] sm:$0xff] }
 0x2c2   :  { %v6283_v63 = vpack.c.bf16 %v848_v52, %v847_v55  ;;  %1276 = vmatprep.subr.bf16.mxu1 %v4721_v48  ;;  %1589 = vmatprep.subr.bf16.mxu0 %v4745_v49  ;;  %v819_v1 = vadd.f32 %v6201_v45, %v818_v62  ;;  %v4749_v15 = vcombine.high %v1485_v44, %v1486_v3  ;;  %v1778_v48 = vld [vmem:[%s7758_s6 + $0x58] sm:$0xff] }
 0x2c3   :  { %1031 = vmatprep.mubr.bf16.mxu0 %v5855_v39  ;;  %1051 = vmatprep.mubr.bf16.mxu1 %v5855_v39  ;;  %v850_v42 = vmax.f32 %v824_v60, 0.0  ;;  %v4748_v23 = vcombine.low %v1485_v44, %v1486_v3  ;;  %v4751_v47 = vcombine.high %v1776_v38, %v1777_v40  ;;  %v1779_v49 = vld [vmem:[%s7758_s6 + $0x78] sm:$0xff]  ;;  %v4750_v50 = vcombine.low %v1776_v38, %v1777_v40  ;;  %v5394_v40 = vld [vmem:[%s7760_s8 + $0x104] ss:$16 sps:$4 sm:$0xff]  }
 0x2c4   :  { %v849_v6 = vmax.f32 %v819_v1, 0.0  ;;  %v5238_v8 = vpop.f32.mrb[24].mxu1  ;;  %v4753_v51 = vcombine.high %v1778_v48, %v1779_v49  ;;  %v1780_v52 = vld [vmem:[%s7758_s6 + $0x98] sm:$0xff]  ;;  %v4752_v54 = vcombine.low %v1778_v48, %v1779_v49  ;;  %v4761_v44 = vcombine.high %v1786_v2, %v1787_v41  ;;  %v5400_v48 = vld [vmem:[%s7760_s8 + $0x124] ss:$16 sps:$4 sm:$0xff]  }
 0x2c5   :  { %1277 = vmatpush1.bf16.msra.mxu1 %v4720_v56  ;;  %1590 = vmatpush1.bf16.msra.mxu0 %v4744_v59  ;;  %v834_v12 = vadd.f32 %v5238_v8, %v6201_v45  ;;  %v828_v13 = vpop.f32.mrb[25].mxu1  ;;  %v4755_v55 = vcombine.high %v1780_v52, %v1781_v53  ;;  %v1782_v56 = vld [vmem:[%s7758_s6 + $0xd8] sm:$0xff]  ;;  %v4754_v59 = vcombine.low %v1780_v52, %v1781_v53  ;;  %v5404_v53 = vld [vmem:[%s7760_s8 + $0x140] ss:$16 sps:$4 sm:$0xff]  }
 0x2c6   :  { %1278 = vmatprep.subr.bf16.mxu1 %v4723_v61  ;;  %1591 = vmatprep.subr.bf16.mxu0 %v4747_v0  ;;  %v6301_v14 = vpack.c.bf16 %v850_v42, %v849_v6  ;;  %v829_v16 = vadd.f32 %v6201_v45, %v828_v13  ;;  %v4727_v45 = vcombine.high %v1174_v19, %v1175_v20  ;;  %v1783_v58 = vld [vmem:[%s7758_s6 + $0xf8] sm:$0xff]  ;;  %v5344_v19 = vld [vmem:[%s7760_s8] ss:$16 sps:$4 sm:$0xff]   ;;  %v5352_v20 = vld [vmem:[%s7760_s8 + $0x24] ss:$16 sps:$4 sm:$0xff]  }
 0x2c7   :  { %v852_v18 = vmax.f32 %v834_v12, 0.0  ;;  %v4757_v60 = vcombine.high %v1782_v56, %v1783_v58  ;;  %v1784_v61 = vld [vmem:[%s7758_s6 + $0x118] sm:$0xff]  ;;  %v4756_v0 = vcombine.low %v1782_v56, %v1783_v58  ;;  %v4760_v6 = vcombine.low %v1786_v2, %v1787_v41  ;;  %v5410_v58 = vld [vmem:[%s7760_s8 + $0x160] ss:$16 sps:$4 sm:$0xff]   ;;  %v5430_v41 = vld [vmem:[%s7760_s8 + $0x1c4] ss:$16 sps:$4 sm:$0xff]  }
 0x2c8   :  { %1032 = vmatmul.mubr.bf16.gmra.mrb[20].mxu0 %v6246_v28  ;;  %1052 = vmatmul.mubr.bf16.gmra.mrb[32].mxu1 %v6283_v63  ;;  %v851_v21 = vmax.f32 %v829_v16, 0.0  ;;  %v1785_v62 = vld [vmem:[%s7758_s6 + $0x138] sm:$0xff]  ;;  %v5346_v16 = vld [vmem:[%s7760_s8 + $0x4] ss:$16 sps:$4 sm:$0xff]   ;;  %v5422_v2 = vld [vmem:[%s7760_s8 + $0x1a0] ss:$16 sps:$4 sm:$0xff]  }
 0x2c9   :  { %1279 = vmatpush1.bf16.msra.mxu1 %v4722_v5  ;;  %1592 = vmatpush1.bf16.msra.mxu0 %v4746_v9  ;;  %v4759_v1 = vcombine.high %v1784_v61, %v1785_v62  ;;  %v4758_v42 = vcombine.low %v1784_v61, %v1785_v62  ;;  %v1788_v3 = vld [vmem:[%s7758_s6 + $0x198] sm:$0xff]  ;;  %v5416_v61 = vld [vmem:[%s7760_s8 + $0x180] ss:$16 sps:$4 sm:$0xff]  }
 0x2ca   :  { %1280 = vmatprep.subr.bf16.mxu1 %v4725_v10  ;;  %1593 = vmatprep.subr.bf16.mxu0 %v4749_v15  ;;  %v6312_v24 = vpack.c.bf16 %v852_v18, %v851_v21  ;;  %v1789_v5 = vld [vmem:[%s7758_s6 + $0x1b8] sm:$0xff]  ;;  %v5350_v21 = vld [vmem:[%s7760_s8 + $0x20] ss:$16 sps:$4 sm:$0xff]  }
 0x2cb   :  { %1061 = vmatprep.mubr.bf16.mxu1 %v5855_v39  ;;  %1611 = vmatprep.mubr.bf16.mxu0 %v5855_v39  ;;  %v4763_v8 = vcombine.high %v1788_v3, %v1789_v5  ;;  %v1790_v9 = vld [vmem:[%s7758_s6 + $0x1d8] sm:$0xff]  ;;  %v4762_v12 = vcombine.low %v1788_v3, %v1789_v5  ;;  %v5436_v5 = vld [vmem:[%s7760_s8 + $0x1e4] ss:$16 sps:$4 sm:$0xff]  }
 0x2cc   :  { %v1791_v10 = vld [vmem:[%s7758_s6 + $0x1f8] sm:$0xff] }
 0x2cd   :  { %1281 = vmatpush1.bf16.msra.mxu1 %v4724_v22  ;;  %1594 = vmatpush1.bf16.msra.mxu0 %v4748_v23  ;;  %v4765_v13 = vcombine.high %v1790_v9, %v1791_v10  ;;  %v4764_v15 = vcombine.low %v1790_v9, %v1791_v10  ;;  %v5349_v18 = vld [vmem:[%s7760_s8 + $0xc] ss:$16 sps:$4 sm:$0xff]   ;;  %v5358_v22 = vld [vmem:[%s7760_s8 + $0x44] ss:$16 sps:$4 sm:$0xff]   ;;  %v5356_v23 = vld [vmem:[%s7760_s8 + $0x40] ss:$16 sps:$4 sm:$0xff]  }
 0x2ce   :  { %1282 = vmatprep.subr.bf16.mxu1 %v4727_v45  ;;  %3680 = vmatprep.subr.bf16.mxu0 %v5346_v16  ;;  %v5364_v45 = vld [vmem:[%s7760_s8 + $0x64] ss:$16 sps:$4 sm:$0xff]   ;;  %v5361_v38 = vld [vmem:[%s7760_s8 + $0x4c] ss:$16 sps:$4 sm:$0xff]   ;;  %v5365_v49 = vld [vmem:[%s7760_s8 + $0x68] ss:$16 sps:$4 sm:$0xff]  }
 0x2cf   :  { %v5371_v52 = vld [vmem:[%s7760_s8 + $0x88] ss:$16 sps:$4 sm:$0xff]   ;;  %v5391_v62 = vld [vmem:[%s7760_s8 + $0xec] ss:$16 sps:$4 sm:$0xff]   ;;  %v5442_v10 = vld [vmem:[%s7760_s8 + $0x204] ss:$16 sps:$4 sm:$0xff]  }
 0x2d0   :  { %1062 = vmatmul.mubr.bf16.gmra.mrb[36].mxu1 %v6301_v14  ;;  %1612 = vmatmul.mubr.bf16.vlgmr.msra.gmra.mrb[24].mxu0 %v6212_v57  ;;  %v5377_v56 = vld [vmem:[%s7760_s8 + $0xa8] ss:$16 sps:$4 sm:$0xff]   ;;  %v5403_v3 = vld [vmem:[%s7760_s8 + $0x12c] ss:$16 sps:$4 sm:$0xff]  }
 0x2d1   :  { %1283 = vmatpush1.bf16.msra.mxu1 %v4726_v27  ;;  %1071 = vmatprep.mubr.bf16.mxu1 %v5855_v39  ;;  %v5368_v27 = vld [vmem:[%s7760_s8 + $0x80] ss:$16 sps:$4 sm:$0xff]   ;;  %v5407_v9 = vld [vmem:[%s7760_s8 + $0x148] ss:$16 sps:$4 sm:$0xff]  }
 0x2d2   :  { %1284 = vmatprep.subr.bf16.mxu1 %v4729_v29  ;;  %1621 = vmatprep.mubr.bf16.mxu0 %v5855_v39  ;;  %v5376_v29 = vld [vmem:[%s7760_s8 + $0xa4] ss:$16 sps:$4 sm:$0xff]   ;;  %v5419_v16 = vld [vmem:[%s7760_s8 + $0x188] ss:$16 sps:$4 sm:$0xff]  }
 0x2d3   :  { %3681 = vmatpush1.bf16.msra.mxu0 %v5344_v19  ;;  %v5433_v19 = vld [vmem:[%s7760_s8 + $0x1cc] ss:$16 sps:$4 sm:$0xff]  }
 0x2d4   :  { %3682 = vmatprep.subr.bf16.mxu0 %v5352_v20  ;;  %v5431_v20 = vld [vmem:[%s7760_s8 + $0x1c8] ss:$16 sps:$4 sm:$0xff]  }
 0x2d5   :  { %1285 = vmatpush1.bf16.msra.mxu1 %v4728_v32  ;;  %v5380_v32 = vld [vmem:[%s7760_s8 + $0xc0] ss:$16 sps:$4 sm:$0xff]  }
 0x2d6   :  { %1286 = vmatprep.subr.bf16.mxu1 %v4731_v33  ;;  %v5347_v33 = vld [vmem:[%s7760_s8 + $0x8] ss:$16 sps:$4 sm:$0xff]  }
 0x2d7   :  { %3683 = vmatpush1.bf16.msra.mxu0 %v5350_v21  ;;  %v5445_v21 = vld [vmem:[%s7760_s8 + $0x20c] ss:$16 sps:$4 sm:$0xff]  }
 0x2d8   :  { %1072 = vmatmul.mubr.bf16.gmra.mrb[40].mxu1 %v6312_v24  ;;  %1622 = vmatmul.mubr.bf16.gmra.mrb[28].mxu0 %v6224_v4 }
 0x2d9   :  { %1287 = vmatpush1.bf16.msra.mxu1 %v4730_v36  ;;  %1306 = vmatprep.mubr.bf16.mxu1 %v5855_v39  ;;  %v5386_v36 = vld [vmem:[%s7760_s8 + $0xe0] ss:$16 sps:$4 sm:$0xff]  }
 0x2da   :  { %1288 = vmatprep.subr.bf16.mxu1 %v4733_v37  ;;  %1631 = vmatprep.mubr.bf16.mxu0 %v5855_v39  ;;  %v5353_v37 = vld [vmem:[%s7760_s8 + $0x28] ss:$16 sps:$4 sm:$0xff]  }
 0x2db   :  { %3684 = vmatprep.subr.bf16.mxu0 %v5358_v22  ;;  %v6631_v22 = vsub.s32 0, %v5944_v7 }
 0x2dc   :  { %3685 = vmatpush1.bf16.msra.mxu0 %v5356_v23  ;;  %v877_v23 = vld [vmem:[%s7759_s7] sm:$0x3] }
 0x2dd   :  { %1289 = vmatpush1.bf16.msra.mxu1 %v4732_v43  ;;  %3686 = vmatprep.subr.bf16.mxu0 %v5364_v45  ;;  %v5359_v43 = vld [vmem:[%s7760_s8 + $0x48] ss:$16 sps:$4 sm:$0xff]   ;;  %v6640_v45 = vrot.slane %v877_v23, %v6631_v22 }
 0x2de   :  { %1884 = vmatprep.subr.bf16.mxu1 %v4751_v47  ;;  %v5367_v47 = vld [vmem:[%s7760_s8 + $0x6c] ss:$16 sps:$4 sm:$0xff]  }
 0x2e0   :  { %1307 = vmatmul.mubr.bf16.vlgmr.msra.gmra.mrb[44].mxu1 %v6212_v57  ;;  %1632 = vmatmul.mubr.bf16.gmra.mrb[32].mxu0 %v6234_v17 }
 0x2e1   :  { %1316 = vmatprep.mubr.bf16.mxu1 %v5855_v39  ;;  %1641 = vmatprep.mubr.bf16.mxu0 %v5855_v39 }
 0x2e2   :  { %1885 = vmatpush1.bf16.msra.mxu1 %v4750_v50  ;;  %3687 = vmatpush1.bf16.msra.mxu0 %v5362_v25  ;;  %v5398_v50 = vld [vmem:[%s7760_s8 + $0x120] ss:$16 sps:$4 sm:$0xff]  }
 0x2e3   :  { %1886 = vmatprep.subr.bf16.mxu1 %v4753_v51  ;;  %3688 = vmatprep.subr.bf16.mxu0 %v5370_v26  ;;  %v5406_v51 = vld [vmem:[%s7760_s8 + $0x144] ss:$16 sps:$4 sm:$0xff]  }
 0x2e6   :  { %1887 = vmatpush1.bf16.msra.mxu1 %v4752_v54  ;;  %3689 = vmatpush1.bf16.msra.mxu0 %v5368_v27  ;;  %v5379_v54 = vld [vmem:[%s7760_s8 + $0xac] ss:$16 sps:$4 sm:$0xff]  }
 0x2e7   :  { %1888 = vmatprep.subr.bf16.mxu1 %v4755_v55  ;;  %3690 = vmatprep.subr.bf16.mxu0 %v5376_v29  ;;  %v5412_v55 = vld [vmem:[%s7760_s8 + $0x164] ss:$16 sps:$4 sm:$0xff]  }
 0x2e8   :  { %1317 = vmatmul.mubr.bf16.gmra.mrb[48].mxu1 %v6224_v4  ;;  %1642 = vmatmul.mubr.bf16.gmra.mrb[36].mxu0 %v6246_v28 }
 0x2e9   :  { %1326 = vmatprep.mubr.bf16.mxu1 %v5855_v39  ;;  %1651 = vmatprep.mubr.bf16.mxu0 %v5855_v39 }
 0x2ea   :  { %1889 = vmatpush1.bf16.msra.mxu1 %v4754_v59  ;;  %3691 = vmatpush1.bf16.msra.mxu0 %v5374_v30  ;;  %v5418_v59 = vld [vmem:[%s7760_s8 + $0x184] ss:$16 sps:$4 sm:$0xff]  }
 0x2eb   :  { %1890 = vmatprep.subr.bf16.mxu1 %v4757_v60  ;;  %3692 = vmatprep.subr.bf16.mxu0 %v5382_v31  ;;  %v5383_v60 = vld [vmem:[%s7760_s8 + $0xc8] ss:$16 sps:$4 sm:$0xff]  }
 0x2ee   :  { %1891 = vmatpush1.bf16.msra.mxu1 %v4756_v0  ;;  %3693 = vmatpush1.bf16.msra.mxu0 %v5380_v32  ;;  %v5424_v0 = vld [vmem:[%s7760_s8 + $0x1a4] ss:$16 sps:$4 sm:$0xff]  }
 0x2ef   :  { %1892 = vmatprep.subr.bf16.mxu1 %v4759_v1  ;;  %3694 = vmatprep.subr.bf16.mxu0 %v5388_v35  ;;  %v5389_v1 = vld [vmem:[%s7760_s8 + $0xe8] ss:$16 sps:$4 sm:$0xff]  }
 0x2f0   :  { %1327 = vmatmul.mubr.bf16.gmra.mrb[52].mxu1 %v6234_v17  ;;  %1652 = vmatmul.mubr.bf16.gmra.mrb[40].mxu0 %v6262_v46 }
 0x2f1   :  { %1336 = vmatprep.mubr.bf16.mxu1 %v5855_v39  ;;  %1661 = vmatprep.mubr.bf16.mxu0 %v5855_v39 }
 0x2f2   :  { %1893 = vmatpush1.bf16.msra.mxu1 %v4758_v42  ;;  %3695 = vmatpush1.bf16.msra.mxu0 %v5386_v36  ;;  %v5395_v42 = vld [vmem:[%s7760_s8 + $0x108] ss:$16 sps:$4 sm:$0xff]  }
 0x2f3   :  { %1894 = vmatprep.subr.bf16.mxu1 %v4761_v44  ;;  %3696 = vmatprep.subr.bf16.mxu0 %v5394_v40  ;;  %v5428_v44 = vld [vmem:[%s7760_s8 + $0x1c0] ss:$16 sps:$4 sm:$0xff]  }
 0x2f6   :  { %1895 = vmatpush1.bf16.msra.mxu1 %v4760_v6  ;;  %v5401_v6 = vld [vmem:[%s7760_s8 + $0x128] ss:$16 sps:$4 sm:$0xff]  }
 0x2f7   :  { %1896 = vmatprep.subr.bf16.mxu1 %v4763_v8  ;;  %v5434_v8 = vld [vmem:[%s7760_s8 + $0x1e0] ss:$16 sps:$4 sm:$0xff]  }
 0x2f8   :  { %1337 = vmatmul.mubr.bf16.gmra.mrb[56].mxu1 %v6246_v28  ;;  %1662 = vmatmul.mubr.bf16.gmra.mrb[44].mxu0 %v6283_v63 }
 0x2f9   :  { %1346 = vmatprep.mubr.bf16.mxu1 %v5855_v39  ;;  %1671 = vmatprep.mubr.bf16.mxu0 %v5855_v39 }
 0x2fa   :  { %1897 = vmatpush1.bf16.msra.mxu1 %v4762_v12  ;;  %v5415_v12 = vld [vmem:[%s7760_s8 + $0x16c] ss:$16 sps:$4 sm:$0xff]  }
 0x2fb   :  { %1898 = vmatprep.subr.bf16.mxu1 %v4765_v13  ;;  %v5413_v13 = vld [vmem:[%s7760_s8 + $0x168] ss:$16 sps:$4 sm:$0xff]  }
 0x2fe   :  { %1899 = vmatpush1.bf16.msra.mxu1 %v4764_v15  ;;  %v5421_v15 = vld [vmem:[%s7760_s8 + $0x18c] ss:$16 sps:$4 sm:$0xff]  }
 0x2ff   :  { %3844 = vmatprep.subr.bf16.mxu1 %v5349_v18  ;;  %v5425_v18 = vld [vmem:[%s7760_s8 + $0x1a8] ss:$16 sps:$4 sm:$0xff]  }
 0x300   :  { %1347 = vmatmul.mubr.bf16.gmra.mrb[60].mxu1 %v6262_v46  ;;  %1672 = vmatmul.mubr.bf16.gmra.mrb[48].mxu0 %v6301_v14 }
 0x301   :  { %1356 = vmatprep.mubr.bf16.mxu1 %v5855_v39  ;;  %1681 = vmatprep.mubr.bf16.mxu0 %v5855_v39 }
 0x308   :  { %1357 = vmatmul.mubr.bf16.gmra.mrb[64].mxu1 %v6283_v63  ;;  %1682 = vmatmul.mubr.bf16.gmra.mrb[52].mxu0 %v6312_v24 }
 0x309   :  { %1366 = vmatprep.mubr.bf16.mxu1 %v5855_v39 }
 0x310   :  { %1367 = vmatmul.mubr.bf16.gmra.mrb[68].mxu1 %v6301_v14 }
 0x311   :  { %1376 = vmatprep.mubr.bf16.mxu1 %v5855_v39 }
 0x318   :  { %1377 = vmatmul.mubr.bf16.gmra.mrb[72].mxu1 %v6312_v24 }
 0x319   :  { %1916 = vmatprep.mubr.bf16.mxu1 %v5855_v39 }
 0x320   :  { %1917 = vmatmul.mubr.bf16.vlgmr.msra.gmra.mrb[76].mxu1 %v6212_v57  ;;  %v5392_v57 = vld [vmem:[%s7760_s8 + $0x100] ss:$16 sps:$4 sm:$0xff]  }
 0x321   :  { %1926 = vmatprep.mubr.bf16.mxu1 %v5855_v39  ;;  %3845 = vmatpush1.bf16.msra.mxu1 %v5347_v33 }
 0x322   :  { %3846 = vmatprep.subr.bf16.mxu1 %v5355_v34  ;;  %3697 = vmatpush1.bf16.msra.mxu0 %v5392_v57 }
 0x323   :  { %3698 = vmatprep.subr.bf16.mxu0 %v5400_v48 }
 0x325   :  { %3847 = vmatpush1.bf16.msra.mxu1 %v5353_v37 }
 0x326   :  { %3848 = vmatprep.subr.bf16.mxu1 %v5361_v38  ;;  %3699 = vmatpush1.bf16.msra.mxu0 %v5398_v50 }
 0x327   :  { %3700 = vmatprep.subr.bf16.mxu0 %v5406_v51 }
 0x328   :  { %1927 = vmatmul.mubr.bf16.gmra.mrb[80].mxu1 %v6224_v4  ;;  %v5373_v4 = vld [vmem:[%s7760_s8 + $0x8c] ss:$16 sps:$4 sm:$0xff]  }
 0x329   :  { %1936 = vmatprep.mubr.bf16.mxu1 %v5855_v39  ;;  %3849 = vmatpush1.bf16.msra.mxu1 %v5359_v43 }
 0x32a   :  { %3850 = vmatprep.subr.bf16.mxu1 %v5367_v47  ;;  %3701 = vmatpush1.bf16.msra.mxu0 %v5404_v53 }
 0x32b   :  { %3702 = vmatprep.subr.bf16.mxu0 %v5412_v55 }
 0x32d   :  { %3851 = vmatpush1.bf16.msra.mxu1 %v5365_v49 }
 0x32e   :  { %3852 = vmatprep.subr.bf16.mxu1 %v5373_v4  ;;  %3703 = vmatpush1.bf16.msra.mxu0 %v5410_v58 }
 0x32f   :  { %3704 = vmatprep.subr.bf16.mxu0 %v5418_v59 }
 0x330   :  { %1937 = vmatmul.mubr.bf16.gmra.mrb[84].mxu1 %v6234_v17  ;;  %v5385_v17 = vld [vmem:[%s7760_s8 + $0xcc] ss:$16 sps:$4 sm:$0xff]  }
 0x331   :  { %1946 = vmatprep.mubr.bf16.mxu1 %v5855_v39  ;;  %3853 = vmatpush1.bf16.msra.mxu1 %v5371_v52 }
 0x332   :  { %3854 = vmatprep.subr.bf16.mxu1 %v5379_v54  ;;  %3705 = vmatpush1.bf16.msra.mxu0 %v5416_v61 }
 0x333   :  { %3706 = vmatprep.subr.bf16.mxu0 %v5424_v0 }
 0x335   :  { %3855 = vmatpush1.bf16.msra.mxu1 %v5377_v56 }
 0x336   :  { %3856 = vmatprep.subr.bf16.mxu1 %v5385_v17  ;;  %3707 = vmatpush1.bf16.msra.mxu0 %v5422_v2 }
 0x337   :  { %3708 = vmatprep.subr.bf16.mxu0 %v5430_v41 }
 0x338   :  { %1947 = vmatmul.mubr.bf16.gmra.mrb[88].mxu1 %v6246_v28  ;;  %v5397_v28 = vld [vmem:[%s7760_s8 + $0x10c] ss:$16 sps:$4 sm:$0xff]  }
 0x339   :  { %1956 = vmatprep.mubr.bf16.mxu1 %v5855_v39  ;;  %3857 = vmatpush1.bf16.msra.mxu1 %v5383_v60 }
 0x33a   :  { %3858 = vmatprep.subr.bf16.mxu1 %v5391_v62  ;;  %3709 = vmatpush1.bf16.msra.mxu0 %v5428_v44 }
 0x33b   :  { %3710 = vmatprep.subr.bf16.mxu0 %v5436_v5 }
 0x33d   :  { %3859 = vmatpush1.bf16.msra.mxu1 %v5389_v1 }
 0x33e   :  { %3860 = vmatprep.subr.bf16.mxu1 %v5397_v28  ;;  %3711 = vmatpush1.bf16.msra.mxu0 %v5434_v8 }
 0x33f   :  { %3721 = vmatprep.subr.bf16.mxu0 %v5442_v10 }
 0x340   :  { %1957 = vmatmul.mubr.bf16.gmra.mrb[92].mxu1 %v6262_v46  ;;  %v5409_v46 = vld [vmem:[%s7760_s8 + $0x14c] ss:$16 sps:$4 sm:$0xff]  }
 0x341   :  { %1966 = vmatprep.mubr.bf16.mxu1 %v5855_v39  ;;  %3861 = vmatpush1.bf16.msra.mxu1 %v5395_v42 }
 0x342   :  { %3862 = vmatprep.subr.bf16.mxu1 %v5403_v3 }
 0x345   :  { %3863 = vmatpush1.bf16.msra.mxu1 %v5401_v6 }
 0x346   :  { %3864 = vmatprep.subr.bf16.mxu1 %v5409_v46 }
 0x348   :  { %1967 = vmatmul.mubr.bf16.gmra.mrb[96].mxu1 %v6283_v63  ;;  %v5427_v63 = vld [vmem:[%s7760_s8 + $0x1ac] ss:$16 sps:$4 sm:$0xff]  }
 0x349   :  { %1976 = vmatprep.mubr.bf16.mxu1 %v5855_v39  ;;  %3865 = vmatpush1.bf16.msra.mxu1 %v5407_v9 }
 0x34a   :  { %3866 = vmatprep.subr.bf16.mxu1 %v5415_v12 }
 0x34d   :  { %3867 = vmatpush1.bf16.msra.mxu1 %v5413_v13 }
 0x34e   :  { %3868 = vmatprep.subr.bf16.mxu1 %v5421_v15 }
 0x350   :  { %1977 = vmatmul.mubr.bf16.gmra.mrb[100].mxu1 %v6301_v14  ;;  %v5437_v14 = vld [vmem:[%s7760_s8 + $0x1e8] ss:$16 sps:$4 sm:$0xff]  }
 0x351   :  { %1986 = vmatprep.mubr.bf16.mxu1 %v5855_v39  ;;  %3869 = vmatpush1.bf16.msra.mxu1 %v5419_v16  ;;  %v5439_v39 = vld [vmem:[%s7760_s8 + $0x1ec] ss:$16 sps:$4 sm:$0xff]  }
 0x352   :  { %3870 = vmatprep.subr.bf16.mxu1 %v5427_v63 }
 0x355   :  { %3871 = vmatpush1.bf16.msra.mxu1 %v5425_v18 }
 0x356   :  { %3872 = vmatprep.subr.bf16.mxu1 %v5433_v19 }
 0x358   :  { %1987 = vmatmul.mubr.bf16.gmra.mrb[104].mxu1 %v6312_v24  ;;  %v6637_v24 = vsub.s32 1, %v5944_v7 }
 0x359   :  { %3873 = vmatpush1.bf16.msra.mxu1 %v5431_v20 }
 0x35a   :  { %3874 = vmatprep.subr.bf16.mxu1 %v5439_v39  ;;  %v6643_v25 = vrot.slane %v877_v23, %v6637_v24 }
 0x35d   :  { %3875 = vmatpush1.bf16.msra.mxu1 %v5437_v14 }
 0x35e   :  { %3885 = vmatprep.subr.bf16.mxu1 %v5445_v21 }
 0x383   :  { %v1003_v26 = vpop.f32.mrb[8].mxu0 }
 0x384   :  { %v1004_v27 = vadd.f32 %v1003_v26, %v6640_v45  ;;  %v1005_v29 = vpop.f32.mrb[9].mxu0  ;;  %v1487_v26 = vld [vmem:[%s7759_s7 + $0x4] sm:$0x3] }
 0x385   :  { %v1006_v30 = vadd.f32 %v1005_v29, %v6643_v25  ;;  %v1007_v31 = vpop.f32.mrb[10].mxu0 }
 0x386   :  { %v1008_v32 = vadd.f32 %v1007_v31, %v6640_v45  ;;  %v1009_v33 = vpop.f32.mrb[11].mxu0  ;;  %v1082_v35 = vmax.f32 %v1004_v27, 0.0 }
 0x387   :  { %v1010_v34 = vadd.f32 %v1009_v33, %v6643_v25  ;;  %v1083_v37 = vmax.f32 %v1006_v30, 0.0 }
 0x388   :  { %v1084_v36 = vmax.f32 %v1008_v32, 0.0 }
 0x389   :  { %v1085_v38 = vmax.f32 %v1010_v34, 0.0 }
 0x38a   :  { %v1114_v40 = vmax.f32 %v1082_v35, %v1084_v36 }
 0x38b   :  { %v1127_v57 = vmax.f32 %v1083_v37, %v1085_v38  ;;  %v1013_v43 = vpop.f32.mrb[12].mxu0 }
 0x38c   :  { %v1014_v47 = vadd.f32 %v1013_v43, %v6640_v45  ;;  %v1015_v48 = vpop.f32.mrb[13].mxu0 }
 0x38d   :  { %v1016_v49 = vadd.f32 %v1015_v48, %v6643_v25  ;;  %v1017_v50 = vpop.f32.mrb[14].mxu0 }
 0x38e   :  { %v1086_v4 = vmax.f32 %v1014_v47, 0.0  ;;  %v1018_v51 = vadd.f32 %v1017_v50, %v6640_v45  ;;  %v1019_v52 = vpop.f32.mrb[15].mxu0 }
 0x38f   :  { %v1087_v53 = vmax.f32 %v1016_v49, 0.0  ;;  %v1020_v54 = vadd.f32 %v1019_v52, %v6643_v25 }
 0x390   :  { %v1115_v55 = vmax.f32 %v1114_v40, %v1086_v4  ;;  %v1088_v56 = vmax.f32 %v1018_v51, 0.0 }
 0x391   :  { %v1128_v58 = vmax.f32 %v1127_v57, %v1087_v53  ;;  %v1089_v17 = vmax.f32 %v1020_v54, 0.0  ;;  %v6669_v57 = vrot.slane %v1487_v26, %v6631_v22 }
 0x392   :  { %v1116_v59 = vmax.f32 %v1115_v55, %v1088_v56 }
 0x393   :  { %v1129_v60 = vmax.f32 %v1128_v58, %v1089_v17  ;;  %v1023_v61 = vpop.f32.mrb[16].mxu0  ;;  %v1043_v62 = vpop.f32.mrb[28].mxu1 }
 0x394   :  { %v1024_v0 = vadd.f32 %v1023_v61, %v6640_v45  ;;  %v1044_v1 = vadd.f32 %v1043_v62, %v6640_v45  ;;  %v1025_v2 = vpop.f32.mrb[17].mxu0  ;;  %v1045_v28 = vpop.f32.mrb[29].mxu1 }
 0x395   :  { %v1026_v41 = vadd.f32 %v1025_v2, %v6643_v25  ;;  %v1046_v42 = vadd.f32 %v1045_v28, %v6643_v25  ;;  %v1027_v44 = vpop.f32.mrb[18].mxu0  ;;  %v1047_v3 = vpop.f32.mrb[30].mxu1  ;;  %v6676_v2 = vrot.slane %v1487_v26, %v6637_v24 }
 0x396   :  { %v1090_v5 = vmax.f32 %v1024_v0, 0.0  ;;  %v1028_v6 = vadd.f32 %v1027_v44, %v6640_v45  ;;  %v1048_v8 = vadd.f32 %v1047_v3, %v6640_v45  ;;  %v1029_v46 = vpop.f32.mrb[19].mxu0  ;;  %v1049_v9 = vpop.f32.mrb[31].mxu1  ;;  %v1098_v16 = vmax.f32 %v1044_v1, 0.0 }
 0x397   :  { %v1091_v10 = vmax.f32 %v1026_v41, 0.0  ;;  %v1030_v12 = vadd.f32 %v1029_v46, %v6643_v25  ;;  %v1050_v13 = vadd.f32 %v1049_v9, %v6643_v25  ;;  %v1099_v20 = vmax.f32 %v1046_v42, 0.0 }
 0x398   :  { %v1117_v15 = vmax.f32 %v1116_v59, %v1090_v5  ;;  %v1092_v63 = vmax.f32 %v1028_v6, 0.0  ;;  %v1100_v18 = vmax.f32 %v1048_v8, 0.0 }
 0x399   :  { %v1130_v19 = vmax.f32 %v1129_v60, %v1091_v10  ;;  %v1093_v39 = vmax.f32 %v1030_v12, 0.0  ;;  %v1101_v14 = vmax.f32 %v1050_v13, 0.0 }
 0x39a   :  { %v1118_v21 = vmax.f32 %v1117_v15, %v1092_v63  ;;  %v1140_v23 = vmax.f32 %v1098_v16, %v1100_v18 }
 0x39b   :  { %v1131_v27 = vmax.f32 %v1130_v19, %v1093_v39  ;;  %v1153_v29 = vmax.f32 %v1099_v20, %v1101_v14  ;;  %v1033_v30 = vpop.f32.mrb[20].mxu0  ;;  %v1053_v31 = vpop.f32.mrb[32].mxu1 }
 0x39c   :  { %v1034_v32 = vadd.f32 %v1033_v30, %v6640_v45  ;;  %v1054_v33 = vadd.f32 %v1053_v31, %v6640_v45  ;;  %v1035_v34 = vpop.f32.mrb[21].mxu0  ;;  %v1055_v35 = vpop.f32.mrb[33].mxu1 }
 0x39d   :  { %v1036_v36 = vadd.f32 %v1035_v34, %v6643_v25  ;;  %v1056_v37 = vadd.f32 %v1055_v35, %v6643_v25  ;;  %v1037_v38 = vpop.f32.mrb[22].mxu0  ;;  %v1057_v40 = vpop.f32.mrb[34].mxu1  ;;  %v1182_v35 = vld [vmem:[%s7759_s7 + $0x2] sm:$0x3] }
 0x39e   :  { %v1094_v43 = vmax.f32 %v1034_v32, 0.0  ;;  %v1102_v47 = vmax.f32 %v1054_v33, 0.0  ;;  %v1038_v48 = vadd.f32 %v1037_v38, %v6640_v45  ;;  %v1058_v49 = vadd.f32 %v1057_v40, %v6640_v45  ;;  %v1039_v50 = vpop.f32.mrb[23].mxu0  ;;  %v1059_v4 = vpop.f32.mrb[35].mxu1 }
 0x39f   :  { %v1095_v51 = vmax.f32 %v1036_v36, 0.0  ;;  %v1103_v52 = vmax.f32 %v1056_v37, 0.0  ;;  %v1040_v53 = vadd.f32 %v1039_v50, %v6643_v25  ;;  %v1060_v54 = vadd.f32 %v1059_v4, %v6643_v25 }
 0x3a0   :  { %v1119_v55 = vmax.f32 %v1118_v21, %v1094_v43  ;;  %v1141_v56 = vmax.f32 %v1140_v23, %v1102_v47  ;;  %v1096_v58 = vmax.f32 %v1038_v48, 0.0  ;;  %v1104_v17 = vmax.f32 %v1058_v49, 0.0 }
 0x3a1   :  { %v1132_v59 = vmax.f32 %v1131_v27, %v1095_v51  ;;  %v1154_v60 = vmax.f32 %v1153_v29, %v1103_v52  ;;  %v1097_v61 = vmax.f32 %v1040_v53, 0.0  ;;  %v1105_v62 = vmax.f32 %v1060_v54, 0.0 }
 0x3a2   :  { %v1120_v0 = vmax.f32 %v1119_v55, %v1096_v58  ;;  %v1142_v1 = vmax.f32 %v1141_v56, %v1104_v17  ;;  %v6692_v54 = vrot.slane %v1182_v35, %v6631_v22 }
 0x3a3   :  { %v1133_v28 = vmax.f32 %v1132_v59, %v1097_v61  ;;  %v1155_v41 = vmax.f32 %v1154_v60, %v1105_v62  ;;  %v1063_v42 = vpop.f32.mrb[36].mxu1  ;;  %v1613_v44 = vpop.f32.mrb[24].mxu0 }
 0x3a4   :  { %v1121_v3 = vrot.slane %v1120_v0, 4  ;;  %v1064_v5 = vadd.f32 %v1063_v42, %v6640_v45  ;;  %v1614_v6 = vadd.f32 %v1613_v44, %v6669_v57  ;;  %v1065_v8 = vpop.f32.mrb[37].mxu1  ;;  %v1615_v46 = vpop.f32.mrb[25].mxu0 }
 0x3a5   :  { %v1134_v9 = vrot.slane %v1133_v28, 4  ;;  %v1066_v10 = vadd.f32 %v1065_v8, %v6643_v25  ;;  %v1067_v12 = vpop.f32.mrb[38].mxu1  ;;  %v1617_v13 = vpop.f32.mrb[26].mxu0  ;;  %v1616_v63 = vadd.f32 %v1615_v46, %v6676_v2 }
 0x3a6   :  { %v1122_v15 = vmax.f32 %v1120_v0, %v1121_v3  ;;  %v1106_v16 = vmax.f32 %v1064_v5, 0.0  ;;  %v1068_v18 = vadd.f32 %v1067_v12, %v6640_v45  ;;  %v1069_v19 = vpop.f32.mrb[39].mxu1  ;;  %v1619_v20 = vpop.f32.mrb[27].mxu0  ;;  %v1692_v14 = vmax.f32 %v1614_v6, 0.0 }
 0x3a7   :  { %v1135_v39 = vmax.f32 %v1133_v28, %v1134_v9  ;;  %v1107_v21 = vmax.f32 %v1066_v10, 0.0  ;;  %v1618_v23 = vadd.f32 %v1617_v13, %v6669_v57  ;;  %v1070_v30 = vadd.f32 %v1069_v19, %v6643_v25 }
 0x3a8   :  { %v1123_v26 = vrot.slane %v1122_v15, 2  ;;  %v1143_v27 = vmax.f32 %v1142_v1, %v1106_v16  ;;  %v1108_v29 = vmax.f32 %v1068_v18, 0.0  ;;  %v1620_v34 = vadd.f32 %v1619_v20, %v6676_v2 }
 0x3a9   :  { %v1136_v31 = vrot.slane %v1135_v39, 2  ;;  %v1156_v32 = vmax.f32 %v1155_v41, %v1107_v21  ;;  %v1694_v33 = vmax.f32 %v1618_v23, 0.0  ;;  %v1109_v38 = vmax.f32 %v1070_v30, 0.0 }
 0x3aa   :  { %v1124_v36 = vmax.f32 %v1122_v15, %v1123_v26  ;;  %v1144_v37 = vmax.f32 %v1143_v27, %v1108_v29  ;;  %v1693_v40 = vmax.f32 %v1616_v63, 0.0  ;;  %v1695_v47 = vmax.f32 %v1620_v34, 0.0 }
 0x3ab   :  { %v1724_v43 = vmax.f32 %v1692_v14, %v1694_v33  ;;  %v1073_v48 = vpop.f32.mrb[40].mxu1  ;;  %v1623_v49 = vpop.f32.mrb[28].mxu0  ;;  %v1157_v50 = vmax.f32 %v1156_v32, %v1109_v38  ;;  %v6694_v55 = vmax.f32 %v1135_v39, %v1136_v31 }
 0x3ac   :  { %v1074_v4 = vadd.f32 %v1073_v48, %v6640_v45  ;;  %v1624_v51 = vadd.f32 %v1623_v49, %v6669_v57  ;;  %v1075_v52 = vpop.f32.mrb[41].mxu1  ;;  %v1625_v53 = vpop.f32.mrb[29].mxu0  ;;  %v1737_v56 = vmax.f32 %v1693_v40, %v1695_v47  ;;  %v1125_v61 = vrot.slane %v1124_v36, 1 }
 0x3ad   :  { %v1076_v58 = vadd.f32 %v1075_v52, %v6643_v25  ;;  %v1626_v17 = vadd.f32 %v1625_v53, %v6676_v2  ;;  %v1077_v59 = vpop.f32.mrb[42].mxu1  ;;  %v1627_v60 = vpop.f32.mrb[30].mxu0  ;;  %v1138_v30 = vrot.slane %v6694_v55, 1 }
 0x3ae   :  { %v1110_v62 = vmax.f32 %v1074_v4, 0.0  ;;  %v1696_v0 = vmax.f32 %v1624_v51, 0.0  ;;  %v1078_v1 = vadd.f32 %v1077_v59, %v6640_v45  ;;  %v1079_v28 = vpop.f32.mrb[43].mxu1  ;;  %v1629_v41 = vpop.f32.mrb[31].mxu0  ;;  %v1628_v3 = vadd.f32 %v1627_v60, %v6669_v57 }
 0x3af   :  { %v1111_v42 = vmax.f32 %v1076_v58, 0.0  ;;  %v1697_v44 = vmax.f32 %v1626_v17, 0.0  ;;  %v1080_v5 = vadd.f32 %v1079_v28, %v6643_v25  ;;  %v1630_v9 = vadd.f32 %v1629_v41, %v6676_v2 }
 0x3b0   :  { %v1145_v6 = vmax.f32 %v1144_v37, %v1110_v62  ;;  %v1725_v8 = vmax.f32 %v1724_v43, %v1696_v0  ;;  %v1112_v46 = vmax.f32 %v1078_v1, 0.0  ;;  %v1698_v13 = vmax.f32 %v1628_v3, 0.0 }
 0x3b1   :  { %v1158_v10 = vmax.f32 %v1157_v50, %v1111_v42  ;;  %v1738_v12 = vmax.f32 %v1737_v56, %v1697_v44  ;;  %v1113_v15 = vmax.f32 %v1080_v5, 0.0  ;;  %v1699_v63 = vmax.f32 %v1630_v9, 0.0 }
 0x3b2   :  { %v1146_v16 = vmax.f32 %v1145_v6, %v1112_v46  ;;  %v6703_v45 = vrot.slane %v1182_v35, %v6637_v24  ;;  %v1726_v18 = vmax.f32 %v1725_v8, %v1698_v13  ;;  %v6707_v29 = vmax.f32 %v1124_v36, %v1125_v61 }
 0x3b3   :  { %v1159_v19 = vmax.f32 %v1158_v10, %v1113_v15  ;;  %v1308_v20 = vpop.f32.mrb[44].mxu1  ;;  %v1633_v39 = vpop.f32.mrb[32].mxu0  ;;  %v1739_v25 = vmax.f32 %v1738_v12, %v1699_v63  ;;  %v1139_v3 = vmax.f32 %v6694_v55, %v1138_v30 }
 0x3b4   :  { %v1147_v14 = vrot.slane %v1146_v16, 4  ;;  %v1309_v21 = vadd.f32 %v1308_v20, %v6692_v54  ;;  %v1634_v23 = vadd.f32 %v1633_v39, %v6669_v57  ;;  %v1310_v26 = vpop.f32.mrb[45].mxu1  ;;  %v1635_v27 = vpop.f32.mrb[33].mxu0 }
 0x3b5   :  { %v1160_v31 = vrot.slane %v1159_v19, 4  ;;  %v1636_v32 = vadd.f32 %v1635_v27, %v6676_v2  ;;  %v1312_v33 = vpop.f32.mrb[46].mxu1  ;;  %v1637_v34 = vpop.f32.mrb[34].mxu0  ;;  %v1311_v38 = vadd.f32 %v1310_v26, %v6703_v45 }
 0x3b6   :  { %v1148_v35 = vmax.f32 %v1146_v16, %v1147_v14  ;;  %v1700_v37 = vmax.f32 %v1634_v23, 0.0  ;;  %v1313_v40 = vadd.f32 %v1312_v33, %v6692_v54  ;;  %v1314_v43 = vpop.f32.mrb[47].mxu1  ;;  %v1639_v47 = vpop.f32.mrb[35].mxu0  ;;  %v1387_v49 = vmax.f32 %v1309_v21, 0.0 }
 0x3b7   :  { %v1161_v48 = vmax.f32 %v1159_v19, %v1160_v31  ;;  %v1701_v50 = vmax.f32 %v1636_v32, 0.0  ;;  %v1638_v36 = vadd.f32 %v1637_v34, %v6669_v57  ;;  %v1315_v53 = vadd.f32 %v1314_v43, %v6703_v45 }
 0x3b8   :  { %v1149_v4 = vrot.slane %v1148_v35, 2  ;;  %v1727_v51 = vmax.f32 %v1726_v18, %v1700_v37  ;;  %v1389_v52 = vmax.f32 %v1313_v40, 0.0  ;;  %v1640_v59 = vadd.f32 %v1639_v47, %v6676_v2 }
 0x3b9   :  { %v1162_v56 = vrot.slane %v1161_v48, 2  ;;  %v1740_v58 = vmax.f32 %v1739_v25, %v1701_v50  ;;  %v1702_v17 = vmax.f32 %v1638_v36, 0.0  ;;  %v1388_v61 = vmax.f32 %v1311_v38, 0.0 }
 0x3ba   :  { %v1150_v60 = vmax.f32 %v1148_v35, %v1149_v4  ;;  %v1419_v62 = vmax.f32 %v1387_v49, %v1389_v52  ;;  %v1390_v0 = vmax.f32 %v1315_v53, 0.0  ;;  %v1703_v41 = vmax.f32 %v1640_v59, 0.0 }
 0x3bb   :  { %v1163_v1 = vmax.f32 %v1161_v48, %v1162_v56  ;;  %v1728_v28 = vmax.f32 %v1727_v51, %v1702_v17  ;;  %v1318_v42 = vpop.f32.mrb[48].mxu1  ;;  %v1643_v44 = vpop.f32.mrb[36].mxu0  ;;  %v5440_v17 = vld [vmem:[%s7760_s8 + $0x200] ss:$16 sps:$4 sm:$0xff]  }
 0x3bc   :  { %v1151_v5 = vrot.slane %v1150_v60, 1  ;;  %v1432_v6 = vmax.f32 %v1388_v61, %v1390_v0  ;;  %v1319_v8 = vadd.f32 %v1318_v42, %v6692_v54  ;;  %v1644_v46 = vadd.f32 %v1643_v44, %v6669_v57  ;;  %v1320_v9 = vpop.f32.mrb[49].mxu1  ;;  %v1645_v10 = vpop.f32.mrb[37].mxu0  ;;  %v5443_v61 = vld [vmem:[%s7760_s8 + $0x208] ss:$16 sps:$4 sm:$0xff]  }
 0x3bd   :  { %v1164_v12 = vrot.slane %v1163_v1, 1  ;;  %v1741_v13 = vmax.f32 %v1740_v58, %v1703_v41  ;;  %v1321_v15 = vadd.f32 %v1320_v9, %v6703_v45  ;;  %v1646_v16 = vadd.f32 %v1645_v10, %v6676_v2  ;;  %v1322_v63 = vpop.f32.mrb[50].mxu1  ;;  %v1647_v18 = vpop.f32.mrb[38].mxu0 }
 0x3be   :  { %v1152_v19 = vmax.f32 %v1150_v60, %v1151_v5  ;;  %v1391_v20 = vmax.f32 %v1319_v8, 0.0  ;;  %v1704_v39 = vmax.f32 %v1644_v46, 0.0  ;;  %v1323_v55 = vadd.f32 %v1322_v63, %v6692_v54  ;;  %v1324_v14 = vpop.f32.mrb[51].mxu1  ;;  %v1649_v25 = vpop.f32.mrb[39].mxu0  ;;  %v5451_v5 = vld [vmem:[%s7760_s8 + $0x22c] ss:$16 sps:$4 sm:$0xff]  }
 0x3bf   :  { %v1392_v21 = vmax.f32 %v1321_v15, 0.0  ;;  %v1705_v23 = vmax.f32 %v1646_v16, 0.0  ;;  %v1648_v26 = vadd.f32 %v1647_v18, %v6669_v57  ;;  %v1325_v27 = vadd.f32 %v1324_v14, %v6703_v45  ;;  %v5446_v18 = vld [vmem:[%s7760_s8 + $0x220] ss:$16 sps:$4 sm:$0xff]   ;;  %v5457_v14 = vld [vmem:[%s7760_s8 + $0x24c] ss:$16 sps:$4 sm:$0xff]  }
 0x3c0   :  { %v1420_v30 = vmax.f32 %v1419_v62, %v1391_v20  ;;  %v1729_v31 = vmax.f32 %v1728_v28, %v1704_v39  ;;  %v1393_v32 = vmax.f32 %v1323_v55, 0.0  ;;  %v1650_v33 = vadd.f32 %v1649_v25, %v6676_v2  ;;  %v5454_v55 = vld [vmem:[%s7760_s8 + $0x244] ss:$16 sps:$4 sm:$0xff]  }
 0x3c1   :  { %v1433_v34 = vmax.f32 %v1432_v6, %v1392_v21  ;;  %v1742_v35 = vmax.f32 %v1741_v13, %v1705_v23  ;;  %v1706_v37 = vmax.f32 %v1648_v26, 0.0  ;;  %v1394_v38 = vmax.f32 %v1325_v27, 0.0 }
 0x3c2   :  { %v1421_v40 = vmax.f32 %v1420_v30, %v1393_v32  ;;  %v1707_v43 = vmax.f32 %v1650_v33, 0.0  ;;  %v1165_v47 = vmax.f32 %v1163_v1, %v1164_v12  ;;  %v2086_v48 = vsel %vm2085_vm4, %v1152_v19, %v6707_v29  ;;  %v5448_v1 = vld [vmem:[%s7760_s8 + $0x224] ss:$16 sps:$4 sm:$0xff]   ;;  %v5449_v19 = vld [vmem:[%s7760_s8 + $0x228] ss:$16 sps:$4 sm:$0xff]  }
 0x3c3   :  { %v6727_v49 = vmax.f32 %v1729_v31, %v1706_v37  ;;  %v1434_v50 = vmax.f32 %v1433_v34, %v1394_v38  ;;  %v1328_v36 = vpop.f32.mrb[52].mxu1  ;;  %v1653_v4 = vpop.f32.mrb[40].mxu0  ;;  %v2114_v42 = vpack.c.bf16 %v2086_v48, %v2086_v48 }
 0x3c4   :  { %v6729_v51 = vmax.f32 %v1742_v35, %v1707_v43  ;;  %v1329_v52 = vadd.f32 %v1328_v36, %v6692_v54  ;;  %v1330_v53 = vpop.f32.mrb[53].mxu1  ;;  %v1655_v56 = vpop.f32.mrb[41].mxu0  ;;  %v2087_v58 = vsel %vm2085_vm4, %v1165_v47, %v1139_v3  ;;  %v1654_v59 = vadd.f32 %v1653_v4, %v6669_v57  ;;  %v5452_v35 = vld [vmem:[%s7760_s8 + $0x240] ss:$16 sps:$4 sm:$0xff]   ;;  %v5455_v43 = vld [vmem:[%s7760_s8 + $0x248] ss:$16 sps:$4 sm:$0xff]  }
 0x3c5   :  { %v1331_v29 = vadd.f32 %v1330_v53, %v6703_v45  ;;  %v2115_v60 = vpack.c.bf16 %v2087_v58, %v2087_v58  ;;  %v1332_v62 = vpop.f32.mrb[54].mxu1  ;;  %v1657_v0 = vpop.f32.mrb[42].mxu0  ;;  %v1656_v8 = vadd.f32 %v1655_v56, %v6676_v2  ;;  %v5463_v58 = vld [vmem:[%s7760_s8 + $0x26c] ss:$16 sps:$4 sm:$0xff]  }
 0x3c6   :  { %v1395_v28 = vmax.f32 %v1329_v52, 0.0  ;;  %v1333_v41 = vadd.f32 %v1332_v62, %v6692_v54  ;;  %v1334_v44 = vpop.f32.mrb[55].mxu1  ;;  %v1659_v3 = vpop.f32.mrb[43].mxu0  ;;  %v1658_v46 = vadd.f32 %v1657_v0, %v6669_v57  ;;  %v1708_v13 = vmax.f32 %v1654_v59, 0.0 }
 0x3c7   :  { %v1396_v6 = vmax.f32 %v1331_v29, 0.0  ;;  %3712 = vmatprep.mubr.bf16.mxu0 %v2115_v60  ;;  %3876 = vmatprep.mubr.bf16.mxu1 %v2115_v60  ;;  %v1335_v12 = vadd.f32 %v1334_v44, %v6703_v45  ;;  %v1660_v63 = vadd.f32 %v1659_v3, %v6676_v2  ;;  %v1709_v25 = vmax.f32 %v1656_v8, 0.0  ;;  %v5458_v44 = vld [vmem:[%s7760_s8 + $0x260] ss:$16 sps:$4 sm:$0xff]   ;;  %v5461_v3 = vld [vmem:[%s7760_s8 + $0x268] ss:$16 sps:$4 sm:$0xff]  }
 0x3c8   :  { %v1422_v9 = vmax.f32 %v1421_v40, %v1395_v28  ;;  %v1397_v10 = vmax.f32 %v1333_v41, 0.0  ;;  %3713 = vmatmul.mubr.bf16.vlgmr.msra.gmra.mrb[56].mxu0 %v2114_v42  ;;  %3877 = vmatmul.mubr.bf16.vlgmr.msra.gmra.mrb[108].mxu1 %v2114_v42  ;;  %v1710_v16 = vmax.f32 %v1658_v46, 0.0  ;;  %v5466_v8 = vld [vmem:[%s7760_s8 + $0x284] ss:$16 sps:$4 sm:$0xff]   ;;  %v5469_v46 = vld [vmem:[%s7760_s8 + $0x28c] ss:$16 sps:$4 sm:$0xff]  }
 0x3c9   :  { %v1435_v15 = vmax.f32 %v1434_v50, %v1396_v6  ;;  %3722 = vmatpush1.bf16.msra.mxu0 %v5440_v17  ;;  %3886 = vmatpush1.bf16.msra.mxu1 %v5443_v61  ;;  %v1398_v39 = vmax.f32 %v1335_v12, 0.0  ;;  %v1711_v23 = vmax.f32 %v1660_v63, 0.0  ;;  %v5460_v50 = vld [vmem:[%s7760_s8 + $0x264] ss:$16 sps:$4 sm:$0xff]  }
 0x3ca   :  { %v1423_v20 = vmax.f32 %v1422_v9, %v1397_v10  ;;  %3723 = vmatprep.subr.bf16.mxu0 %v5448_v1  ;;  %3887 = vmatprep.subr.bf16.mxu1 %v5451_v5  ;;  %v1750_v21 = vmax.f32 %v1708_v13, %v1710_v16 }
 0x3cb   :  { %v1338_v26 = vpop.f32.mrb[56].mxu1  ;;  %v1663_v27 = vpop.f32.mrb[44].mxu0  ;;  %v1436_v30 = vmax.f32 %v1435_v15, %v1398_v39  ;;  %v1763_v37 = vmax.f32 %v1709_v25, %v1711_v23  ;;  %v5472_v23 = vld [vmem:[%s7760_s8 + $0x2a4] ss:$16 sps:$4 sm:$0xff]  }
 0x3cc   :  { %v1339_v31 = vadd.f32 %v1338_v26, %v6692_v54  ;;  %v1664_v32 = vadd.f32 %v1663_v27, %v6669_v57  ;;  %v1340_v33 = vpop.f32.mrb[57].mxu1  ;;  %v1665_v34 = vpop.f32.mrb[45].mxu0  ;;  %v1731_v26 = vrot.slane %v6727_v49, 4 }
 0x3cd   :  { %3724 = vmatpush1.bf16.msra.mxu0 %v5446_v18  ;;  %3888 = vmatpush1.bf16.msra.mxu1 %v5449_v19  ;;  %v1341_v38 = vadd.f32 %v1340_v33, %v6703_v45  ;;  %v1666_v40 = vadd.f32 %v1665_v34, %v6676_v2  ;;  %v1342_v47 = vpop.f32.mrb[58].mxu1  ;;  %v1667_v48 = vpop.f32.mrb[46].mxu0  ;;  %v5475_v33 = vld [vmem:[%s7760_s8 + $0x2ac] ss:$16 sps:$4 sm:$0xff]  }
 0x3ce   :  { %v1399_v36 = vmax.f32 %v1339_v31, 0.0  ;;  %v1712_v4 = vmax.f32 %v1664_v32, 0.0  ;;  %3725 = vmatprep.subr.bf16.mxu0 %v5454_v55  ;;  %3889 = vmatprep.subr.bf16.mxu1 %v5457_v14  ;;  %v1343_v52 = vadd.f32 %v1342_v47, %v6692_v54  ;;  %v1344_v53 = vpop.f32.mrb[59].mxu1  ;;  %v1669_v56 = vpop.f32.mrb[47].mxu0  ;;  %v1668_v29 = vadd.f32 %v1667_v48, %v6669_v57  ;;  %v5467_v14 = vld [vmem:[%s7760_s8 + $0x288] ss:$16 sps:$4 sm:$0xff]  }
 0x3cf   :  { %v1400_v17 = vmax.f32 %v1341_v38, 0.0  ;;  %v1713_v59 = vmax.f32 %v1666_v40, 0.0  ;;  %v1345_v0 = vadd.f32 %v1344_v53, %v6703_v45  ;;  %v1670_v42 = vadd.f32 %v1669_v56, %v6676_v2  ;;  %v5470_v47 = vld [vmem:[%s7760_s8 + $0x2a0] ss:$16 sps:$4 sm:$0xff]   ;;  %v5478_v53 = vld [vmem:[%s7760_s8 + $0x2c4] ss:$16 sps:$4 sm:$0xff]  }
 0x3d0   :  { %v1424_v60 = vmax.f32 %v1423_v20, %v1399_v36  ;;  %v1751_v61 = vmax.f32 %v1750_v21, %v1712_v4  ;;  %v1401_v62 = vmax.f32 %v1343_v52, 0.0  ;;  %v1714_v41 = vmax.f32 %v1668_v29, 0.0  ;;  %v5464_v20 = vld [vmem:[%s7760_s8 + $0x280] ss:$16 sps:$4 sm:$0xff]   ;;  %v5473_v52 = vld [vmem:[%s7760_s8 + $0x2a8] ss:$16 sps:$4 sm:$0xff]  }
 0x3d1   :  { %v1437_v1 = vmax.f32 %v1436_v30, %v1400_v17  ;;  %v1764_v28 = vmax.f32 %v1763_v37, %v1713_v59  ;;  %3726 = vmatpush1.bf16.msra.mxu0 %v5452_v35  ;;  %3890 = vmatpush1.bf16.msra.mxu1 %v5455_v43  ;;  %v1402_v6 = vmax.f32 %v1345_v0, 0.0  ;;  %v1715_v10 = vmax.f32 %v1670_v42, 0.0  ;;  %v5481_v29 = vld [vmem:[%s7760_s8 + $0x2cc] ss:$16 sps:$4 sm:$0xff]  }
 0x3d2   :  { %v6790_v5 = vmax.f32 %v1424_v60, %v1401_v62  ;;  %3727 = vmatprep.subr.bf16.mxu0 %v5460_v50  ;;  %3891 = vmatprep.subr.bf16.mxu1 %v5463_v58  ;;  %v1752_v9 = vmax.f32 %v1751_v61, %v1714_v41  ;;  %v6831_v56 = vmax.f32 %v6727_v49, %v1731_v26  ;;  %v1744_v58 = vrot.slane %v6729_v51, 4 }
 0x3d3   :  { %v1348_v12 = vpop.f32.mrb[60].mxu1  ;;  %v1673_v13 = vpop.f32.mrb[48].mxu0  ;;  %v6798_v15 = vmax.f32 %v1437_v1, %v1402_v6  ;;  %v1765_v39 = vmax.f32 %v1764_v28, %v1715_v10 }
 0x3d4   :  { %v1349_v16 = vadd.f32 %v1348_v12, %v6692_v54  ;;  %v1674_v63 = vadd.f32 %v1673_v13, %v6669_v57  ;;  %v1350_v18 = vpop.f32.mrb[61].mxu1  ;;  %v1675_v19 = vpop.f32.mrb[49].mxu0  ;;  %v5484_v12 = vld [vmem:[%s7760_s8 + $0x2e4] ss:$16 sps:$4 sm:$0xff]   ;;  %v1733_v13 = vrot.slane %v6831_v56, 2 }
 0x3d5   :  { %3728 = vmatpush1.bf16.msra.mxu0 %v5458_v44  ;;  %3892 = vmatpush1.bf16.msra.mxu1 %v5461_v3  ;;  %v1676_v55 = vadd.f32 %v1675_v19, %v6676_v2  ;;  %v1352_v25 = vpop.f32.mrb[62].mxu1  ;;  %v1677_v21 = vpop.f32.mrb[50].mxu0  ;;  %v1351_v30 = vadd.f32 %v1350_v18, %v6703_v45  ;;  %v5476_v44 = vld [vmem:[%s7760_s8 + $0x2c0] ss:$16 sps:$4 sm:$0xff]  }
 0x3d6   :  { %v1716_v27 = vmax.f32 %v1674_v63, 0.0  ;;  %3729 = vmatprep.subr.bf16.mxu0 %v5466_v8  ;;  %3893 = vmatprep.subr.bf16.mxu1 %v5469_v46  ;;  %v1354_v31 = vpop.f32.mrb[63].mxu1  ;;  %v1679_v32 = vpop.f32.mrb[51].mxu0  ;;  %v1353_v35 = vadd.f32 %v1352_v25, %v6692_v54  ;;  %v1678_v37 = vadd.f32 %v1677_v21, %v6669_v57  ;;  %v1403_v38 = vmax.f32 %v1349_v16, 0.0  ;;  %v5479_v46 = vld [vmem:[%s7760_s8 + $0x2c8] ss:$16 sps:$4 sm:$0xff]  }
 0x3d7   :  { %v1717_v34 = vmax.f32 %v1676_v55, 0.0  ;;  %v1355_v43 = vadd.f32 %v1354_v31, %v6703_v45  ;;  %v1680_v4 = vadd.f32 %v1679_v32, %v6676_v2  ;;  %v1404_v17 = vmax.f32 %v1351_v30, 0.0 }
 0x3d8   :  { %v1753_v40 = vmax.f32 %v1752_v9, %v1716_v27  ;;  %v1405_v50 = vmax.f32 %v1353_v35, 0.0  ;;  %v1718_v36 = vmax.f32 %v1678_v37, 0.0  ;;  %v1745_v16 = vmax.f32 %v6729_v51, %v1744_v58  ;;  %v5488_v58 = vld [vmem:[%s7760_s8 + $0x300] ss:$16 sps:$4 sm:$0xff]  }
 0x3d9   :  { %v1766_v48 = vmax.f32 %v1765_v39, %v1717_v34  ;;  %3730 = vmatpush1.bf16.msra.mxu0 %v5464_v20  ;;  %3894 = vmatpush1.bf16.msra.mxu1 %v5467_v14  ;;  %v1406_v59 = vmax.f32 %v1355_v43, 0.0  ;;  %v1719_v62 = vmax.f32 %v1680_v4, 0.0  ;;  %v5487_v39 = vld [vmem:[%s7760_s8 + $0x2ec] ss:$16 sps:$4 sm:$0xff]   ;;  %v5482_v34 = vld [vmem:[%s7760_s8 + $0x2e0] ss:$16 sps:$4 sm:$0xff]  }
 0x3da   :  { %3731 = vmatprep.subr.bf16.mxu0 %v5472_v23  ;;  %3895 = vmatprep.subr.bf16.mxu1 %v5475_v33  ;;  %v1445_v60 = vmax.f32 %v1403_v38, %v1405_v50  ;;  %v1754_v61 = vmax.f32 %v1753_v40, %v1718_v36  ;;  %v5493_v40 = vld [vmem:[%s7760_s8 + $0x30c] ss:$16 sps:$4 sm:$0xff]   ;;  %v1746_v50 = vrot.slane %v1745_v16, 2 }
 0x3db   :  { %v1358_v0 = vpop.f32.mrb[64].mxu1  ;;  %v1683_v1 = vpop.f32.mrb[52].mxu0  ;;  %v1458_v28 = vmax.f32 %v1404_v17, %v1406_v59  ;;  %v1767_v3 = vmax.f32 %v1766_v48, %v1719_v62  ;;  %v1734_v17 = vmax.f32 %v6831_v56, %v1733_v13  ;;  %v5496_v62 = vld [vmem:[%s7760_s8 + $0x324] ss:$16 sps:$4 sm:$0xff]  }
 0x3dc   :  { %v1359_v41 = vadd.f32 %v1358_v0, %v6692_v54  ;;  %v1360_v49 = vpop.f32.mrb[65].mxu1  ;;  %v1685_v42 = vpop.f32.mrb[53].mxu0  ;;  %v1684_v6 = vadd.f32 %v1683_v1, %v6669_v57 }
 0x3dd   :  { %3732 = vmatpush1.bf16.msra.mxu0 %v5470_v47  ;;  %3896 = vmatpush1.bf16.msra.mxu1 %v5473_v52  ;;  %v1361_v8 = vadd.f32 %v1360_v49, %v6703_v45  ;;  %v1362_v9 = vpop.f32.mrb[66].mxu1  ;;  %v1687_v10 = vpop.f32.mrb[54].mxu0  ;;  %v1686_v18 = vadd.f32 %v1685_v42, %v6676_v2 }
 0x3de   :  { %v1407_v63 = vmax.f32 %v1359_v41, 0.0  ;;  %3733 = vmatprep.subr.bf16.mxu0 %v5478_v53  ;;  %3897 = vmatprep.subr.bf16.mxu1 %v5481_v29  ;;  %v1364_v19 = vpop.f32.mrb[67].mxu1  ;;  %v1689_v20 = vpop.f32.mrb[55].mxu0  ;;  %v1720_v55 = vmax.f32 %v1684_v6, 0.0  ;;  %v1363_v25 = vadd.f32 %v1362_v9, %v6692_v54  ;;  %v1688_v21 = vadd.f32 %v1687_v10, %v6669_v57  ;;  %v5485_v57 = vld [vmem:[%s7760_s8 + $0x2e8] ss:$16 sps:$4 sm:$0xff]  }
 0x3df   :  { %v1408_v14 = vmax.f32 %v1361_v8, 0.0  ;;  %v1721_v26 = vmax.f32 %v1686_v18, 0.0  ;;  %v1365_v51 = vadd.f32 %v1364_v19, %v6703_v45  ;;  %v1690_v27 = vadd.f32 %v1689_v20, %v6676_v2  ;;  %v5490_v2 = vld [vmem:[%s7760_s8 + $0x304] ss:$16 sps:$4 sm:$0xff]   ;;  %v5499_v41 = vld [vmem:[%s7760_s8 + $0x32c] ss:$16 sps:$4 sm:$0xff]  }
 0x3e0   :  { %v1446_v23 = vmax.f32 %v1445_v60, %v1407_v63  ;;  %v1755_v30 = vmax.f32 %v1754_v61, %v1720_v55  ;;  %v1409_v32 = vmax.f32 %v1363_v25, 0.0  ;;  %v1722_v33 = vmax.f32 %v1688_v21, 0.0  ;;  %v5491_v60 = vld [vmem:[%s7760_s8 + $0x308] ss:$16 sps:$4 sm:$0xff]   ;;  %v5494_v9 = vld [vmem:[%s7760_s8 + $0x320] ss:$16 sps:$4 sm:$0xff]  }
 0x3e1   :  { %v1459_v31 = vmax.f32 %v1458_v28, %v1408_v14  ;;  %3734 = vmatpush1.bf16.msra.mxu0 %v5476_v44  ;;  %3898 = vmatpush1.bf16.msra.mxu1 %v5479_v46  ;;  %v1768_v35 = vmax.f32 %v1767_v3, %v1721_v26  ;;  %v1410_v37 = vmax.f32 %v1365_v51, 0.0  ;;  %v1723_v38 = vmax.f32 %v1690_v27, 0.0  ;;  %v5497_v10 = vld [vmem:[%s7760_s8 + $0x328] ss:$16 sps:$4 sm:$0xff]   ;;  %v5505_v55 = vld [vmem:[%s7760_s8 + $0x34c] ss:$16 sps:$4 sm:$0xff]  }
 0x3e2   :  { %3735 = vmatprep.subr.bf16.mxu0 %v5484_v12  ;;  %3899 = vmatprep.subr.bf16.mxu1 %v5487_v39  ;;  %v1447_v43 = vmax.f32 %v1446_v23, %v1409_v32  ;;  %v1756_v47 = vmax.f32 %v1755_v30, %v1722_v33  ;;  %v1747_v3 = vmax.f32 %v1745_v16, %v1746_v50  ;;  %v1735_v12 = vrot.slane %v1734_v17, 1  ;;  %v5502_v16 = vld [vmem:[%s7760_s8 + $0x344] ss:$16 sps:$4 sm:$0xff]   ;;  %v5500_v32 = vld [vmem:[%s7760_s8 + $0x340] ss:$16 sps:$4 sm:$0xff]  }
 0x3e3   :  { %v1368_v48 = vpop.f32.mrb[68].mxu1  ;;  %v1460_v36 = vmax.f32 %v1459_v31, %v1410_v37  ;;  %v1769_v4 = vmax.f32 %v1768_v35, %v1723_v38  ;;  %v1426_v19 = vrot.slane %v6790_v5, 4  ;;  %v1792_v14 = vld [vmem:[%s7759_s7 + $0x6] sm:$0x3]  ;;  %v1439_v25 = vrot.slane %v6798_v15, 4 }
 0x3e4   :  { %v1369_v52 = vadd.f32 %v1368_v48, %v6692_v54  ;;  %v1370_v53 = vpop.f32.mrb[69].mxu1  ;;  %v1757_v59 = vrot.slane %v1756_v47, 4  ;;  %v1748_v51 = vrot.slane %v1747_v3, 1  ;;  %v1736_v33 = vmax.f32 %v1734_v17, %v1735_v12  ;;  %v5503_v35 = vld [vmem:[%s7760_s8 + $0x348] ss:$16 sps:$4 sm:$0xff]  }
 0x3e5   :  { %3736 = vmatpush1.bf16.msra.mxu0 %v5482_v34  ;;  %3900 = vmatpush1.bf16.msra.mxu1 %v5485_v57  ;;  %v1371_v29 = vadd.f32 %v1370_v53, %v6703_v45  ;;  %v1372_v61 = vpop.f32.mrb[70].mxu1  ;;  %v1770_v0 = vrot.slane %v1769_v4, 4  ;;  %v5508_v38 = vld [vmem:[%s7760_s8 + $0x364] ss:$16 sps:$4 sm:$0xff]   ;;  %v5515_v12 = vld [vmem:[%s7760_s8 + $0x388] ss:$16 sps:$4 sm:$0xff]  }
 0x3e6   :  { %v1411_v1 = vmax.f32 %v1369_v52, 0.0  ;;  %3737 = vmatprep.subr.bf16.mxu0 %v5490_v2  ;;  %3901 = vmatprep.subr.bf16.mxu1 %v5493_v40  ;;  %v1373_v56 = vadd.f32 %v1372_v61, %v6692_v54  ;;  %v1374_v28 = vpop.f32.mrb[71].mxu1  ;;  %v1758_v49 = vmax.f32 %v1756_v47, %v1757_v59  ;;  %v6917_v2 = vrot.slane %v1792_v14, %v6631_v22 }
 0x3e7   :  { %v1412_v42 = vmax.f32 %v1371_v29, 0.0  ;;  %v1375_v44 = vadd.f32 %v1374_v28, %v6703_v45  ;;  %v1771_v6 = vmax.f32 %v1769_v4, %v1770_v0  ;;  %v1427_v40 = vmax.f32 %v6790_v5, %v1426_v19  ;;  %v5517_v28 = vld [vmem:[%s7760_s8 + $0x38c] ss:$16 sps:$4 sm:$0xff]  }
 0x3e8   :  { %v1448_v8 = vmax.f32 %v1447_v43, %v1411_v1  ;;  %v1413_v46 = vmax.f32 %v1373_v56, 0.0  ;;  %v1759_v13 = vrot.slane %v1758_v49, 2  ;;  %v1440_v4 = vmax.f32 %v6798_v15, %v1439_v25  ;;  %v5509_v15 = vld [vmem:[%s7760_s8 + $0x368] ss:$16 sps:$4 sm:$0xff]   ;;  %v5514_v56 = vld [vmem:[%s7760_s8 + $0x384] ss:$16 sps:$4 sm:$0xff]  }
 0x3e9   :  { %v1461_v63 = vmax.f32 %v1460_v36, %v1412_v42  ;;  %3738 = vmatpush1.bf16.msra.mxu0 %v5488_v58  ;;  %3902 = vmatpush1.bf16.msra.mxu1 %v5491_v60  ;;  %v1414_v18 = vmax.f32 %v1375_v44, 0.0  ;;  %v1772_v20 = vrot.slane %v1771_v6, 2  ;;  %v5511_v36 = vld [vmem:[%s7760_s8 + $0x36c] ss:$16 sps:$4 sm:$0xff]   ;;  %v1749_v5 = vmax.f32 %v1747_v3, %v1748_v51  ;;  %v5518_v51 = vld [vmem:[%s7760_s8 + $0x3a0] ss:$16 sps:$4 sm:$0xff]  }
 0x3ea   :  { %v1449_v39 = vmax.f32 %v1448_v8, %v1413_v46  ;;  %3739 = vmatprep.subr.bf16.mxu0 %v5496_v62  ;;  %3903 = vmatprep.subr.bf16.mxu1 %v5499_v41  ;;  %v1760_v21 = vmax.f32 %v1758_v49, %v1759_v13  ;;  %v6933_v62 = vrot.slane %v1792_v14, %v6637_v24  ;;  %v1428_v0 = vrot.slane %v1427_v40, 2 }
 0x3eb   :  { %v1462_v23 = vmax.f32 %v1461_v63, %v1414_v18  ;;  %v1378_v26 = vpop.f32.mrb[72].mxu1  ;;  %v1773_v27 = vmax.f32 %v1771_v6, %v1772_v20  ;;  %v1441_v49 = vrot.slane %v1440_v4, 2  ;;  %v5520_v20 = vld [vmem:[%s7760_s8 + $0x3a4] ss:$16 sps:$4 sm:$0xff]  }
 0x3ec   :  { %v1379_v30 = vadd.f32 %v1378_v26, %v6692_v54  ;;  %v1380_v31 = vpop.f32.mrb[73].mxu1  ;;  %v1761_v34 = vrot.slane %v1760_v21, 1  ;;  %v1429_v63 = vmax.f32 %v1427_v40, %v1428_v0 }
 0x3ed   :  { %3740 = vmatpush1.bf16.msra.mxu0 %v5494_v9  ;;  %3904 = vmatpush1.bf16.msra.mxu1 %v5497_v10  ;;  %v1381_v57 = vadd.f32 %v1380_v31, %v6703_v45  ;;  %v1382_v37 = vpop.f32.mrb[74].mxu1  ;;  %v1774_v43 = vrot.slane %v1773_v27, 1  ;;  %v5512_v10 = vld [vmem:[%s7760_s8 + $0x380] ss:$16 sps:$4 sm:$0xff]  }
 0x3ee   :  { %v1415_v47 = vmax.f32 %v1379_v30, 0.0  ;;  %3741 = vmatprep.subr.bf16.mxu0 %v5502_v16  ;;  %3905 = vmatprep.subr.bf16.mxu1 %v5505_v55  ;;  %v1383_v48 = vadd.f32 %v1382_v37, %v6692_v54  ;;  %v1384_v50 = vpop.f32.mrb[75].mxu1  ;;  %v1762_v52 = vmax.f32 %v1760_v21, %v1761_v34  ;;  %v5506_v54 = vld [vmem:[%s7760_s8 + $0x360] ss:$16 sps:$4 sm:$0xff]   ;;  %v1442_v55 = vmax.f32 %v1440_v4, %v1441_v49  ;;  %v5529_v37 = vld [vmem:[%s7760_s8 + $0x3cc] ss:$16 sps:$4 sm:$0xff]  }
 0x3ef   :  { %v1416_v53 = vmax.f32 %v1381_v57, 0.0  ;;  %v1385_v58 = vadd.f32 %v1384_v50, %v6703_v45  ;;  %v1775_v29 = vmax.f32 %v1773_v27, %v1774_v43 }
 0x3f0   :  { %v1450_v17 = vmax.f32 %v1449_v39, %v1415_v47  ;;  %v1417_v59 = vmax.f32 %v1383_v48, 0.0  ;;  %v6936_v45 = vsel %vm2085_vm4, %v1762_v52, %v1736_v33  ;;  %v5523_v39 = vld [vmem:[%s7760_s8 + $0x3ac] ss:$16 sps:$4 sm:$0xff]   ;;  %v1430_v33 = vrot.slane %v1429_v63, 1 }
 0x3f1   :  { %v1463_v60 = vmax.f32 %v1462_v23, %v1416_v53  ;;  %3742 = vmatpush1.bf16.msra.mxu0 %v5500_v32  ;;  %3906 = vmatpush1.bf16.msra.mxu1 %v5503_v35  ;;  %v1418_v61 = vmax.f32 %v1385_v58, 0.0  ;;  %v6945_v41 = vsel %vm2085_vm4, %v1775_v29, %v1749_v5  ;;  %v5521_v32 = vld [vmem:[%s7760_s8 + $0x3a8] ss:$16 sps:$4 sm:$0xff]   ;;  %v5526_v35 = vld [vmem:[%s7760_s8 + $0x3c4] ss:$16 sps:$4 sm:$0xff]  }
 0x3f2   :  { %v1451_v1 = vmax.f32 %v1450_v17, %v1417_v59  ;;  %3743 = vmatprep.subr.bf16.mxu0 %v5508_v38  ;;  %3907 = vmatprep.subr.bf16.mxu1 %v5511_v36  ;;  %v1443_v38 = vrot.slane %v1442_v55, 1  ;;  %v5524_v53 = vld [vmem:[%s7760_s8 + $0x3c0] ss:$16 sps:$4 sm:$0xff]   ;;  %v5527_v58 = vld [vmem:[%s7760_s8 + $0x3c8] ss:$16 sps:$4 sm:$0xff]   ;;  %v1431_v59 = vmax.f32 %v1429_v63, %v1430_v33 }
 0x3f3   :  { %v1464_v42 = vmax.f32 %v1463_v60, %v1418_v61  ;;  %v1918_v44 = vpop.f32.mrb[76].mxu1  ;;  %v5541_v63 = vld [vmem:[%s7760_s8 + $0x40c] ss:$16 sps:$4 sm:$0xff]  }
 0x3f4   :  { %v1452_v3 = vrot.slane %v1451_v1, 4  ;;  %v1919_v6 = vadd.f32 %v1918_v44, %v6917_v2  ;;  %v1920_v8 = vpop.f32.mrb[77].mxu1 }
 0x3f5   :  { %v1465_v46 = vrot.slane %v1464_v42, 4  ;;  %3744 = vmatpush1.bf16.msra.mxu0 %v5506_v54  ;;  %3908 = vmatpush1.bf16.msra.mxu1 %v5509_v15  ;;  %v1921_v9 = vadd.f32 %v1920_v8, %v6933_v62  ;;  %v1922_v13 = vpop.f32.mrb[78].mxu1  ;;  %v5532_v54 = vld [vmem:[%s7760_s8 + $0x3e4] ss:$16 sps:$4 sm:$0xff]   ;;  %v5535_v15 = vld [vmem:[%s7760_s8 + $0x3ec] ss:$16 sps:$4 sm:$0xff]  }
 0x3f6   :  { %v1453_v18 = vmax.f32 %v1451_v1, %v1452_v3  ;;  %3745 = vmatprep.subr.bf16.mxu0 %v5514_v56  ;;  %3909 = vmatprep.subr.bf16.mxu1 %v5517_v28  ;;  %v1923_v16 = vadd.f32 %v1922_v13, %v6917_v2  ;;  %v1924_v19 = vpop.f32.mrb[79].mxu1  ;;  %v1997_v23 = vmax.f32 %v1919_v6, 0.0  ;;  %v1444_v56 = vmax.f32 %v1442_v55, %v1443_v38  ;;  %v5530_v8 = vld [vmem:[%s7760_s8 + $0x3e0] ss:$16 sps:$4 sm:$0xff]   ;;  %v5538_v13 = vld [vmem:[%s7760_s8 + $0x404] ss:$16 sps:$4 sm:$0xff]  }
 0x3f7   :  { %v1466_v14 = vmax.f32 %v1464_v42, %v1465_v46  ;;  %v1925_v25 = vadd.f32 %v1924_v19, %v6933_v62  ;;  %v1998_v30 = vmax.f32 %v1921_v9, 0.0  ;;  %v5533_v46 = vld [vmem:[%s7760_s8 + $0x3e8] ss:$16 sps:$4 sm:$0xff]   ;;  %v5536_v55 = vld [vmem:[%s7760_s8 + $0x400] ss:$16 sps:$4 sm:$0xff]  }
 0x3f8   :  { %v1454_v21 = vrot.slane %v1453_v18, 2  ;;  %v1999_v26 = vmax.f32 %v1923_v16, 0.0  ;;  %v5542_v38 = vld [vmem:[%s7760_s8 + $0x420] ss:$16 sps:$4 sm:$0xff]  }
 0x3f9   :  { %v1467_v27 = vrot.slane %v1466_v14, 2  ;;  %3746 = vmatpush1.bf16.msra.mxu0 %v5512_v10  ;;  %3910 = vmatpush1.bf16.msra.mxu1 %v5515_v12  ;;  %v2000_v31 = vmax.f32 %v1925_v25, 0.0 }
 0x3fa   :  { %v1455_v34 = vmax.f32 %v1453_v18, %v1454_v21  ;;  %v2029_v57 = vmax.f32 %v1997_v23, %v1999_v26  ;;  %3747 = vmatprep.subr.bf16.mxu0 %v5520_v20  ;;  %3911 = vmatprep.subr.bf16.mxu1 %v5523_v39 }
 0x3fb   :  { %v1468_v40 = vmax.f32 %v1466_v14, %v1467_v27  ;;  %v2042_v43 = vmax.f32 %v1998_v30, %v2000_v31  ;;  %v1928_v47 = vpop.f32.mrb[80].mxu1  ;;  %v5539_v14 = vld [vmem:[%s7760_s8 + $0x408] ss:$16 sps:$4 sm:$0xff]   ;;  %v5544_v31 = vld [vmem:[%s7760_s8 + $0x424] ss:$16 sps:$4 sm:$0xff]  }
 0x3fc   :  { %v1456_v48 = vrot.slane %v1455_v34, 1  ;;  %v1929_v50 = vadd.f32 %v1928_v47, %v6917_v2  ;;  %v1930_v36 = vpop.f32.mrb[81].mxu1  ;;  %v5550_v47 = vld [vmem:[%s7760_s8 + $0x444] ss:$16 sps:$4 sm:$0xff]  }
 0x3fd   :  { %v1469_v4 = vrot.slane %v1468_v40, 1  ;;  %3748 = vmatpush1.bf16.msra.mxu0 %v5518_v51  ;;  %3912 = vmatpush1.bf16.msra.mxu1 %v5521_v32  ;;  %v1931_v52 = vadd.f32 %v1930_v36, %v6933_v62  ;;  %v1932_v17 = vpop.f32.mrb[82].mxu1  ;;  %v5547_v32 = vld [vmem:[%s7760_s8 + $0x42c] ss:$16 sps:$4 sm:$0xff]  }
 0x3fe   :  { %v1457_v5 = vmax.f32 %v1455_v34, %v1456_v48  ;;  %v2001_v29 = vmax.f32 %v1929_v50, 0.0  ;;  %3749 = vmatprep.subr.bf16.mxu0 %v5526_v35  ;;  %3913 = vmatprep.subr.bf16.mxu1 %v5529_v37  ;;  %v1933_v60 = vadd.f32 %v1932_v17, %v6917_v2  ;;  %v1934_v61 = vpop.f32.mrb[83].mxu1 }
 0x3ff   :  { %v2002_v0 = vmax.f32 %v1931_v52, 0.0  ;;  %v1935_v1 = vadd.f32 %v1934_v61, %v6933_v62  ;;  %v1470_v28 = vmax.f32 %v1468_v40, %v1469_v4  ;;  %v5545_v40 = vld [vmem:[%s7760_s8 + $0x428] ss:$16 sps:$4 sm:$0xff]   ;;  %v5559_v61 = vld [vmem:[%s7760_s8 + $0x46c] ss:$16 sps:$4 sm:$0xff]  }
 0x400   :  { %v2030_v49 = vmax.f32 %v2029_v57, %v2001_v29  ;;  %v2003_v42 = vmax.f32 %v1933_v60, 0.0  ;;  %v2094_v44 = vsel %vm2085_vm4, %v1457_v5, %v1431_v59  ;;  %v2119_v57 = vpack.c.bf16 %v6945_v41, %v6945_v41  ;;  %v5553_v41 = vld [vmem:[%s7760_s8 + $0x44c] ss:$16 sps:$4 sm:$0xff]   ;;  %v5556_v60 = vld [vmem:[%s7760_s8 + $0x464] ss:$16 sps:$4 sm:$0xff]  }
 0x401   :  { %v2043_v3 = vmax.f32 %v2042_v43, %v2002_v0  ;;  %3750 = vmatpush1.bf16.msra.mxu0 %v5524_v53  ;;  %3914 = vmatpush1.bf16.msra.mxu1 %v5527_v58  ;;  %v2004_v6 = vmax.f32 %v1935_v1, 0.0  ;;  %v2095_v9 = vsel %vm2085_vm4, %v1470_v28, %v1444_v56  ;;  %v2116_v26 = vpack.c.bf16 %v2094_v44, %v2094_v44  ;;  %v5548_v53 = vld [vmem:[%s7760_s8 + $0x440] ss:$16 sps:$4 sm:$0xff]   ;;  %v5551_v58 = vld [vmem:[%s7760_s8 + $0x448] ss:$16 sps:$4 sm:$0xff]  }
 0x402   :  { %v2031_v10 = vmax.f32 %v2030_v49, %v2003_v42  ;;  %3751 = vmatprep.subr.bf16.mxu0 %v5532_v54  ;;  %3915 = vmatprep.subr.bf16.mxu1 %v5535_v15  ;;  %v2117_v12 = vpack.c.bf16 %v2095_v9, %v2095_v9  ;;  %v5554_v49 = vld [vmem:[%s7760_s8 + $0x460] ss:$16 sps:$4 sm:$0xff]   ;;  %v5557_v42 = vld [vmem:[%s7760_s8 + $0x468] ss:$16 sps:$4 sm:$0xff]  }
 0x403   :  { %v2044_v18 = vmax.f32 %v2043_v3, %v2004_v6  ;;  %v1938_v16 = vpop.f32.mrb[84].mxu1  ;;  %v5562_v3 = vld [vmem:[%s7760_s8 + $0x484] ss:$16 sps:$4 sm:$0xff]   ;;  %v5565_v6 = vld [vmem:[%s7760_s8 + $0x48c] ss:$16 sps:$4 sm:$0xff]  }
 0x404   :  { %v1939_v19 = vadd.f32 %v1938_v16, %v6917_v2  ;;  %v1940_v20 = vpop.f32.mrb[85].mxu1  ;;  %3753 = vmatprep.mubr.bf16.mxu0 %v2117_v12  ;;  %3917 = vmatprep.mubr.bf16.mxu1 %v2117_v12 }
 0x405   :  { %3752 = vmatpush1.bf16.msra.mxu0 %v5530_v8  ;;  %3916 = vmatpush1.bf16.msra.mxu1 %v5533_v46  ;;  %v1941_v39 = vadd.f32 %v1940_v20, %v6933_v62  ;;  %v1942_v25 = vpop.f32.mrb[86].mxu1  ;;  %v5568_v20 = vld [vmem:[%s7760_s8 + $0x4a4] ss:$16 sps:$4 sm:$0xff]  }
 0x406   :  { %v2005_v21 = vmax.f32 %v1939_v19, 0.0  ;;  %3762 = vmatprep.subr.bf16.mxu0 %v5538_v13  ;;  %3926 = vmatprep.subr.bf16.mxu1 %v5541_v63  ;;  %v1943_v23 = vadd.f32 %v1942_v25, %v6917_v2  ;;  %v1944_v51 = vpop.f32.mrb[87].mxu1  ;;  %v5560_v13 = vld [vmem:[%s7760_s8 + $0x480] ss:$16 sps:$4 sm:$0xff]   ;;  %v5563_v63 = vld [vmem:[%s7760_s8 + $0x488] ss:$16 sps:$4 sm:$0xff]  }
 0x407   :  { %v2006_v27 = vmax.f32 %v1941_v39, 0.0  ;;  %v1945_v30 = vadd.f32 %v1944_v51, %v6933_v62  ;;  %v5571_v39 = vld [vmem:[%s7760_s8 + $0x4ac] ss:$16 sps:$4 sm:$0xff]   ;;  %v5569_v51 = vld [vmem:[%s7760_s8 + $0x4a8] ss:$16 sps:$4 sm:$0xff]  }
 0x408   :  { %v2032_v33 = vmax.f32 %v2031_v10, %v2005_v21  ;;  %v2007_v34 = vmax.f32 %v1943_v23, 0.0  ;;  %3754 = vmatmul.mubr.bf16.vlgmr.msra.gmra.mrb[56].mxu0 %v2116_v26  ;;  %3918 = vmatmul.mubr.bf16.vlgmr.msra.gmra.mrb[108].mxu1 %v2116_v26  ;;  %v5566_v26 = vld [vmem:[%s7760_s8 + $0x4a0] ss:$16 sps:$4 sm:$0xff]  }
 0x409   :  { %v2045_v35 = vmax.f32 %v2044_v18, %v2006_v27  ;;  %3763 = vmatpush1.bf16.msra.mxu0 %v5536_v55  ;;  %3927 = vmatpush1.bf16.msra.mxu1 %v5539_v14  ;;  %v2008_v37 = vmax.f32 %v1945_v30, 0.0  ;;  %v5574_v30 = vld [vmem:[%s7760_s8 + $0x4c4] ss:$16 sps:$4 sm:$0xff]  }
 0x40a   :  { %v2033_v43 = vmax.f32 %v2032_v33, %v2007_v34  ;;  %3794 = vmatprep.mubr.bf16.mxu0 %v2119_v57  ;;  %3958 = vmatprep.mubr.bf16.mxu1 %v2119_v57 }
 0x40b   :  { %v2046_v48 = vmax.f32 %v2045_v35, %v2008_v37  ;;  %3764 = vmatprep.subr.bf16.mxu0 %v5544_v31  ;;  %3928 = vmatprep.subr.bf16.mxu1 %v5547_v32  ;;  %v1948_v50 = vpop.f32.mrb[88].mxu1  ;;  %v5577_v31 = vld [vmem:[%s7760_s8 + $0x4cc] ss:$16 sps:$4 sm:$0xff]   ;;  %v5572_v37 = vld [vmem:[%s7760_s8 + $0x4c0] ss:$16 sps:$4 sm:$0xff]  }
 0x40c   :  { %v1949_v36 = vadd.f32 %v1948_v50, %v6917_v2  ;;  %v1950_v4 = vpop.f32.mrb[89].mxu1  ;;  %v5583_v50 = vld [vmem:[%s7760_s8 + $0x4ec] ss:$16 sps:$4 sm:$0xff]  }
 0x40d   :  { %3765 = vmatpush1.bf16.msra.mxu0 %v5542_v38  ;;  %3929 = vmatpush1.bf16.msra.mxu1 %v5545_v40  ;;  %v1951_v52 = vadd.f32 %v1950_v4, %v6933_v62  ;;  %v1952_v17 = vpop.f32.mrb[90].mxu1  ;;  %v5575_v38 = vld [vmem:[%s7760_s8 + $0x4c8] ss:$16 sps:$4 sm:$0xff]  }
 0x40e   :  { %v2009_v59 = vmax.f32 %v1949_v36, 0.0  ;;  %3766 = vmatprep.subr.bf16.mxu0 %v5550_v47  ;;  %3930 = vmatprep.subr.bf16.mxu1 %v5553_v41  ;;  %v1953_v5 = vadd.f32 %v1952_v17, %v6917_v2  ;;  %v1954_v29 = vpop.f32.mrb[91].mxu1 }
 0x40f   :  { %v2010_v54 = vmax.f32 %v1951_v52, 0.0  ;;  %v1955_v15 = vadd.f32 %v1954_v29, %v6933_v62 }
 0x410   :  { %v2034_v0 = vmax.f32 %v2033_v43, %v2009_v59  ;;  %v2011_v1 = vmax.f32 %v1953_v5, 0.0  ;;  %v5578_v59 = vld [vmem:[%s7760_s8 + $0x4e0] ss:$16 sps:$4 sm:$0xff]   ;;  %v5581_v5 = vld [vmem:[%s7760_s8 + $0x4e8] ss:$16 sps:$4 sm:$0xff]  }
 0x411   :  { %v2047_v56 = vmax.f32 %v2046_v48, %v2010_v54  ;;  %3767 = vmatpush1.bf16.msra.mxu0 %v5548_v53  ;;  %3931 = vmatpush1.bf16.msra.mxu1 %v5551_v58  ;;  %v2012_v28 = vmax.f32 %v1955_v15, 0.0  ;;  %v5580_v48 = vld [vmem:[%s7760_s8 + $0x4e4] ss:$16 sps:$4 sm:$0xff]  }
 0x412   :  { %v7057_v44 = vmax.f32 %v2034_v0, %v2011_v1  ;;  %3768 = vmatprep.subr.bf16.mxu0 %v5556_v60  ;;  %3932 = vmatprep.subr.bf16.mxu1 %v5559_v61  ;;  %v5586_v60 = vld [vmem:[%s7760_s8 + $0x504] ss:$16 sps:$4 sm:$0xff]   ;;  %v5589_v61 = vld [vmem:[%s7760_s8 + $0x50c] ss:$16 sps:$4 sm:$0xff]  }
 0x413   :  { %v7065_v8 = vmax.f32 %v2047_v56, %v2012_v28  ;;  %v1958_v46 = vpop.f32.mrb[92].mxu1  ;;  %v5584_v28 = vld [vmem:[%s7760_s8 + $0x500] ss:$16 sps:$4 sm:$0xff]  }
 0x414   :  { %v1959_v9 = vadd.f32 %v1958_v46, %v6917_v2  ;;  %v1960_v10 = vpop.f32.mrb[93].mxu1 }
 0x415   :  { %3769 = vmatpush1.bf16.msra.mxu0 %v5554_v49  ;;  %3933 = vmatpush1.bf16.msra.mxu1 %v5557_v42  ;;  %v1961_v12 = vadd.f32 %v1960_v10, %v6933_v62  ;;  %v1962_v18 = vpop.f32.mrb[94].mxu1  ;;  %v5587_v49 = vld [vmem:[%s7760_s8 + $0x508] ss:$16 sps:$4 sm:$0xff]   ;;  %v5595_v10 = vld [vmem:[%s7760_s8 + $0x52c] ss:$16 sps:$4 sm:$0xff]  }
 0x416   :  { %3770 = vmatprep.subr.bf16.mxu0 %v5562_v3  ;;  %3934 = vmatprep.subr.bf16.mxu1 %v5565_v6  ;;  %v1963_v16 = vadd.f32 %v1962_v18, %v6917_v2  ;;  %v1964_v19 = vpop.f32.mrb[95].mxu1  ;;  %v2013_v14 = vmax.f32 %v1959_v9, 0.0  ;;  %v5592_v9 = vld [vmem:[%s7760_s8 + $0x524] ss:$16 sps:$4 sm:$0xff]  }
 0x417   :  { %v1965_v55 = vadd.f32 %v1964_v19, %v6933_v62  ;;  %v2014_v21 = vmax.f32 %v1961_v12, 0.0 }
 0x418   :  { %v2015_v25 = vmax.f32 %v1963_v16, 0.0 }
 0x419   :  { %3771 = vmatpush1.bf16.msra.mxu0 %v5560_v13  ;;  %3935 = vmatpush1.bf16.msra.mxu1 %v5563_v63  ;;  %v2016_v23 = vmax.f32 %v1965_v55, 0.0  ;;  %v2036_v55 = vrot.slane %v7057_v44, 4 }
 0x41a   :  { %v2055_v27 = vmax.f32 %v2013_v14, %v2015_v25  ;;  %3772 = vmatprep.subr.bf16.mxu0 %v5568_v20  ;;  %3936 = vmatprep.subr.bf16.mxu1 %v5571_v39  ;;  %v5590_v20 = vld [vmem:[%s7760_s8 + $0x520] ss:$16 sps:$4 sm:$0xff]   ;;  %v5593_v39 = vld [vmem:[%s7760_s8 + $0x528] ss:$16 sps:$4 sm:$0xff]   ;;  %v5598_v25 = vld [vmem:[%s7760_s8 + $0x544] ss:$16 sps:$4 sm:$0xff]  }
 0x41b   :  { %v2068_v32 = vmax.f32 %v2014_v21, %v2016_v23  ;;  %v1968_v33 = vpop.f32.mrb[96].mxu1  ;;  %v5601_v21 = vld [vmem:[%s7760_s8 + $0x54c] ss:$16 sps:$4 sm:$0xff]   ;;  %v2049_v23 = vrot.slane %v7065_v8, 4 }
 0x41c   :  { %v1969_v34 = vadd.f32 %v1968_v33, %v6917_v2  ;;  %v1970_v57 = vpop.f32.mrb[97].mxu1  ;;  %v5599_v33 = vld [vmem:[%s7760_s8 + $0x548] ss:$16 sps:$4 sm:$0xff]  }
 0x41d   :  { %3773 = vmatpush1.bf16.msra.mxu0 %v5566_v26  ;;  %3937 = vmatpush1.bf16.msra.mxu1 %v5569_v51  ;;  %v1971_v35 = vadd.f32 %v1970_v57, %v6933_v62  ;;  %v1972_v40 = vpop.f32.mrb[98].mxu1  ;;  %v2037_v57 = vmax.f32 %v7057_v44, %v2036_v55 }
 0x41e   :  { %v2017_v43 = vmax.f32 %v1969_v34, 0.0  ;;  %3774 = vmatprep.subr.bf16.mxu0 %v5574_v30  ;;  %3938 = vmatprep.subr.bf16.mxu1 %v5577_v31  ;;  %v1973_v47 = vadd.f32 %v1972_v40, %v6917_v2  ;;  %v1974_v41 = vpop.f32.mrb[99].mxu1  ;;  %v5604_v40 = vld [vmem:[%s7760_s8 + $0x564] ss:$16 sps:$4 sm:$0xff]  }
 0x41f   :  { %v2018_v36 = vmax.f32 %v1971_v35, 0.0  ;;  %v1975_v4 = vadd.f32 %v1974_v41, %v6933_v62 }
 0x420   :  { %v2056_v52 = vmax.f32 %v2055_v27, %v2017_v43  ;;  %v2019_v53 = vmax.f32 %v1973_v47, 0.0  ;;  %v5607_v43 = vld [vmem:[%s7760_s8 + $0x56c] ss:$16 sps:$4 sm:$0xff]   ;;  %v2050_v47 = vmax.f32 %v7065_v8, %v2049_v23 }
 0x421   :  { %v2069_v58 = vmax.f32 %v2068_v32, %v2018_v36  ;;  %3775 = vmatpush1.bf16.msra.mxu0 %v5572_v37  ;;  %3939 = vmatpush1.bf16.msra.mxu1 %v5575_v38  ;;  %v2020_v17 = vmax.f32 %v1975_v4, 0.0  ;;  %v5596_v32 = vld [vmem:[%s7760_s8 + $0x540] ss:$16 sps:$4 sm:$0xff]   ;;  %v5613_v8 = vld [vmem:[%s7760_s8 + $0x58c] ss:$16 sps:$4 sm:$0xff]  }
 0x422   :  { %v2057_v29 = vmax.f32 %v2056_v52, %v2019_v53  ;;  %3776 = vmatprep.subr.bf16.mxu0 %v5580_v48  ;;  %3940 = vmatprep.subr.bf16.mxu1 %v5583_v50  ;;  %v5602_v4 = vld [vmem:[%s7760_s8 + $0x560] ss:$16 sps:$4 sm:$0xff]   ;;  %v5605_v52 = vld [vmem:[%s7760_s8 + $0x568] ss:$16 sps:$4 sm:$0xff]   ;;  %v2038_v53 = vrot.slane %v2037_v57, 2 }
 0x423   :  { %v2070_v54 = vmax.f32 %v2069_v58, %v2020_v17  ;;  %v1978_v15 = vpop.f32.mrb[100].mxu1  ;;  %v2051_v17 = vrot.slane %v2050_v47, 2 }
 0x424   :  { %v1979_v0 = vadd.f32 %v1978_v15, %v6917_v2  ;;  %v1980_v1 = vpop.f32.mrb[101].mxu1 }
 0x425   :  { %3777 = vmatpush1.bf16.msra.mxu0 %v5578_v59  ;;  %3941 = vmatpush1.bf16.msra.mxu1 %v5581_v5  ;;  %v1981_v56 = vadd.f32 %v1980_v1, %v6933_v62  ;;  %v1982_v42 = vpop.f32.mrb[102].mxu1  ;;  %v5619_v1 = vld [vmem:[%s7760_s8 + $0x5ac] ss:$16 sps:$4 sm:$0xff]  }
 0x426   :  { %v2021_v3 = vmax.f32 %v1979_v0, 0.0  ;;  %3778 = vmatprep.subr.bf16.mxu0 %v5586_v60  ;;  %3942 = vmatprep.subr.bf16.mxu1 %v5589_v61  ;;  %v1983_v6 = vadd.f32 %v1982_v42, %v6917_v2  ;;  %v1984_v46 = vpop.f32.mrb[103].mxu1  ;;  %v5608_v60 = vld [vmem:[%s7760_s8 + $0x580] ss:$16 sps:$4 sm:$0xff]   ;;  %v5611_v61 = vld [vmem:[%s7760_s8 + $0x588] ss:$16 sps:$4 sm:$0xff]  }
 0x427   :  { %v2022_v12 = vmax.f32 %v1981_v56, 0.0  ;;  %v1985_v13 = vadd.f32 %v1984_v46, %v6933_v62  ;;  %v5616_v0 = vld [vmem:[%s7760_s8 + $0x5a4] ss:$16 sps:$4 sm:$0xff]   ;;  %v2052_v56 = vmax.f32 %v2050_v47, %v2051_v17  ;;  %v5649_v47 = vld [vmem:[%s7760_s8 + $0x64c] ss:$16 sps:$4 sm:$0xff]  }
 0x428   :  { %v2058_v63 = vmax.f32 %v2057_v29, %v2021_v3  ;;  %v2023_v18 = vmax.f32 %v1983_v6, 0.0  ;;  %v5614_v3 = vld [vmem:[%s7760_s8 + $0x5a0] ss:$16 sps:$4 sm:$0xff]   ;;  %v5617_v6 = vld [vmem:[%s7760_s8 + $0x5a8] ss:$16 sps:$4 sm:$0xff]  }
 0x429   :  { %v2071_v16 = vmax.f32 %v2070_v54, %v2022_v12  ;;  %3779 = vmatpush1.bf16.msra.mxu0 %v5584_v28  ;;  %3943 = vmatpush1.bf16.msra.mxu1 %v5587_v49  ;;  %v2024_v19 = vmax.f32 %v1985_v13, 0.0  ;;  %v2039_v54 = vmax.f32 %v2037_v57, %v2038_v53  ;;  %v5625_v12 = vld [vmem:[%s7760_s8 + $0x5cc] ss:$16 sps:$4 sm:$0xff]   ;;  %v2053_v13 = vrot.slane %v2052_v56, 1  ;;  %v5656_v53 = vld [vmem:[%s7760_s8 + $0x680] ss:$16 sps:$4 sm:$0xff]  }
 0x42a   :  { %v2059_v14 = vmax.f32 %v2058_v63, %v2023_v18  ;;  %3780 = vmatprep.subr.bf16.mxu0 %v5592_v9  ;;  %3944 = vmatprep.subr.bf16.mxu1 %v5595_v10  ;;  %v5622_v10 = vld [vmem:[%s7760_s8 + $0x5c4] ss:$16 sps:$4 sm:$0xff]   ;;  %v2118_v57 = vpack.c.bf16 %v6936_v45, %v6936_v45  ;;  %v5638_v45 = vld [vmem:[%s7760_s8 + $0x620] ss:$16 sps:$4 sm:$0xff]  }
 0x42b   :  { %v2072_v26 = vmax.f32 %v2071_v16, %v2024_v19  ;;  %v1988_v51 = vpop.f32.mrb[104].mxu1  ;;  %v2040_v46 = vrot.slane %v2039_v54, 1  ;;  %v5620_v19 = vld [vmem:[%s7760_s8 + $0x5c0] ss:$16 sps:$4 sm:$0xff]  }
 0x42c   :  { %v1989_v27 = vadd.f32 %v1988_v51, %v6917_v2  ;;  %v1990_v30 = vpop.f32.mrb[105].mxu1  ;;  %v5626_v51 = vld [vmem:[%s7760_s8 + $0x5e0] ss:$16 sps:$4 sm:$0xff]  }
 0x42d   :  { %3781 = vmatpush1.bf16.msra.mxu0 %v5590_v20  ;;  %3945 = vmatpush1.bf16.msra.mxu1 %v5593_v39  ;;  %v1991_v31 = vadd.f32 %v1990_v30, %v6933_v62  ;;  %v1992_v34 = vpop.f32.mrb[106].mxu1  ;;  %v5623_v20 = vld [vmem:[%s7760_s8 + $0x5c8] ss:$16 sps:$4 sm:$0xff]   ;;  %v2041_v39 = vmax.f32 %v2039_v54, %v2040_v46  ;;  %v5662_v17 = vld [vmem:[%s7760_s8 + $0x6a0] ss:$16 sps:$4 sm:$0xff]  }
 0x42e   :  { %v2025_v35 = vmax.f32 %v1989_v27, 0.0  ;;  %3782 = vmatprep.subr.bf16.mxu0 %v5598_v25  ;;  %3946 = vmatprep.subr.bf16.mxu1 %v5601_v21  ;;  %v1993_v37 = vadd.f32 %v1992_v34, %v6917_v2  ;;  %v1994_v38 = vpop.f32.mrb[107].mxu1  ;;  %v5631_v25 = vld [vmem:[%s7760_s8 + $0x5ec] ss:$16 sps:$4 sm:$0xff]   ;;  %v2054_v21 = vmax.f32 %v2052_v56, %v2053_v13  ;;  %v5629_v27 = vld [vmem:[%s7760_s8 + $0x5e8] ss:$16 sps:$4 sm:$0xff]  }
 0x42f   :  { %v2026_v41 = vmax.f32 %v1991_v31, 0.0  ;;  %v1995_v48 = vadd.f32 %v1994_v38, %v6933_v62  ;;  %v5610_v62 = vld [vmem:[%s7760_s8 + $0x584] ss:$16 sps:$4 sm:$0xff]   ;;  %v5643_v38 = vld [vmem:[%s7760_s8 + $0x62c] ss:$16 sps:$4 sm:$0xff]  }
 0x430   :  { %v2060_v44 = vmax.f32 %v2059_v14, %v2025_v35  ;;  %v2027_v50 = vmax.f32 %v1993_v37, 0.0  ;;  %v5628_v14 = vld [vmem:[%s7760_s8 + $0x5e4] ss:$16 sps:$4 sm:$0xff]   ;;  %v5635_v35 = vld [vmem:[%s7760_s8 + $0x608] ss:$16 sps:$4 sm:$0xff]  }
 0x431   :  { %v2073_v36 = vmax.f32 %v2072_v26, %v2026_v41  ;;  %3783 = vmatpush1.bf16.msra.mxu0 %v5596_v32  ;;  %3947 = vmatpush1.bf16.msra.mxu1 %v5599_v33  ;;  %v2028_v2 = vmax.f32 %v1995_v48, 0.0  ;;  %v5634_v31 = vld [vmem:[%s7760_s8 + $0x604] ss:$16 sps:$4 sm:$0xff]   ;;  %v5637_v32 = vld [vmem:[%s7760_s8 + $0x60c] ss:$16 sps:$4 sm:$0xff]  }
 0x432   :  { %v2061_v58 = vmax.f32 %v2060_v44, %v2027_v50  ;;  %3784 = vmatprep.subr.bf16.mxu0 %v5604_v40  ;;  %3948 = vmatprep.subr.bf16.mxu1 %v5607_v43  ;;  %v5632_v33 = vld [vmem:[%s7760_s8 + $0x600] ss:$16 sps:$4 sm:$0xff]   ;;  %v5640_v37 = vld [vmem:[%s7760_s8 + $0x624] ss:$16 sps:$4 sm:$0xff]   ;;  %v5641_v40 = vld [vmem:[%s7760_s8 + $0x628] ss:$16 sps:$4 sm:$0xff]  }
 0x433   :  { %v2074_v59 = vmax.f32 %v2073_v36, %v2028_v2  ;;  %v5646_v43 = vld [vmem:[%s7760_s8 + $0x644] ss:$16 sps:$4 sm:$0xff]   ;;  %v5644_v41 = vld [vmem:[%s7760_s8 + $0x640] ss:$16 sps:$4 sm:$0xff]   ;;  %v5647_v48 = vld [vmem:[%s7760_s8 + $0x648] ss:$16 sps:$4 sm:$0xff]  }
 0x434   :  { %v2062_v5 = vrot.slane %v2061_v58, 4  ;;  %v5652_v44 = vld [vmem:[%s7760_s8 + $0x664] ss:$16 sps:$4 sm:$0xff]   ;;  %v5655_v50 = vld [vmem:[%s7760_s8 + $0x66c] ss:$16 sps:$4 sm:$0xff]  }
 0x435   :  { %v2075_v29 = vrot.slane %v2074_v59, 4  ;;  %3785 = vmatpush1.bf16.msra.mxu0 %v5602_v4  ;;  %3949 = vmatpush1.bf16.msra.mxu1 %v5605_v52  ;;  %v5650_v36 = vld [vmem:[%s7760_s8 + $0x660] ss:$16 sps:$4 sm:$0xff]   ;;  %v5653_v2 = vld [vmem:[%s7760_s8 + $0x668] ss:$16 sps:$4 sm:$0xff]  }
 0x436   :  { %v2063_v15 = vmax.f32 %v2061_v58, %v2062_v5  ;;  %3786 = vmatprep.subr.bf16.mxu0 %v5610_v62  ;;  %3950 = vmatprep.subr.bf16.mxu1 %v5613_v8  ;;  %v5658_v4 = vld [vmem:[%s7760_s8 + $0x684] ss:$16 sps:$4 sm:$0xff]   ;;  %v5661_v52 = vld [vmem:[%s7760_s8 + $0x68c] ss:$16 sps:$4 sm:$0xff]   ;;  %v5659_v58 = vld [vmem:[%s7760_s8 + $0x688] ss:$16 sps:$4 sm:$0xff]  }
 0x437   :  { %v2076_v28 = vmax.f32 %v2074_v59, %v2075_v29  ;;  %v5664_v62 = vld [vmem:[%s7760_s8 + $0x6a4] ss:$16 sps:$4 sm:$0xff]   ;;  %v5667_v8 = vld [vmem:[%s7760_s8 + $0x6ac] ss:$16 sps:$4 sm:$0xff]   ;;  %v5665_v59 = vld [vmem:[%s7760_s8 + $0x6a8] ss:$16 sps:$4 sm:$0xff]  }
 0x438   :  { %v2064_v49 = vrot.slane %v2063_v15, 2  ;;  %v5670_v5 = vld [vmem:[%s7760_s8 + $0x6c4] ss:$16 sps:$4 sm:$0xff]   ;;  %v5673_v29 = vld [vmem:[%s7760_s8 + $0x6cc] ss:$16 sps:$4 sm:$0xff]  }
 0x439   :  { %v2077_v42 = vrot.slane %v2076_v28, 2  ;;  %3787 = vmatpush1.bf16.msra.mxu0 %v5608_v60  ;;  %3951 = vmatpush1.bf16.msra.mxu1 %v5611_v61  ;;  %v5668_v60 = vld [vmem:[%s7760_s8 + $0x6c0] ss:$16 sps:$4 sm:$0xff]   ;;  %v5671_v61 = vld [vmem:[%s7760_s8 + $0x6c8] ss:$16 sps:$4 sm:$0xff]  }
 0x43a   :  { %v2065_v9 = vmax.f32 %v2063_v15, %v2064_v49  ;;  %3788 = vmatprep.subr.bf16.mxu0 %v5616_v0  ;;  %3952 = vmatprep.subr.bf16.mxu1 %v5619_v1  ;;  %v5676_v54 = vld [vmem:[%s7760_s8 + $0x6e4] ss:$16 sps:$4 sm:$0xff]   ;;  %v5679_v15 = vld [vmem:[%s7760_s8 + $0x6ec] ss:$16 sps:$4 sm:$0xff]   ;;  %v5674_v0 = vld [vmem:[%s7760_s8 + $0x6e0] ss:$16 sps:$4 sm:$0xff]  }
 0x43b   :  { %v2078_v63 = vmax.f32 %v2076_v28, %v2077_v42  ;;  %v5677_v1 = vld [vmem:[%s7760_s8 + $0x6e8] ss:$16 sps:$4 sm:$0xff]   ;;  %v5682_v56 = vld [vmem:[%s7760_s8 + $0x704] ss:$16 sps:$4 sm:$0xff]   ;;  %v5685_v28 = vld [vmem:[%s7760_s8 + $0x70c] ss:$16 sps:$4 sm:$0xff]  }
 0x43c   :  { %v2066_v18 = vrot.slane %v2065_v9, 1  ;;  %v5680_v49 = vld [vmem:[%s7760_s8 + $0x700] ss:$16 sps:$4 sm:$0xff]   ;;  %v5683_v42 = vld [vmem:[%s7760_s8 + $0x708] ss:$16 sps:$4 sm:$0xff]  }
 0x43d   :  { %v2079_v16 = vrot.slane %v2078_v63, 1  ;;  %3789 = vmatpush1.bf16.msra.mxu0 %v5614_v3  ;;  %3953 = vmatpush1.bf16.msra.mxu1 %v5617_v6  ;;  %v5688_v3 = vld [vmem:[%s7760_s8 + $0x724] ss:$16 sps:$4 sm:$0xff]   ;;  %v5691_v6 = vld [vmem:[%s7760_s8 + $0x72c] ss:$16 sps:$4 sm:$0xff]  }
 0x43e   :  { %v2067_v55 = vmax.f32 %v2065_v9, %v2066_v18  ;;  %3790 = vmatprep.subr.bf16.mxu0 %v5622_v10  ;;  %3954 = vmatprep.subr.bf16.mxu1 %v5625_v12  ;;  %v5686_v46 = vld [vmem:[%s7760_s8 + $0x720] ss:$16 sps:$4 sm:$0xff]   ;;  %v5689_v9 = vld [vmem:[%s7760_s8 + $0x728] ss:$16 sps:$4 sm:$0xff]   ;;  %v5694_v10 = vld [vmem:[%s7760_s8 + $0x744] ss:$16 sps:$4 sm:$0xff]  }
 0x43f   :  { %v2080_v23 = vmax.f32 %v2078_v63, %v2079_v16  ;;  %v5697_v12 = vld [vmem:[%s7760_s8 + $0x74c] ss:$16 sps:$4 sm:$0xff]   ;;  %v5692_v13 = vld [vmem:[%s7760_s8 + $0x740] ss:$16 sps:$4 sm:$0xff]   ;;  %v5695_v63 = vld [vmem:[%s7760_s8 + $0x748] ss:$16 sps:$4 sm:$0xff]  }
 0x440   :  { %v7220_v26 = vsel %vm2085_vm4, %v2067_v55, %v2041_v39  ;;  %v5700_v18 = vld [vmem:[%s7760_s8 + $0x764] ss:$16 sps:$4 sm:$0xff]   ;;  %v5703_v16 = vld [vmem:[%s7760_s8 + $0x76c] ss:$16 sps:$4 sm:$0xff]  }
 0x441   :  { %3791 = vmatpush1.bf16.msra.mxu0 %v5620_v19  ;;  %3955 = vmatpush1.bf16.msra.mxu1 %v5623_v20  ;;  %v2111_v30 = vsel %vm2085_vm4, %v2080_v23, %v2054_v21  ;;  %v5698_v19 = vld [vmem:[%s7760_s8 + $0x760] ss:$16 sps:$4 sm:$0xff]   ;;  %v5701_v20 = vld [vmem:[%s7760_s8 + $0x768] ss:$16 sps:$4 sm:$0xff]   ;;  %v5706_v39 = vld [vmem:[%s7760_s8 + $0x784] ss:$16 sps:$4 sm:$0xff]  }
 0x442   :  { %3792 = vmatprep.subr.bf16.mxu0 %v5628_v14  ;;  %3956 = vmatprep.subr.bf16.mxu1 %v5631_v25  ;;  %v2121_v34 = vpack.c.bf16 %v2111_v30, %v2111_v30  ;;  %v5709_v55 = vld [vmem:[%s7760_s8 + $0x78c] ss:$16 sps:$4 sm:$0xff]   ;;  %v5704_v14 = vld [vmem:[%s7760_s8 + $0x780] ss:$16 sps:$4 sm:$0xff]   ;;  %v5707_v25 = vld [vmem:[%s7760_s8 + $0x788] ss:$16 sps:$4 sm:$0xff]  }
 0x443   :  { %v5712_v21 = vld [vmem:[%s7760_s8 + $0x7a4] ss:$16 sps:$4 sm:$0xff]   ;;  %v5715_v23 = vld [vmem:[%s7760_s8 + $0x7ac] ss:$16 sps:$4 sm:$0xff]  }
 0x444   :  { %v5718_v30 = vld [vmem:[%s7760_s8 + $0x7c4] ss:$16 sps:$4 sm:$0xff]  }
 0x445   :  { %3793 = vmatpush1.bf16.msra.mxu0 %v5626_v51  ;;  %3957 = vmatpush1.bf16.msra.mxu1 %v5629_v27  ;;  %v5710_v51 = vld [vmem:[%s7760_s8 + $0x7a0] ss:$16 sps:$4 sm:$0xff]   ;;  %v5713_v27 = vld [vmem:[%s7760_s8 + $0x7a8] ss:$16 sps:$4 sm:$0xff]  }
 0x446   :  { %3803 = vmatprep.subr.bf16.mxu0 %v5634_v31  ;;  %3967 = vmatprep.subr.bf16.mxu1 %v5637_v32  ;;  %v5721_v31 = vld [vmem:[%s7760_s8 + $0x7cc] ss:$16 sps:$4 sm:$0xff]   ;;  %v5716_v32 = vld [vmem:[%s7760_s8 + $0x7c0] ss:$16 sps:$4 sm:$0xff]  }
 0x448   :  { %3795 = vmatmul.mubr.bf16.vlgmr.msra.gmra.mrb[56].mxu0 %v2118_v57  ;;  %3959 = vmatmul.mubr.bf16.vlgmr.msra.gmra.mrb[108].mxu1 %v2118_v57  ;;  %v5727_v57 = vld [vmem:[%s7760_s8 + $0x7ec] ss:$16 sps:$4 sm:$0xff]  }
 0x449   :  { %3804 = vmatpush1.bf16.msra.mxu0 %v5632_v33  ;;  %3835 = vmatprep.mubr.bf16.mxu0 %v2121_v34  ;;  %v5719_v33 = vld [vmem:[%s7760_s8 + $0x7c8] ss:$16 sps:$4 sm:$0xff]  }
 0x44a   :  { %3968 = vmatpush1.bf16.msra.mxu1 %v5635_v35  ;;  %3999 = vmatprep.mubr.bf16.mxu1 %v2121_v34  ;;  %v5724_v34 = vld [vmem:[%s7760_s8 + $0x7e4] ss:$16 sps:$4 sm:$0xff]   ;;  %v5722_v35 = vld [vmem:[%s7760_s8 + $0x7e0] ss:$16 sps:$4 sm:$0xff]  }
 0x44b   :  { %3805 = vmatprep.subr.bf16.mxu0 %v5640_v37  ;;  %3969 = vmatprep.subr.bf16.mxu1 %v5643_v38  ;;  %v5725_v37 = vld [vmem:[%s7760_s8 + $0x7e8] ss:$16 sps:$4 sm:$0xff]   ;;  %v5730_v38 = vld [vmem:[%s7762_s10 + $0x4] ss:$8 sps:$4 sm:$0xff]  }
 0x44d   :  { %3806 = vmatpush1.bf16.msra.mxu0 %v5638_v45  ;;  %v5728_v45 = vld [vmem:[%s7762_s10] ss:$8 sps:$4 sm:$0xff]  }
 0x44e   :  { %3970 = vmatpush1.bf16.msra.mxu1 %v5641_v40  ;;  %3807 = vmatprep.subr.bf16.mxu0 %v5646_v43  ;;  %v2120_v40 = vpack.c.bf16 %v7220_v26, %v7220_v26  ;;  %v5733_v43 = vld [vmem:[%s7762_s10 + $0x14] ss:$8 sps:$4 sm:$0xff]   ;;  %v5734_v26 = vld [vmem:[%s7762_s10 + $0x20] ss:$8 sps:$4 sm:$0xff]  }
 0x44f   :  { %3971 = vmatprep.subr.bf16.mxu1 %v5649_v47  ;;  %v5731_v47 = vld [vmem:[%s7762_s10 + $0x10] ss:$8 sps:$4 sm:$0xff]  }
 0x451   :  { %3808 = vmatpush1.bf16.msra.mxu0 %v5644_v41  ;;  %v5736_v41 = vld [vmem:[%s7762_s10 + $0x24] ss:$8 sps:$4 sm:$0xff]  }
 0x452   :  { %3972 = vmatpush1.bf16.msra.mxu1 %v5647_v48  ;;  %3809 = vmatprep.subr.bf16.mxu0 %v5652_v44  ;;  %v5739_v48 = vld [vmem:[%s7762_s10 + $0x34] ss:$8 sps:$4 sm:$0xff]   ;;  %v5737_v44 = vld [vmem:[%s7762_s10 + $0x30] ss:$8 sps:$4 sm:$0xff]  }
 0x453   :  { %3973 = vmatprep.subr.bf16.mxu1 %v5655_v50  ;;  %v5742_v50 = vld [vmem:[%s7762_s10 + $0x44] ss:$8 sps:$4 sm:$0xff]  }
 0x455   :  { %3810 = vmatpush1.bf16.msra.mxu0 %v5650_v36  ;;  %v5740_v36 = vld [vmem:[%s7762_s10 + $0x40] ss:$8 sps:$4 sm:$0xff]  }
 0x456   :  { %3974 = vmatpush1.bf16.msra.mxu1 %v5653_v2  ;;  %3811 = vmatprep.subr.bf16.mxu0 %v5658_v4  ;;  %v5745_v2 = vld [vmem:[%s7762_s10 + $0x54] ss:$8 sps:$4 sm:$0xff]   ;;  %v5743_v4 = vld [vmem:[%s7762_s10 + $0x50] ss:$8 sps:$4 sm:$0xff]  }
 0x457   :  { %3975 = vmatprep.subr.bf16.mxu1 %v5661_v52  ;;  %v5748_v52 = vld [vmem:[%s7762_s10 + $0x64] ss:$8 sps:$4 sm:$0xff]  }
 0x459   :  { %3812 = vmatpush1.bf16.msra.mxu0 %v5656_v53  ;;  %v5746_v53 = vld [vmem:[%s7762_s10 + $0x60] ss:$8 sps:$4 sm:$0xff]  }
 0x45a   :  { %3976 = vmatpush1.bf16.msra.mxu1 %v5659_v58  ;;  %3813 = vmatprep.subr.bf16.mxu0 %v5664_v62  ;;  %v5751_v58 = vld [vmem:[%s7762_s10 + $0x74] ss:$8 sps:$4 sm:$0xff]   ;;  %v5749_v62 = vld [vmem:[%s7762_s10 + $0x70] ss:$8 sps:$4 sm:$0xff]  }
 0x45b   :  { %3977 = vmatprep.subr.bf16.mxu1 %v5667_v8  ;;  %v5754_v8 = vld [vmem:[%s7762_s10 + $0x84] ss:$8 sps:$4 sm:$0xff]  }
 0x45d   :  { %3814 = vmatpush1.bf16.msra.mxu0 %v5662_v17  ;;  %v5752_v17 = vld [vmem:[%s7762_s10 + $0x80] ss:$8 sps:$4 sm:$0xff]  }
 0x45e   :  { %3978 = vmatpush1.bf16.msra.mxu1 %v5665_v59  ;;  %3815 = vmatprep.subr.bf16.mxu0 %v5670_v5  ;;  %v5757_v59 = vld [vmem:[%s7762_s10 + $0x94] ss:$8 sps:$4 sm:$0xff]   ;;  %v5755_v5 = vld [vmem:[%s7762_s10 + $0x90] ss:$8 sps:$4 sm:$0xff]  }
 0x45f   :  { %3979 = vmatprep.subr.bf16.mxu1 %v5673_v29  ;;  %v5760_v29 = vld [vmem:[%s7762_s10 + $0xa4] ss:$8 sps:$4 sm:$0xff]  }
 0x461   :  { %3816 = vmatpush1.bf16.msra.mxu0 %v5668_v60  ;;  %v5758_v60 = vld [vmem:[%s7762_s10 + $0xa0] ss:$8 sps:$4 sm:$0xff]  }
 0x462   :  { %3980 = vmatpush1.bf16.msra.mxu1 %v5671_v61  ;;  %3817 = vmatprep.subr.bf16.mxu0 %v5676_v54  ;;  %v5763_v61 = vld [vmem:[%s7762_s10 + $0xb4] ss:$8 sps:$4 sm:$0xff]   ;;  %v5761_v54 = vld [vmem:[%s7762_s10 + $0xb0] ss:$8 sps:$4 sm:$0xff]  }
 0x463   :  { %3981 = vmatprep.subr.bf16.mxu1 %v5679_v15  ;;  %v5766_v15 = vld [vmem:[%s7762_s10 + $0xc4] ss:$8 sps:$4 sm:$0xff]  }
 0x465   :  { %3818 = vmatpush1.bf16.msra.mxu0 %v5674_v0  ;;  %v5764_v0 = vld [vmem:[%s7762_s10 + $0xc0] ss:$8 sps:$4 sm:$0xff]  }
 0x466   :  { %3982 = vmatpush1.bf16.msra.mxu1 %v5677_v1  ;;  %3819 = vmatprep.subr.bf16.mxu0 %v5682_v56  ;;  %v5769_v1 = vld [vmem:[%s7762_s10 + $0xd4] ss:$8 sps:$4 sm:$0xff]   ;;  %v5767_v56 = vld [vmem:[%s7762_s10 + $0xd0] ss:$8 sps:$4 sm:$0xff]  }
 0x467   :  { %3983 = vmatprep.subr.bf16.mxu1 %v5685_v28  ;;  %v5772_v28 = vld [vmem:[%s7762_s10 + $0xe4] ss:$8 sps:$4 sm:$0xff]  }
 0x469   :  { %3820 = vmatpush1.bf16.msra.mxu0 %v5680_v49  ;;  %v5770_v49 = vld [vmem:[%s7762_s10 + $0xe0] ss:$8 sps:$4 sm:$0xff]  }
 0x46a   :  { %3984 = vmatpush1.bf16.msra.mxu1 %v5683_v42  ;;  %3821 = vmatprep.subr.bf16.mxu0 %v5688_v3  ;;  %v5775_v42 = vld [vmem:[%s7762_s10 + $0xf4] ss:$8 sps:$4 sm:$0xff]   ;;  %v5773_v3 = vld [vmem:[%s7762_s10 + $0xf0] ss:$8 sps:$4 sm:$0xff]  }
 0x46b   :  { %3985 = vmatprep.subr.bf16.mxu1 %v5691_v6  ;;  %v5778_v6 = vld [vmem:[%s7762_s10 + $0x104] ss:$8 sps:$4 sm:$0xff]  }
 0x46d   :  { %3822 = vmatpush1.bf16.msra.mxu0 %v5686_v46  ;;  %v4512_v46 = vld [vmem:[%s7764_s12 + $0x80] sm:$0xff] }
 0x46e   :  { %3986 = vmatpush1.bf16.msra.mxu1 %v5689_v9  ;;  %3823 = vmatprep.subr.bf16.mxu0 %v5694_v10  ;;  %v4513_v9 = vld [vmem:[%s7764_s12 + $0x88] sm:$0xff]  ;;  %v4496_v10 = vld [vmem:[%s7764_s12] sm:$0xff] }
 0x46f   :  { %3987 = vmatprep.subr.bf16.mxu1 %v5697_v12  ;;  %v5255_v12 = vpack.c.bf16 %v4513_v9, %v4512_v46  ;;  %v5781_v9 = vld [vmem:[%s7762_s10 + $0x114] ss:$8 sps:$4 sm:$0xff]  }
 0x471   :  { %3824 = vmatpush1.bf16.msra.mxu0 %v5692_v13  ;;  %v4497_v13 = vld [vmem:[%s7764_s12 + $0x8] sm:$0xff] }
 0x472   :  { %3988 = vmatpush1.bf16.msra.mxu1 %v5695_v63  ;;  %3825 = vmatprep.subr.bf16.mxu0 %v5700_v18  ;;  %v4514_v63 = vld [vmem:[%s7764_s12 + $0x90] sm:$0xff]  ;;  %v4515_v18 = vld [vmem:[%s7764_s12 + $0x98] sm:$0xff] }
 0x473   :  { %3989 = vmatprep.subr.bf16.mxu1 %v5703_v16  ;;  %v5257_v16 = vpack.c.bf16 %v4497_v13, %v4496_v10  ;;  %v5784_v13 = vld [vmem:[%s7762_s10 + $0x124] ss:$8 sps:$4 sm:$0xff]  }
 0x475   :  { %3826 = vmatpush1.bf16.msra.mxu0 %v5698_v19  ;;  %v5259_v19 = vpack.c.bf16 %v4515_v18, %v4514_v63  ;;  %v5782_v63 = vld [vmem:[%s7762_s10 + $0x120] ss:$8 sps:$4 sm:$0xff]   ;;  %v5787_v18 = vld [vmem:[%s7762_s10 + $0x134] ss:$8 sps:$4 sm:$0xff]  }
 0x476   :  { %3990 = vmatpush1.bf16.msra.mxu1 %v5701_v20  ;;  %3827 = vmatprep.subr.bf16.mxu0 %v5706_v39  ;;  %v4498_v20 = vld [vmem:[%s7764_s12 + $0x10] sm:$0xff]  ;;  %v4499_v39 = vld [vmem:[%s7764_s12 + $0x18] sm:$0xff] }
 0x477   :  { %3991 = vmatprep.subr.bf16.mxu1 %v5709_v55  ;;  %v4516_v55 = vld [vmem:[%s7764_s12 + $0xa0] sm:$0xff] }
 0x479   :  { %3828 = vmatpush1.bf16.msra.mxu0 %v5704_v14  ;;  %v4517_v14 = vld [vmem:[%s7764_s12 + $0xa8] sm:$0xff] }
 0x47a   :  { %3992 = vmatpush1.bf16.msra.mxu1 %v5707_v25  ;;  %3829 = vmatprep.subr.bf16.mxu0 %v5712_v21  ;;  %v5261_v25 = vpack.c.bf16 %v4499_v39, %v4498_v20  ;;  %v5263_v21 = vpack.c.bf16 %v4517_v14, %v4516_v55  ;;  %v5788_v20 = vld [vmem:[%s7762_s10 + $0x140] ss:$8 sps:$4 sm:$0xff]   ;;  %v5793_v39 = vld [vmem:[%s7762_s10 + $0x154] ss:$8 sps:$4 sm:$0xff]   ;;  %v5791_v55 = vld [vmem:[%s7762_s10 + $0x150] ss:$8 sps:$4 sm:$0xff]  }
 0x47b   :  { %3993 = vmatprep.subr.bf16.mxu1 %v5715_v23  ;;  %v4500_v23 = vld [vmem:[%s7764_s12 + $0x20] sm:$0xff] }
 0x47c   :  { %v5796_v14 = vld [vmem:[%s7762_s10 + $0x164] ss:$8 sps:$4 sm:$0xff]  }
 0x47d   :  { %3830 = vmatpush1.bf16.msra.mxu0 %v5710_v51  ;;  %v4501_v51 = vld [vmem:[%s7764_s12 + $0x28] sm:$0xff] }
 0x47e   :  { %3994 = vmatpush1.bf16.msra.mxu1 %v5713_v27  ;;  %3831 = vmatprep.subr.bf16.mxu0 %v5718_v30  ;;  %v4518_v27 = vld [vmem:[%s7764_s12 + $0xb0] sm:$0xff]  ;;  %v4519_v30 = vld [vmem:[%s7764_s12 + $0xb8] sm:$0xff] }
 0x47f   :  { %3995 = vmatprep.subr.bf16.mxu1 %v5721_v31  ;;  %v5265_v31 = vpack.c.bf16 %v4501_v51, %v4500_v23  ;;  %v5797_v23 = vld [vmem:[%s7762_s10 + $0x170] ss:$8 sps:$4 sm:$0xff]   ;;  %v5802_v51 = vld [vmem:[%s7762_s10 + $0x184] ss:$8 sps:$4 sm:$0xff]  }
 0x481   :  { %3832 = vmatpush1.bf16.msra.mxu0 %v5716_v32  ;;  %v5267_v32 = vpack.c.bf16 %v4519_v30, %v4518_v27  ;;  %v5800_v27 = vld [vmem:[%s7762_s10 + $0x180] ss:$8 sps:$4 sm:$0xff]   ;;  %v5805_v30 = vld [vmem:[%s7762_s10 + $0x194] ss:$8 sps:$4 sm:$0xff]  }
 0x482   :  { %3996 = vmatpush1.bf16.msra.mxu1 %v5719_v33  ;;  %3833 = vmatprep.subr.bf16.mxu0 %v5724_v34  ;;  %v4502_v33 = vld [vmem:[%s7764_s12 + $0x30] sm:$0xff]  ;;  %v4503_v34 = vld [vmem:[%s7764_s12 + $0x38] sm:$0xff] }
 0x483   :  { %3997 = vmatprep.subr.bf16.mxu1 %v5727_v57  ;;  %v4520_v57 = vld [vmem:[%s7764_s12 + $0xc0] sm:$0xff] }
 0x485   :  { %3834 = vmatpush1.bf16.msra.mxu0 %v5722_v35  ;;  %v4521_v35 = vld [vmem:[%s7764_s12 + $0xc8] sm:$0xff] }
 0x486   :  { %3998 = vmatpush1.bf16.msra.mxu1 %v5725_v37  ;;  %4412 = vmatprep.subr.bf16.mxu0 %v5730_v38  ;;  %v5269_v37 = vpack.c.bf16 %v4503_v34, %v4502_v33  ;;  %v5271_v38 = vpack.c.bf16 %v4521_v35, %v4520_v57  ;;  %v5806_v33 = vld [vmem:[%s7762_s10 + $0x1a0] ss:$8 sps:$4 sm:$0xff]   ;;  %v5811_v34 = vld [vmem:[%s7762_s10 + $0x1b4] ss:$8 sps:$4 sm:$0xff]   ;;  %v5809_v57 = vld [vmem:[%s7762_s10 + $0x1b0] ss:$8 sps:$4 sm:$0xff]  }
 0x487   :  { %5256 = vmatprep.subr.bf16.mxu1 %v5255_v12  ;;  %v5779_v12 = vld [vmem:[%s7762_s10 + $0x110] ss:$8 sps:$4 sm:$0xff]   ;;  %v5814_v35 = vld [vmem:[%s7762_s10 + $0x1c4] ss:$8 sps:$4 sm:$0xff]  }
 0x488   :  { %3836 = vmatmul.mubr.bf16.vlgmr.msra.gmra.mrb[56].mxu0 %v2120_v40 }
 0x489   :  { %4000 = vmatmul.mubr.bf16.vlgmr.msra.gmra.mrb[108].mxu1 %v2120_v40  ;;  %4413 = vmatpush1.bf16.msra.mxu0 %v5728_v45  ;;  %v4504_v45 = vld [vmem:[%s7764_s12 + $0x40] sm:$0xff]  ;;  %v4505_v40 = vld [vmem:[%s7764_s12 + $0x48] sm:$0xff] }
 0x48a   :  { %4414 = vmatprep.subr.bf16.mxu0 %v5733_v43  ;;  %5258 = vmatpush3.bf16.msra.mxu1 %v5257_v16  ;;  %v4522_v43 = vld [vmem:[%s7764_s12 + $0xd0] sm:$0xff] }
 0x48b   :  { %5260 = vmatprep.subr.bf16.mxu1 %v5259_v19  ;;  %v5785_v16 = vld [vmem:[%s7762_s10 + $0x130] ss:$8 sps:$4 sm:$0xff]   ;;  %v5790_v19 = vld [vmem:[%s7762_s10 + $0x144] ss:$8 sps:$4 sm:$0xff]  }
 0x48d   :  { %4415 = vmatpush1.bf16.msra.mxu0 %v5731_v47  ;;  %v4523_v47 = vld [vmem:[%s7764_s12 + $0xd8] sm:$0xff] }
 0x48e   :  { %4416 = vmatprep.subr.bf16.mxu0 %v5736_v41  ;;  %5262 = vmatpush3.bf16.msra.mxu1 %v5261_v25  ;;  %v5273_v41 = vpack.c.bf16 %v4505_v40, %v4504_v45  ;;  %v5794_v25 = vld [vmem:[%s7762_s10 + $0x160] ss:$8 sps:$4 sm:$0xff]   ;;  %v5817_v45 = vld [vmem:[%s7762_s10 + $0x1d4] ss:$8 sps:$4 sm:$0xff]   ;;  %v5815_v40 = vld [vmem:[%s7762_s10 + $0x1d0] ss:$8 sps:$4 sm:$0xff]  }
 0x48f   :  { %5264 = vmatprep.subr.bf16.mxu1 %v5263_v21  ;;  %v5799_v21 = vld [vmem:[%s7762_s10 + $0x174] ss:$8 sps:$4 sm:$0xff]  }
 0x491   :  { %4417 = vmatpush1.bf16.msra.mxu0 %v5734_v26  ;;  %v5275_v26 = vpack.c.bf16 %v4523_v47, %v4522_v43  ;;  %v5820_v47 = vld [vmem:[%s7762_s10 + $0x1e4] ss:$8 sps:$4 sm:$0xff]  }
 0x492   :  { %4418 = vmatprep.subr.bf16.mxu0 %v5739_v48  ;;  %5266 = vmatpush3.bf16.msra.mxu1 %v5265_v31  ;;  %v4506_v48 = vld [vmem:[%s7764_s12 + $0x50] sm:$0xff] }
 0x493   :  { %5268 = vmatprep.subr.bf16.mxu1 %v5267_v32  ;;  %v5803_v31 = vld [vmem:[%s7762_s10 + $0x190] ss:$8 sps:$4 sm:$0xff]   ;;  %v5808_v32 = vld [vmem:[%s7762_s10 + $0x1a4] ss:$8 sps:$4 sm:$0xff]  }
 0x495   :  { %4419 = vmatpush1.bf16.msra.mxu0 %v5737_v44  ;;  %v4507_v44 = vld [vmem:[%s7764_s12 + $0x58] sm:$0xff] }
 0x496   :  { %4420 = vmatprep.subr.bf16.mxu0 %v5742_v50  ;;  %5270 = vmatpush3.bf16.msra.mxu1 %v5269_v37  ;;  %v4524_v50 = vld [vmem:[%s7764_s12 + $0xe0] sm:$0xff] }
 0x497   :  { %5272 = vmatprep.subr.bf16.mxu1 %v5271_v38  ;;  %v5812_v37 = vld [vmem:[%s7762_s10 + $0x1c0] ss:$8 sps:$4 sm:$0xff]   ;;  %v2390_v38 = vsub.s32 2, %v5944_v7 }
 0x499   :  { %4421 = vmatpush1.bf16.msra.mxu0 %v5740_v36  ;;  %v4525_v36 = vld [vmem:[%s7764_s12 + $0xe8] sm:$0xff] }
 0x49a   :  { %4422 = vmatprep.subr.bf16.mxu0 %v5745_v2  ;;  %5274 = vmatpush3.bf16.msra.mxu1 %v5273_v41  ;;  %v5277_v2 = vpack.c.bf16 %v4507_v44, %v4506_v48  ;;  %v5821_v48 = vld [vmem:[%s7762_s10 + $0x1f0] ss:$8 sps:$4 sm:$0xff]  }
 0x49b   :  { %5276 = vmatprep.subr.bf16.mxu1 %v5275_v26  ;;  %v5823_v26 = vld [vmem:[%s7762_s10 + $0x1f4] ss:$8 sps:$4 sm:$0xff]  }
 0x49d   :  { %4423 = vmatpush1.bf16.msra.mxu0 %v5743_v4  ;;  %v5279_v4 = vpack.c.bf16 %v4525_v36, %v4524_v50  ;;  %v4508_v36 = vld [vmem:[%s7764_s12 + $0x60] sm:$0xff] }
 0x49e   :  { %4424 = vmatprep.subr.bf16.mxu0 %v5748_v52  ;;  %5278 = vmatpush3.bf16.msra.mxu1 %v5277_v2  ;;  %v7605_v52 = vld [vmem:[%s7761_s9] sm:$0xf]  ;;  %v4509_v2 = vld [vmem:[%s7764_s12 + $0x68] sm:$0xff] }
 0x49f   :  { %5280 = vmatprep.subr.bf16.mxu1 %v5279_v4  ;;  %v2391_v43 = vrot.slane %v7605_v52, %v2390_v38  ;;  %v5281_v4 = vpack.c.bf16 %v4509_v2, %v4508_v36 }
 0x4a1   :  { %4425 = vmatpush1.bf16.msra.mxu0 %v5746_v53  ;;  %v2394_v53 = vsub.s32 3, %v5944_v7  ;;  %v5818_v7 = vld [vmem:[%s7762_s10 + $0x1e0] ss:$8 sps:$4 sm:$0xff]  }
 0x4a2   :  { %4426 = vmatprep.subr.bf16.mxu0 %v5751_v58  ;;  %v2383_v58 = vrot.slane %v7605_v52, %v6631_v22  ;;  %5282 = vmatpush3.bf16.msra.mxu1 %v5281_v4 }
 0x4a5   :  { %4427 = vmatpush1.bf16.msra.mxu0 %v5749_v62  ;;  %v2387_v62 = vrot.slane %v7605_v52, %v6637_v24 }
 0x4a6   :  { %4428 = vmatprep.subr.bf16.mxu0 %v5754_v8  ;;  %v2395_v8 = vrot.slane %v7605_v52, %v2394_v53  ;;  %v4526_v52 = vld [vmem:[%s7764_s12 + $0xf0] sm:$0xff]  ;;  %v4527_v53 = vld [vmem:[%s7764_s12 + $0xf8] sm:$0xff] }
 0x4a9   :  { %4429 = vmatpush1.bf16.msra.mxu0 %v5752_v17 }
 0x4aa   :  { %4430 = vmatprep.subr.bf16.mxu0 %v5757_v59 }
 0x4ad   :  { %4431 = vmatpush1.bf16.msra.mxu0 %v5755_v5 }
 0x4ae   :  { %4432 = vmatprep.subr.bf16.mxu0 %v5760_v29 }
 0x4b1   :  { %4433 = vmatpush1.bf16.msra.mxu0 %v5758_v60 }
 0x4b2   :  { %4434 = vmatprep.subr.bf16.mxu0 %v5763_v61 }
 0x4b5   :  { %4435 = vmatpush1.bf16.msra.mxu0 %v5761_v54 }
 0x4b6   :  { %4436 = vmatprep.subr.bf16.mxu0 %v5766_v15 }
 0x4b9   :  { %4437 = vmatpush1.bf16.msra.mxu0 %v5764_v0 }
 0x4ba   :  { %4438 = vmatprep.subr.bf16.mxu0 %v5769_v1 }
 0x4bd   :  { %4439 = vmatpush1.bf16.msra.mxu0 %v5767_v56 }
 0x4be   :  { %4440 = vmatprep.subr.bf16.mxu0 %v5772_v28 }
 0x4c1   :  { %4441 = vmatpush1.bf16.msra.mxu0 %v5770_v49 }
 0x4c2   :  { %4442 = vmatprep.subr.bf16.mxu0 %v5775_v42 }
 0x4c5   :  { %4443 = vmatpush1.bf16.msra.mxu0 %v5773_v3 }
 0x4c6   :  { %4453 = vmatprep.subr.bf16.mxu0 %v5778_v6  ;;  %v5776_v6 = vld [vmem:[%s7762_s10 + $0x100] ss:$8 sps:$4 sm:$0xff]  }
 0x55b   :  { %v3837_v17 = vpop.f32.mrb[56].mxu0 }
 0x55c   :  { %v5303_v59 = vadd.f32 %v3837_v17, %v2383_v58  ;;  %v7613_v5 = vpop.f32.mrb[108].mxu1  ;;  %v3839_v29 = vpop.f32.mrb[57].mxu0  ;;  %v5283_v58 = vpack.c.bf16 %v4527_v53, %v4526_v52 }
 0x55d   :  { %v5304_v60 = vadd.f32 %v3839_v29, %v2387_v62  ;;  %v4003_v61 = vpop.f32.mrb[109].mxu1  ;;  %v3841_v54 = vpop.f32.mrb[58].mxu0  ;;  %v5305_v41 = vadd.f32 %v7613_v5, %v2391_v43  ;;  %v4510_v62 = vld [vmem:[%s7764_s12 + $0x70] sm:$0xff] }
 0x55e   :  { %v4008_v15 = vmax.f32 %v5303_v59, 0.0  ;;  %v5306_v0 = vadd.f32 %v4003_v61, %v2395_v8  ;;  %v4005_v1 = vpop.f32.mrb[110].mxu1  ;;  %v3842_v56 = vpop.f32.mrb[59].mxu0  ;;  %v4511_v8 = vld [vmem:[%s7764_s12 + $0x78] sm:$0xff]  ;;  %5284 = vmatprep.subr.bf16.mxu1 %v5283_v58  ;;  %v4080_v59 = vld [vmem:[%s7763_s11] sm:$0x3] }
 0x55f   :  { %v4009_v28 = vmax.f32 %v5304_v60, 0.0  ;;  %v4006_v49 = vpop.f32.mrb[111].mxu1  ;;  %v4010_v44 = vmax.f32 %v5305_v41, 0.0  ;;  %v5285_v17 = vpack.c.bf16 %v4511_v8, %v4510_v62  ;;  %v4085_v5 = vrot.slane %v4080_v59, %v6631_v22  ;;  %s5856_s11 = smov [#allocation2]  }
 0x560   :  { %v4011_v42 = vmax.f32 %v5306_v0, 0.0  ;;  %v4012_v46 = vpack.c.bf16 %v4008_v15, %v4008_v15  ;;  %v4089_v29 = vrot.slane %v4080_v59, %v6637_v24 }
 0x561   :  { %v4013_v3 = vpack.c.bf16 %v4009_v28, %v4009_v28  ;;  %v4014_v50 = vpack.c.bf16 %v4010_v44, %v4010_v44  ;;  %5286 = vmatpush3.bf16.msra.mxu1 %v5285_v17 }
 0x562   :  { %v4015_v10 = vpack.c.bf16 %v4011_v42, %v4011_v42 }
 0x563   :  { %4444 = vmatprep.mubr.bf16.mxu0 %v4013_v3  ;;  %v5086_v3 = vld [vmem:[%s7765_s13] ss:$0 sm:$0xff]  ;;  %s4651_s13 = sshll.u32 %s5856_s11, 4  ;;  %s4652_s13 = int_to_ptr.vmem [resolvable:$true] %s4651_s13 }
 0x564   :  { %4445 = vmatmul.mubr.bf16.vlgmr.msra.gmra.mrb[60].mxu0 %v4012_v46  ;;  %s5828_s26 = scalar_lea.vmem %s4652_s13, 32  ;;  %p5833_p1 = scmp.lt.s32.totalorder %s4652_s13, %s4652_s13 }
 0x565   :  { %4454 = vmatpush1.bf16.msra.mxu0 %v5776_v6  ;;  %4485 = vmatprep.mubr.bf16.mxu0 %v4015_v10  ;;  %p5829_p0 = scmp.ne.s32.totalorder %s4652_s13, %s5828_s26  ;;  %p5834_p2 = scmp.lt.s32.totalorder %s5828_s26, %s5828_s26 }
 0x566   :  { %4455 = vmatprep.subr.bf16.mxu0 %v5781_v9 }
 0x567   :  { %p5835_p3 = por %p5834_p2, %p5833_p1 }
 0x569   :  { %4456 = vmatpush1.bf16.msra.mxu0 %v5779_v12  ;;  %p5836_p4 = pnand %p5835_p3, %p5829_p0 }
 0x56a   :  { %4457 = vmatprep.subr.bf16.mxu0 %v5784_v13 }
 0x56d   :  { %4458 = vmatpush1.bf16.msra.mxu0 %v5782_v63 }
 0x56e   :  { %4459 = vmatprep.subr.bf16.mxu0 %v5787_v18 }
 0x571   :  { %4460 = vmatpush1.bf16.msra.mxu0 %v5785_v16 }
 0x572   :  { %4461 = vmatprep.subr.bf16.mxu0 %v5790_v19 }
 0x575   :  { %4462 = vmatpush1.bf16.msra.mxu0 %v5788_v20 }
 0x576   :  { %4463 = vmatprep.subr.bf16.mxu0 %v5793_v39 }
 0x579   :  { %4464 = vmatpush1.bf16.msra.mxu0 %v5791_v55 }
 0x57a   :  { %4465 = vmatprep.subr.bf16.mxu0 %v5796_v14 }
 0x57d   :  { %4466 = vmatpush1.bf16.msra.mxu0 %v5794_v25 }
 0x57e   :  { %4467 = vmatprep.subr.bf16.mxu0 %v5799_v21 }
 0x581   :  { %4468 = vmatpush1.bf16.msra.mxu0 %v5797_v23 }
 0x582   :  { %4469 = vmatprep.subr.bf16.mxu0 %v5802_v51 }
 0x585   :  { %4470 = vmatpush1.bf16.msra.mxu0 %v5800_v27 }
 0x586   :  { %4471 = vmatprep.subr.bf16.mxu0 %v5805_v30 }
 0x589   :  { %4472 = vmatpush1.bf16.msra.mxu0 %v5803_v31 }
 0x58a   :  { %4473 = vmatprep.subr.bf16.mxu0 %v5808_v32 }
 0x58d   :  { %4474 = vmatpush1.bf16.msra.mxu0 %v5806_v33 }
 0x58e   :  { %4475 = vmatprep.subr.bf16.mxu0 %v5811_v34 }
 0x591   :  { %4476 = vmatpush1.bf16.msra.mxu0 %v5809_v57 }
 0x592   :  { %4477 = vmatprep.subr.bf16.mxu0 %v5814_v35 }
 0x595   :  { %4478 = vmatpush1.bf16.msra.mxu0 %v5812_v37 }
 0x596   :  { %4479 = vmatprep.subr.bf16.mxu0 %v5817_v45 }
 0x599   :  { %4480 = vmatpush1.bf16.msra.mxu0 %v5815_v40 }
 0x59a   :  { %4481 = vmatprep.subr.bf16.mxu0 %v5820_v47 }
 0x59d   :  { %4482 = vmatpush1.bf16.msra.mxu0 %v5818_v7 }
 0x59e   :  { %4483 = vmatprep.subr.bf16.mxu0 %v5823_v26 }
 0x5a1   :  { %4484 = vmatpush1.bf16.msra.mxu0 %v5821_v48 }
 0x5a4   :  { %4486 = vmatmul.mubr.bf16.vlgmr.msra.gmra.mrb[60].mxu0 %v4014_v50 }
 0x677   :  { %v4487_v60 = vpop.f32.mrb[60].mxu0 }
 0x678   :  { %v5307_v61 = vadd.f32 %v4487_v60, %v4085_v5  ;;  %v4489_v54 = vpop.f32.mrb[61].mxu0 }
 0x679   :  { %v5308_v15 = vadd.f32 %v4489_v54, %v4089_v29  ;;  %v4491_v0 = vpop.f32.mrb[62].mxu0 }
 0x67a   :  { %v4492_v1 = vpop.f32.mrb[63].mxu0  ;;  %v4494_v28 = vmax.f32 %v5307_v61, 0.0 }
 0x67b   :  { %v4495_v56 = vmax.f32 %v5308_v15, 0.0 }
 0x67d   :  { %4599 = vmatprep.mubr.f32.mxu1 %v4495_v56 }
 0x67e   :  { %4600 = vmatmul.mubr.f32.vlgmr.msra.gmra.mrb[26].mxu1 %v4494_v28 }
 0x751   :  { %v5163_v49 = vpop.f32.mrb[26].mxu1 }
 0x752   :  { %v5164_v42 = vpop.f32.mrb[27].mxu1 }
 0x753   :  { %v5165_v6 = vadd.f32 %v5164_v42, %v5163_v49 }
 0x755   :  { %v4602_v22 = vadd.f32 %v5165_v6, %v5086_v3 }
 0x757   :  { %v4606_v24 = vsel %vm4605_vm5, %v4602_v22, -inf }
 0x758   :  { %4607 = vmax.xlane.f32.xlu0 %v4606_v24 }
 0x7e5   :  { %v4608_v46 = vpop.xlane.xlu0 %4607 }
 0x7e6   :  { %v4609_v9 = vsub.f32 %v4602_v22, %v4608_v46 }
 0x7e8   :  { %v4610_v10 = vmul.f32 1.442695, %v4609_v9 }
 0x7ea   :  { %5824 = vpow2.f32 %v4610_v10 }
 0x7f4   :  { %v5825_v12 = vpop.eup %5824 }
 0x7f5   :  { %v4612_v13 = vsel %vm4605_vm5, %v5825_v12, 0.0 }
 0x7f6   :  { %4613 = vadd.xlane.f32.xlu0 %v4612_v13 }
 0x883   :  { %v4614_v63 = vpop.xlane.xlu0 %4613 }
 0x884   :  { %5826 = vlog2.f32 %v4614_v63 }
 0x88e   :  { %v5827_v18 = vpop.eup %5826 }
 0x88f   :  { %v4616_v16 = vmul.f32 0.6931472, %v5827_v18 }
 0x891   :  { %v4617_v19 = vsub.f32 %v4609_v9, %v4616_v16 }
 0x893   :  { %v4625_v20 = vrot.slane %v4617_v19, %v5947_v11 }
 0x895   :  { %v4626_v39 = vcombine.high %v4625_v20, %v4625_v20  ;;  %v4633_v55 = vrot.slane %v4625_v20, %v5947_v11 }
 0x897   :  { %v4640_v14 = vrot.slane %v4626_v39, %v5947_v11  ;;  %4644 = vst.msk [vmem:[#allocation2] sm:$0x1] %vm4643_vm6, %v4633_v55 }
 0x899   :  { %4645 = vst.msk [vmem:[#allocation2 + $0x1] sm:$0x1] %vm4643_vm6, %v4640_v14 }
 0x89a   :  { %5839 = shalt.err (!%p5836_p4)
}
 0x89b   :  { %s5840_s28 = scalar_lea.hbm %s7766_s14, 32 }
 0x89c   :  { %p5841_p5 = scmp.ne.s32.totalorder %s7766_s14, %s5840_s28  ;;  %p5844_p6 = scmp.lt.u32.totalorder %s5840_s28, %s7766_s14 }
 0x89e   :  { %p5846_p7 = pnand %p5844_p6, %p5841_p5 }
 0x8a0   :  { %5849 = shalt.err (!%p5846_p7)
}
 0x8a1   :  { %s5857_s15 = smov 16   ;;  %s5858_s16 = smov 1  }
 0x8a2   :  { %4657 = dma.vmem_to_hbm [thread:$0]  %s4652_s13, 32, %s7766_s14, [#allocation3], %s5857_s15, %s5857_s15, %s5858_s16  }
 0x8a3   :  { %5850 = dma.done.wait [#allocation3], 32  }
 0x8a4   :  { %5851 = vsyncadd [#allocation3], 4294967264 }
 0x8a5   :  { %4661 = vsyncpa [#allocation3], 1 }

</bundles_post_ra>
